<compile_context>
chip_gen: v7x
topology: tpu7x:2x2x1
jax: 0.10.0
libtpu: 0.0.40
codegen_flags: <defaults>
</compile_context>

<pallas_src>
import math
from functools import partial

import numpy as np
import jax
import jax.numpy as jnp
from jax.experimental import pallas as pl
from jax.experimental.pallas import tpu as pltpu


def _round_up(x, m):
    return ((x + m - 1) // m) * m


def _largest_divisor_leq(n, cap):
    for d in range(min(cap, n), 0, -1):
        if n % d == 0:
            return d
    return 1


def _vmem_limit_and_th_cap():
    """Generation-dependent scoped-VMEM limit and conv tile-height cap."""
    try:
        cap = int(pltpu.get_tpu_info().vmem_capacity_bytes)
    except Exception:
        cap = 64 * 1024 * 1024
    if cap >= 100 * 1024 * 1024:            # v5e / v6e: 128 MiB of VMEM
        return 96 * 1024 * 1024, 32
    return 44 * 1024 * 1024, 16             # v7x: 64 MiB per TensorCore


# ---------------------------------------------------------------------------
# Pallas kernel 1: per (n, row-tile, channel-block) upsample / passthrough
#   stage blocks : up = U_tile(TH1*W, SSp) @ y_blk(SSp, TK)   (bias folded in y)
#   feats blocks : straight copy
#   output       : lane-dense (TH1, Wp, TK) block of x_cb, zero tail cols only
# ---------------------------------------------------------------------------
def _stages_kernel(n_sc, W, y_ref, u_ref, x_ref, o_ref):
    kb = pl.program_id(2)
    _, _, TH1, Wp, TK = o_ref.shape

    @pl.when(kb < n_sc)
    def _():                                  # pyramid-stage channel block
        up = jnp.dot(u_ref[...], y_ref[0], preferred_element_type=jnp.float32)
        o_ref[0, 0, :, 0:W, :] = up.reshape(TH1, W, TK).astype(o_ref.dtype)

    @pl.when(kb >= n_sc)
    def _():                                  # feats passthrough block
        o_ref[0, 0, :, 0:W, :] = x_ref[0].astype(o_ref.dtype)

    # right-halo / alignment tail (<= 8 cols); the interior is never rewritten
    o_ref[0, 0, :, W:Wp, :] = jnp.zeros((TH1, Wp - W, TK), o_ref.dtype)


def stages_pallas(y_all, U_pad, x_ph, *, W, Wp, TH1, n_sc, n_k, TK,
                  storage_dtype, vmem_limit):
    N, SSp, SCp = y_all.shape
    _, H_tot, _, Cin_p = x_ph.shape
    n_h1 = H_tot // TH1
    n_cin = Cin_p // TK
    return pl.pallas_call(
        partial(_stages_kernel, n_sc, W),
        out_shape=jax.ShapeDtypeStruct((N, n_k, H_tot, Wp, TK), storage_dtype),
        grid=(N, n_h1, n_k),
        in_specs=[
            pl.BlockSpec((1, SSp, TK),
                         lambda n, h, kb: (n, 0, jnp.minimum(kb, n_sc - 1))),
            pl.BlockSpec((TH1 * W, SSp), lambda n, h, kb: (h, 0)),
            pl.BlockSpec((1, TH1, W, TK),
                         lambda n, h, kb: (n, h, 0,
                                           jnp.maximum(kb - n_sc, 0))),
        ],
        out_specs=pl.BlockSpec((1, 1, TH1, Wp, TK),
                               lambda n, h, kb: (n, kb, h, 0, 0)),
        compiler_params=pltpu.CompilerParams(
            dimension_semantics=("parallel", "parallel", "parallel"),
            vmem_limit_bytes=vmem_limit),
    )(y_all, U_pad, x_ph)


# ---------------------------------------------------------------------------
# Pallas kernel 2: bottleneck 3x3 conv (+ folded BN scale) + bias + ReLU
# ---------------------------------------------------------------------------
def _bottleneck_kernel(W, n_h, x_hbm, w_ref, b_ref, o_ref,
                       strip_ref, acc_ref, sem):
    n = pl.program_id(0)
    h = pl.program_id(1)
    k = pl.program_id(2)
    nk = pl.num_programs(2)
    TH = o_ref.shape[1]
    Wp, TK = strip_ref.shape[2], strip_ref.shape[3]
    Cp = o_ref.shape[3]
    slot = (h * nk + k) % 2                   # parity of the within-n step

    def start_strip(hh, kk, sl):
        row0 = pl.multiple_of(hh * TH, TH)
        pltpu.make_async_copy(x_hbm.at[n, kk, pl.ds(row0, TH + 2)],
                              strip_ref.at[sl], sem.at[sl]).start()

    @pl.when(jnp.logical_and(h == 0, k == 0))
    def _():                                  # prime the very first strip
        start_strip(h, k, slot)

    @pl.when(k == 0)
    def _():
        acc_ref[...] = jnp.zeros_like(acc_ref)

    pltpu.make_async_copy(
        x_hbm.at[n, k, pl.ds(pl.multiple_of(h * TH, TH), TH + 2)],
        strip_ref.at[slot], sem.at[slot]).wait()

    last_k = k == nk - 1

    @pl.when(jnp.logical_not(jnp.logical_and(last_k, h == n_h - 1)))
    def _():                                  # prefetch next strip (may cross h)
        start_strip(jnp.where(last_k, h + 1, h),
                    jnp.where(last_k, 0, k + 1), 1 - slot)

    # 3x3 conv as 9 matmuls over the full padded width; LHS streams straight
    # from the strip ref (never materialised as a whole value).
    for kh in range(3):
        rows = strip_ref[slot, pl.ds(kh, TH)].reshape(TH * Wp, TK)
        for kw in range(3):
            acc_ref[kw] += jnp.dot(rows, w_ref[3 * kh + kw],
                                   preferred_element_type=jnp.float32)

    @pl.when(last_k)
    def _():
        a0 = acc_ref[0].reshape(TH, Wp, Cp)
        a1 = acc_ref[1].reshape(TH, Wp, Cp)
        a2 = acc_ref[2].reshape(TH, Wp, Cp)
        # out[:, j] = a0[:, j-1] + a1[:, j] + a2[:, j+1]; the rolled-in
        # columns are the zero tail columns, so the wrap is exact and all
        # slices / stores stay sublane- and lane-aligned.
        y = jnp.roll(a0, 1, axis=1) + a1 + jnp.roll(a2, -1, axis=1)
        y = jnp.maximum(y[:, 0:W, :] + b_ref[...], 0.0)
        o_ref[...] = y[None].astype(o_ref.dtype)


def bottleneck_pallas(x_cb, w9p, bias, *, H, W, TH, Coutp, vmem_limit):
    """x_cb: (N, n_k, H_tot, Wp, TK) channel-blocked buffer (halo rows / cols
       already zero).  w9p: (9, n_k*TK, Coutp) BN-scale folded; bias (1,Coutp)."""
    N, n_k, H_tot, Wp, TK = x_cb.shape
    assert H % TH == 0 and H_tot >= H + 2
    n_h = H // TH
    return pl.pallas_call(
        partial(_bottleneck_kernel, W, n_h),
        out_shape=jax.ShapeDtypeStruct((N, H, W, Coutp), jnp.float32),
        grid=(N, n_h, n_k),
        in_specs=[
            pl.BlockSpec(memory_space=pl.ANY),                        # raw HBM
            pl.BlockSpec((9, TK, Coutp), lambda n, h, k: (0, k, 0)),  # weights
            pl.BlockSpec((1, Coutp), lambda n, h, k: (0, 0)),         # bias
        ],
        out_specs=pl.BlockSpec((1, TH, W, Coutp), lambda n, h, k: (n, h, 0, 0)),
        scratch_shapes=[
            pltpu.VMEM((2, TH + 2, Wp, TK), x_cb.dtype),   # dbl-buffered strip
            pltpu.VMEM((3, TH * Wp, Coutp), jnp.float32),  # per-kw accumulators
            pltpu.SemaphoreType.DMA((2,)),
        ],
        compiler_params=pltpu.CompilerParams(
            dimension_semantics=("parallel", "arbitrary", "arbitrary"),
            vmem_limit_bytes=vmem_limit),
    )(x_cb, w9p, bias)


# ---------------------------------------------------------------------------
# Glue: adaptive average pooling (PyTorch semantics), bilinear interp matrix
# ---------------------------------------------------------------------------
def adaptive_avg_pool_nhwc(x, s):
    N, H, W, C = x.shape
    rows = []
    for i in range(s):
        hs, he = (i * H) // s, -((-(i + 1) * H) // s)
        cols = []
        for j in range(s):
            ws, we = (j * W) // s, -((-(j + 1) * W) // s)
            cols.append(jnp.mean(x[:, hs:he, ws:we, :], axis=(1, 2)))
        rows.append(jnp.stack(cols, axis=1))
    return jnp.stack(rows, axis=1)  # (N, s, s, C)


def interp_matrix(out_len, in_len):
    """1-D bilinear interpolation matrix, align_corners=True (F.upsample)."""
    M = np.zeros((out_len, in_len), np.float32)
    if in_len == 1:
        M[:, 0] = 1.0
    else:
        for h in range(out_len):
            src = (h * (in_len - 1) / (out_len - 1)) if out_len > 1 else 0.0
            i0 = min(int(math.floor(src)), in_len - 1)
            i1 = min(i0 + 1, in_len - 1)
            frac = src - i0
            M[h, i0] += 1.0 - frac
            M[h, i1] += frac
    return jnp.asarray(M)


def bn_affine(gamma, beta, mean, var, eps=1e-5):
    scale = gamma / jnp.sqrt(var + eps)
    bias = beta - mean * scale
    return scale, bias


# ---------------------------------------------------------------------------
# Parameter init (deterministic, synthetic) and forward passes
# ---------------------------------------------------------------------------
def init_params(key, inplanes, out_planes, sizes):
    ctot = inplanes + len(sizes) * out_planes
    keys = jax.random.split(key, 3 * len(sizes) + 3)
    stages = []
    for i, _ in enumerate(sizes):
        kw, kg, kb = keys[3 * i], keys[3 * i + 1], keys[3 * i + 2]
        # torch weight (Cout, Cin, 1, 1) -> stored as (Cin, Cout) for matmul
        w = 0.1 * jax.random.normal(kw, (out_planes, inplanes), jnp.float32)
        gamma = 1.0 + 0.1 * jax.random.normal(kg, (out_planes,), jnp.float32)
        beta = 0.05 * jax.random.normal(kb, (out_planes,), jnp.float32)
        sc, bi = bn_affine(gamma, beta, jnp.zeros((out_planes,)),
                           jnp.ones((out_planes,)))
        stages.append((w.T, sc, bi))
    kw, kg, kb = keys[-3], keys[-2], keys[-1]
    # torch weight (Cout, Ctot, 3, 3) -> HWIO (3, 3, Ctot, Cout) -> (9, Ctot, Cout)
    w3_torch = 0.05 * jax.random.normal(kw, (out_planes, ctot, 3, 3), jnp.float32)
    w3_hwio = jnp.transpose(w3_torch, (2, 3, 1, 0))
    w9 = w3_hwio.reshape(9, ctot, out_planes)
    gamma = 1.0 + 0.1 * jax.random.normal(kg, (out_planes,), jnp.float32)
    beta = 0.05 * jax.random.normal(kb, (out_planes,), jnp.float32)
    sc, bi = bn_affine(gamma, beta, jnp.zeros((out_planes,)),
                       jnp.ones((out_planes,)))
    return {"stages": stages, "bottleneck": (w9, sc, bi),
            "bottleneck_hwio": w3_hwio}


def psp_forward(feats_nchw, params, sizes, *, tile_h_up=None, tile_h_conv=None,
                TK=128, storage_dtype=jnp.float32):
    x = jnp.transpose(feats_nchw, (0, 2, 3, 1)).astype(jnp.float32)  # -> NHWC
    N, H, W, Cin = x.shape

    out_planes = params["stages"][0][0].shape[1]
    SC = len(sizes) * out_planes
    SCp = _round_up(SC, TK)              # stage channels padded to TK blocks
    Cin_p = _round_up(Cin, TK)           # feats channels padded to TK blocks
    n_sc, n_cin = SCp // TK, Cin_p // TK
    n_k = n_sc + n_cin
    Coutp = _round_up(out_planes, 128)

    vmem_limit, th_cap = _vmem_limit_and_th_cap()
    TH2 = tile_h_conv or _largest_divisor_leq(H, th_cap)
    assert H % TH2 == 0
    TH1 = tile_h_up or min(32, H + 2)
    TH1 *= 8 // math.gcd(TH1 * W, 8)     # keep U blocks sublane-dense
    H_tot = _round_up(H + 2, TH1)        # buffer rows: 1 top halo + H + >=1 bottom
    Wp = _round_up(W + 1, 8)             # data cols 0..W-1 + >=1 zero tail col

    ss_list = [s * s for s in sizes]
    SS = sum(ss_list)
    SSp = _round_up(SS, 8)

    # ---- host-side prep: everything here is tiny (pooled-resolution only) ----
    pooled_all = jnp.concatenate(
        [adaptive_avg_pool_nhwc(x, s).reshape(N, s * s, Cin) for s in sizes],
        axis=1)
    pooled_all = jnp.pad(pooled_all, ((0, 0), (0, SSp - SS), (0, 0)))

    w_cat = jnp.concatenate([w1 * sc[None, :]
                             for (w1, sc, _) in params["stages"]], axis=1)
    bias_cat = jnp.concatenate([bi for (_, _, bi) in params["stages"]])

    mask_np = np.zeros((SSp, SC), np.float32)        # block-diagonal stage mask
    off = 0
    for si, s in enumerate(sizes):
        mask_np[off:off + s * s, si * out_planes:(si + 1) * out_planes] = 1.0
        off += s * s
    mask = jnp.asarray(mask_np)

    # bias folded in before the upsample (rows of U sum to 1 within each scale)
    y_all = (jnp.einsum("nsc,cd->nsd", pooled_all, w_cat)
             + bias_cat[None, None, :]) * mask[None]
    y_all = jnp.pad(y_all, ((0, 0), (0, 0), (0, SCp - SC))).astype(jnp.float32)

    U_all = jnp.concatenate(
        [jnp.einsum("hi,wj->hwij", interp_matrix(H, s),
                    interp_matrix(W, s)).reshape(H * W, s * s)
         for s in sizes], axis=1)
    U_all = jnp.pad(U_all, ((0, 0), (0, SSp - SS)))
    # one zero row of halo on top, the rest at the bottom -> boundary tiles of
    # kernel 1 write zeros automatically (no in-kernel special casing).
    U_pad = jnp.concatenate(
        [jnp.zeros((W, SSp), jnp.float32), U_all,
         jnp.zeros(((H_tot - H - 1) * W, SSp), jnp.float32)], axis=0)

    x_ph = jnp.pad(x, ((0, 0), (1, H_tot - H - 1), (0, 0),
                       (0, Cin_p - Cin))).astype(storage_dtype)

    x_cb = stages_pallas(y_all, U_pad, x_ph, W=W, Wp=Wp, TH1=TH1, n_sc=n_sc,
                         n_k=n_k, TK=TK, storage_dtype=storage_dtype,
                         vmem_limit=vmem_limit)

    # ---- bottleneck: fold BN scale into 3x3 weights, match channel blocking ----
    w9, sc, bi = params["bottleneck"]                    # (9, Ctot, Cout)
    w9s = w9 * sc[None, None, :]
    w9p = jnp.concatenate(
        [w9s[:, :SC, :], jnp.zeros((9, SCp - SC, out_planes), jnp.float32),
         w9s[:, SC:, :], jnp.zeros((9, Cin_p - Cin, out_planes), jnp.float32)],
        axis=1)
    w9p = jnp.pad(w9p, ((0, 0), (0, 0),
                        (0, Coutp - out_planes))).astype(storage_dtype)
    bip = jnp.pad(bi, (0, Coutp - out_planes)).astype(jnp.float32)[None]

    out = bottleneck_pallas(x_cb, w9p, bip, H=H, W=W, TH=TH2, Coutp=Coutp,
                            vmem_limit=vmem_limit)
    out = out[..., :out_planes]
    return jnp.transpose(out, (0, 3, 1, 2))              # -> NCHW


def psp_forward_ref(feats_nchw, params, sizes):
    """Pure-JAX reference (no Pallas) for correctness checking."""
    x = jnp.transpose(feats_nchw, (0, 2, 3, 1))
    N, H, W, Cin = x.shape
    priors = []
    for si, s in enumerate(sizes):
        pooled = adaptive_avg_pool_nhwc(x, s)
        w1, sc, bi = params["stages"][si]
        y = jnp.einsum("nijc,cd->nijd", pooled, w1) * sc + bi
        Lh, Lw = interp_matrix(H, s), interp_matrix(W, s)
        up = jnp.einsum("hi,nijd,wj->nhwd", Lh, y, Lw)
        priors.append(up)
    cat = jnp.concatenate(priors + [x], axis=-1)
    _, sc, bi = params["bottleneck"]
    conv = jax.lax.conv_general_dilated(
        cat, params["bottleneck_hwio"], window_strides=(1, 1), padding="SAME",
        dimension_numbers=("NHWC", "HWIO", "NHWC"))
    out = jnp.maximum(conv * sc + bi, 0.0)
    return jnp.transpose(out, (0, 3, 1, 2))


if __name__ == "__main__":
    N, inplanes, H, W = 2, 4, 16, 16
    out_planes = 32
    sizes = (1, 2, 3, 6)

    key = jax.random.PRNGKey(0)
    pkey, xkey = jax.random.split(key)
    params = init_params(pkey, inplanes, out_planes, sizes)
    feats = jax.random.normal(xkey, (N, inplanes, H, W), jnp.float32)  # NCHW

    ref = jax.block_until_ready(psp_forward_ref(feats, params, sizes))

    # f32 storage (tight check against the pure-JAX reference)
    fwd = jax.jit(lambda t: psp_forward(t, params, sizes))
    out = jax.block_until_ready(fwd(feats))
    assert out.shape == (N, out_planes, H, W)
    assert jnp.allclose(out, ref, rtol=1e-3, atol=1e-3), "f32 mismatch vs ref"

    # bf16 storage for x_cb / conv weights (production config), f32 accumulate
    fwd_bf16 = jax.jit(
        lambda t: psp_forward(t, params, sizes, storage_dtype=jnp.bfloat16))
    out_bf16 = jax.block_until_ready(fwd_bf16(feats))
    assert out_bf16.shape == (N, out_planes, H, W)
    assert jnp.allclose(out_bf16, ref, rtol=3e-2, atol=3e-2), "bf16 mismatch"

    print("KERNEL_OK")
</pallas_src>

<mosaic_0001>
module attributes {stable_mosaic.version = 11 : i64} {
  func.func @_stages_kernel(%arg0: i32, %arg1: i32, %arg2: i32, %arg3: memref<1x56x128xf32, #tpu.memory_space<vmem>>, %arg4: memref<288x56xf32, #tpu.memory_space<vmem>>, %arg5: memref<1x18x16x128xf32, #tpu.memory_space<vmem>>, %arg6: memref<1x1x18x24x128xf32, #tpu.memory_space<vmem>>) attributes {dimension_semantics = [#tpu.dimension_semantics<parallel>, #tpu.dimension_semantics<parallel>, #tpu.dimension_semantics<parallel>], iteration_bounds = array<i64: 2, 1, 2>, scalar_prefetch = 0 : i64, scratch_operands = 0 : i64, tpu.core_type = #tpu.core_type<tc>, window_params = [{transform_indices = @transform_0, window_bounds = array<i64: 1, 56, 128>}, {transform_indices = @transform_1, window_bounds = array<i64: 288, 56>}, {transform_indices = @transform_2, window_bounds = array<i64: 1, 18, 16, 128>}, {transform_indices = @transform_3, window_bounds = array<i64: 1, 1, 18, 24, 128>}]} {
    %c1_i32 = arith.constant 1 : i32
    %0 = arith.cmpi slt, %arg2, %c1_i32 : i32
    %1 = arith.extui %0 : i1 to i32
    %c0_i32 = arith.constant 0 : i32
    %2 = arith.cmpi ne, %1, %c0_i32 : i32
    scf.if %2 {
      %c0_5 = arith.constant 0 : index
      %c0_6 = arith.constant 0 : index
      %10 = vector.load %arg4[%c0_5, %c0_6] : memref<288x56xf32, #tpu.memory_space<vmem>>, vector<288x56xf32>
      %c0_7 = arith.constant 0 : index
      %c0_8 = arith.constant 0 : index
      %c0_9 = arith.constant 0 : index
      %11 = vector.load %arg3[%c0_7, %c0_8, %c0_9] : memref<1x56x128xf32, #tpu.memory_space<vmem>>, vector<1x56x128xf32>
      %12 = vector.shape_cast %11 : vector<1x56x128xf32> to vector<56x128xf32>
      %cst_10 = arith.constant dense<0.000000e+00> : vector<288x128xf32>
      %13 = tpu.matmul %10, %12, %cst_10 {dimension_numbers = #tpu.dot_dimension_numbers<[1], [0], [0], [1], [0, 0, 1, 1], [], []>} : vector<288x56xf32>, vector<56x128xf32>, vector<288x128xf32> -> vector<288x128xf32>
      %14 = vector.shape_cast %13 : vector<288x128xf32> to vector<18x16x128xf32>
      %c0_11 = arith.constant 0 : index
      %c0_12 = arith.constant 0 : index
      %c0_13 = arith.constant 0 : index
      %c0_14 = arith.constant 0 : index
      %c0_15 = arith.constant 0 : index
      %15 = vector.load %arg6[%c0_11, %c0_12, %c0_13, %c0_14, %c0_15] : memref<1x1x18x24x128xf32, #tpu.memory_space<vmem>>, vector<1x1x18x16x128xf32>
      %16 = vector.shape_cast %15 : vector<1x1x18x16x128xf32> to vector<18x16x128xf32>
      %17 = vector.shape_cast %14 : vector<18x16x128xf32> to vector<1x1x18x16x128xf32>
      tpu.vector_store %arg6[%c0_11, %c0_12, %c0_13, %c0_14, %c0_15], %17 {strides = array<i32>} : memref<1x1x18x24x128xf32, #tpu.memory_space<vmem>>, vector<1x1x18x16x128xf32>,
    } else {
    }
    %c1_i32_0 = arith.constant 1 : i32
    %3 = arith.cmpi sge, %arg2, %c1_i32_0 : i32
    %4 = arith.extui %3 : i1 to i32
    %c0_i32_1 = arith.constant 0 : i32
    %5 = arith.cmpi ne, %4, %c0_i32_1 : i32
    scf.if %5 {
      %c0_5 = arith.constant 0 : index
      %c0_6 = arith.constant 0 : index
      %c0_7 = arith.constant 0 : index
      %c0_8 = arith.constant 0 : index
      %10 = vector.load %arg5[%c0_5, %c0_6, %c0_7, %c0_8] : memref<1x18x16x128xf32, #tpu.memory_space<vmem>>, vector<1x18x16x128xf32>
      %11 = vector.shape_cast %10 : vector<1x18x16x128xf32> to vector<18x16x128xf32>
      %c0_9 = arith.constant 0 : index
      %c0_10 = arith.constant 0 : index
      %c0_11 = arith.constant 0 : index
      %c0_12 = arith.constant 0 : index
      %c0_13 = arith.constant 0 : index
      %12 = vector.load %arg6[%c0_9, %c0_10, %c0_11, %c0_12, %c0_13] : memref<1x1x18x24x128xf32, #tpu.memory_space<vmem>>, vector<1x1x18x16x128xf32>
      %13 = vector.shape_cast %12 : vector<1x1x18x16x128xf32> to vector<18x16x128xf32>
      %14 = vector.shape_cast %11 : vector<18x16x128xf32> to vector<1x1x18x16x128xf32>
      tpu.vector_store %arg6[%c0_9, %c0_10, %c0_11, %c0_12, %c0_13], %14 {strides = array<i32>} : memref<1x1x18x24x128xf32, #tpu.memory_space<vmem>>, vector<1x1x18x16x128xf32>,
    } else {
    }
    %cst = arith.constant 0.000000e+00 : f32
    %6 = vector.broadcast %cst : f32 to vector<18x8x128xf32>
    %c0 = arith.constant 0 : index
    %c0_2 = arith.constant 0 : index
    %c0_3 = arith.constant 0 : index
    %c16 = arith.constant 16 : index
    %c0_4 = arith.constant 0 : index
    %7 = vector.load %arg6[%c0, %c0_2, %c0_3, %c16, %c0_4] : memref<1x1x18x24x128xf32, #tpu.memory_space<vmem>>, vector<1x1x18x8x128xf32>
    %8 = vector.shape_cast %7 : vector<1x1x18x8x128xf32> to vector<18x8x128xf32>
    %9 = vector.shape_cast %6 : vector<18x8x128xf32> to vector<1x1x18x8x128xf32>
    tpu.vector_store %arg6[%c0, %c0_2, %c0_3, %c16, %c0_4], %9 {strides = array<i32>} : memref<1x1x18x24x128xf32, #tpu.memory_space<vmem>>, vector<1x1x18x8x128xf32>,
    return
  }
  func.func @transform_0(%arg0: i32, %arg1: i32, %arg2: i32) -> (i32, i32, i32) {
    %c0_i32 = arith.constant 0 : i32
    %0 = arith.minsi %arg2, %c0_i32 : i32
    %c0_i32_0 = arith.constant 0 : i32
    %c0_i32_1 = arith.constant 0 : i32
    return %arg0, %c0_i32_0, %0 : i32, i32, i32
  }
  func.func @transform_1(%arg0: i32, %arg1: i32, %arg2: i32) -> (i32, i32) {
    %c0_i32 = arith.constant 0 : i32
    %c0_i32_0 = arith.constant 0 : i32
    return %arg1, %c0_i32 : i32, i32
  }
  func.func @transform_2(%arg0: i32, %arg1: i32, %arg2: i32) -> (i32, i32, i32, i32) {
    %c1_i32 = arith.constant 1 : i32
    %0 = arith.subi %arg2, %c1_i32 : i32
    %c0_i32 = arith.constant 0 : i32
    %1 = arith.maxsi %0, %c0_i32 : i32
    %c0_i32_0 = arith.constant 0 : i32
    %c0_i32_1 = arith.constant 0 : i32
    return %arg0, %arg1, %c0_i32_0, %1 : i32, i32, i32, i32
  }
  func.func @transform_3(%arg0: i32, %arg1: i32, %arg2: i32) -> (i32, i32, i32, i32, i32) {
    %c0_i32 = arith.constant 0 : i32
    %c0_i32_0 = arith.constant 0 : i32
    %c0_i32_1 = arith.constant 0 : i32
    return %arg0, %arg2, %arg1, %c0_i32, %c0_i32_0 : i32, i32, i32, i32, i32
  }
}

module attributes {stable_mosaic.version = 11 : i64} {
  func.func @_bottleneck_kernel(%arg0: i32, %arg1: i32, %arg2: i32, %arg3: memref<2x2x18x24x128xf32, #tpu.memory_space<any>>, %arg4: memref<9x128x128xf32, #tpu.memory_space<vmem>>, %arg5: memref<1x128xf32, #tpu.memory_space<vmem>>, %arg6: memref<1x16x16x128xf32, #tpu.memory_space<vmem>>, %arg7: memref<2x18x24x128xf32, #tpu.memory_space<vmem>>, %arg8: memref<3x384x128xf32, #tpu.memory_space<vmem>>, %arg9: memref<2x!tpu.dma_semaphore, #tpu.memory_space<semaphore_mem>>) attributes {dimension_semantics = [#tpu.dimension_semantics<parallel>, #tpu.dimension_semantics<arbitrary>, #tpu.dimension_semantics<arbitrary>], iteration_bounds = array<i64: 2, 1, 2>, scalar_prefetch = 0 : i64, scratch_operands = 3 : i64, tpu.core_type = #tpu.core_type<tc>, window_params = [{}, {transform_indices = @transform_1, window_bounds = array<i64: 9, 128, 128>}, {pipeline_mode = #tpu.pipeline_mode<synchronous>, transform_indices = @transform_2, window_bounds = array<i64: 1, 128>}, {transform_indices = @transform_3, window_bounds = array<i64: 1, 16, 16, 128>}]} {
    %c2_i32 = arith.constant 2 : i32
    %0 = arith.muli %arg1, %c2_i32 : i32
    %1 = arith.addi %0, %arg2 : i32
    %c2_i32_0 = arith.constant 2 : i32
    %c0_i32 = arith.constant 0 : i32
    %2 = arith.cmpi eq, %c2_i32_0, %c0_i32 : i32
    %c1_i32 = arith.constant 1 : i32
    %3 = arith.select %2, %c1_i32, %c2_i32_0 : i32
    %4 = arith.remsi %1, %3 : i32
    %c0_i32_1 = arith.constant 0 : i32
    %5 = arith.cmpi ne, %4, %c0_i32_1 : i32
    %c0_i32_2 = arith.constant 0 : i32
    %6 = arith.cmpi slt, %4, %c0_i32_2 : i32
    %c0_i32_3 = arith.constant 0 : i32
    %7 = arith.cmpi slt, %3, %c0_i32_3 : i32
    %8 = arith.xori %6, %7 : i1
    %9 = arith.andi %8, %5 : i1
    %10 = arith.addi %4, %3 : i32
    %11 = arith.select %9, %10, %4 : i32
    %c0_i32_4 = arith.constant 0 : i32
    %12 = arith.cmpi eq, %arg1, %c0_i32_4 : i32
    %c0_i32_5 = arith.constant 0 : i32
    %13 = arith.cmpi eq, %arg2, %c0_i32_5 : i32
    %14 = arith.andi %12, %13 : i1
    %15 = arith.extui %14 : i1 to i32
    %c0_i32_6 = arith.constant 0 : i32
    %16 = arith.cmpi ne, %15, %c0_i32_6 : i32
    scf.if %16 {
      %c16_i32_107 = arith.constant 16 : i32
      %129 = arith.muli %arg1, %c16_i32_107 : i32
      %130 = tpu.assume_multiple %129, 16 : i32
      %c0_i32_108 = arith.constant 0 : i32
      %c0_i32_109 = arith.constant 0 : i32
      %131 = tpu.memref_slice %arg3[%arg0, %arg2, %130, %c0_i32_108, %c0_i32_109] : memref<2x2x18x24x128xf32, #tpu.memory_space<any>> -> memref<1x1x18x24x128xf32, #tpu.memory_space<any>>
      %132 = tpu.memref_squeeze %131 : memref<1x1x18x24x128xf32, #tpu.memory_space<any>> -> memref<18x24x128xf32, #tpu.memory_space<any>>
      %c0_i32_110 = arith.constant 0 : i32
      %c0_i32_111 = arith.constant 0 : i32
      %c0_i32_112 = arith.constant 0 : i32
      %133 = tpu.memref_slice %arg7[%11, %c0_i32_110, %c0_i32_111, %c0_i32_112] : memref<2x18x24x128xf32, #tpu.memory_space<vmem>> -> memref<1x18x24x128xf32, #tpu.memory_space<vmem>>
      %134 = tpu.memref_squeeze %133 : memref<1x18x24x128xf32, #tpu.memory_space<vmem>> -> memref<18x24x128xf32, #tpu.memory_space<vmem>>
      %135 = tpu.memref_slice %arg9[%11] : memref<2x!tpu.dma_semaphore, #tpu.memory_space<semaphore_mem>> -> memref<1x!tpu.dma_semaphore, #tpu.memory_space<semaphore_mem>>
      %136 = tpu.memref_squeeze %135 : memref<1x!tpu.dma_semaphore, #tpu.memory_space<semaphore_mem>> -> memref<!tpu.dma_semaphore, #tpu.memory_space<semaphore_mem>>
      tpu.enqueue_dma source(%132 : memref<18x24x128xf32, #tpu.memory_space<any>>) target(%134 : memref<18x24x128xf32, #tpu.memory_space<vmem>>) target_semaphore(%136 : memref<!tpu.dma_semaphore, #tpu.memory_space<semaphore_mem>>)
    } else {
    }
    %c0_i32_7 = arith.constant 0 : i32
    %17 = arith.cmpi eq, %arg2, %c0_i32_7 : i32
    %18 = arith.extui %17 : i1 to i32
    %c0_i32_8 = arith.constant 0 : i32
    %19 = arith.cmpi ne, %18, %c0_i32_8 : i32
    scf.if %19 {
      %cst_107 = arith.constant 0.000000e+00 : f32
      %129 = vector.broadcast %cst_107 : f32 to vector<3x384x128xf32>
      %c0_108 = arith.constant 0 : index
      %c0_109 = arith.constant 0 : index
      %c0_110 = arith.constant 0 : index
      %130 = vector.load %arg8[%c0_108, %c0_109, %c0_110] : memref<3x384x128xf32, #tpu.memory_space<vmem>>, vector<3x384x128xf32>
      tpu.vector_store %arg8[%c0_108, %c0_109, %c0_110], %129 {strides = array<i32>} : memref<3x384x128xf32, #tpu.memory_space<vmem>>, vector<3x384x128xf32>,
    } else {
    }
    %c16_i32 = arith.constant 16 : i32
    %20 = arith.muli %arg1, %c16_i32 : i32
    %21 = tpu.assume_multiple %20, 16 : i32
    %c0_i32_9 = arith.constant 0 : i32
    %c0_i32_10 = arith.constant 0 : i32
    %22 = tpu.memref_slice %arg3[%arg0, %arg2, %21, %c0_i32_9, %c0_i32_10] : memref<2x2x18x24x128xf32, #tpu.memory_space<any>> -> memref<1x1x18x24x128xf32, #tpu.memory_space<any>>
    %23 = tpu.memref_squeeze %22 : memref<1x1x18x24x128xf32, #tpu.memory_space<any>> -> memref<18x24x128xf32, #tpu.memory_space<any>>
    %c0_i32_11 = arith.constant 0 : i32
    %c0_i32_12 = arith.constant 0 : i32
    %c0_i32_13 = arith.constant 0 : i32
    %24 = tpu.memref_slice %arg7[%11, %c0_i32_11, %c0_i32_12, %c0_i32_13] : memref<2x18x24x128xf32, #tpu.memory_space<vmem>> -> memref<1x18x24x128xf32, #tpu.memory_space<vmem>>
    %25 = tpu.memref_squeeze %24 : memref<1x18x24x128xf32, #tpu.memory_space<vmem>> -> memref<18x24x128xf32, #tpu.memory_space<vmem>>
    %26 = tpu.memref_slice %arg9[%11] : memref<2x!tpu.dma_semaphore, #tpu.memory_space<semaphore_mem>> -> memref<1x!tpu.dma_semaphore, #tpu.memory_space<semaphore_mem>>
    %27 = tpu.memref_squeeze %26 : memref<1x!tpu.dma_semaphore, #tpu.memory_space<semaphore_mem>> -> memref<!tpu.dma_semaphore, #tpu.memory_space<semaphore_mem>>
    tpu.wait_dma2 semaphore(%27 : memref<!tpu.dma_semaphore, #tpu.memory_space<semaphore_mem>>) src(%23 : memref<18x24x128xf32, #tpu.memory_space<any>>) dst(%25 : memref<18x24x128xf32, #tpu.memory_space<vmem>>)
    %c1_i32_14 = arith.constant 1 : i32
    %28 = arith.cmpi eq, %arg2, %c1_i32_14 : i32
    %c0_i32_15 = arith.constant 0 : i32
    %29 = arith.cmpi eq, %arg1, %c0_i32_15 : i32
    %30 = arith.andi %28, %29 : i1
    %true = arith.constant true
    %31 = arith.xori %30, %true : i1
    %32 = arith.extui %31 : i1 to i32
    %c0_i32_16 = arith.constant 0 : i32
    %33 = arith.cmpi ne, %32, %c0_i32_16 : i32
    scf.if %33 {
      %c1_i32_107 = arith.constant 1 : i32
      %129 = arith.addi %arg1, %c1_i32_107 : i32
      %130 = arith.select %28, %129, %arg1 : i32
      %c1_i32_108 = arith.constant 1 : i32
      %131 = arith.addi %arg2, %c1_i32_108 : i32
      %c0_i32_109 = arith.constant 0 : i32
      %132 = arith.select %28, %c0_i32_109, %131 : i32
      %c1_i32_110 = arith.constant 1 : i32
      %133 = arith.subi %c1_i32_110, %11 : i32
      %c16_i32_111 = arith.constant 16 : i32
      %134 = arith.muli %130, %c16_i32_111 : i32
      %135 = tpu.assume_multiple %134, 16 : i32
      %c0_i32_112 = arith.constant 0 : i32
      %c0_i32_113 = arith.constant 0 : i32
      %136 = tpu.memref_slice %arg3[%arg0, %132, %135, %c0_i32_112, %c0_i32_113] : memref<2x2x18x24x128xf32, #tpu.memory_space<any>> -> memref<1x1x18x24x128xf32, #tpu.memory_space<any>>
      %137 = tpu.memref_squeeze %136 : memref<1x1x18x24x128xf32, #tpu.memory_space<any>> -> memref<18x24x128xf32, #tpu.memory_space<any>>
      %c0_i32_114 = arith.constant 0 : i32
      %c0_i32_115 = arith.constant 0 : i32
      %c0_i32_116 = arith.constant 0 : i32
      %138 = tpu.memref_slice %arg7[%133, %c0_i32_114, %c0_i32_115, %c0_i32_116] : memref<2x18x24x128xf32, #tpu.memory_space<vmem>> -> memref<1x18x24x128xf32, #tpu.memory_space<vmem>>
      %139 = tpu.memref_squeeze %138 : memref<1x18x24x128xf32, #tpu.memory_space<vmem>> -> memref<18x24x128xf32, #tpu.memory_space<vmem>>
      %140 = tpu.memref_slice %arg9[%133] : memref<2x!tpu.dma_semaphore, #tpu.memory_space<semaphore_mem>> -> memref<1x!tpu.dma_semaphore, #tpu.memory_space<semaphore_mem>>
      %141 = tpu.memref_squeeze %140 : memref<1x!tpu.dma_semaphore, #tpu.memory_space<semaphore_mem>> -> memref<!tpu.dma_semaphore, #tpu.memory_space<semaphore_mem>>
      tpu.enqueue_dma source(%137 : memref<18x24x128xf32, #tpu.memory_space<any>>) target(%139 : memref<18x24x128xf32, #tpu.memory_space<vmem>>) target_semaphore(%141 : memref<!tpu.dma_semaphore, #tpu.memory_space<semaphore_mem>>)
    } else {
    }
    %34 = arith.index_cast %11 : i32 to index
    %c0 = arith.constant 0 : index
    %c0_17 = arith.constant 0 : index
    %c0_18 = arith.constant 0 : index
    %35 = vector.load %arg7[%34, %c0, %c0_17, %c0_18] : memref<2x18x24x128xf32, #tpu.memory_space<vmem>>, vector<1x16x24x128xf32>
    %36 = vector.shape_cast %35 : vector<1x16x24x128xf32> to vector<16x24x128xf32>
    %37 = vector.shape_cast %36 : vector<16x24x128xf32> to vector<384x128xf32>
    %c0_19 = arith.constant 0 : index
    %c0_20 = arith.constant 0 : index
    %c0_21 = arith.constant 0 : index
    %38 = vector.load %arg8[%c0_19, %c0_20, %c0_21] : memref<3x384x128xf32, #tpu.memory_space<vmem>>, vector<1x384x128xf32>
    %39 = vector.shape_cast %38 : vector<1x384x128xf32> to vector<384x128xf32>
    %c0_22 = arith.constant 0 : index
    %c0_23 = arith.constant 0 : index
    %c0_24 = arith.constant 0 : index
    %40 = vector.load %arg4[%c0_22, %c0_23, %c0_24] : memref<9x128x128xf32, #tpu.memory_space<vmem>>, vector<1x128x128xf32>
    %41 = vector.shape_cast %40 : vector<1x128x128xf32> to vector<128x128xf32>
    %cst = arith.constant dense<0.000000e+00> : vector<384x128xf32>
    %42 = tpu.matmul %37, %41, %cst {dimension_numbers = #tpu.dot_dimension_numbers<[1], [0], [0], [1], [0, 0, 1, 1], [], []>} : vector<384x128xf32>, vector<128x128xf32>, vector<384x128xf32> -> vector<384x128xf32>
    %43 = arith.addf %39, %42 : vector<384x128xf32>
    %c0_25 = arith.constant 0 : index
    %c0_26 = arith.constant 0 : index
    %c0_27 = arith.constant 0 : index
    %44 = vector.load %arg8[%c0_25, %c0_26, %c0_27] : memref<3x384x128xf32, #tpu.memory_space<vmem>>, vector<1x384x128xf32>
    %45 = vector.shape_cast %44 : vector<1x384x128xf32> to vector<384x128xf32>
    %46 = vector.shape_cast %43 : vector<384x128xf32> to vector<1x384x128xf32>
    tpu.vector_store %arg8[%c0_25, %c0_26, %c0_27], %46 {strides = array<i32>} : memref<3x384x128xf32, #tpu.memory_space<vmem>>, vector<1x384x128xf32>,
    %c1 = arith.constant 1 : index
    %c0_28 = arith.constant 0 : index
    %c0_29 = arith.constant 0 : index
    %47 = vector.load %arg8[%c1, %c0_28, %c0_29] : memref<3x384x128xf32, #tpu.memory_space<vmem>>, vector<1x384x128xf32>
    %48 = vector.shape_cast %47 : vector<1x384x128xf32> to vector<384x128xf32>
    %c1_30 = arith.constant 1 : index
    %c0_31 = arith.constant 0 : index
    %c0_32 = arith.constant 0 : index
    %49 = vector.load %arg4[%c1_30, %c0_31, %c0_32] : memref<9x128x128xf32, #tpu.memory_space<vmem>>, vector<1x128x128xf32>
    %50 = vector.shape_cast %49 : vector<1x128x128xf32> to vector<128x128xf32>
    %cst_33 = arith.constant dense<0.000000e+00> : vector<384x128xf32>
    %51 = tpu.matmul %37, %50, %cst_33 {dimension_numbers = #tpu.dot_dimension_numbers<[1], [0], [0], [1], [0, 0, 1, 1], [], []>} : vector<384x128xf32>, vector<128x128xf32>, vector<384x128xf32> -> vector<384x128xf32>
    %52 = arith.addf %48, %51 : vector<384x128xf32>
    %c1_34 = arith.constant 1 : index
    %c0_35 = arith.constant 0 : index
    %c0_36 = arith.constant 0 : index
    %53 = vector.load %arg8[%c1_34, %c0_35, %c0_36] : memref<3x384x128xf32, #tpu.memory_space<vmem>>, vector<1x384x128xf32>
    %54 = vector.shape_cast %53 : vector<1x384x128xf32> to vector<384x128xf32>
    %55 = vector.shape_cast %52 : vector<384x128xf32> to vector<1x384x128xf32>
    tpu.vector_store %arg8[%c1_34, %c0_35, %c0_36], %55 {strides = array<i32>} : memref<3x384x128xf32, #tpu.memory_space<vmem>>, vector<1x384x128xf32>,
    %c2 = arith.constant 2 : index
    %c0_37 = arith.constant 0 : index
    %c0_38 = arith.constant 0 : index
    %56 = vector.load %arg8[%c2, %c0_37, %c0_38] : memref<3x384x128xf32, #tpu.memory_space<vmem>>, vector<1x384x128xf32>
    %57 = vector.shape_cast %56 : vector<1x384x128xf32> to vector<384x128xf32>
    %c2_39 = arith.constant 2 : index
    %c0_40 = arith.constant 0 : index
    %c0_41 = arith.constant 0 : index
    %58 = vector.load %arg4[%c2_39, %c0_40, %c0_41] : memref<9x128x128xf32, #tpu.memory_space<vmem>>, vector<1x128x128xf32>
    %59 = vector.shape_cast %58 : vector<1x128x128xf32> to vector<128x128xf32>
    %cst_42 = arith.constant dense<0.000000e+00> : vector<384x128xf32>
    %60 = tpu.matmul %37, %59, %cst_42 {dimension_numbers = #tpu.dot_dimension_numbers<[1], [0], [0], [1], [0, 0, 1, 1], [], []>} : vector<384x128xf32>, vector<128x128xf32>, vector<384x128xf32> -> vector<384x128xf32>
    %61 = arith.addf %57, %60 : vector<384x128xf32>
    %c2_43 = arith.constant 2 : index
    %c0_44 = arith.constant 0 : index
    %c0_45 = arith.constant 0 : index
    %62 = vector.load %arg8[%c2_43, %c0_44, %c0_45] : memref<3x384x128xf32, #tpu.memory_space<vmem>>, vector<1x384x128xf32>
    %63 = vector.shape_cast %62 : vector<1x384x128xf32> to vector<384x128xf32>
    %64 = vector.shape_cast %61 : vector<384x128xf32> to vector<1x384x128xf32>
    tpu.vector_store %arg8[%c2_43, %c0_44, %c0_45], %64 {strides = array<i32>} : memref<3x384x128xf32, #tpu.memory_space<vmem>>, vector<1x384x128xf32>,
    %65 = arith.index_cast %11 : i32 to index
    %c1_46 = arith.constant 1 : index
    %c0_47 = arith.constant 0 : index
    %c0_48 = arith.constant 0 : index
    %66 = vector.load %arg7[%65, %c1_46, %c0_47, %c0_48] : memref<2x18x24x128xf32, #tpu.memory_space<vmem>>, vector<1x16x24x128xf32>
    %67 = vector.shape_cast %66 : vector<1x16x24x128xf32> to vector<16x24x128xf32>
    %68 = vector.shape_cast %67 : vector<16x24x128xf32> to vector<384x128xf32>
    %c0_49 = arith.constant 0 : index
    %c0_50 = arith.constant 0 : index
    %c0_51 = arith.constant 0 : index
    %69 = vector.load %arg8[%c0_49, %c0_50, %c0_51] : memref<3x384x128xf32, #tpu.memory_space<vmem>>, vector<1x384x128xf32>
    %70 = vector.shape_cast %69 : vector<1x384x128xf32> to vector<384x128xf32>
    %c3 = arith.constant 3 : index
    %c0_52 = arith.constant 0 : index
    %c0_53 = arith.constant 0 : index
    %71 = vector.load %arg4[%c3, %c0_52, %c0_53] : memref<9x128x128xf32, #tpu.memory_space<vmem>>, vector<1x128x128xf32>
    %72 = vector.shape_cast %71 : vector<1x128x128xf32> to vector<128x128xf32>
    %cst_54 = arith.constant dense<0.000000e+00> : vector<384x128xf32>
    %73 = tpu.matmul %68, %72, %cst_54 {dimension_numbers = #tpu.dot_dimension_numbers<[1], [0], [0], [1], [0, 0, 1, 1], [], []>} : vector<384x128xf32>, vector<128x128xf32>, vector<384x128xf32> -> vector<384x128xf32>
    %74 = arith.addf %70, %73 : vector<384x128xf32>
    %c0_55 = arith.constant 0 : index
    %c0_56 = arith.constant 0 : index
    %c0_57 = arith.constant 0 : index
    %75 = vector.load %arg8[%c0_55, %c0_56, %c0_57] : memref<3x384x128xf32, #tpu.memory_space<vmem>>, vector<1x384x128xf32>
    %76 = vector.shape_cast %75 : vector<1x384x128xf32> to vector<384x128xf32>
    %77 = vector.shape_cast %74 : vector<384x128xf32> to vector<1x384x128xf32>
    tpu.vector_store %arg8[%c0_55, %c0_56, %c0_57], %77 {strides = array<i32>} : memref<3x384x128xf32, #tpu.memory_space<vmem>>, vector<1x384x128xf32>,
    %c1_58 = arith.constant 1 : index
    %c0_59 = arith.constant 0 : index
    %c0_60 = arith.constant 0 : index
    %78 = vector.load %arg8[%c1_58, %c0_59, %c0_60] : memref<3x384x128xf32, #tpu.memory_space<vmem>>, vector<1x384x128xf32>
    %79 = vector.shape_cast %78 : vector<1x384x128xf32> to vector<384x128xf32>
    %c4 = arith.constant 4 : index
    %c0_61 = arith.constant 0 : index
    %c0_62 = arith.constant 0 : index
    %80 = vector.load %arg4[%c4, %c0_61, %c0_62] : memref<9x128x128xf32, #tpu.memory_space<vmem>>, vector<1x128x128xf32>
    %81 = vector.shape_cast %80 : vector<1x128x128xf32> to vector<128x128xf32>
    %cst_63 = arith.constant dense<0.000000e+00> : vector<384x128xf32>
    %82 = tpu.matmul %68, %81, %cst_63 {dimension_numbers = #tpu.dot_dimension_numbers<[1], [0], [0], [1], [0, 0, 1, 1], [], []>} : vector<384x128xf32>, vector<128x128xf32>, vector<384x128xf32> -> vector<384x128xf32>
    %83 = arith.addf %79, %82 : vector<384x128xf32>
    %c1_64 = arith.constant 1 : index
    %c0_65 = arith.constant 0 : index
    %c0_66 = arith.constant 0 : index
    %84 = vector.load %arg8[%c1_64, %c0_65, %c0_66] : memref<3x384x128xf32, #tpu.memory_space<vmem>>, vector<1x384x128xf32>
    %85 = vector.shape_cast %84 : vector<1x384x128xf32> to vector<384x128xf32>
    %86 = vector.shape_cast %83 : vector<384x128xf32> to vector<1x384x128xf32>
    tpu.vector_store %arg8[%c1_64, %c0_65, %c0_66], %86 {strides = array<i32>} : memref<3x384x128xf32, #tpu.memory_space<vmem>>, vector<1x384x128xf32>,
    %c2_67 = arith.constant 2 : index
    %c0_68 = arith.constant 0 : index
    %c0_69 = arith.constant 0 : index
    %87 = vector.load %arg8[%c2_67, %c0_68, %c0_69] : memref<3x384x128xf32, #tpu.memory_space<vmem>>, vector<1x384x128xf32>
    %88 = vector.shape_cast %87 : vector<1x384x128xf32> to vector<384x128xf32>
    %c5 = arith.constant 5 : index
    %c0_70 = arith.constant 0 : index
    %c0_71 = arith.constant 0 : index
    %89 = vector.load %arg4[%c5, %c0_70, %c0_71] : memref<9x128x128xf32, #tpu.memory_space<vmem>>, vector<1x128x128xf32>
    %90 = vector.shape_cast %89 : vector<1x128x128xf32> to vector<128x128xf32>
    %cst_72 = arith.constant dense<0.000000e+00> : vector<384x128xf32>
    %91 = tpu.matmul %68, %90, %cst_72 {dimension_numbers = #tpu.dot_dimension_numbers<[1], [0], [0], [1], [0, 0, 1, 1], [], []>} : vector<384x128xf32>, vector<128x128xf32>, vector<384x128xf32> -> vector<384x128xf32>
    %92 = arith.addf %88, %91 : vector<384x128xf32>
    %c2_73 = arith.constant 2 : index
    %c0_74 = arith.constant 0 : index
    %c0_75 = arith.constant 0 : index
    %93 = vector.load %arg8[%c2_73, %c0_74, %c0_75] : memref<3x384x128xf32, #tpu.memory_space<vmem>>, vector<1x384x128xf32>
    %94 = vector.shape_cast %93 : vector<1x384x128xf32> to vector<384x128xf32>
    %95 = vector.shape_cast %92 : vector<384x128xf32> to vector<1x384x128xf32>
    tpu.vector_store %arg8[%c2_73, %c0_74, %c0_75], %95 {strides = array<i32>} : memref<3x384x128xf32, #tpu.memory_space<vmem>>, vector<1x384x128xf32>,
    %96 = arith.index_cast %11 : i32 to index
    %c2_76 = arith.constant 2 : index
    %c0_77 = arith.constant 0 : index
    %c0_78 = arith.constant 0 : index
    %97 = vector.load %arg7[%96, %c2_76, %c0_77, %c0_78] : memref<2x18x24x128xf32, #tpu.memory_space<vmem>>, vector<1x16x24x128xf32>
    %98 = vector.shape_cast %97 : vector<1x16x24x128xf32> to vector<16x24x128xf32>
    %99 = vector.shape_cast %98 : vector<16x24x128xf32> to vector<384x128xf32>
    %c0_79 = arith.constant 0 : index
    %c0_80 = arith.constant 0 : index
    %c0_81 = arith.constant 0 : index
    %100 = vector.load %arg8[%c0_79, %c0_80, %c0_81] : memref<3x384x128xf32, #tpu.memory_space<vmem>>, vector<1x384x128xf32>
    %101 = vector.shape_cast %100 : vector<1x384x128xf32> to vector<384x128xf32>
    %c6 = arith.constant 6 : index
    %c0_82 = arith.constant 0 : index
    %c0_83 = arith.constant 0 : index
    %102 = vector.load %arg4[%c6, %c0_82, %c0_83] : memref<9x128x128xf32, #tpu.memory_space<vmem>>, vector<1x128x128xf32>
    %103 = vector.shape_cast %102 : vector<1x128x128xf32> to vector<128x128xf32>
    %cst_84 = arith.constant dense<0.000000e+00> : vector<384x128xf32>
    %104 = tpu.matmul %99, %103, %cst_84 {dimension_numbers = #tpu.dot_dimension_numbers<[1], [0], [0], [1], [0, 0, 1, 1], [], []>} : vector<384x128xf32>, vector<128x128xf32>, vector<384x128xf32> -> vector<384x128xf32>
    %105 = arith.addf %101, %104 : vector<384x128xf32>
    %c0_85 = arith.constant 0 : index
    %c0_86 = arith.constant 0 : index
    %c0_87 = arith.constant 0 : index
    %106 = vector.load %arg8[%c0_85, %c0_86, %c0_87] : memref<3x384x128xf32, #tpu.memory_space<vmem>>, vector<1x384x128xf32>
    %107 = vector.shape_cast %106 : vector<1x384x128xf32> to vector<384x128xf32>
    %108 = vector.shape_cast %105 : vector<384x128xf32> to vector<1x384x128xf32>
    tpu.vector_store %arg8[%c0_85, %c0_86, %c0_87], %108 {strides = array<i32>} : memref<3x384x128xf32, #tpu.memory_space<vmem>>, vector<1x384x128xf32>,
    %c1_88 = arith.constant 1 : index
    %c0_89 = arith.constant 0 : index
    %c0_90 = arith.constant 0 : index
    %109 = vector.load %arg8[%c1_88, %c0_89, %c0_90] : memref<3x384x128xf32, #tpu.memory_space<vmem>>, vector<1x384x128xf32>
    %110 = vector.shape_cast %109 : vector<1x384x128xf32> to vector<384x128xf32>
    %c7 = arith.constant 7 : index
    %c0_91 = arith.constant 0 : index
    %c0_92 = arith.constant 0 : index
    %111 = vector.load %arg4[%c7, %c0_91, %c0_92] : memref<9x128x128xf32, #tpu.memory_space<vmem>>, vector<1x128x128xf32>
    %112 = vector.shape_cast %111 : vector<1x128x128xf32> to vector<128x128xf32>
    %cst_93 = arith.constant dense<0.000000e+00> : vector<384x128xf32>
    %113 = tpu.matmul %99, %112, %cst_93 {dimension_numbers = #tpu.dot_dimension_numbers<[1], [0], [0], [1], [0, 0, 1, 1], [], []>} : vector<384x128xf32>, vector<128x128xf32>, vector<384x128xf32> -> vector<384x128xf32>
    %114 = arith.addf %110, %113 : vector<384x128xf32>
    %c1_94 = arith.constant 1 : index
    %c0_95 = arith.constant 0 : index
    %c0_96 = arith.constant 0 : index
    %115 = vector.load %arg8[%c1_94, %c0_95, %c0_96] : memref<3x384x128xf32, #tpu.memory_space<vmem>>, vector<1x384x128xf32>
    %116 = vector.shape_cast %115 : vector<1x384x128xf32> to vector<384x128xf32>
    %117 = vector.shape_cast %114 : vector<384x128xf32> to vector<1x384x128xf32>
    tpu.vector_store %arg8[%c1_94, %c0_95, %c0_96], %117 {strides = array<i32>} : memref<3x384x128xf32, #tpu.memory_space<vmem>>, vector<1x384x128xf32>,
    %c2_97 = arith.constant 2 : index
    %c0_98 = arith.constant 0 : index
    %c0_99 = arith.constant 0 : index
    %118 = vector.load %arg8[%c2_97, %c0_98, %c0_99] : memref<3x384x128xf32, #tpu.memory_space<vmem>>, vector<1x384x128xf32>
    %119 = vector.shape_cast %118 : vector<1x384x128xf32> to vector<384x128xf32>
    %c8 = arith.constant 8 : index
    %c0_100 = arith.constant 0 : index
    %c0_101 = arith.constant 0 : index
    %120 = vector.load %arg4[%c8, %c0_100, %c0_101] : memref<9x128x128xf32, #tpu.memory_space<vmem>>, vector<1x128x128xf32>
    %121 = vector.shape_cast %120 : vector<1x128x128xf32> to vector<128x128xf32>
    %cst_102 = arith.constant dense<0.000000e+00> : vector<384x128xf32>
    %122 = tpu.matmul %99, %121, %cst_102 {dimension_numbers = #tpu.dot_dimension_numbers<[1], [0], [0], [1], [0, 0, 1, 1], [], []>} : vector<384x128xf32>, vector<128x128xf32>, vector<384x128xf32> -> vector<384x128xf32>
    %123 = arith.addf %119, %122 : vector<384x128xf32>
    %c2_103 = arith.constant 2 : index
    %c0_104 = arith.constant 0 : index
    %c0_105 = arith.constant 0 : index
    %124 = vector.load %arg8[%c2_103, %c0_104, %c0_105] : memref<3x384x128xf32, #tpu.memory_space<vmem>>, vector<1x384x128xf32>
    %125 = vector.shape_cast %124 : vector<1x384x128xf32> to vector<384x128xf32>
    %126 = vector.shape_cast %123 : vector<384x128xf32> to vector<1x384x128xf32>
    tpu.vector_store %arg8[%c2_103, %c0_104, %c0_105], %126 {strides = array<i32>} : memref<3x384x128xf32, #tpu.memory_space<vmem>>, vector<1x384x128xf32>,
    %127 = arith.extui %28 : i1 to i32
    %c0_i32_106 = arith.constant 0 : i32
    %128 = arith.cmpi ne, %127, %c0_i32_106 : i32
    scf.if %128 {
      %c0_107 = arith.constant 0 : index
      %c0_108 = arith.constant 0 : index
      %c0_109 = arith.constant 0 : index
      %129 = vector.load %arg8[%c0_107, %c0_108, %c0_109] : memref<3x384x128xf32, #tpu.memory_space<vmem>>, vector<1x384x128xf32>
      %130 = vector.shape_cast %129 : vector<1x384x128xf32> to vector<384x128xf32>
      %131 = vector.shape_cast %130 : vector<384x128xf32> to vector<16x24x128xf32>
      %c1_110 = arith.constant 1 : index
      %c0_111 = arith.constant 0 : index
      %c0_112 = arith.constant 0 : index
      %132 = vector.load %arg8[%c1_110, %c0_111, %c0_112] : memref<3x384x128xf32, #tpu.memory_space<vmem>>, vector<1x384x128xf32>
      %133 = vector.shape_cast %132 : vector<1x384x128xf32> to vector<384x128xf32>
      %134 = vector.shape_cast %133 : vector<384x128xf32> to vector<16x24x128xf32>
      %c2_113 = arith.constant 2 : index
      %c0_114 = arith.constant 0 : index
      %c0_115 = arith.constant 0 : index
      %135 = vector.load %arg8[%c2_113, %c0_114, %c0_115] : memref<3x384x128xf32, #tpu.memory_space<vmem>>, vector<1x384x128xf32>
      %136 = vector.shape_cast %135 : vector<1x384x128xf32> to vector<384x128xf32>
      %137 = vector.shape_cast %136 : vector<384x128xf32> to vector<16x24x128xf32>
      %138 = vector.extract_strided_slice %131 {offsets = [0, 23, 0], sizes = [16, 1, 128], strides = [1, 1, 1]} : vector<16x24x128xf32> to vector<16x1x128xf32>
      %139 = vector.extract_strided_slice %131 {offsets = [0, 0, 0], sizes = [16, 23, 128], strides = [1, 1, 1]} : vector<16x24x128xf32> to vector<16x23x128xf32>
      %140 = tpu.concatenate %138, %139 in 1 : vector<16x1x128xf32>, vector<16x23x128xf32> -> vector<16x24x128xf32>
      %141 = arith.addf %140, %134 : vector<16x24x128xf32>
      %142 = vector.extract_strided_slice %137 {offsets = [0, 1, 0], sizes = [16, 23, 128], strides = [1, 1, 1]} : vector<16x24x128xf32> to vector<16x23x128xf32>
      %143 = vector.extract_strided_slice %137 {offsets = [0, 0, 0], sizes = [16, 1, 128], strides = [1, 1, 1]} : vector<16x24x128xf32> to vector<16x1x128xf32>
      %144 = tpu.concatenate %142, %143 in 1 : vector<16x23x128xf32>, vector<16x1x128xf32> -> vector<16x24x128xf32>
      %145 = arith.addf %141, %144 : vector<16x24x128xf32>
      %146 = vector.extract_strided_slice %145 {offsets = [0, 0, 0], sizes = [16, 16, 128], strides = [1, 1, 1]} : vector<16x24x128xf32> to vector<16x16x128xf32>
      %c0_116 = arith.constant 0 : index
      %c0_117 = arith.constant 0 : index
      %147 = vector.load %arg5[%c0_116, %c0_117] : memref<1x128xf32, #tpu.memory_space<vmem>>, vector<1x128xf32>
      %148 = vector.shape_cast %147 : vector<1x128xf32> to vector<1x1x128xf32>
      %149 = vector.broadcast %148 : vector<1x1x128xf32> to vector<16x16x128xf32>
      %150 = arith.addf %146, %149 : vector<16x16x128xf32>
      %cst_118 = arith.constant 0.000000e+00 : f32
      %151 = vector.broadcast %cst_118 : f32 to vector<16x16x128xf32>
      %152 = arith.maximumf %150, %151 : vector<16x16x128xf32>
      %153 = vector.shape_cast %152 : vector<16x16x128xf32> to vector<1x16x16x128xf32>
      %c0_119 = arith.constant 0 : index
      %c0_120 = arith.constant 0 : index
      %c0_121 = arith.constant 0 : index
      %c0_122 = arith.constant 0 : index
      %154 = vector.load %arg6[%c0_119, %c0_120, %c0_121, %c0_122] : memref<1x16x16x128xf32, #tpu.memory_space<vmem>>, vector<1x16x16x128xf32>
      tpu.vector_store %arg6[%c0_119, %c0_120, %c0_121, %c0_122], %153 {strides = array<i32>} : memref<1x16x16x128xf32, #tpu.memory_space<vmem>>, vector<1x16x16x128xf32>,
    } else {
    }
    return
  }
  func.func @transform_1(%arg0: i32, %arg1: i32, %arg2: i32) -> (i32, i32, i32) {
    %c0_i32 = arith.constant 0 : i32
    %c0_i32_0 = arith.constant 0 : i32
    %c0_i32_1 = arith.constant 0 : i32
    return %c0_i32, %arg2, %c0_i32_0 : i32, i32, i32
  }
  func.func @transform_2(%arg0: i32, %arg1: i32, %arg2: i32) -> (i32, i32) {
    %c0_i32 = arith.constant 0 : i32
    %c0_i32_0 = arith.constant 0 : i32
    %c0_i32_1 = arith.constant 0 : i32
    return %c0_i32, %c0_i32_0 : i32, i32
  }
  func.func @transform_3(%arg0: i32, %arg1: i32, %arg2: i32) -> (i32, i32, i32, i32) {
    %c0_i32 = arith.constant 0 : i32
    %c0_i32_0 = arith.constant 0 : i32
    %c0_i32_1 = arith.constant 0 : i32
    return %arg0, %arg1, %c0_i32, %c0_i32_0 : i32, i32, i32, i32
  }
}

</mosaic_0001>

<bundles_post_ra>
// kernel: _lambda_.2
= control target key start
LH: loop header
LB: loop body
LE: loop exit
PB: predicated region body
PF: predicated region fallthrough
CT: control target
= control target key end

     0   :  { %s1314_s12 = smov 0   ;;  %s1316_s13 = smov 0   ;;  %s1662_s0 = inlined_call_operand.vmem [shape: f32[2,56,128], index: 0, kind: input, shape index: {}]   ;;  %s1663_s1 = inlined_call_operand.vmem [shape: f32[288,56], index: 1, kind: input, shape index: {}]   ;;  %s1664_s2 = inlined_call_operand.vmem [shape: f32[2,18,16,128], index: 2, kind: input, shape index: {}]   ;;  %s1665_s3 = inlined_call_operand.vmem [shape: f32[2,2,18,24,128], index: 3, kind: output, shape index: {}]  }
   0x1   :  { %s1318_s14 = smov 0   ;;  %s1320_s15 = smov 0  }
   0x2   :  { %s1322_s16 = smov 0  }
   0x3 LB: > { %s25_s17 = sadd.s32 1, %s1283_s14  ;;  %s32_s18 = sadd.s32 1, %s1287_s15  ;;  %s1291_s16 = sphi %s1322_s16, %s13_s16   ;;  %s1287_s15 = sphi %s1320_s15, %s1669_s15   ;;  %s1283_s14 = sphi %s1318_s14, %s1668_s14   ;;  %s1279_s13 = sphi %s1316_s13, %s1667_s13   ;;  %s1275_s12 = sphi %s1314_s12, %s1666_s12  }
   0x4   : > { %p26_p0 = scmp.ge.s32.totalorder %s25_s17, 2  ;;  %p1023_p1 = scmp.ge.s32.totalorder %s1291_s16, 1 }
   0x5   : > { %p219_p2 = scmp.lt.s32.totalorder %s1291_s16, 5 }
   0x6   : > { %s1671_s17 = smov (%p26_p0, %s25_s17), 0  ;;  %s1673_s18 = smov (!%p26_p0, %s32_s18), %s1287_s15 }
   0x7   : > { %p220_p3 = pnand %p1023_p1, %p219_p2  ;;  %p34_p4 = scmp.ge.s32.totalorder %s1673_s18, 2 }
   0x8   : > { %p278_p5 = scmp.lt.s32.totalorder (!%p220_p3), %s1275_s12, 0  ;;  %p280_p6 = scmp.lt.s32.totalorder (!%p220_p3), %s1279_s13, 1 }
   0x9   : > { %s1675_s18 = smov (%p34_p4, %s1673_s18), 0  ;;  %223 = sbr.rel (%p220_p3) target bundleno = 316 (0x13c), region = 32 }
   0xa   : > { %p319_p7 = scmp.lt.s32.totalorder (!%p220_p3), %s1275_s12, 1  ;;  %p1036_p8 = scmp.ge.s32.totalorder (!%p220_p3), %s1275_s12, 1 }
  0x10   : > { %s279_s19 = scalar_select %p278_p5, %s1275_s12, 0 }
  0x11   : > { %s1677_s13 = smov (!%p280_p6, %s1279_s13), 1  ;;  %v335_v8 = vld [vmem:[%s1663_s1] sm:$0xff] (!%p1036_p8)  ;;  %vm378_vm0 = vcmask (!%p1036_p8), 457728   ;;  %v353_v9 = vld [vmem:[%s1663_s1 + $0x90] sm:$0xff] (!%p1036_p8)  ;;  %v336_v12 = vld [vmem:[%s1663_s1 + $0x8] sm:$0xff] (!%p1036_p8) }
  0x12   : > { %s1679_s19 = smov (!%p278_p5, %s279_s19), 0  ;;  %s1207_s20 = smul.u32 7, %s1677_s13  ;;  %1133 = vmatprep.mubr.msk.f32.mxu0 (!%p1036_p8), %vm378_vm0, %v335_v8  ;;  %1160 = vmatprep.mubr.msk.f32.mxu1 (!%p1036_p8), %vm378_vm0, %v353_v9  ;;  %v354_v13 = vld [vmem:[%s1663_s1 + $0x98] sm:$0xff] (!%p1036_p8)  ;;  %v337_v14 = vld [vmem:[%s1663_s1 + $0x10] sm:$0xff] (!%p1036_p8)  ;;  %v355_v15 = vld [vmem:[%s1663_s1 + $0xa0] sm:$0xff] (!%p1036_p8) }
  0x13   : > { %s1211_s22 = smul.u32 288, %s1677_s13  ;;  %v338_v16 = vld [vmem:[%s1663_s1 + $0x18] sm:$0xff] (!%p1036_p8)  ;;  %v356_v17 = vld [vmem:[%s1663_s1 + $0xa8] sm:$0xff] (!%p1036_p8)  ;;  %v339_v18 = vld [vmem:[%s1663_s1 + $0x20] sm:$0xff] (!%p1036_p8) }
  0x14   : > { %s285_s21 = sadd.s32 %s1207_s20, %s1679_s19  ;;  %s1210_s24 = smul.u32 108, %s1677_s13  ;;  %v357_v19 = vld [vmem:[%s1663_s1 + $0xb0] sm:$0xff] (!%p1036_p8)  ;;  %v340_v20 = vld [vmem:[%s1663_s1 + $0x28] sm:$0xff] (!%p1036_p8)  ;;  %v358_v21 = vld [vmem:[%s1663_s1 + $0xb8] sm:$0xff] (!%p1036_p8) }
  0x15   : > { %s1027_s23 = sshll.u32 %s285_s21, 3  ;;  %s1357_s30 = scalar_lea.vmem %s1664_s2, %s1211_s22  ;;  %v341_v22 = vld [vmem:[%s1663_s1 + $0x30] sm:$0xff] (!%p1036_p8)  ;;  %v359_v23 = vld [vmem:[%s1663_s1 + $0xc0] sm:$0xff] (!%p1036_p8)  ;;  %v342_v24 = vld [vmem:[%s1663_s1 + $0x38] sm:$0xff] (!%p1036_p8) }
  0x16   : > { %s1352_s27 = scalar_lea.vmem %s1662_s0, %s1027_s23  ;;  %v360_v25 = vld [vmem:[%s1663_s1 + $0xc8] sm:$0xff] (!%p1036_p8)  ;;  %v343_v26 = vld [vmem:[%s1663_s1 + $0x40] sm:$0xff] (!%p1036_p8)  ;;  %v361_v27 = vld [vmem:[%s1663_s1 + $0xd0] sm:$0xff] (!%p1036_p8) }
  0x17   : > { %s320_s4 = scalar_select %p319_p7, %s1275_s12, 1 }
  0x18   : > { %334 = sbr.rel (%p1036_p8) target bundleno = 287 (0x11f), region = 36  ;;  %v371_v0 = vld [vmem:[%s1352_s27] sm:$0xff] (!%p1036_p8)  ;;  %v372_v1 = vld [vmem:[%s1352_s27 + $0x8] sm:$0xff] (!%p1036_p8)  ;;  %v373_v2 = vld [vmem:[%s1352_s27 + $0x10] sm:$0xff] (!%p1036_p8) }
  0x19   : > { %s1209_s5 = smul.u32 54, %s320_s4  ;;  %v1187_v3 = vpack.c.bf16 (!%p1036_p8), %v372_v1, %v371_v0  ;;  %v374_v4 = vld [vmem:[%s1352_s27 + $0x18] sm:$0xff] (!%p1036_p8)  ;;  %v375_v6 = vld [vmem:[%s1352_s27 + $0x20] sm:$0xff] (!%p1036_p8)  ;;  %v376_v7 = vld [vmem:[%s1352_s27 + $0x28] sm:$0xff] (!%p1036_p8) }
  0x1a   : > { %v1191_v5 = vpack.c.bf16 (!%p1036_p8), %v374_v4, %v373_v2  ;;  %v1195_v10 = vpack.c.bf16 (!%p1036_p8), %v376_v7, %v375_v6  ;;  %v377_v11 = vld [vmem:[%s1352_s27 + $0x30] sm:$0xff] (!%p1036_p8)  ;;  %v344_v28 = vld [vmem:[%s1663_s1 + $0x48] sm:$0xff] (!%p1036_p8)  ;;  %v362_v29 = vld [vmem:[%s1663_s1 + $0xd8] sm:$0xff] (!%p1036_p8) }
  0x1b   : > { %s327_s6 = sadd.s32 %s1210_s24, %s1209_s5  ;;  %1188 = vmatprep.subr.bf16.mxu0 (!%p1036_p8), %v1187_v3  ;;  %1199 = vmatprep.subr.bf16.mxu1 (!%p1036_p8), %v1187_v3  ;;  %v345_v30 = vld [vmem:[%s1663_s1 + $0x50] sm:$0xff] (!%p1036_p8)  ;;  %v363_v31 = vld [vmem:[%s1663_s1 + $0xe0] sm:$0xff] (!%p1036_p8)  ;;  %v346_v32 = vld [vmem:[%s1663_s1 + $0x58] sm:$0xff] (!%p1036_p8) }
  0x1c   : > { %s1035_s7 = sshll.u32 %s327_s6, 3  ;;  %1190 = vmatpush3.bf16.msra.mxu0 (!%p1036_p8), %v1187_v3  ;;  %1203 = vmatpush3.bf16.msra.mxu1 (!%p1036_p8), %v1187_v3  ;;  %v364_v33 = vld [vmem:[%s1663_s1 + $0xe8] sm:$0xff] (!%p1036_p8)  ;;  %v347_v34 = vld [vmem:[%s1663_s1 + $0x60] sm:$0xff] (!%p1036_p8)  ;;  %v365_v35 = vld [vmem:[%s1663_s1 + $0xf0] sm:$0xff] (!%p1036_p8) }
  0x1d   : > { %s1365_s10 = scalar_lea.vmem %s1665_s3, %s1035_s7  ;;  %1192 = vmatprep.subr.bf16.mxu0 (!%p1036_p8), %v1191_v5  ;;  %1200 = vmatprep.subr.bf16.mxu1 (!%p1036_p8), %v1191_v5  ;;  %v348_v36 = vld [vmem:[%s1663_s1 + $0x68] sm:$0xff] (!%p1036_p8)  ;;  %v366_v37 = vld [vmem:[%s1663_s1 + $0xf8] sm:$0xff] (!%p1036_p8)  ;;  %v349_v38 = vld [vmem:[%s1663_s1 + $0x70] sm:$0xff] (!%p1036_p8) }
  0x1e   : > { %v367_v39 = vld [vmem:[%s1663_s1 + $0x100] sm:$0xff] (!%p1036_p8)  ;;  %v350_v40 = vld [vmem:[%s1663_s1 + $0x78] sm:$0xff] (!%p1036_p8)  ;;  %v368_v41 = vld [vmem:[%s1663_s1 + $0x108] sm:$0xff] (!%p1036_p8) }
  0x1f   : > { %v351_v42 = vld [vmem:[%s1663_s1 + $0x80] sm:$0xff]  ;;  %v369_v43 = vld [vmem:[%s1663_s1 + $0x110] sm:$0xff]  ;;  %v352_v44 = vld [vmem:[%s1663_s1 + $0x88] sm:$0xff] }
  0x20   : > { %1194 = vmatpush3.bf16.msra.mxu0 %v1191_v5  ;;  %1204 = vmatpush3.bf16.msra.mxu1 %v1191_v5  ;;  %v370_v45 = vld [vmem:[%s1663_s1 + $0x118] sm:$0xff] }
  0x21   : > { %1196 = vmatprep.subr.bf16.mxu0 %v1195_v10  ;;  %1201 = vmatprep.subr.bf16.mxu1 %v1195_v10 }
  0x24   : > { %1198 = vmatpush3.bf16.msra.mxu0 %v1195_v10  ;;  %1205 = vmatpush3.bf16.msra.mxu1 %v1195_v10 }
  0x25   : > { %1131 = vmatprep.subr.mxu0 %v377_v11  ;;  %1202 = vmatprep.subr.mxu1 %v377_v11 }
  0x28   : > { %1132 = vmatpush3.msra.mxu0 %v377_v11  ;;  %1206 = vmatpush3.msra.mxu1 %v377_v11 }
  0x29   : > { %1134 = vmatmul.mubr.msk.f32.vlgmr.msra.gmra.mrb[0].mxu0 %vm378_vm0, %v336_v12  ;;  %1161 = vmatmul.mubr.msk.f32.vlgmr.msra.gmra.mrb[0].mxu1 %vm378_vm0, %v354_v13 }
  0x2a   : > { %1136 = vmatprep.mubr.msk.f32.mxu0 %vm378_vm0, %v337_v14  ;;  %1163 = vmatprep.mubr.msk.f32.mxu1 %vm378_vm0, %v355_v15 }
  0x2d   : > { %1137 = vmatmul.mubr.msk.f32.gmra.mrb[2].mxu0 %vm378_vm0, %v338_v16  ;;  %1164 = vmatmul.mubr.msk.f32.gmra.mrb[2].mxu1 %vm378_vm0, %v356_v17 }
  0x2e   : > { %1139 = vmatprep.mubr.msk.f32.mxu0 %vm378_vm0, %v339_v18  ;;  %1166 = vmatprep.mubr.msk.f32.mxu1 %vm378_vm0, %v357_v19 }
  0x31   : > { %1140 = vmatmul.mubr.msk.f32.gmra.mrb[4].mxu0 %vm378_vm0, %v340_v20  ;;  %1167 = vmatmul.mubr.msk.f32.gmra.mrb[4].mxu1 %vm378_vm0, %v358_v21 }
  0x32   : > { %1142 = vmatprep.mubr.msk.f32.mxu0 %vm378_vm0, %v341_v22  ;;  %1169 = vmatprep.mubr.msk.f32.mxu1 %vm378_vm0, %v359_v23 }
  0x35   : > { %1143 = vmatmul.mubr.msk.f32.gmra.mrb[6].mxu0 %vm378_vm0, %v342_v24  ;;  %1170 = vmatmul.mubr.msk.f32.gmra.mrb[6].mxu1 %vm378_vm0, %v360_v25 }
  0x36   : > { %1145 = vmatprep.mubr.msk.f32.mxu0 %vm378_vm0, %v343_v26  ;;  %1172 = vmatprep.mubr.msk.f32.mxu1 %vm378_vm0, %v361_v27 }
  0x39   : > { %1146 = vmatmul.mubr.msk.f32.gmra.mrb[8].mxu0 %vm378_vm0, %v344_v28  ;;  %1173 = vmatmul.mubr.msk.f32.gmra.mrb[8].mxu1 %vm378_vm0, %v362_v29 }
  0x3a   : > { %1148 = vmatprep.mubr.msk.f32.mxu0 %vm378_vm0, %v345_v30  ;;  %1175 = vmatprep.mubr.msk.f32.mxu1 %vm378_vm0, %v363_v31 }
  0x3d   : > { %1149 = vmatmul.mubr.msk.f32.gmra.mrb[10].mxu0 %vm378_vm0, %v346_v32  ;;  %1176 = vmatmul.mubr.msk.f32.gmra.mrb[10].mxu1 %vm378_vm0, %v364_v33 }
  0x3e   : > { %1151 = vmatprep.mubr.msk.f32.mxu0 %vm378_vm0, %v347_v34  ;;  %1178 = vmatprep.mubr.msk.f32.mxu1 %vm378_vm0, %v365_v35 }
  0x41   : > { %1152 = vmatmul.mubr.msk.f32.gmra.mrb[12].mxu0 %vm378_vm0, %v348_v36  ;;  %1179 = vmatmul.mubr.msk.f32.gmra.mrb[12].mxu1 %vm378_vm0, %v366_v37 }
  0x42   : > { %1154 = vmatprep.mubr.msk.f32.mxu0 %vm378_vm0, %v349_v38  ;;  %1181 = vmatprep.mubr.msk.f32.mxu1 %vm378_vm0, %v367_v39 }
  0x45   : > { %1155 = vmatmul.mubr.msk.f32.gmra.mrb[14].mxu0 %vm378_vm0, %v350_v40  ;;  %1182 = vmatmul.mubr.msk.f32.gmra.mrb[14].mxu1 %vm378_vm0, %v368_v41 }
  0x46   : > { %1157 = vmatprep.mubr.msk.f32.mxu0 %vm378_vm0, %v351_v42  ;;  %1184 = vmatprep.mubr.msk.f32.mxu1 %vm378_vm0, %v369_v43 }
  0x49   : > { %1158 = vmatmul.mubr.msk.f32.gmra.mrb[16].mxu0 %vm378_vm0, %v352_v44  ;;  %1185 = vmatmul.mubr.msk.f32.gmra.mrb[16].mxu1 %vm378_vm0, %v370_v45 }
  0xfc   : > { %v1135_v46 = vpop.f32.mrb[0].mxu0  ;;  %v1162_v47 = vpop.f32.mrb[0].mxu1 }
  0xfd   : > { %733 = vst [vmem:[%s1365_s10 + $0x8] sm:$0xff] %v1135_v46  ;;  %751 = vst [vmem:[%s1365_s10 + $0xe0] sm:$0xff] %v1162_v47  ;;  %v553_v48 = vpop.f32.mrb[1].mxu0  ;;  %v643_v49 = vpop.f32.mrb[1].mxu1 }
  0xfe   : > { %732 = vst [vmem:[%s1365_s10] sm:$0xff] %v553_v48  ;;  %750 = vst [vmem:[%s1365_s10 + $0xd8] sm:$0xff] %v643_v49 }
 0x100   : > { %v1138_v50 = vpop.f32.mrb[2].mxu0  ;;  %v1165_v51 = vpop.f32.mrb[2].mxu1 }
 0x101   : > { %735 = vst [vmem:[%s1365_s10 + $0x20] sm:$0xff] %v1138_v50  ;;  %753 = vst [vmem:[%s1365_s10 + $0xf8] sm:$0xff] %v1165_v51  ;;  %v563_v52 = vpop.f32.mrb[3].mxu0  ;;  %v653_v53 = vpop.f32.mrb[3].mxu1 }
 0x102   : > { %734 = vst [vmem:[%s1365_s10 + $0x18] sm:$0xff] %v563_v52  ;;  %752 = vst [vmem:[%s1365_s10 + $0xf0] sm:$0xff] %v653_v53 }
 0x104   : > { %v1141_v54 = vpop.f32.mrb[4].mxu0  ;;  %v1168_v55 = vpop.f32.mrb[4].mxu1 }
 0x105   : > { %737 = vst [vmem:[%s1365_s10 + $0x38] sm:$0xff] %v1141_v54  ;;  %755 = vst [vmem:[%s1365_s10 + $0x110] sm:$0xff] %v1168_v55  ;;  %v573_v56 = vpop.f32.mrb[5].mxu0  ;;  %v663_v57 = vpop.f32.mrb[5].mxu1 }
 0x106   : > { %736 = vst [vmem:[%s1365_s10 + $0x30] sm:$0xff] %v573_v56  ;;  %754 = vst [vmem:[%s1365_s10 + $0x108] sm:$0xff] %v663_v57 }
 0x108   : > { %v1144_v58 = vpop.f32.mrb[6].mxu0  ;;  %v1171_v59 = vpop.f32.mrb[6].mxu1 }
 0x109   : > { %739 = vst [vmem:[%s1365_s10 + $0x50] sm:$0xff] %v1144_v58  ;;  %757 = vst [vmem:[%s1365_s10 + $0x128] sm:$0xff] %v1171_v59  ;;  %v583_v60 = vpop.f32.mrb[7].mxu0  ;;  %v673_v61 = vpop.f32.mrb[7].mxu1 }
 0x10a   : > { %738 = vst [vmem:[%s1365_s10 + $0x48] sm:$0xff] %v583_v60  ;;  %756 = vst [vmem:[%s1365_s10 + $0x120] sm:$0xff] %v673_v61 }
 0x10c   : > { %v1147_v62 = vpop.f32.mrb[8].mxu0  ;;  %v1174_v63 = vpop.f32.mrb[8].mxu1 }
 0x10d   : > { %741 = vst [vmem:[%s1365_s10 + $0x68] sm:$0xff] %v1147_v62  ;;  %759 = vst [vmem:[%s1365_s10 + $0x140] sm:$0xff] %v1174_v63  ;;  %v593_v0 = vpop.f32.mrb[9].mxu0  ;;  %v683_v1 = vpop.f32.mrb[9].mxu1 }
 0x10e   : > { %740 = vst [vmem:[%s1365_s10 + $0x60] sm:$0xff] %v593_v0  ;;  %758 = vst [vmem:[%s1365_s10 + $0x138] sm:$0xff] %v683_v1 }
 0x110   : > { %v1150_v2 = vpop.f32.mrb[10].mxu0  ;;  %v1177_v3 = vpop.f32.mrb[10].mxu1 }
 0x111   : > { %743 = vst [vmem:[%s1365_s10 + $0x80] sm:$0xff] %v1150_v2  ;;  %761 = vst [vmem:[%s1365_s10 + $0x158] sm:$0xff] %v1177_v3  ;;  %v603_v4 = vpop.f32.mrb[11].mxu0  ;;  %v693_v5 = vpop.f32.mrb[11].mxu1 }
 0x112   : > { %742 = vst [vmem:[%s1365_s10 + $0x78] sm:$0xff] %v603_v4  ;;  %760 = vst [vmem:[%s1365_s10 + $0x150] sm:$0xff] %v693_v5 }
 0x114   : > { %v1153_v6 = vpop.f32.mrb[12].mxu0  ;;  %v1180_v7 = vpop.f32.mrb[12].mxu1 }
 0x115   : > { %745 = vst [vmem:[%s1365_s10 + $0x98] sm:$0xff] %v1153_v6  ;;  %763 = vst [vmem:[%s1365_s10 + $0x170] sm:$0xff] %v1180_v7  ;;  %v613_v8 = vpop.f32.mrb[13].mxu0  ;;  %v703_v9 = vpop.f32.mrb[13].mxu1 }
 0x116   : > { %744 = vst [vmem:[%s1365_s10 + $0x90] sm:$0xff] %v613_v8  ;;  %762 = vst [vmem:[%s1365_s10 + $0x168] sm:$0xff] %v703_v9 }
 0x118   : > { %v1156_v10 = vpop.f32.mrb[14].mxu0  ;;  %v1183_v11 = vpop.f32.mrb[14].mxu1 }
 0x119   : > { %747 = vst [vmem:[%s1365_s10 + $0xb0] sm:$0xff] %v1156_v10  ;;  %765 = vst [vmem:[%s1365_s10 + $0x188] sm:$0xff] %v1183_v11  ;;  %v623_v12 = vpop.f32.mrb[15].mxu0  ;;  %v713_v13 = vpop.f32.mrb[15].mxu1 }
 0x11a   : > { %746 = vst [vmem:[%s1365_s10 + $0xa8] sm:$0xff] %v623_v12  ;;  %764 = vst [vmem:[%s1365_s10 + $0x180] sm:$0xff] %v713_v13 }
 0x11c   : > { %v1159_v14 = vpop.f32.mrb[16].mxu0  ;;  %v1186_v15 = vpop.f32.mrb[16].mxu1 }
 0x11d   : > { %749 = vst [vmem:[%s1365_s10 + $0xc8] sm:$0xff] %v1159_v14  ;;  %767 = vst [vmem:[%s1365_s10 + $0x1a0] sm:$0xff] %v1186_v15  ;;  %v633_v16 = vpop.f32.mrb[17].mxu0  ;;  %v723_v17 = vpop.f32.mrb[17].mxu1 }
 0x11e   : > { %748 = vst [vmem:[%s1365_s10 + $0xc0] sm:$0xff] %v633_v16  ;;  %766 = vst [vmem:[%s1365_s10 + $0x198] sm:$0xff] %v723_v17 }
 0x11f PF: > { %771 = sbr.rel (%p319_p7) target bundleno = 306 (0x132), region = 40  ;;  %v772_v18 = vld [vmem:[%s1357_s30] sm:$0xff] (!%p319_p7)  ;;  %v773_v19 = vld [vmem:[%s1357_s30 + $0x8] sm:$0xff] (!%p319_p7)  ;;  %v774_v20 = vld [vmem:[%s1357_s30 + $0x10] sm:$0xff] (!%p319_p7) }
 0x120   : > { %808 = vst [vmem:[%s1365_s10] sm:$0xff] (!%p319_p7), %v772_v18  ;;  %809 = vst [vmem:[%s1365_s10 + $0x8] sm:$0xff] (!%p319_p7), %v773_v19  ;;  %v775_v21 = vld [vmem:[%s1357_s30 + $0x18] sm:$0xff] (!%p319_p7)  ;;  %v776_v22 = vld [vmem:[%s1357_s30 + $0x20] sm:$0xff] (!%p319_p7) }
 0x121   : > { %810 = vst [vmem:[%s1365_s10 + $0x18] sm:$0xff] (!%p319_p7), %v774_v20  ;;  %v777_v23 = vld [vmem:[%s1357_s30 + $0x28] sm:$0xff] (!%p319_p7)  ;;  %811 = vst [vmem:[%s1365_s10 + $0x20] sm:$0xff] (!%p319_p7), %v775_v21  ;;  %v778_v24 = vld [vmem:[%s1357_s30 + $0x30] sm:$0xff] (!%p319_p7) }
 0x122   : > { %812 = vst [vmem:[%s1365_s10 + $0x30] sm:$0xff] (!%p319_p7), %v776_v22  ;;  %813 = vst [vmem:[%s1365_s10 + $0x38] sm:$0xff] (!%p319_p7), %v777_v23  ;;  %v779_v25 = vld [vmem:[%s1357_s30 + $0x38] sm:$0xff] (!%p319_p7)  ;;  %v780_v26 = vld [vmem:[%s1357_s30 + $0x40] sm:$0xff] (!%p319_p7) }
 0x123   : > { %814 = vst [vmem:[%s1365_s10 + $0x48] sm:$0xff] (!%p319_p7), %v778_v24  ;;  %815 = vst [vmem:[%s1365_s10 + $0x50] sm:$0xff] (!%p319_p7), %v779_v25  ;;  %v781_v27 = vld [vmem:[%s1357_s30 + $0x48] sm:$0xff] (!%p319_p7)  ;;  %v782_v28 = vld [vmem:[%s1357_s30 + $0x50] sm:$0xff] (!%p319_p7) }
 0x124   : > { %816 = vst [vmem:[%s1365_s10 + $0x60] sm:$0xff] (!%p319_p7), %v780_v26  ;;  %v783_v29 = vld [vmem:[%s1357_s30 + $0x58] sm:$0xff] (!%p319_p7)  ;;  %817 = vst [vmem:[%s1365_s10 + $0x68] sm:$0xff] (!%p319_p7), %v781_v27  ;;  %v784_v30 = vld [vmem:[%s1357_s30 + $0x60] sm:$0xff] (!%p319_p7) }
 0x125   : > { %818 = vst [vmem:[%s1365_s10 + $0x78] sm:$0xff] (!%p319_p7), %v782_v28  ;;  %819 = vst [vmem:[%s1365_s10 + $0x80] sm:$0xff] (!%p319_p7), %v783_v29  ;;  %v785_v31 = vld [vmem:[%s1357_s30 + $0x68] sm:$0xff] (!%p319_p7)  ;;  %v786_v32 = vld [vmem:[%s1357_s30 + $0x70] sm:$0xff] (!%p319_p7) }
 0x126   : > { %820 = vst [vmem:[%s1365_s10 + $0x90] sm:$0xff] %v784_v30  ;;  %821 = vst [vmem:[%s1365_s10 + $0x98] sm:$0xff] %v785_v31  ;;  %v787_v33 = vld [vmem:[%s1357_s30 + $0x78] sm:$0xff]  ;;  %v788_v34 = vld [vmem:[%s1357_s30 + $0x80] sm:$0xff] }
 0x127   : > { %822 = vst [vmem:[%s1365_s10 + $0xa8] sm:$0xff] %v786_v32  ;;  %v789_v35 = vld [vmem:[%s1357_s30 + $0x88] sm:$0xff]  ;;  %823 = vst [vmem:[%s1365_s10 + $0xb0] sm:$0xff] %v787_v33  ;;  %v790_v36 = vld [vmem:[%s1357_s30 + $0x90] sm:$0xff] }
 0x128   : > { %824 = vst [vmem:[%s1365_s10 + $0xc0] sm:$0xff] %v788_v34  ;;  %825 = vst [vmem:[%s1365_s10 + $0xc8] sm:$0xff] %v789_v35  ;;  %v791_v37 = vld [vmem:[%s1357_s30 + $0x98] sm:$0xff]  ;;  %v792_v38 = vld [vmem:[%s1357_s30 + $0xa0] sm:$0xff] }
 0x129   : > { %826 = vst [vmem:[%s1365_s10 + $0xd8] sm:$0xff] %v790_v36  ;;  %827 = vst [vmem:[%s1365_s10 + $0xe0] sm:$0xff] %v791_v37  ;;  %v793_v39 = vld [vmem:[%s1357_s30 + $0xa8] sm:$0xff]  ;;  %v794_v40 = vld [vmem:[%s1357_s30 + $0xb0] sm:$0xff] }
 0x12a   : > { %828 = vst [vmem:[%s1365_s10 + $0xf0] sm:$0xff] %v792_v38  ;;  %v795_v41 = vld [vmem:[%s1357_s30 + $0xb8] sm:$0xff]  ;;  %829 = vst [vmem:[%s1365_s10 + $0xf8] sm:$0xff] %v793_v39  ;;  %v796_v42 = vld [vmem:[%s1357_s30 + $0xc0] sm:$0xff] }
 0x12b   : > { %830 = vst [vmem:[%s1365_s10 + $0x108] sm:$0xff] %v794_v40  ;;  %831 = vst [vmem:[%s1365_s10 + $0x110] sm:$0xff] %v795_v41  ;;  %v797_v43 = vld [vmem:[%s1357_s30 + $0xc8] sm:$0xff]  ;;  %v798_v44 = vld [vmem:[%s1357_s30 + $0xd0] sm:$0xff] }
 0x12c   : > { %832 = vst [vmem:[%s1365_s10 + $0x120] sm:$0xff] %v796_v42  ;;  %833 = vst [vmem:[%s1365_s10 + $0x128] sm:$0xff] %v797_v43  ;;  %v799_v45 = vld [vmem:[%s1357_s30 + $0xd8] sm:$0xff]  ;;  %v800_v46 = vld [vmem:[%s1357_s30 + $0xe0] sm:$0xff] }
 0x12d   : > { %834 = vst [vmem:[%s1365_s10 + $0x138] sm:$0xff] %v798_v44  ;;  %v801_v47 = vld [vmem:[%s1357_s30 + $0xe8] sm:$0xff]  ;;  %835 = vst [vmem:[%s1365_s10 + $0x140] sm:$0xff] %v799_v45  ;;  %v802_v48 = vld [vmem:[%s1357_s30 + $0xf0] sm:$0xff] }
 0x12e   : > { %836 = vst [vmem:[%s1365_s10 + $0x150] sm:$0xff] %v800_v46  ;;  %837 = vst [vmem:[%s1365_s10 + $0x158] sm:$0xff] %v801_v47  ;;  %v803_v49 = vld [vmem:[%s1357_s30 + $0xf8] sm:$0xff]  ;;  %v804_v50 = vld [vmem:[%s1357_s30 + $0x100] sm:$0xff] }
 0x12f   : > { %838 = vst [vmem:[%s1365_s10 + $0x168] sm:$0xff] %v802_v48  ;;  %839 = vst [vmem:[%s1365_s10 + $0x170] sm:$0xff] %v803_v49  ;;  %v805_v51 = vld [vmem:[%s1357_s30 + $0x108] sm:$0xff]  ;;  %v806_v52 = vld [vmem:[%s1357_s30 + $0x110] sm:$0xff] }
 0x130   : > { %840 = vst [vmem:[%s1365_s10 + $0x180] sm:$0xff] %v804_v50  ;;  %v807_v53 = vld [vmem:[%s1357_s30 + $0x118] sm:$0xff]  ;;  %841 = vst [vmem:[%s1365_s10 + $0x188] sm:$0xff] %v805_v51 }
 0x131   : > { %842 = vst [vmem:[%s1365_s10 + $0x198] sm:$0xff] %v806_v52  ;;  %843 = vst [vmem:[%s1365_s10 + $0x1a0] sm:$0xff] %v807_v53 }
 0x132 PF: > { %v1293_v54 = vmov 0.0  }
 0x133   : > { %844 = vst [vmem:[%s1365_s10 + $0x10] sm:$0xff] %v1293_v54  ;;  %845 = vst [vmem:[%s1365_s10 + $0x28] sm:$0xff] %v1293_v54 }
 0x134   : > { %846 = vst [vmem:[%s1365_s10 + $0x40] sm:$0xff] %v1293_v54  ;;  %847 = vst [vmem:[%s1365_s10 + $0x58] sm:$0xff] %v1293_v54 }
 0x135   : > { %848 = vst [vmem:[%s1365_s10 + $0x70] sm:$0xff] %v1293_v54  ;;  %849 = vst [vmem:[%s1365_s10 + $0x88] sm:$0xff] %v1293_v54 }
 0x136   : > { %850 = vst [vmem:[%s1365_s10 + $0xa0] sm:$0xff] %v1293_v54  ;;  %851 = vst [vmem:[%s1365_s10 + $0xb8] sm:$0xff] %v1293_v54 }
 0x137   : > { %852 = vst [vmem:[%s1365_s10 + $0xd0] sm:$0xff] %v1293_v54  ;;  %853 = vst [vmem:[%s1365_s10 + $0xe8] sm:$0xff] %v1293_v54 }
 0x138   : > { %854 = vst [vmem:[%s1365_s10 + $0x100] sm:$0xff] %v1293_v54  ;;  %855 = vst [vmem:[%s1365_s10 + $0x118] sm:$0xff] %v1293_v54 }
 0x139   : > { %856 = vst [vmem:[%s1365_s10 + $0x130] sm:$0xff] %v1293_v54  ;;  %857 = vst [vmem:[%s1365_s10 + $0x148] sm:$0xff] %v1293_v54 }
 0x13a   : > { %858 = vst [vmem:[%s1365_s10 + $0x160] sm:$0xff] %v1293_v54  ;;  %859 = vst [vmem:[%s1365_s10 + $0x178] sm:$0xff] %v1293_v54 }
 0x13b   : > { %860 = vst [vmem:[%s1365_s10 + $0x190] sm:$0xff] %v1293_v54  ;;  %861 = vst [vmem:[%s1365_s10 + $0x1a8] sm:$0xff] %v1293_v54 }
 0x13c PF: > { %s13_s16 = sadd.s32 1, %s1291_s16   ;;  %s1666_s12 = smov %s1283_s14 }
 0x13d   : > { %p10_p9 = scmp.ge.s32.totalorder %s13_s16, 6   ;;  %s1667_s13 = smov %s1287_s15 }
 0x13e   : > { %s1668_s14 = smov %s1671_s17  ;;  %s1669_s15 = smov %s1675_s18 }
 0x13f   :  { %12 = sbr.rel (!%p10_p9) target bundleno = 3 (0x3), region = 76 }

// kernel: _lambda_.3
= control target key start
LH: loop header
LB: loop body
LE: loop exit
PB: predicated region body
PF: predicated region fallthrough
CT: control target
= control target key end

     0   :  { %s9394_s12 = smov 0   ;;  %s9396_s13 = smov 0   ;;  %s11286_s0 = inlined_call_operand.vmem [shape: f32[2,2,18,24,128], index: 0, kind: input, shape index: {}]   ;;  %s11287_s1 = inlined_call_operand.vmem [shape: f32[9,256,128], index: 1, kind: input, shape index: {}]   ;;  %s11288_s2 = inlined_call_operand.vmem [shape: f32[1,128], index: 2, kind: input, shape index: {}]   ;;  %s11289_s3 = inlined_call_operand.vmem [shape: f32[2,16,16,128], index: 3, kind: output, shape index: {}]  }
   0x1   :  { %s9398_s14 = smov 0   ;;  %s9400_s15 = smov 0  }
   0x2   :  { %s9402_s16 = smov 0   ;;  %s9404_s17 = smov 0  }
   0x3   :  { %s9406_s18 = smov 0  }
   0x4 LB: > { %s25_s19 = sadd.s32 1, %s9363_s16  ;;  %s32_s20 = sadd.s32 1, %s9367_s17  ;;  %s9371_s18 = sphi %s9406_s18, %s13_s18   ;;  %s9367_s17 = sphi %s9404_s17, %s11299_s17   ;;  %s9363_s16 = sphi %s9402_s16, %s11298_s16   ;;  %s9359_s15 = sphi %s9400_s15, %s11297_s15   ;;  %s9355_s14 = sphi %s9398_s14, %s11296_s14   ;;  %s9351_s13 = sphi %s9396_s13, %s11295_s13   ;;  %s9347_s12 = sphi %s9394_s12, %s11294_s12  }
   0x5   : > { %p26_p0 = scmp.ge.s32.totalorder %s25_s19, 2  ;;  %s39_s21 = sadd.s32 1, %s9351_s13 }
   0x6   : > { %p46_p1 = scmp.ne.s32.totalorder %s9351_s13, %s9347_s12  ;;  %p47_p2 = scmp.eq.s32.totalorder %s9371_s18, 0 }
   0x7   : > { %s11301_s19 = smov (%p26_p0, %s25_s19), 0  ;;  %s11303_s20 = smov (!%p26_p0, %s32_s20), %s9367_s17 }
   0x8   : > { %s36_s22 = ssub.s32 %s9363_s16, %s11301_s19  ;;  %p48_p3 = por %p47_p2, %p46_p1 }
   0x9   : > { %p34_p4 = scmp.ge.s32.totalorder %s11303_s20, 2  ;;  %p37_p5 = scmp.eq.s32.totalorder %s36_s22, 0 }
   0xa   : > { %p6424_p6 = scmp.ge.s32.totalorder %s9371_s18, 4 }
   0xb   : > { %s11305_s20 = smov (%p34_p4, %s11303_s20), 0 }
   0xc   : > { %s9443_s23 = scalar_select %p37_p5, %s9351_s13, %s39_s21  }
   0xd   : > { %124 = sbr.rel (%p6424_p6) target bundleno = 97 (0x61), region = 20 }
  0x14   : > { %127 = sbr.rel (!%p48_p3) target bundleno = 97 (0x61), region = 24  ;;  %s129_s24 = sand.u32 (%p48_p3), 1, %s9351_s13  }
  0x15   : > { %s6668_s25 = sshll.u32 (%p48_p3), %s9363_s16, 7  ;;  %s9208_s26 = smul.u32 (%p48_p3), 1152, %s129_s24 }
  0x16   : > { %s9451_s29 = scalar_lea.vmem (%p48_p3), %s11287_s1, %s6668_s25 }
  0x17   : > { %v448_v0 = vld [vmem:[%s9451_s29] sm:$0xff] (%p48_p3)  ;;  %v450_v1 = vld [vmem:[%s9451_s29 + $0x8] sm:$0xff] (%p48_p3)  ;;  %v452_v2 = vld [vmem:[%s9451_s29 + $0x10] sm:$0xff] (%p48_p3)  ;;  %s9459_s30 = scalar_lea.vmem (%p48_p3), [#allocation5], %s9208_s26 }
  0x18   : > { %v454_v3 = vld [vmem:[%s9451_s29 + $0x18] sm:$0xff] (%p48_p3)  ;;  %v456_v4 = vld [vmem:[%s9451_s29 + $0x20] sm:$0xff] (%p48_p3)  ;;  %v458_v5 = vld [vmem:[%s9451_s29 + $0x28] sm:$0xff] (%p48_p3)  ;;  %449 = vst [vmem:[%s9459_s30] sm:$0xff] (%p48_p3), %v448_v0 }
  0x19   : > { %451 = vst [vmem:[%s9459_s30 + $0x8] sm:$0xff] (%p48_p3), %v450_v1  ;;  %453 = vst [vmem:[%s9459_s30 + $0x10] sm:$0xff] (%p48_p3), %v452_v2  ;;  %v460_v6 = vld [vmem:[%s9451_s29 + $0x30] sm:$0xff] (%p48_p3)  ;;  %v462_v7 = vld [vmem:[%s9451_s29 + $0x38] sm:$0xff] (%p48_p3) }
  0x1a   : > { %455 = vst [vmem:[%s9459_s30 + $0x18] sm:$0xff] (%p48_p3), %v454_v3  ;;  %457 = vst [vmem:[%s9459_s30 + $0x20] sm:$0xff] (%p48_p3), %v456_v4  ;;  %v464_v8 = vld [vmem:[%s9451_s29 + $0x40] sm:$0xff] (%p48_p3)  ;;  %v466_v9 = vld [vmem:[%s9451_s29 + $0x48] sm:$0xff] (%p48_p3) }
  0x1b   : > { %459 = vst [vmem:[%s9459_s30 + $0x28] sm:$0xff] %v458_v5  ;;  %461 = vst [vmem:[%s9459_s30 + $0x30] sm:$0xff] %v460_v6  ;;  %v468_v10 = vld [vmem:[%s9451_s29 + $0x50] sm:$0xff]  ;;  %v470_v11 = vld [vmem:[%s9451_s29 + $0x58] sm:$0xff] }
  0x1c   : > { %463 = vst [vmem:[%s9459_s30 + $0x38] sm:$0xff] %v462_v7  ;;  %465 = vst [vmem:[%s9459_s30 + $0x40] sm:$0xff] %v464_v8  ;;  %v472_v12 = vld [vmem:[%s9451_s29 + $0x60] sm:$0xff]  ;;  %v474_v13 = vld [vmem:[%s9451_s29 + $0x68] sm:$0xff] }
  0x1d   : > { %467 = vst [vmem:[%s9459_s30 + $0x48] sm:$0xff] %v466_v9  ;;  %469 = vst [vmem:[%s9459_s30 + $0x50] sm:$0xff] %v468_v10  ;;  %v476_v14 = vld [vmem:[%s9451_s29 + $0x70] sm:$0xff]  ;;  %v478_v15 = vld [vmem:[%s9451_s29 + $0x78] sm:$0xff] }
  0x1e   : > { %471 = vst [vmem:[%s9459_s30 + $0x58] sm:$0xff] %v470_v11  ;;  %473 = vst [vmem:[%s9459_s30 + $0x60] sm:$0xff] %v472_v12  ;;  %v480_v16 = vld [vmem:[%s9451_s29 + $0x100] sm:$0xff]  ;;  %v482_v17 = vld [vmem:[%s9451_s29 + $0x108] sm:$0xff] }
  0x1f   : > { %475 = vst [vmem:[%s9459_s30 + $0x68] sm:$0xff] %v474_v13  ;;  %477 = vst [vmem:[%s9459_s30 + $0x70] sm:$0xff] %v476_v14  ;;  %v484_v18 = vld [vmem:[%s9451_s29 + $0x110] sm:$0xff]  ;;  %v486_v19 = vld [vmem:[%s9451_s29 + $0x118] sm:$0xff] }
  0x20   : > { %479 = vst [vmem:[%s9459_s30 + $0x78] sm:$0xff] %v478_v15  ;;  %481 = vst [vmem:[%s9459_s30 + $0x80] sm:$0xff] %v480_v16  ;;  %v488_v20 = vld [vmem:[%s9451_s29 + $0x120] sm:$0xff]  ;;  %v490_v21 = vld [vmem:[%s9451_s29 + $0x128] sm:$0xff] }
  0x21   : > { %483 = vst [vmem:[%s9459_s30 + $0x88] sm:$0xff] %v482_v17  ;;  %485 = vst [vmem:[%s9459_s30 + $0x90] sm:$0xff] %v484_v18  ;;  %v492_v22 = vld [vmem:[%s9451_s29 + $0x130] sm:$0xff]  ;;  %v494_v23 = vld [vmem:[%s9451_s29 + $0x138] sm:$0xff] }
  0x22   : > { %487 = vst [vmem:[%s9459_s30 + $0x98] sm:$0xff] %v486_v19  ;;  %489 = vst [vmem:[%s9459_s30 + $0xa0] sm:$0xff] %v488_v20  ;;  %v496_v24 = vld [vmem:[%s9451_s29 + $0x140] sm:$0xff]  ;;  %v498_v25 = vld [vmem:[%s9451_s29 + $0x148] sm:$0xff] }
  0x23   : > { %491 = vst [vmem:[%s9459_s30 + $0xa8] sm:$0xff] %v490_v21  ;;  %493 = vst [vmem:[%s9459_s30 + $0xb0] sm:$0xff] %v492_v22  ;;  %v500_v26 = vld [vmem:[%s9451_s29 + $0x150] sm:$0xff]  ;;  %v502_v27 = vld [vmem:[%s9451_s29 + $0x158] sm:$0xff] }
  0x24   : > { %495 = vst [vmem:[%s9459_s30 + $0xb8] sm:$0xff] %v494_v23  ;;  %497 = vst [vmem:[%s9459_s30 + $0xc0] sm:$0xff] %v496_v24  ;;  %v504_v28 = vld [vmem:[%s9451_s29 + $0x160] sm:$0xff]  ;;  %v506_v29 = vld [vmem:[%s9451_s29 + $0x168] sm:$0xff] }
  0x25   : > { %499 = vst [vmem:[%s9459_s30 + $0xc8] sm:$0xff] %v498_v25  ;;  %501 = vst [vmem:[%s9459_s30 + $0xd0] sm:$0xff] %v500_v26  ;;  %v508_v30 = vld [vmem:[%s9451_s29 + $0x170] sm:$0xff]  ;;  %v510_v31 = vld [vmem:[%s9451_s29 + $0x178] sm:$0xff] }
  0x26   : > { %503 = vst [vmem:[%s9459_s30 + $0xd8] sm:$0xff] %v502_v27  ;;  %505 = vst [vmem:[%s9459_s30 + $0xe0] sm:$0xff] %v504_v28  ;;  %v512_v32 = vld [vmem:[%s9451_s29 + $0x200] sm:$0xff]  ;;  %v514_v33 = vld [vmem:[%s9451_s29 + $0x208] sm:$0xff] }
  0x27   : > { %507 = vst [vmem:[%s9459_s30 + $0xe8] sm:$0xff] %v506_v29  ;;  %509 = vst [vmem:[%s9459_s30 + $0xf0] sm:$0xff] %v508_v30  ;;  %v516_v34 = vld [vmem:[%s9451_s29 + $0x210] sm:$0xff]  ;;  %v518_v35 = vld [vmem:[%s9451_s29 + $0x218] sm:$0xff] }
  0x28   : > { %511 = vst [vmem:[%s9459_s30 + $0xf8] sm:$0xff] %v510_v31  ;;  %513 = vst [vmem:[%s9459_s30 + $0x100] sm:$0xff] %v512_v32  ;;  %v520_v36 = vld [vmem:[%s9451_s29 + $0x220] sm:$0xff]  ;;  %v522_v37 = vld [vmem:[%s9451_s29 + $0x228] sm:$0xff] }
  0x29   : > { %515 = vst [vmem:[%s9459_s30 + $0x108] sm:$0xff] %v514_v33  ;;  %517 = vst [vmem:[%s9459_s30 + $0x110] sm:$0xff] %v516_v34  ;;  %v524_v38 = vld [vmem:[%s9451_s29 + $0x230] sm:$0xff]  ;;  %v526_v39 = vld [vmem:[%s9451_s29 + $0x238] sm:$0xff] }
  0x2a   : > { %519 = vst [vmem:[%s9459_s30 + $0x118] sm:$0xff] %v518_v35  ;;  %521 = vst [vmem:[%s9459_s30 + $0x120] sm:$0xff] %v520_v36  ;;  %v528_v40 = vld [vmem:[%s9451_s29 + $0x240] sm:$0xff]  ;;  %v530_v41 = vld [vmem:[%s9451_s29 + $0x248] sm:$0xff] }
  0x2b   : > { %523 = vst [vmem:[%s9459_s30 + $0x128] sm:$0xff] %v522_v37  ;;  %525 = vst [vmem:[%s9459_s30 + $0x130] sm:$0xff] %v524_v38  ;;  %v532_v42 = vld [vmem:[%s9451_s29 + $0x250] sm:$0xff]  ;;  %v534_v43 = vld [vmem:[%s9451_s29 + $0x258] sm:$0xff] }
  0x2c   : > { %527 = vst [vmem:[%s9459_s30 + $0x138] sm:$0xff] %v526_v39  ;;  %529 = vst [vmem:[%s9459_s30 + $0x140] sm:$0xff] %v528_v40  ;;  %v536_v44 = vld [vmem:[%s9451_s29 + $0x260] sm:$0xff]  ;;  %v538_v45 = vld [vmem:[%s9451_s29 + $0x268] sm:$0xff] }
  0x2d   : > { %531 = vst [vmem:[%s9459_s30 + $0x148] sm:$0xff] %v530_v41  ;;  %533 = vst [vmem:[%s9459_s30 + $0x150] sm:$0xff] %v532_v42  ;;  %v540_v46 = vld [vmem:[%s9451_s29 + $0x270] sm:$0xff]  ;;  %v542_v47 = vld [vmem:[%s9451_s29 + $0x278] sm:$0xff] }
  0x2e   : > { %535 = vst [vmem:[%s9459_s30 + $0x158] sm:$0xff] %v534_v43  ;;  %537 = vst [vmem:[%s9459_s30 + $0x160] sm:$0xff] %v536_v44  ;;  %v544_v48 = vld [vmem:[%s9451_s29 + $0x300] sm:$0xff]  ;;  %v546_v49 = vld [vmem:[%s9451_s29 + $0x308] sm:$0xff] }
  0x2f   : > { %539 = vst [vmem:[%s9459_s30 + $0x168] sm:$0xff] %v538_v45  ;;  %541 = vst [vmem:[%s9459_s30 + $0x170] sm:$0xff] %v540_v46  ;;  %v548_v50 = vld [vmem:[%s9451_s29 + $0x310] sm:$0xff]  ;;  %v550_v51 = vld [vmem:[%s9451_s29 + $0x318] sm:$0xff] }
  0x30   : > { %543 = vst [vmem:[%s9459_s30 + $0x178] sm:$0xff] %v542_v47  ;;  %545 = vst [vmem:[%s9459_s30 + $0x180] sm:$0xff] %v544_v48  ;;  %v552_v52 = vld [vmem:[%s9451_s29 + $0x320] sm:$0xff]  ;;  %v554_v53 = vld [vmem:[%s9451_s29 + $0x328] sm:$0xff] }
  0x31   : > { %547 = vst [vmem:[%s9459_s30 + $0x188] sm:$0xff] %v546_v49  ;;  %549 = vst [vmem:[%s9459_s30 + $0x190] sm:$0xff] %v548_v50  ;;  %v556_v54 = vld [vmem:[%s9451_s29 + $0x330] sm:$0xff]  ;;  %v558_v55 = vld [vmem:[%s9451_s29 + $0x338] sm:$0xff] }
  0x32   : > { %551 = vst [vmem:[%s9459_s30 + $0x198] sm:$0xff] %v550_v51  ;;  %553 = vst [vmem:[%s9459_s30 + $0x1a0] sm:$0xff] %v552_v52  ;;  %v560_v56 = vld [vmem:[%s9451_s29 + $0x340] sm:$0xff]  ;;  %v562_v57 = vld [vmem:[%s9451_s29 + $0x348] sm:$0xff] }
  0x33   : > { %555 = vst [vmem:[%s9459_s30 + $0x1a8] sm:$0xff] %v554_v53  ;;  %557 = vst [vmem:[%s9459_s30 + $0x1b0] sm:$0xff] %v556_v54  ;;  %v564_v58 = vld [vmem:[%s9451_s29 + $0x350] sm:$0xff]  ;;  %v566_v59 = vld [vmem:[%s9451_s29 + $0x358] sm:$0xff] }
  0x34   : > { %559 = vst [vmem:[%s9459_s30 + $0x1b8] sm:$0xff] %v558_v55  ;;  %561 = vst [vmem:[%s9459_s30 + $0x1c0] sm:$0xff] %v560_v56  ;;  %v568_v60 = vld [vmem:[%s9451_s29 + $0x360] sm:$0xff]  ;;  %v570_v61 = vld [vmem:[%s9451_s29 + $0x368] sm:$0xff] }
  0x35   : > { %563 = vst [vmem:[%s9459_s30 + $0x1c8] sm:$0xff] %v562_v57  ;;  %565 = vst [vmem:[%s9459_s30 + $0x1d0] sm:$0xff] %v564_v58  ;;  %v572_v62 = vld [vmem:[%s9451_s29 + $0x370] sm:$0xff]  ;;  %v574_v63 = vld [vmem:[%s9451_s29 + $0x378] sm:$0xff] }
  0x36   : > { %567 = vst [vmem:[%s9459_s30 + $0x1d8] sm:$0xff] %v566_v59  ;;  %569 = vst [vmem:[%s9459_s30 + $0x1e0] sm:$0xff] %v568_v60  ;;  %v576_v0 = vld [vmem:[%s9451_s29 + $0x400] sm:$0xff]  ;;  %v578_v1 = vld [vmem:[%s9451_s29 + $0x408] sm:$0xff] }
  0x37   : > { %571 = vst [vmem:[%s9459_s30 + $0x1e8] sm:$0xff] %v570_v61  ;;  %573 = vst [vmem:[%s9459_s30 + $0x1f0] sm:$0xff] %v572_v62  ;;  %v580_v2 = vld [vmem:[%s9451_s29 + $0x410] sm:$0xff]  ;;  %v582_v3 = vld [vmem:[%s9451_s29 + $0x418] sm:$0xff] }
  0x38   : > { %575 = vst [vmem:[%s9459_s30 + $0x1f8] sm:$0xff] %v574_v63  ;;  %577 = vst [vmem:[%s9459_s30 + $0x200] sm:$0xff] %v576_v0  ;;  %v584_v4 = vld [vmem:[%s9451_s29 + $0x420] sm:$0xff]  ;;  %v586_v5 = vld [vmem:[%s9451_s29 + $0x428] sm:$0xff] }
  0x39   : > { %579 = vst [vmem:[%s9459_s30 + $0x208] sm:$0xff] %v578_v1  ;;  %581 = vst [vmem:[%s9459_s30 + $0x210] sm:$0xff] %v580_v2  ;;  %v588_v6 = vld [vmem:[%s9451_s29 + $0x430] sm:$0xff]  ;;  %v590_v7 = vld [vmem:[%s9451_s29 + $0x438] sm:$0xff] }
  0x3a   : > { %583 = vst [vmem:[%s9459_s30 + $0x218] sm:$0xff] %v582_v3  ;;  %585 = vst [vmem:[%s9459_s30 + $0x220] sm:$0xff] %v584_v4  ;;  %v592_v8 = vld [vmem:[%s9451_s29 + $0x440] sm:$0xff]  ;;  %v594_v9 = vld [vmem:[%s9451_s29 + $0x448] sm:$0xff] }
  0x3b   : > { %587 = vst [vmem:[%s9459_s30 + $0x228] sm:$0xff] %v586_v5  ;;  %589 = vst [vmem:[%s9459_s30 + $0x230] sm:$0xff] %v588_v6  ;;  %v596_v10 = vld [vmem:[%s9451_s29 + $0x450] sm:$0xff]  ;;  %v598_v11 = vld [vmem:[%s9451_s29 + $0x458] sm:$0xff] }
  0x3c   : > { %591 = vst [vmem:[%s9459_s30 + $0x238] sm:$0xff] %v590_v7  ;;  %593 = vst [vmem:[%s9459_s30 + $0x240] sm:$0xff] %v592_v8  ;;  %v600_v12 = vld [vmem:[%s9451_s29 + $0x460] sm:$0xff]  ;;  %v602_v13 = vld [vmem:[%s9451_s29 + $0x468] sm:$0xff] }
  0x3d   : > { %595 = vst [vmem:[%s9459_s30 + $0x248] sm:$0xff] %v594_v9  ;;  %597 = vst [vmem:[%s9459_s30 + $0x250] sm:$0xff] %v596_v10  ;;  %v604_v14 = vld [vmem:[%s9451_s29 + $0x470] sm:$0xff]  ;;  %v606_v15 = vld [vmem:[%s9451_s29 + $0x478] sm:$0xff] }
  0x3e   : > { %599 = vst [vmem:[%s9459_s30 + $0x258] sm:$0xff] %v598_v11  ;;  %601 = vst [vmem:[%s9459_s30 + $0x260] sm:$0xff] %v600_v12  ;;  %v608_v16 = vld [vmem:[%s9451_s29 + $0x500] sm:$0xff]  ;;  %v610_v17 = vld [vmem:[%s9451_s29 + $0x508] sm:$0xff] }
  0x3f   : > { %603 = vst [vmem:[%s9459_s30 + $0x268] sm:$0xff] %v602_v13  ;;  %605 = vst [vmem:[%s9459_s30 + $0x270] sm:$0xff] %v604_v14  ;;  %v612_v18 = vld [vmem:[%s9451_s29 + $0x510] sm:$0xff]  ;;  %v614_v19 = vld [vmem:[%s9451_s29 + $0x518] sm:$0xff] }
  0x40   : > { %607 = vst [vmem:[%s9459_s30 + $0x278] sm:$0xff] %v606_v15  ;;  %609 = vst [vmem:[%s9459_s30 + $0x280] sm:$0xff] %v608_v16  ;;  %v616_v20 = vld [vmem:[%s9451_s29 + $0x520] sm:$0xff]  ;;  %v618_v21 = vld [vmem:[%s9451_s29 + $0x528] sm:$0xff] }
  0x41   : > { %611 = vst [vmem:[%s9459_s30 + $0x288] sm:$0xff] %v610_v17  ;;  %613 = vst [vmem:[%s9459_s30 + $0x290] sm:$0xff] %v612_v18  ;;  %v620_v22 = vld [vmem:[%s9451_s29 + $0x530] sm:$0xff]  ;;  %v622_v23 = vld [vmem:[%s9451_s29 + $0x538] sm:$0xff] }
  0x42   : > { %615 = vst [vmem:[%s9459_s30 + $0x298] sm:$0xff] %v614_v19  ;;  %617 = vst [vmem:[%s9459_s30 + $0x2a0] sm:$0xff] %v616_v20  ;;  %v624_v24 = vld [vmem:[%s9451_s29 + $0x540] sm:$0xff]  ;;  %v626_v25 = vld [vmem:[%s9451_s29 + $0x548] sm:$0xff] }
  0x43   : > { %619 = vst [vmem:[%s9459_s30 + $0x2a8] sm:$0xff] %v618_v21  ;;  %621 = vst [vmem:[%s9459_s30 + $0x2b0] sm:$0xff] %v620_v22  ;;  %v628_v26 = vld [vmem:[%s9451_s29 + $0x550] sm:$0xff]  ;;  %v630_v27 = vld [vmem:[%s9451_s29 + $0x558] sm:$0xff] }
  0x44   : > { %623 = vst [vmem:[%s9459_s30 + $0x2b8] sm:$0xff] %v622_v23  ;;  %625 = vst [vmem:[%s9459_s30 + $0x2c0] sm:$0xff] %v624_v24  ;;  %v632_v28 = vld [vmem:[%s9451_s29 + $0x560] sm:$0xff]  ;;  %v634_v29 = vld [vmem:[%s9451_s29 + $0x568] sm:$0xff] }
  0x45   : > { %627 = vst [vmem:[%s9459_s30 + $0x2c8] sm:$0xff] %v626_v25  ;;  %629 = vst [vmem:[%s9459_s30 + $0x2d0] sm:$0xff] %v628_v26  ;;  %v636_v30 = vld [vmem:[%s9451_s29 + $0x570] sm:$0xff]  ;;  %v638_v31 = vld [vmem:[%s9451_s29 + $0x578] sm:$0xff] }
  0x46   : > { %631 = vst [vmem:[%s9459_s30 + $0x2d8] sm:$0xff] %v630_v27  ;;  %633 = vst [vmem:[%s9459_s30 + $0x2e0] sm:$0xff] %v632_v28  ;;  %v640_v32 = vld [vmem:[%s9451_s29 + $0x600] sm:$0xff]  ;;  %v642_v33 = vld [vmem:[%s9451_s29 + $0x608] sm:$0xff] }
  0x47   : > { %635 = vst [vmem:[%s9459_s30 + $0x2e8] sm:$0xff] %v634_v29  ;;  %637 = vst [vmem:[%s9459_s30 + $0x2f0] sm:$0xff] %v636_v30  ;;  %v644_v34 = vld [vmem:[%s9451_s29 + $0x610] sm:$0xff]  ;;  %v646_v35 = vld [vmem:[%s9451_s29 + $0x618] sm:$0xff] }
  0x48   : > { %639 = vst [vmem:[%s9459_s30 + $0x2f8] sm:$0xff] %v638_v31  ;;  %641 = vst [vmem:[%s9459_s30 + $0x300] sm:$0xff] %v640_v32  ;;  %v648_v36 = vld [vmem:[%s9451_s29 + $0x620] sm:$0xff]  ;;  %v650_v37 = vld [vmem:[%s9451_s29 + $0x628] sm:$0xff] }
  0x49   : > { %643 = vst [vmem:[%s9459_s30 + $0x308] sm:$0xff] %v642_v33  ;;  %645 = vst [vmem:[%s9459_s30 + $0x310] sm:$0xff] %v644_v34  ;;  %v652_v38 = vld [vmem:[%s9451_s29 + $0x630] sm:$0xff]  ;;  %v654_v39 = vld [vmem:[%s9451_s29 + $0x638] sm:$0xff] }
  0x4a   : > { %647 = vst [vmem:[%s9459_s30 + $0x318] sm:$0xff] %v646_v35  ;;  %649 = vst [vmem:[%s9459_s30 + $0x320] sm:$0xff] %v648_v36  ;;  %v656_v40 = vld [vmem:[%s9451_s29 + $0x640] sm:$0xff]  ;;  %v658_v41 = vld [vmem:[%s9451_s29 + $0x648] sm:$0xff] }
  0x4b   : > { %651 = vst [vmem:[%s9459_s30 + $0x328] sm:$0xff] %v650_v37  ;;  %653 = vst [vmem:[%s9459_s30 + $0x330] sm:$0xff] %v652_v38  ;;  %v660_v42 = vld [vmem:[%s9451_s29 + $0x650] sm:$0xff]  ;;  %v662_v43 = vld [vmem:[%s9451_s29 + $0x658] sm:$0xff] }
  0x4c   : > { %655 = vst [vmem:[%s9459_s30 + $0x338] sm:$0xff] %v654_v39  ;;  %657 = vst [vmem:[%s9459_s30 + $0x340] sm:$0xff] %v656_v40  ;;  %v664_v44 = vld [vmem:[%s9451_s29 + $0x660] sm:$0xff]  ;;  %v666_v45 = vld [vmem:[%s9451_s29 + $0x668] sm:$0xff] }
  0x4d   : > { %659 = vst [vmem:[%s9459_s30 + $0x348] sm:$0xff] %v658_v41  ;;  %661 = vst [vmem:[%s9459_s30 + $0x350] sm:$0xff] %v660_v42  ;;  %v668_v46 = vld [vmem:[%s9451_s29 + $0x670] sm:$0xff]  ;;  %v670_v47 = vld [vmem:[%s9451_s29 + $0x678] sm:$0xff] }
  0x4e   : > { %663 = vst [vmem:[%s9459_s30 + $0x358] sm:$0xff] %v662_v43  ;;  %665 = vst [vmem:[%s9459_s30 + $0x360] sm:$0xff] %v664_v44  ;;  %v672_v48 = vld [vmem:[%s9451_s29 + $0x700] sm:$0xff]  ;;  %v674_v49 = vld [vmem:[%s9451_s29 + $0x708] sm:$0xff] }
  0x4f   : > { %667 = vst [vmem:[%s9459_s30 + $0x368] sm:$0xff] %v666_v45  ;;  %669 = vst [vmem:[%s9459_s30 + $0x370] sm:$0xff] %v668_v46  ;;  %v676_v50 = vld [vmem:[%s9451_s29 + $0x710] sm:$0xff]  ;;  %v678_v51 = vld [vmem:[%s9451_s29 + $0x718] sm:$0xff] }
  0x50   : > { %671 = vst [vmem:[%s9459_s30 + $0x378] sm:$0xff] %v670_v47  ;;  %673 = vst [vmem:[%s9459_s30 + $0x380] sm:$0xff] %v672_v48  ;;  %v680_v52 = vld [vmem:[%s9451_s29 + $0x720] sm:$0xff]  ;;  %v682_v53 = vld [vmem:[%s9451_s29 + $0x728] sm:$0xff] }
  0x51   : > { %675 = vst [vmem:[%s9459_s30 + $0x388] sm:$0xff] %v674_v49  ;;  %677 = vst [vmem:[%s9459_s30 + $0x390] sm:$0xff] %v676_v50  ;;  %v684_v54 = vld [vmem:[%s9451_s29 + $0x730] sm:$0xff]  ;;  %v686_v55 = vld [vmem:[%s9451_s29 + $0x738] sm:$0xff] }
  0x52   : > { %679 = vst [vmem:[%s9459_s30 + $0x398] sm:$0xff] %v678_v51  ;;  %681 = vst [vmem:[%s9459_s30 + $0x3a0] sm:$0xff] %v680_v52  ;;  %v688_v56 = vld [vmem:[%s9451_s29 + $0x740] sm:$0xff]  ;;  %v690_v57 = vld [vmem:[%s9451_s29 + $0x748] sm:$0xff] }
  0x53   : > { %683 = vst [vmem:[%s9459_s30 + $0x3a8] sm:$0xff] %v682_v53  ;;  %685 = vst [vmem:[%s9459_s30 + $0x3b0] sm:$0xff] %v684_v54  ;;  %v692_v58 = vld [vmem:[%s9451_s29 + $0x750] sm:$0xff]  ;;  %v694_v59 = vld [vmem:[%s9451_s29 + $0x758] sm:$0xff] }
  0x54   : > { %687 = vst [vmem:[%s9459_s30 + $0x3b8] sm:$0xff] %v686_v55  ;;  %689 = vst [vmem:[%s9459_s30 + $0x3c0] sm:$0xff] %v688_v56  ;;  %v696_v60 = vld [vmem:[%s9451_s29 + $0x760] sm:$0xff]  ;;  %v698_v61 = vld [vmem:[%s9451_s29 + $0x768] sm:$0xff] }
  0x55   : > { %691 = vst [vmem:[%s9459_s30 + $0x3c8] sm:$0xff] %v690_v57  ;;  %693 = vst [vmem:[%s9459_s30 + $0x3d0] sm:$0xff] %v692_v58  ;;  %v700_v62 = vld [vmem:[%s9451_s29 + $0x770] sm:$0xff]  ;;  %v702_v63 = vld [vmem:[%s9451_s29 + $0x778] sm:$0xff] }
  0x56   : > { %695 = vst [vmem:[%s9459_s30 + $0x3d8] sm:$0xff] %v694_v59  ;;  %697 = vst [vmem:[%s9459_s30 + $0x3e0] sm:$0xff] %v696_v60  ;;  %v704_v0 = vld [vmem:[%s9451_s29 + $0x800] sm:$0xff]  ;;  %v706_v1 = vld [vmem:[%s9451_s29 + $0x808] sm:$0xff] }
  0x57   : > { %699 = vst [vmem:[%s9459_s30 + $0x3e8] sm:$0xff] %v698_v61  ;;  %701 = vst [vmem:[%s9459_s30 + $0x3f0] sm:$0xff] %v700_v62  ;;  %v708_v2 = vld [vmem:[%s9451_s29 + $0x810] sm:$0xff]  ;;  %v710_v3 = vld [vmem:[%s9451_s29 + $0x818] sm:$0xff] }
  0x58   : > { %703 = vst [vmem:[%s9459_s30 + $0x3f8] sm:$0xff] %v702_v63  ;;  %705 = vst [vmem:[%s9459_s30 + $0x400] sm:$0xff] %v704_v0  ;;  %v712_v4 = vld [vmem:[%s9451_s29 + $0x820] sm:$0xff]  ;;  %v714_v5 = vld [vmem:[%s9451_s29 + $0x828] sm:$0xff] }
  0x59   : > { %707 = vst [vmem:[%s9459_s30 + $0x408] sm:$0xff] %v706_v1  ;;  %709 = vst [vmem:[%s9459_s30 + $0x410] sm:$0xff] %v708_v2  ;;  %v716_v6 = vld [vmem:[%s9451_s29 + $0x830] sm:$0xff]  ;;  %v718_v7 = vld [vmem:[%s9451_s29 + $0x838] sm:$0xff] }
  0x5a   : > { %711 = vst [vmem:[%s9459_s30 + $0x418] sm:$0xff] %v710_v3  ;;  %713 = vst [vmem:[%s9459_s30 + $0x420] sm:$0xff] %v712_v4  ;;  %v720_v8 = vld [vmem:[%s9451_s29 + $0x840] sm:$0xff]  ;;  %v722_v9 = vld [vmem:[%s9451_s29 + $0x848] sm:$0xff] }
  0x5b   : > { %715 = vst [vmem:[%s9459_s30 + $0x428] sm:$0xff] %v714_v5  ;;  %717 = vst [vmem:[%s9459_s30 + $0x430] sm:$0xff] %v716_v6  ;;  %v724_v10 = vld [vmem:[%s9451_s29 + $0x850] sm:$0xff]  ;;  %v726_v11 = vld [vmem:[%s9451_s29 + $0x858] sm:$0xff] }
  0x5c   : > { %719 = vst [vmem:[%s9459_s30 + $0x438] sm:$0xff] %v718_v7  ;;  %721 = vst [vmem:[%s9459_s30 + $0x440] sm:$0xff] %v720_v8  ;;  %v728_v12 = vld [vmem:[%s9451_s29 + $0x860] sm:$0xff]  ;;  %v730_v13 = vld [vmem:[%s9451_s29 + $0x868] sm:$0xff] }
  0x5d   : > { %723 = vst [vmem:[%s9459_s30 + $0x448] sm:$0xff] %v722_v9  ;;  %725 = vst [vmem:[%s9459_s30 + $0x450] sm:$0xff] %v724_v10  ;;  %v732_v14 = vld [vmem:[%s9451_s29 + $0x870] sm:$0xff]  ;;  %v734_v15 = vld [vmem:[%s9451_s29 + $0x878] sm:$0xff] }
  0x5e   : > { %727 = vst [vmem:[%s9459_s30 + $0x458] sm:$0xff] %v726_v11  ;;  %729 = vst [vmem:[%s9459_s30 + $0x460] sm:$0xff] %v728_v12 }
  0x5f   : > { %731 = vst [vmem:[%s9459_s30 + $0x468] sm:$0xff] %v730_v13  ;;  %733 = vst [vmem:[%s9459_s30 + $0x470] sm:$0xff] %v732_v14 }
  0x60   : > { %735 = vst [vmem:[%s9459_s30 + $0x478] sm:$0xff] %v734_v15 }
  0x61 PF: > { %p6427_p7 = scmp.ge.s32.totalorder %s9371_s18, 1  ;;  %p740_p8 = scmp.lt.s32.totalorder %s9371_s18, 5 }
  0x63   : > { %p741_p9 = pnand %p6427_p7, %p740_p8 }
  0x65   : > { %744 = sbr.rel (%p741_p9) target bundleno = 1020 (0x3fc), region = 62 }
  0x6c   : > { %s747_s4 = sand.u32 1, %s9347_s12   ;;  %p775_p10 = scmp.lt.s32.totalorder %s9359_s15, 1 }
  0x6d   : > { %s9209_s5 = smul.u32 1152, %s747_s4  ;;  %p787_p11 = scmp.lt.s32.totalorder %s9355_s14, 0 }
  0x6e   : > { %s776_s6 = scalar_select %p775_p10, %s9359_s15, 1 }
  0x6f   : > { %s788_s7 = ssub.s32 0, %s9355_s14  ;;  %p800_p12 = scmp.eq.s32.totalorder %s9355_s14, 0 }
  0x70   : > { %s6669_s8 = sshll.u32 %s776_s6, 8  ;;  %s6430_s9 = smin.u32 %s9355_s14, %s788_s7 }
  0x71   : > { %s9754_s21 = scalar_lea.vmem %s11289_s3, %s6669_s8  ;;  %s790_s22 = sand.u32 1, %s6430_s9  }
  0x72   : > { %s791_s24 = ssub.s32 0, %s790_s22  ;;  %s9759_s12 = scalar_lea.vmem [#allocation5], %s9209_s5 }
  0x73   : > { %s11307_s24 = smov (!%p787_p11, %s791_s24), %s790_s22  ;;  %804 = sbr.rel (!%p800_p12) target bundleno = 151 (0x97), region = 70 }
  0x74   : > { %p6432_p13 = scmp.lt.s32.totalorder %s11307_s24, 0  ;;  %s797_s25 = sadd.s32 2, %s11307_s24 }
  0x75   : > { %s807_s26 = smul.u32 (%p800_p12), 432, %s9355_s14 }
  0x76   : > { %s11309_s25 = smov (!%p6432_p13, %s797_s25), %s11307_s24  ;;  %s809_s27 = smul.u32 (%p800_p12), 864, %s9359_s15 }
  0x77   : > { %s812_s28 = smul.u32 (%p800_p12), 432, %s11309_s25  ;;  %s814_s7 = scalar_lea.sflag (%p800_p12), [#allocation4], %s11309_s25 }
  0x78   : > { %s810_s29 = sadd.s32 (%p800_p12), %s809_s27, %s807_s26 }
  0x79   : > { %s9767_s6 = scalar_lea.vmem (%p800_p12), %s11286_s0, %s810_s29  ;;  %s9772_s5 = scalar_lea.vmem (%p800_p12), [#allocation2], %s812_s28 }
  0x7a   : > { %v847_v16 = vld [vmem:[%s9767_s6] sm:$0xff]  ;;  %v849_v17 = vld [vmem:[%s9767_s6 + $0x8] sm:$0xff]  ;;  %v851_v18 = vld [vmem:[%s9767_s6 + $0x10] sm:$0xff] }
  0x7b   : > { %848 = vst [vmem:[%s9772_s5] sm:$0xff] %v847_v16  ;;  %850 = vst [vmem:[%s9772_s5 + $0x8] sm:$0xff] %v849_v17  ;;  %v853_v19 = vld [vmem:[%s9767_s6 + $0x18] sm:$0xff]  ;;  %v855_v20 = vld [vmem:[%s9767_s6 + $0x20] sm:$0xff] }
  0x7c   : > { %852 = vst [vmem:[%s9772_s5 + $0x10] sm:$0xff] %v851_v18  ;;  %v857_v21 = vld [vmem:[%s9767_s6 + $0x28] sm:$0xff]  ;;  %854 = vst [vmem:[%s9772_s5 + $0x18] sm:$0xff] %v853_v19  ;;  %v859_v22 = vld [vmem:[%s9767_s6 + $0x30] sm:$0xff] }
  0x7d   : > { %856 = vst [vmem:[%s9772_s5 + $0x20] sm:$0xff] %v855_v20  ;;  %858 = vst [vmem:[%s9772_s5 + $0x28] sm:$0xff] %v857_v21  ;;  %v861_v23 = vld [vmem:[%s9767_s6 + $0x38] sm:$0xff]  ;;  %v863_v24 = vld [vmem:[%s9767_s6 + $0x40] sm:$0xff] }
  0x7e   : > { %860 = vst [vmem:[%s9772_s5 + $0x30] sm:$0xff] %v859_v22  ;;  %862 = vst [vmem:[%s9772_s5 + $0x38] sm:$0xff] %v861_v23  ;;  %v865_v25 = vld [vmem:[%s9767_s6 + $0x48] sm:$0xff]  ;;  %v867_v26 = vld [vmem:[%s9767_s6 + $0x50] sm:$0xff] }
  0x7f   : > { %864 = vst [vmem:[%s9772_s5 + $0x40] sm:$0xff] %v863_v24  ;;  %v869_v27 = vld [vmem:[%s9767_s6 + $0x58] sm:$0xff]  ;;  %866 = vst [vmem:[%s9772_s5 + $0x48] sm:$0xff] %v865_v25  ;;  %v871_v28 = vld [vmem:[%s9767_s6 + $0x60] sm:$0xff] }
  0x80   : > { %868 = vst [vmem:[%s9772_s5 + $0x50] sm:$0xff] %v867_v26  ;;  %870 = vst [vmem:[%s9772_s5 + $0x58] sm:$0xff] %v869_v27  ;;  %v873_v29 = vld [vmem:[%s9767_s6 + $0x68] sm:$0xff]  ;;  %v875_v30 = vld [vmem:[%s9767_s6 + $0x70] sm:$0xff] }
  0x81   : > { %872 = vst [vmem:[%s9772_s5 + $0x60] sm:$0xff] %v871_v28  ;;  %874 = vst [vmem:[%s9772_s5 + $0x68] sm:$0xff] %v873_v29  ;;  %v877_v31 = vld [vmem:[%s9767_s6 + $0x78] sm:$0xff]  ;;  %v879_v32 = vld [vmem:[%s9767_s6 + $0x80] sm:$0xff] }
  0x82   : > { %876 = vst [vmem:[%s9772_s5 + $0x70] sm:$0xff] %v875_v30  ;;  %v881_v33 = vld [vmem:[%s9767_s6 + $0x88] sm:$0xff]  ;;  %878 = vst [vmem:[%s9772_s5 + $0x78] sm:$0xff] %v877_v31  ;;  %v883_v34 = vld [vmem:[%s9767_s6 + $0x90] sm:$0xff] }
  0x83   : > { %880 = vst [vmem:[%s9772_s5 + $0x80] sm:$0xff] %v879_v32  ;;  %882 = vst [vmem:[%s9772_s5 + $0x88] sm:$0xff] %v881_v33  ;;  %v885_v35 = vld [vmem:[%s9767_s6 + $0x98] sm:$0xff]  ;;  %v887_v36 = vld [vmem:[%s9767_s6 + $0xa0] sm:$0xff] }
  0x84   : > { %884 = vst [vmem:[%s9772_s5 + $0x90] sm:$0xff] %v883_v34  ;;  %886 = vst [vmem:[%s9772_s5 + $0x98] sm:$0xff] %v885_v35  ;;  %v889_v37 = vld [vmem:[%s9767_s6 + $0xa8] sm:$0xff]  ;;  %v891_v38 = vld [vmem:[%s9767_s6 + $0xb0] sm:$0xff] }
  0x85   : > { %888 = vst [vmem:[%s9772_s5 + $0xa0] sm:$0xff] %v887_v36  ;;  %v893_v39 = vld [vmem:[%s9767_s6 + $0xb8] sm:$0xff]  ;;  %890 = vst [vmem:[%s9772_s5 + $0xa8] sm:$0xff] %v889_v37  ;;  %v895_v40 = vld [vmem:[%s9767_s6 + $0xc0] sm:$0xff] }
  0x86   : > { %892 = vst [vmem:[%s9772_s5 + $0xb0] sm:$0xff] %v891_v38  ;;  %894 = vst [vmem:[%s9772_s5 + $0xb8] sm:$0xff] %v893_v39  ;;  %v897_v41 = vld [vmem:[%s9767_s6 + $0xc8] sm:$0xff]  ;;  %v899_v42 = vld [vmem:[%s9767_s6 + $0xd0] sm:$0xff] }
  0x87   : > { %896 = vst [vmem:[%s9772_s5 + $0xc0] sm:$0xff] %v895_v40  ;;  %898 = vst [vmem:[%s9772_s5 + $0xc8] sm:$0xff] %v897_v41  ;;  %v901_v43 = vld [vmem:[%s9767_s6 + $0xd8] sm:$0xff]  ;;  %v903_v44 = vld [vmem:[%s9767_s6 + $0xe0] sm:$0xff] }
  0x88   : > { %900 = vst [vmem:[%s9772_s5 + $0xd0] sm:$0xff] %v899_v42  ;;  %v905_v45 = vld [vmem:[%s9767_s6 + $0xe8] sm:$0xff]  ;;  %902 = vst [vmem:[%s9772_s5 + $0xd8] sm:$0xff] %v901_v43  ;;  %v907_v46 = vld [vmem:[%s9767_s6 + $0xf0] sm:$0xff] }
  0x89   : > { %904 = vst [vmem:[%s9772_s5 + $0xe0] sm:$0xff] %v903_v44  ;;  %906 = vst [vmem:[%s9772_s5 + $0xe8] sm:$0xff] %v905_v45  ;;  %v909_v47 = vld [vmem:[%s9767_s6 + $0xf8] sm:$0xff]  ;;  %v911_v48 = vld [vmem:[%s9767_s6 + $0x100] sm:$0xff] }
  0x8a   : > { %908 = vst [vmem:[%s9772_s5 + $0xf0] sm:$0xff] %v907_v46  ;;  %910 = vst [vmem:[%s9772_s5 + $0xf8] sm:$0xff] %v909_v47  ;;  %v913_v49 = vld [vmem:[%s9767_s6 + $0x108] sm:$0xff]  ;;  %v915_v50 = vld [vmem:[%s9767_s6 + $0x110] sm:$0xff] }
  0x8b   : > { %912 = vst [vmem:[%s9772_s5 + $0x100] sm:$0xff] %v911_v48  ;;  %v917_v51 = vld [vmem:[%s9767_s6 + $0x118] sm:$0xff]  ;;  %914 = vst [vmem:[%s9772_s5 + $0x108] sm:$0xff] %v913_v49  ;;  %v919_v52 = vld [vmem:[%s9767_s6 + $0x120] sm:$0xff] }
  0x8c   : > { %916 = vst [vmem:[%s9772_s5 + $0x110] sm:$0xff] %v915_v50  ;;  %918 = vst [vmem:[%s9772_s5 + $0x118] sm:$0xff] %v917_v51  ;;  %v921_v53 = vld [vmem:[%s9767_s6 + $0x128] sm:$0xff]  ;;  %v923_v54 = vld [vmem:[%s9767_s6 + $0x130] sm:$0xff] }
  0x8d   : > { %920 = vst [vmem:[%s9772_s5 + $0x120] sm:$0xff] %v919_v52  ;;  %922 = vst [vmem:[%s9772_s5 + $0x128] sm:$0xff] %v921_v53  ;;  %v925_v55 = vld [vmem:[%s9767_s6 + $0x138] sm:$0xff]  ;;  %v927_v56 = vld [vmem:[%s9767_s6 + $0x140] sm:$0xff] }
  0x8e   : > { %924 = vst [vmem:[%s9772_s5 + $0x130] sm:$0xff] %v923_v54  ;;  %v929_v57 = vld [vmem:[%s9767_s6 + $0x148] sm:$0xff]  ;;  %926 = vst [vmem:[%s9772_s5 + $0x138] sm:$0xff] %v925_v55  ;;  %v931_v58 = vld [vmem:[%s9767_s6 + $0x150] sm:$0xff] }
  0x8f   : > { %928 = vst [vmem:[%s9772_s5 + $0x140] sm:$0xff] %v927_v56  ;;  %930 = vst [vmem:[%s9772_s5 + $0x148] sm:$0xff] %v929_v57  ;;  %v933_v59 = vld [vmem:[%s9767_s6 + $0x158] sm:$0xff]  ;;  %v935_v60 = vld [vmem:[%s9767_s6 + $0x160] sm:$0xff] }
  0x90   : > { %932 = vst [vmem:[%s9772_s5 + $0x150] sm:$0xff] %v931_v58  ;;  %934 = vst [vmem:[%s9772_s5 + $0x158] sm:$0xff] %v933_v59  ;;  %v937_v61 = vld [vmem:[%s9767_s6 + $0x168] sm:$0xff]  ;;  %v939_v62 = vld [vmem:[%s9767_s6 + $0x170] sm:$0xff] }
  0x91   : > { %936 = vst [vmem:[%s9772_s5 + $0x160] sm:$0xff] %v935_v60  ;;  %v941_v63 = vld [vmem:[%s9767_s6 + $0x178] sm:$0xff]  ;;  %938 = vst [vmem:[%s9772_s5 + $0x168] sm:$0xff] %v937_v61  ;;  %v943_v0 = vld [vmem:[%s9767_s6 + $0x180] sm:$0xff] }
  0x92   : > { %940 = vst [vmem:[%s9772_s5 + $0x170] sm:$0xff] %v939_v62  ;;  %942 = vst [vmem:[%s9772_s5 + $0x178] sm:$0xff] %v941_v63  ;;  %v945_v1 = vld [vmem:[%s9767_s6 + $0x188] sm:$0xff]  ;;  %v947_v2 = vld [vmem:[%s9767_s6 + $0x190] sm:$0xff] }
  0x93   : > { %944 = vst [vmem:[%s9772_s5 + $0x180] sm:$0xff] %v943_v0  ;;  %946 = vst [vmem:[%s9772_s5 + $0x188] sm:$0xff] %v945_v1  ;;  %v949_v3 = vld [vmem:[%s9767_s6 + $0x198] sm:$0xff]  ;;  %v951_v4 = vld [vmem:[%s9767_s6 + $0x1a0] sm:$0xff] }
  0x94   : > { %948 = vst [vmem:[%s9772_s5 + $0x190] sm:$0xff] %v947_v2  ;;  %v953_v5 = vld [vmem:[%s9767_s6 + $0x1a8] sm:$0xff]  ;;  %950 = vst [vmem:[%s9772_s5 + $0x198] sm:$0xff] %v949_v3 }
  0x95   : > { %952 = vst [vmem:[%s9772_s5 + $0x1a0] sm:$0xff] %v951_v4  ;;  %954 = vst [vmem:[%s9772_s5 + $0x1a8] sm:$0xff] %v953_v5 }
  0x96   : > { %962 = vsyncadd %s814_s7, 6912 }
  0x97 PF: > { %p6434_p0 = scmp.ne.s32.totalorder %s9355_s14, 0 }
  0x98   : > { %v9373_v6 = vmov (!%p6434_p0), 0.0  }
  0x99   : > { %965 = sbr.rel (%p6434_p0) target bundleno = 225 (0xe1), region = 108  ;;  %966 = vst [vmem:[#allocation3] sm:$0xff] (!%p6434_p0), %v9373_v6  ;;  %967 = vst [vmem:[#allocation3 + $0x8] sm:$0xff] (!%p6434_p0), %v9373_v6 }
  0x9a   : > { %968 = vst [vmem:[#allocation3 + $0x10] sm:$0xff] (!%p6434_p0), %v9373_v6  ;;  %969 = vst [vmem:[#allocation3 + $0x18] sm:$0xff] (!%p6434_p0), %v9373_v6 }
  0x9b   : > { %970 = vst [vmem:[#allocation3 + $0x20] sm:$0xff] (!%p6434_p0), %v9373_v6  ;;  %971 = vst [vmem:[#allocation3 + $0x28] sm:$0xff] (!%p6434_p0), %v9373_v6 }
  0x9c   : > { %972 = vst [vmem:[#allocation3 + $0x30] sm:$0xff] (!%p6434_p0), %v9373_v6  ;;  %973 = vst [vmem:[#allocation3 + $0x38] sm:$0xff] (!%p6434_p0), %v9373_v6 }
  0x9d   : > { %974 = vst [vmem:[#allocation3 + $0x40] sm:$0xff] (!%p6434_p0), %v9373_v6  ;;  %975 = vst [vmem:[#allocation3 + $0x48] sm:$0xff] (!%p6434_p0), %v9373_v6 }
  0x9e   : > { %976 = vst [vmem:[#allocation3 + $0x50] sm:$0xff] (!%p6434_p0), %v9373_v6  ;;  %977 = vst [vmem:[#allocation3 + $0x58] sm:$0xff] (!%p6434_p0), %v9373_v6 }
  0x9f   : > { %978 = vst [vmem:[#allocation3 + $0x60] sm:$0xff] (!%p6434_p0), %v9373_v6  ;;  %979 = vst [vmem:[#allocation3 + $0x68] sm:$0xff] (!%p6434_p0), %v9373_v6 }
  0xa0   : > { %980 = vst [vmem:[#allocation3 + $0x70] sm:$0xff] %v9373_v6  ;;  %981 = vst [vmem:[#allocation3 + $0x78] sm:$0xff] %v9373_v6 }
  0xa1   : > { %982 = vst [vmem:[#allocation3 + $0x80] sm:$0xff] %v9373_v6  ;;  %983 = vst [vmem:[#allocation3 + $0x88] sm:$0xff] %v9373_v6 }
  0xa2   : > { %984 = vst [vmem:[#allocation3 + $0x90] sm:$0xff] %v9373_v6  ;;  %985 = vst [vmem:[#allocation3 + $0x98] sm:$0xff] %v9373_v6 }
  0xa3   : > { %986 = vst [vmem:[#allocation3 + $0xa0] sm:$0xff] %v9373_v6  ;;  %987 = vst [vmem:[#allocation3 + $0xa8] sm:$0xff] %v9373_v6 }
  0xa4   : > { %988 = vst [vmem:[#allocation3 + $0xb0] sm:$0xff] %v9373_v6  ;;  %989 = vst [vmem:[#allocation3 + $0xb8] sm:$0xff] %v9373_v6 }
  0xa5   : > { %990 = vst [vmem:[#allocation3 + $0xc0] sm:$0xff] %v9373_v6  ;;  %991 = vst [vmem:[#allocation3 + $0xc8] sm:$0xff] %v9373_v6 }
  0xa6   : > { %992 = vst [vmem:[#allocation3 + $0xd0] sm:$0xff] %v9373_v6  ;;  %993 = vst [vmem:[#allocation3 + $0xd8] sm:$0xff] %v9373_v6 }
  0xa7   : > { %994 = vst [vmem:[#allocation3 + $0xe0] sm:$0xff] %v9373_v6  ;;  %995 = vst [vmem:[#allocation3 + $0xe8] sm:$0xff] %v9373_v6 }
  0xa8   : > { %996 = vst [vmem:[#allocation3 + $0xf0] sm:$0xff] %v9373_v6  ;;  %997 = vst [vmem:[#allocation3 + $0xf8] sm:$0xff] %v9373_v6 }
  0xa9   : > { %998 = vst [vmem:[#allocation3 + $0x100] sm:$0xff] %v9373_v6  ;;  %999 = vst [vmem:[#allocation3 + $0x108] sm:$0xff] %v9373_v6 }
  0xaa   : > { %1000 = vst [vmem:[#allocation3 + $0x110] sm:$0xff] %v9373_v6  ;;  %1001 = vst [vmem:[#allocation3 + $0x118] sm:$0xff] %v9373_v6 }
  0xab   : > { %1002 = vst [vmem:[#allocation3 + $0x120] sm:$0xff] %v9373_v6  ;;  %1003 = vst [vmem:[#allocation3 + $0x128] sm:$0xff] %v9373_v6 }
  0xac   : > { %1004 = vst [vmem:[#allocation3 + $0x130] sm:$0xff] %v9373_v6  ;;  %1005 = vst [vmem:[#allocation3 + $0x138] sm:$0xff] %v9373_v6 }
  0xad   : > { %1006 = vst [vmem:[#allocation3 + $0x140] sm:$0xff] %v9373_v6  ;;  %1007 = vst [vmem:[#allocation3 + $0x148] sm:$0xff] %v9373_v6 }
  0xae   : > { %1008 = vst [vmem:[#allocation3 + $0x150] sm:$0xff] %v9373_v6  ;;  %1009 = vst [vmem:[#allocation3 + $0x158] sm:$0xff] %v9373_v6 }
  0xaf   : > { %1010 = vst [vmem:[#allocation3 + $0x160] sm:$0xff] %v9373_v6  ;;  %1011 = vst [vmem:[#allocation3 + $0x168] sm:$0xff] %v9373_v6 }
  0xb0   : > { %1012 = vst [vmem:[#allocation3 + $0x170] sm:$0xff] %v9373_v6  ;;  %1013 = vst [vmem:[#allocation3 + $0x178] sm:$0xff] %v9373_v6 }
  0xb1   : > { %1014 = vst [vmem:[#allocation3 + $0x180] sm:$0xff] %v9373_v6  ;;  %1015 = vst [vmem:[#allocation3 + $0x188] sm:$0xff] %v9373_v6 }
  0xb2   : > { %1016 = vst [vmem:[#allocation3 + $0x190] sm:$0xff] %v9373_v6  ;;  %1017 = vst [vmem:[#allocation3 + $0x198] sm:$0xff] %v9373_v6 }
  0xb3   : > { %1018 = vst [vmem:[#allocation3 + $0x1a0] sm:$0xff] %v9373_v6  ;;  %1019 = vst [vmem:[#allocation3 + $0x1a8] sm:$0xff] %v9373_v6 }
  0xb4   : > { %1020 = vst [vmem:[#allocation3 + $0x1b0] sm:$0xff] %v9373_v6  ;;  %1021 = vst [vmem:[#allocation3 + $0x1b8] sm:$0xff] %v9373_v6 }
  0xb5   : > { %1022 = vst [vmem:[#allocation3 + $0x1c0] sm:$0xff] %v9373_v6  ;;  %1023 = vst [vmem:[#allocation3 + $0x1c8] sm:$0xff] %v9373_v6 }
  0xb6   : > { %1024 = vst [vmem:[#allocation3 + $0x1d0] sm:$0xff] %v9373_v6  ;;  %1025 = vst [vmem:[#allocation3 + $0x1d8] sm:$0xff] %v9373_v6 }
  0xb7   : > { %1026 = vst [vmem:[#allocation3 + $0x1e0] sm:$0xff] %v9373_v6  ;;  %1027 = vst [vmem:[#allocation3 + $0x1e8] sm:$0xff] %v9373_v6 }
  0xb8   : > { %1028 = vst [vmem:[#allocation3 + $0x1f0] sm:$0xff] %v9373_v6  ;;  %1029 = vst [vmem:[#allocation3 + $0x1f8] sm:$0xff] %v9373_v6 }
  0xb9   : > { %1030 = vst [vmem:[#allocation3 + $0x200] sm:$0xff] %v9373_v6  ;;  %1031 = vst [vmem:[#allocation3 + $0x208] sm:$0xff] %v9373_v6 }
  0xba   : > { %1032 = vst [vmem:[#allocation3 + $0x210] sm:$0xff] %v9373_v6  ;;  %1033 = vst [vmem:[#allocation3 + $0x218] sm:$0xff] %v9373_v6 }
  0xbb   : > { %1034 = vst [vmem:[#allocation3 + $0x220] sm:$0xff] %v9373_v6  ;;  %1035 = vst [vmem:[#allocation3 + $0x228] sm:$0xff] %v9373_v6 }
  0xbc   : > { %1036 = vst [vmem:[#allocation3 + $0x230] sm:$0xff] %v9373_v6  ;;  %1037 = vst [vmem:[#allocation3 + $0x238] sm:$0xff] %v9373_v6 }
  0xbd   : > { %1038 = vst [vmem:[#allocation3 + $0x240] sm:$0xff] %v9373_v6  ;;  %1039 = vst [vmem:[#allocation3 + $0x248] sm:$0xff] %v9373_v6 }
  0xbe   : > { %1040 = vst [vmem:[#allocation3 + $0x250] sm:$0xff] %v9373_v6  ;;  %1041 = vst [vmem:[#allocation3 + $0x258] sm:$0xff] %v9373_v6 }
  0xbf   : > { %1042 = vst [vmem:[#allocation3 + $0x260] sm:$0xff] %v9373_v6  ;;  %1043 = vst [vmem:[#allocation3 + $0x268] sm:$0xff] %v9373_v6 }
  0xc0   : > { %1044 = vst [vmem:[#allocation3 + $0x270] sm:$0xff] %v9373_v6  ;;  %1045 = vst [vmem:[#allocation3 + $0x278] sm:$0xff] %v9373_v6 }
  0xc1   : > { %1046 = vst [vmem:[#allocation3 + $0x280] sm:$0xff] %v9373_v6  ;;  %1047 = vst [vmem:[#allocation3 + $0x288] sm:$0xff] %v9373_v6 }
  0xc2   : > { %1048 = vst [vmem:[#allocation3 + $0x290] sm:$0xff] %v9373_v6  ;;  %1049 = vst [vmem:[#allocation3 + $0x298] sm:$0xff] %v9373_v6 }
  0xc3   : > { %1050 = vst [vmem:[#allocation3 + $0x2a0] sm:$0xff] %v9373_v6  ;;  %1051 = vst [vmem:[#allocation3 + $0x2a8] sm:$0xff] %v9373_v6 }
  0xc4   : > { %1052 = vst [vmem:[#allocation3 + $0x2b0] sm:$0xff] %v9373_v6  ;;  %1053 = vst [vmem:[#allocation3 + $0x2b8] sm:$0xff] %v9373_v6 }
  0xc5   : > { %1054 = vst [vmem:[#allocation3 + $0x2c0] sm:$0xff] %v9373_v6  ;;  %1055 = vst [vmem:[#allocation3 + $0x2c8] sm:$0xff] %v9373_v6 }
  0xc6   : > { %1056 = vst [vmem:[#allocation3 + $0x2d0] sm:$0xff] %v9373_v6  ;;  %1057 = vst [vmem:[#allocation3 + $0x2d8] sm:$0xff] %v9373_v6 }
  0xc7   : > { %1058 = vst [vmem:[#allocation3 + $0x2e0] sm:$0xff] %v9373_v6  ;;  %1059 = vst [vmem:[#allocation3 + $0x2e8] sm:$0xff] %v9373_v6 }
  0xc8   : > { %1060 = vst [vmem:[#allocation3 + $0x2f0] sm:$0xff] %v9373_v6  ;;  %1061 = vst [vmem:[#allocation3 + $0x2f8] sm:$0xff] %v9373_v6 }
  0xc9   : > { %1062 = vst [vmem:[#allocation3 + $0x300] sm:$0xff] %v9373_v6  ;;  %1063 = vst [vmem:[#allocation3 + $0x308] sm:$0xff] %v9373_v6 }
  0xca   : > { %1064 = vst [vmem:[#allocation3 + $0x310] sm:$0xff] %v9373_v6  ;;  %1065 = vst [vmem:[#allocation3 + $0x318] sm:$0xff] %v9373_v6 }
  0xcb   : > { %1066 = vst [vmem:[#allocation3 + $0x320] sm:$0xff] %v9373_v6  ;;  %1067 = vst [vmem:[#allocation3 + $0x328] sm:$0xff] %v9373_v6 }
  0xcc   : > { %1068 = vst [vmem:[#allocation3 + $0x330] sm:$0xff] %v9373_v6  ;;  %1069 = vst [vmem:[#allocation3 + $0x338] sm:$0xff] %v9373_v6 }
  0xcd   : > { %1070 = vst [vmem:[#allocation3 + $0x340] sm:$0xff] %v9373_v6  ;;  %1071 = vst [vmem:[#allocation3 + $0x348] sm:$0xff] %v9373_v6 }
  0xce   : > { %1072 = vst [vmem:[#allocation3 + $0x350] sm:$0xff] %v9373_v6  ;;  %1073 = vst [vmem:[#allocation3 + $0x358] sm:$0xff] %v9373_v6 }
  0xcf   : > { %1074 = vst [vmem:[#allocation3 + $0x360] sm:$0xff] %v9373_v6  ;;  %1075 = vst [vmem:[#allocation3 + $0x368] sm:$0xff] %v9373_v6 }
  0xd0   : > { %1076 = vst [vmem:[#allocation3 + $0x370] sm:$0xff] %v9373_v6  ;;  %1077 = vst [vmem:[#allocation3 + $0x378] sm:$0xff] %v9373_v6 }
  0xd1   : > { %1078 = vst [vmem:[#allocation3 + $0x380] sm:$0xff] %v9373_v6  ;;  %1079 = vst [vmem:[#allocation3 + $0x388] sm:$0xff] %v9373_v6 }
  0xd2   : > { %1080 = vst [vmem:[#allocation3 + $0x390] sm:$0xff] %v9373_v6  ;;  %1081 = vst [vmem:[#allocation3 + $0x398] sm:$0xff] %v9373_v6 }
  0xd3   : > { %1082 = vst [vmem:[#allocation3 + $0x3a0] sm:$0xff] %v9373_v6  ;;  %1083 = vst [vmem:[#allocation3 + $0x3a8] sm:$0xff] %v9373_v6 }
  0xd4   : > { %1084 = vst [vmem:[#allocation3 + $0x3b0] sm:$0xff] %v9373_v6  ;;  %1085 = vst [vmem:[#allocation3 + $0x3b8] sm:$0xff] %v9373_v6 }
  0xd5   : > { %1086 = vst [vmem:[#allocation3 + $0x3c0] sm:$0xff] %v9373_v6  ;;  %1087 = vst [vmem:[#allocation3 + $0x3c8] sm:$0xff] %v9373_v6 }
  0xd6   : > { %1088 = vst [vmem:[#allocation3 + $0x3d0] sm:$0xff] %v9373_v6  ;;  %1089 = vst [vmem:[#allocation3 + $0x3d8] sm:$0xff] %v9373_v6 }
  0xd7   : > { %1090 = vst [vmem:[#allocation3 + $0x3e0] sm:$0xff] %v9373_v6  ;;  %1091 = vst [vmem:[#allocation3 + $0x3e8] sm:$0xff] %v9373_v6 }
  0xd8   : > { %1092 = vst [vmem:[#allocation3 + $0x3f0] sm:$0xff] %v9373_v6  ;;  %1093 = vst [vmem:[#allocation3 + $0x3f8] sm:$0xff] %v9373_v6 }
  0xd9   : > { %1094 = vst [vmem:[#allocation3 + $0x400] sm:$0xff] %v9373_v6  ;;  %1095 = vst [vmem:[#allocation3 + $0x408] sm:$0xff] %v9373_v6 }
  0xda   : > { %1096 = vst [vmem:[#allocation3 + $0x410] sm:$0xff] %v9373_v6  ;;  %1097 = vst [vmem:[#allocation3 + $0x418] sm:$0xff] %v9373_v6 }
  0xdb   : > { %1098 = vst [vmem:[#allocation3 + $0x420] sm:$0xff] %v9373_v6  ;;  %1099 = vst [vmem:[#allocation3 + $0x428] sm:$0xff] %v9373_v6 }
  0xdc   : > { %1100 = vst [vmem:[#allocation3 + $0x430] sm:$0xff] %v9373_v6  ;;  %1101 = vst [vmem:[#allocation3 + $0x438] sm:$0xff] %v9373_v6 }
  0xdd   : > { %1102 = vst [vmem:[#allocation3 + $0x440] sm:$0xff] %v9373_v6  ;;  %1103 = vst [vmem:[#allocation3 + $0x448] sm:$0xff] %v9373_v6 }
  0xde   : > { %1104 = vst [vmem:[#allocation3 + $0x450] sm:$0xff] %v9373_v6  ;;  %1105 = vst [vmem:[#allocation3 + $0x458] sm:$0xff] %v9373_v6 }
  0xdf   : > { %1106 = vst [vmem:[#allocation3 + $0x460] sm:$0xff] %v9373_v6  ;;  %1107 = vst [vmem:[#allocation3 + $0x468] sm:$0xff] %v9373_v6 }
  0xe0   : > { %1108 = vst [vmem:[#allocation3 + $0x470] sm:$0xff] %v9373_v6  ;;  %1109 = vst [vmem:[#allocation3 + $0x478] sm:$0xff] %v9373_v6 }
  0xe1 PF: > { %s1111_s8 = scalar_lea.sflag [#allocation4], %s11309_s25 }
  0xe2   : > { %9343 = dma.done.wait %s1111_s8, 6912 }
  0xe3   : > { %9344 = vsyncadd %s1111_s8, 4294960384  ;;  %p1116_p1 = scmp.eq.s32.totalorder %s9355_s14, 1 }
  0xe4   : > { %s1124_s10 = sadd.s32 (!%p1116_p1), 1, %s9355_s14  ;;  %s1126_s11 = ssub.s32 (!%p1116_p1), 1, %s11309_s25 }
  0xe5   : > { %1121 = sbr.rel (%p1116_p1) target bundleno = 273 (0x111), region = 112  ;;  %s1136_s5 = scalar_lea.sflag (!%p1116_p1), [#allocation4], %s1126_s11 }
  0xe6   : > { %s1131_s26 = smul.u32 (!%p1116_p1), 864, %s9359_s15 }
  0xe7   : > { %s1134_s28 = smul.u32 (!%p1116_p1), 432, %s1126_s11 }
  0xe9   : > { %s10040_s15 = scalar_lea.vmem (!%p1116_p1), [#allocation2], %s1134_s28 }
  0xec   : > { %s1123_s9 = scalar_select %p1116_p1, 1, 0 }
  0xed   : > { %s11311_s10 = smov (%p1116_p1, %s1124_s10), 0 }
  0xee   : > { %s6437_s22 = smul.u32 384, %s1123_s9 }
  0xef   : > { %s1129_s24 = smul.u32 432, %s11311_s10 }
  0xf1   : > { %s1130_s27 = sadd.s32 %s6437_s22, %s1129_s24 }
  0xf2   : > { %s1132_s29 = sadd.s32 %s1131_s26, %s1130_s27 }
  0xf3   : > { %s10035_s6 = scalar_lea.vmem %s11286_s0, %s1132_s29 }
  0xf4   : > { %v1169_v7 = vld [vmem:[%s10035_s6] sm:$0xff]  ;;  %v1171_v8 = vld [vmem:[%s10035_s6 + $0x8] sm:$0xff]  ;;  %v1173_v9 = vld [vmem:[%s10035_s6 + $0x10] sm:$0xff] }
  0xf5   : > { %1170 = vst [vmem:[%s10040_s15] sm:$0xff] %v1169_v7  ;;  %1172 = vst [vmem:[%s10040_s15 + $0x8] sm:$0xff] %v1171_v8  ;;  %v1175_v10 = vld [vmem:[%s10035_s6 + $0x18] sm:$0xff]  ;;  %v1177_v11 = vld [vmem:[%s10035_s6 + $0x20] sm:$0xff] }
  0xf6   : > { %1174 = vst [vmem:[%s10040_s15 + $0x10] sm:$0xff] %v1173_v9  ;;  %v1179_v12 = vld [vmem:[%s10035_s6 + $0x28] sm:$0xff]  ;;  %1176 = vst [vmem:[%s10040_s15 + $0x18] sm:$0xff] %v1175_v10  ;;  %v1181_v13 = vld [vmem:[%s10035_s6 + $0x30] sm:$0xff] }
  0xf7   : > { %1178 = vst [vmem:[%s10040_s15 + $0x20] sm:$0xff] %v1177_v11  ;;  %1180 = vst [vmem:[%s10040_s15 + $0x28] sm:$0xff] %v1179_v12  ;;  %v1183_v14 = vld [vmem:[%s10035_s6 + $0x38] sm:$0xff]  ;;  %v1185_v15 = vld [vmem:[%s10035_s6 + $0x40] sm:$0xff] }
  0xf8   : > { %1182 = vst [vmem:[%s10040_s15 + $0x30] sm:$0xff] %v1181_v13  ;;  %1184 = vst [vmem:[%s10040_s15 + $0x38] sm:$0xff] %v1183_v14  ;;  %v1187_v16 = vld [vmem:[%s10035_s6 + $0x48] sm:$0xff]  ;;  %v1189_v17 = vld [vmem:[%s10035_s6 + $0x50] sm:$0xff] }
  0xf9   : > { %1186 = vst [vmem:[%s10040_s15 + $0x40] sm:$0xff] %v1185_v15  ;;  %v1191_v18 = vld [vmem:[%s10035_s6 + $0x58] sm:$0xff]  ;;  %1188 = vst [vmem:[%s10040_s15 + $0x48] sm:$0xff] %v1187_v16  ;;  %v1193_v19 = vld [vmem:[%s10035_s6 + $0x60] sm:$0xff] }
  0xfa   : > { %1190 = vst [vmem:[%s10040_s15 + $0x50] sm:$0xff] %v1189_v17  ;;  %1192 = vst [vmem:[%s10040_s15 + $0x58] sm:$0xff] %v1191_v18  ;;  %v1195_v20 = vld [vmem:[%s10035_s6 + $0x68] sm:$0xff]  ;;  %v1197_v21 = vld [vmem:[%s10035_s6 + $0x70] sm:$0xff] }
  0xfb   : > { %1194 = vst [vmem:[%s10040_s15 + $0x60] sm:$0xff] %v1193_v19  ;;  %1196 = vst [vmem:[%s10040_s15 + $0x68] sm:$0xff] %v1195_v20  ;;  %v1199_v22 = vld [vmem:[%s10035_s6 + $0x78] sm:$0xff]  ;;  %v1201_v23 = vld [vmem:[%s10035_s6 + $0x80] sm:$0xff] }
  0xfc   : > { %1198 = vst [vmem:[%s10040_s15 + $0x70] sm:$0xff] %v1197_v21  ;;  %v1203_v24 = vld [vmem:[%s10035_s6 + $0x88] sm:$0xff]  ;;  %1200 = vst [vmem:[%s10040_s15 + $0x78] sm:$0xff] %v1199_v22  ;;  %v1205_v25 = vld [vmem:[%s10035_s6 + $0x90] sm:$0xff] }
  0xfd   : > { %1202 = vst [vmem:[%s10040_s15 + $0x80] sm:$0xff] %v1201_v23  ;;  %1204 = vst [vmem:[%s10040_s15 + $0x88] sm:$0xff] %v1203_v24  ;;  %v1207_v26 = vld [vmem:[%s10035_s6 + $0x98] sm:$0xff]  ;;  %v1209_v27 = vld [vmem:[%s10035_s6 + $0xa0] sm:$0xff] }
  0xfe   : > { %1206 = vst [vmem:[%s10040_s15 + $0x90] sm:$0xff] %v1205_v25  ;;  %1208 = vst [vmem:[%s10040_s15 + $0x98] sm:$0xff] %v1207_v26  ;;  %v1211_v28 = vld [vmem:[%s10035_s6 + $0xa8] sm:$0xff]  ;;  %v1213_v29 = vld [vmem:[%s10035_s6 + $0xb0] sm:$0xff] }
  0xff   : > { %1210 = vst [vmem:[%s10040_s15 + $0xa0] sm:$0xff] %v1209_v27  ;;  %v1215_v30 = vld [vmem:[%s10035_s6 + $0xb8] sm:$0xff]  ;;  %1212 = vst [vmem:[%s10040_s15 + $0xa8] sm:$0xff] %v1211_v28  ;;  %v1217_v31 = vld [vmem:[%s10035_s6 + $0xc0] sm:$0xff] }
 0x100   : > { %1214 = vst [vmem:[%s10040_s15 + $0xb0] sm:$0xff] %v1213_v29  ;;  %1216 = vst [vmem:[%s10040_s15 + $0xb8] sm:$0xff] %v1215_v30  ;;  %v1219_v32 = vld [vmem:[%s10035_s6 + $0xc8] sm:$0xff]  ;;  %v1221_v33 = vld [vmem:[%s10035_s6 + $0xd0] sm:$0xff] }
 0x101   : > { %1218 = vst [vmem:[%s10040_s15 + $0xc0] sm:$0xff] %v1217_v31  ;;  %1220 = vst [vmem:[%s10040_s15 + $0xc8] sm:$0xff] %v1219_v32  ;;  %v1223_v34 = vld [vmem:[%s10035_s6 + $0xd8] sm:$0xff]  ;;  %v1225_v35 = vld [vmem:[%s10035_s6 + $0xe0] sm:$0xff] }
 0x102   : > { %1222 = vst [vmem:[%s10040_s15 + $0xd0] sm:$0xff] %v1221_v33  ;;  %v1227_v36 = vld [vmem:[%s10035_s6 + $0xe8] sm:$0xff]  ;;  %1224 = vst [vmem:[%s10040_s15 + $0xd8] sm:$0xff] %v1223_v34  ;;  %v1229_v37 = vld [vmem:[%s10035_s6 + $0xf0] sm:$0xff] }
 0x103   : > { %1226 = vst [vmem:[%s10040_s15 + $0xe0] sm:$0xff] %v1225_v35  ;;  %1228 = vst [vmem:[%s10040_s15 + $0xe8] sm:$0xff] %v1227_v36  ;;  %v1231_v38 = vld [vmem:[%s10035_s6 + $0xf8] sm:$0xff]  ;;  %v1233_v39 = vld [vmem:[%s10035_s6 + $0x100] sm:$0xff] }
 0x104   : > { %1230 = vst [vmem:[%s10040_s15 + $0xf0] sm:$0xff] %v1229_v37  ;;  %1232 = vst [vmem:[%s10040_s15 + $0xf8] sm:$0xff] %v1231_v38  ;;  %v1235_v40 = vld [vmem:[%s10035_s6 + $0x108] sm:$0xff]  ;;  %v1237_v41 = vld [vmem:[%s10035_s6 + $0x110] sm:$0xff] }
 0x105   : > { %1234 = vst [vmem:[%s10040_s15 + $0x100] sm:$0xff] %v1233_v39  ;;  %v1239_v42 = vld [vmem:[%s10035_s6 + $0x118] sm:$0xff]  ;;  %1236 = vst [vmem:[%s10040_s15 + $0x108] sm:$0xff] %v1235_v40  ;;  %v1241_v43 = vld [vmem:[%s10035_s6 + $0x120] sm:$0xff] }
 0x106   : > { %1238 = vst [vmem:[%s10040_s15 + $0x110] sm:$0xff] %v1237_v41  ;;  %1240 = vst [vmem:[%s10040_s15 + $0x118] sm:$0xff] %v1239_v42  ;;  %v1243_v44 = vld [vmem:[%s10035_s6 + $0x128] sm:$0xff]  ;;  %v1245_v45 = vld [vmem:[%s10035_s6 + $0x130] sm:$0xff] }
 0x107   : > { %1242 = vst [vmem:[%s10040_s15 + $0x120] sm:$0xff] %v1241_v43  ;;  %1244 = vst [vmem:[%s10040_s15 + $0x128] sm:$0xff] %v1243_v44  ;;  %v1247_v46 = vld [vmem:[%s10035_s6 + $0x138] sm:$0xff]  ;;  %v1249_v47 = vld [vmem:[%s10035_s6 + $0x140] sm:$0xff] }
 0x108   : > { %1246 = vst [vmem:[%s10040_s15 + $0x130] sm:$0xff] %v1245_v45  ;;  %v1251_v48 = vld [vmem:[%s10035_s6 + $0x148] sm:$0xff]  ;;  %1248 = vst [vmem:[%s10040_s15 + $0x138] sm:$0xff] %v1247_v46  ;;  %v1253_v49 = vld [vmem:[%s10035_s6 + $0x150] sm:$0xff] }
 0x109   : > { %1250 = vst [vmem:[%s10040_s15 + $0x140] sm:$0xff] %v1249_v47  ;;  %1252 = vst [vmem:[%s10040_s15 + $0x148] sm:$0xff] %v1251_v48  ;;  %v1255_v50 = vld [vmem:[%s10035_s6 + $0x158] sm:$0xff]  ;;  %v1257_v51 = vld [vmem:[%s10035_s6 + $0x160] sm:$0xff] }
 0x10a   : > { %1254 = vst [vmem:[%s10040_s15 + $0x150] sm:$0xff] %v1253_v49  ;;  %1256 = vst [vmem:[%s10040_s15 + $0x158] sm:$0xff] %v1255_v50  ;;  %v1259_v52 = vld [vmem:[%s10035_s6 + $0x168] sm:$0xff]  ;;  %v1261_v53 = vld [vmem:[%s10035_s6 + $0x170] sm:$0xff] }
 0x10b   : > { %1258 = vst [vmem:[%s10040_s15 + $0x160] sm:$0xff] %v1257_v51  ;;  %v1263_v54 = vld [vmem:[%s10035_s6 + $0x178] sm:$0xff]  ;;  %1260 = vst [vmem:[%s10040_s15 + $0x168] sm:$0xff] %v1259_v52  ;;  %v1265_v55 = vld [vmem:[%s10035_s6 + $0x180] sm:$0xff] }
 0x10c   : > { %1262 = vst [vmem:[%s10040_s15 + $0x170] sm:$0xff] %v1261_v53  ;;  %1264 = vst [vmem:[%s10040_s15 + $0x178] sm:$0xff] %v1263_v54  ;;  %v1267_v56 = vld [vmem:[%s10035_s6 + $0x188] sm:$0xff]  ;;  %v1269_v57 = vld [vmem:[%s10035_s6 + $0x190] sm:$0xff] }
 0x10d   : > { %1266 = vst [vmem:[%s10040_s15 + $0x180] sm:$0xff] %v1265_v55  ;;  %1268 = vst [vmem:[%s10040_s15 + $0x188] sm:$0xff] %v1267_v56  ;;  %v1271_v58 = vld [vmem:[%s10035_s6 + $0x198] sm:$0xff]  ;;  %v1273_v59 = vld [vmem:[%s10035_s6 + $0x1a0] sm:$0xff] }
 0x10e   : > { %1270 = vst [vmem:[%s10040_s15 + $0x190] sm:$0xff] %v1269_v57  ;;  %v1275_v60 = vld [vmem:[%s10035_s6 + $0x1a8] sm:$0xff]  ;;  %1272 = vst [vmem:[%s10040_s15 + $0x198] sm:$0xff] %v1271_v58 }
 0x10f   : > { %1274 = vst [vmem:[%s10040_s15 + $0x1a0] sm:$0xff] %v1273_v59  ;;  %1276 = vst [vmem:[%s10040_s15 + $0x1a8] sm:$0xff] %v1275_v60 }
 0x110   : > { %1284 = vsyncadd %s1136_s5, 6912 }
 0x111 PF: > { %v1383_v61 = vld [vmem:[%s9759_s12] sm:$0xff]  ;;  %v1384_v62 = vld [vmem:[%s9759_s12 + $0x8] sm:$0xff]  ;;  %v1385_v2 = vld [vmem:[%s9759_s12 + $0x10] sm:$0xff]  ;;  %s1285_s7 = smul.u32 432, %s11309_s25  ;;  %p6662_p2 = scmp.ne.s32.totalorder %s9355_s14, 1 }
 0x112   : > { %v6454_v63 = vld [vmem:[%s9759_s12 + $0x100] sm:$0xff]  ;;  %v8184_v0 = vpack.c.bf16 %v1384_v62, %v1383_v61  ;;  %v6455_v1 = vld [vmem:[%s9759_s12 + $0x108] sm:$0xff]  ;;  %v1386_v3 = vld [vmem:[%s9759_s12 + $0x18] sm:$0xff]  ;;  %vm5841_vm0 = vcmask (!%p6662_p2), 1040384   ;;  %vm6018_vm1 = vcmask (!%p6662_p2), 1046528  }
 0x113   : > { %v10155_v4 = vpack.c.bf16 %v6455_v1, %v6454_v63  ;;  %v8188_v5 = vpack.c.bf16 %v1386_v3, %v1385_v2  ;;  %v6456_v6 = vld [vmem:[%s9759_s12 + $0x110] sm:$0xff]  ;;  %v6457_v7 = vld [vmem:[%s9759_s12 + $0x118] sm:$0xff]  ;;  %v1387_v8 = vld [vmem:[%s9759_s12 + $0x20] sm:$0xff]  ;;  %s10181_s25 = scalar_lea.vmem [#allocation2], %s1285_s7 }
 0x114   : > { %8185 = vmatprep.subr.bf16.mxu1 %v8184_v0  ;;  %v10160_v9 = vpack.c.bf16 %v6457_v7, %v6456_v6  ;;  %v1388_v10 = vld [vmem:[%s9759_s12 + $0x28] sm:$0xff]  ;;  %v6458_v11 = vld [vmem:[%s9759_s12 + $0x120] sm:$0xff]  ;;  %v1389_v15 = vld [vmem:[%s9759_s12 + $0x30] sm:$0xff] }
 0x115   : > { %v6459_v12 = vld [vmem:[%s9759_s12 + $0x128] sm:$0xff]  ;;  %8249 = vmatprep.subr.bf16.mxu0 %v10155_v4  ;;  %8187 = vmatpush3.bf16.msra.mxu1 %v8184_v0  ;;  %v8192_v13 = vpack.c.bf16 %v1388_v10, %v1387_v8  ;;  %v1390_v16 = vld [vmem:[%s9759_s12 + $0x38] sm:$0xff]  ;;  %v6460_v17 = vld [vmem:[%s9759_s12 + $0x130] sm:$0xff] }
 0x116   : > { %8251 = vmatpush3.bf16.msra.mxu0 %v10155_v4  ;;  %8189 = vmatprep.subr.bf16.mxu1 %v8188_v5  ;;  %v10169_v14 = vpack.c.bf16 %v6459_v12, %v6458_v11  ;;  %v6461_v18 = vld [vmem:[%s9759_s12 + $0x138] sm:$0xff]  ;;  %v8196_v19 = vpack.c.bf16 %v1390_v16, %v1389_v15  ;;  %v1391_v21 = vld [vmem:[%s9759_s12 + $0x40] sm:$0xff]  ;;  %v1392_v22 = vld [vmem:[%s9759_s12 + $0x48] sm:$0xff] }
 0x117   : > { %8253 = vmatprep.subr.bf16.mxu0 %v10160_v9  ;;  %v10177_v20 = vpack.c.bf16 %v6461_v18, %v6460_v17  ;;  %v10184_v23 = vld [vmem:[%s10181_s25] sm:$0xff]  ;;  %v6463_v25 = vld [vmem:[%s9759_s12 + $0x148] sm:$0xff]  ;;  %v8200_v26 = vpack.c.bf16 %v1392_v22, %v1391_v21  ;;  %v1394_v29 = vld [vmem:[%s9759_s12 + $0x58] sm:$0xff] }
 0x118   : > { %v6462_v24 = vld [vmem:[%s9759_s12 + $0x140] sm:$0xff]  ;;  %7280 = vmatprep.mubr.f32.mxu1 %v10184_v23  ;;  %7488 = vmatprep.mubr.f32.mxu0 %v10184_v23  ;;  %v1393_v28 = vld [vmem:[%s9759_s12 + $0x50] sm:$0xff]  ;;  %v6465_v31 = vld [vmem:[%s9759_s12 + $0x158] sm:$0xff] }
 0x119   : > { %8191 = vmatpush3.bf16.msra.mxu1 %v8188_v5  ;;  %v10192_v27 = vpack.c.bf16 %v6463_v25, %v6462_v24  ;;  %v6464_v30 = vld [vmem:[%s9759_s12 + $0x150] sm:$0xff]  ;;  %v8204_v32 = vpack.c.bf16 %v1394_v29, %v1393_v28  ;;  %v1395_v34 = vld [vmem:[%s9759_s12 + $0x60] sm:$0xff]  ;;  %v1396_v35 = vld [vmem:[%s9759_s12 + $0x68] sm:$0xff] }
 0x11a   : > { %8255 = vmatpush3.bf16.msra.mxu0 %v10160_v9  ;;  %8193 = vmatprep.subr.bf16.mxu1 %v8192_v13  ;;  %v10200_v33 = vpack.c.bf16 %v6465_v31, %v6464_v30  ;;  %v6466_v36 = vld [vmem:[%s9759_s12 + $0x160] sm:$0xff]  ;;  %v6467_v37 = vld [vmem:[%s9759_s12 + $0x168] sm:$0xff]  ;;  %v8208_v38 = vpack.c.bf16 %v1396_v35, %v1395_v34  ;;  %v1397_v40 = vld [vmem:[%s9759_s12 + $0x70] sm:$0xff] }
 0x11b   : > { %8257 = vmatprep.subr.bf16.mxu0 %v10169_v14  ;;  %v10208_v39 = vpack.c.bf16 %v6467_v37, %v6466_v36  ;;  %v1398_v41 = vld [vmem:[%s9759_s12 + $0x78] sm:$0xff]  ;;  %v6468_v42 = vld [vmem:[%s9759_s12 + $0x170] sm:$0xff]  ;;  %v6438_v46 = vld [vmem:[%s9759_s12 + $0x80] sm:$0xff] }
 0x11c   : > { %v6469_v43 = vld [vmem:[%s9759_s12 + $0x178] sm:$0xff]  ;;  %v8212_v44 = vpack.c.bf16 %v1398_v41, %v1397_v40  ;;  %v6439_v47 = vld [vmem:[%s9759_s12 + $0x88] sm:$0xff]  ;;  %v6518_v48 = vld [vmem:[%s9759_s12 + $0x180] sm:$0xff] }
 0x11d   : > { %8195 = vmatpush3.bf16.msra.mxu1 %v8192_v13  ;;  %v10216_v45 = vpack.c.bf16 %v6469_v43, %v6468_v42  ;;  %v6519_v49 = vld [vmem:[%s9759_s12 + $0x188] sm:$0xff]  ;;  %v8216_v50 = vpack.c.bf16 %v6439_v47, %v6438_v46  ;;  %v6520_v52 = vld [vmem:[%s9759_s12 + $0x190] sm:$0xff]  ;;  %v6521_v53 = vld [vmem:[%s9759_s12 + $0x198] sm:$0xff] }
 0x11e   : > { %8259 = vmatpush3.bf16.msra.mxu0 %v10169_v14  ;;  %8197 = vmatprep.subr.bf16.mxu1 %v8196_v19  ;;  %v8280_v51 = vpack.c.bf16 %v6519_v49, %v6518_v48  ;;  %v10227_v54 = vld [vmem:[%s10181_s25 + $0x8] sm:$0xff]  ;;  %v6440_v55 = vld [vmem:[%s9759_s12 + $0x90] sm:$0xff]  ;;  %v8284_v58 = vpack.c.bf16 %v6521_v53, %v6520_v52  ;;  %v6522_v60 = vld [vmem:[%s9759_s12 + $0x1a0] sm:$0xff] }
 0x11f   : > { %8261 = vmatprep.subr.bf16.mxu0 %v10177_v20  ;;  %v6441_v56 = vld [vmem:[%s9759_s12 + $0x98] sm:$0xff]  ;;  %v10233_v57 = vld [vmem:[%s10181_s25 + $0x10] sm:$0xff]  ;;  %v6523_v61 = vld [vmem:[%s9759_s12 + $0x1a8] sm:$0xff] }
 0x120   : > { %v8220_v59 = vpack.c.bf16 %v6441_v56, %v6440_v55  ;;  %v10240_v62 = vld [vmem:[%s10181_s25 + $0x18] sm:$0xff]  ;;  %v6442_v63 = vld [vmem:[%s9759_s12 + $0xa0] sm:$0xff]  ;;  %v8288_v2 = vpack.c.bf16 %v6523_v61, %v6522_v60  ;;  %v6524_v3 = vld [vmem:[%s9759_s12 + $0x1b0] sm:$0xff] }
 0x121   : > { %8199 = vmatpush3.bf16.msra.mxu1 %v8196_v19  ;;  %v6443_v0 = vld [vmem:[%s9759_s12 + $0xa8] sm:$0xff]  ;;  %v10246_v1 = vld [vmem:[%s10181_s25 + $0x20] sm:$0xff]  ;;  %v6525_v5 = vld [vmem:[%s9759_s12 + $0x1b8] sm:$0xff] }
 0x122   : > { %8263 = vmatpush3.bf16.msra.mxu0 %v10177_v20  ;;  %8201 = vmatprep.subr.bf16.mxu1 %v8200_v26  ;;  %v8224_v6 = vpack.c.bf16 %v6443_v0, %v6442_v63  ;;  %v10255_v7 = vld [vmem:[%s10181_s25 + $0x28] sm:$0xff]  ;;  %v6444_v8 = vld [vmem:[%s9759_s12 + $0xb0] sm:$0xff]  ;;  %v8292_v12 = vpack.c.bf16 %v6525_v5, %v6524_v3  ;;  %v6526_v13 = vld [vmem:[%s9759_s12 + $0x1c0] sm:$0xff] }
 0x123   : > { %8265 = vmatprep.subr.bf16.mxu0 %v10192_v27  ;;  %v6445_v10 = vld [vmem:[%s9759_s12 + $0xb8] sm:$0xff]  ;;  %v10261_v11 = vld [vmem:[%s10181_s25 + $0x30] sm:$0xff]  ;;  %v6527_v15 = vld [vmem:[%s9759_s12 + $0x1c8] sm:$0xff] }
 0x124   : > { %v8228_v16 = vpack.c.bf16 %v6445_v10, %v6444_v8  ;;  %v10269_v17 = vld [vmem:[%s10181_s25 + $0x38] sm:$0xff]  ;;  %v6446_v18 = vld [vmem:[%s9759_s12 + $0xc0] sm:$0xff]  ;;  %v8296_v22 = vpack.c.bf16 %v6527_v15, %v6526_v13  ;;  %v6528_v24 = vld [vmem:[%s9759_s12 + $0x1d0] sm:$0xff] }
 0x125   : > { %8203 = vmatpush3.bf16.msra.mxu1 %v8200_v26  ;;  %v6447_v19 = vld [vmem:[%s9759_s12 + $0xc8] sm:$0xff]  ;;  %v10275_v21 = vld [vmem:[%s10181_s25 + $0x40] sm:$0xff]  ;;  %v6529_v25 = vld [vmem:[%s9759_s12 + $0x1d8] sm:$0xff] }
 0x126   : > { %8267 = vmatpush3.bf16.msra.mxu0 %v10192_v27  ;;  %8205 = vmatprep.subr.bf16.mxu1 %v8204_v32  ;;  %v8232_v26 = vpack.c.bf16 %v6447_v19, %v6446_v18  ;;  %v10283_v28 = vld [vmem:[%s10181_s25 + $0x48] sm:$0xff]  ;;  %v6448_v29 = vld [vmem:[%s9759_s12 + $0xd0] sm:$0xff]  ;;  %v6530_v34 = vld [vmem:[%s9759_s12 + $0x1e0] sm:$0xff] }
 0x127   : > { %8269 = vmatprep.subr.bf16.mxu0 %v10200_v33  ;;  %v6449_v30 = vld [vmem:[%s9759_s12 + $0xd8] sm:$0xff]  ;;  %v10289_v31 = vld [vmem:[%s10181_s25 + $0x50] sm:$0xff]  ;;  %v6531_v35 = vld [vmem:[%s9759_s12 + $0x1e8] sm:$0xff] }
 0x128   : > { %v8236_v36 = vpack.c.bf16 %v6449_v30, %v6448_v29  ;;  %v10297_v37 = vld [vmem:[%s10181_s25 + $0x58] sm:$0xff]  ;;  %v10303_v41 = vld [vmem:[%s10181_s25 + $0x60] sm:$0xff]  ;;  %v8304_v42 = vpack.c.bf16 %v6531_v35, %v6530_v34  ;;  %v10311_v47 = vld [vmem:[%s10181_s25 + $0x68] sm:$0xff] }
 0x129   : > { %8207 = vmatpush3.bf16.msra.mxu1 %v8204_v32  ;;  %v8300_v32 = vpack.c.bf16 %v6529_v25, %v6528_v24  ;;  %v6451_v40 = vld [vmem:[%s9759_s12 + $0xe8] sm:$0xff]  ;;  %v6532_v43 = vld [vmem:[%s9759_s12 + $0x1f0] sm:$0xff]  ;;  %v6453_v49 = vld [vmem:[%s9759_s12 + $0xf8] sm:$0xff] }
 0x12a   : > { %8271 = vmatpush3.bf16.msra.mxu0 %v10200_v33  ;;  %8209 = vmatprep.subr.bf16.mxu1 %v8208_v38  ;;  %v6452_v48 = vld [vmem:[%s9759_s12 + $0xf0] sm:$0xff]  ;;  %v6550_v52 = vld [vmem:[%s9759_s12 + $0x280] sm:$0xff]  ;;  %v6551_v53 = vld [vmem:[%s9759_s12 + $0x288] sm:$0xff] }
 0x12b   : > { %8273 = vmatprep.subr.bf16.mxu0 %v10208_v39  ;;  %v8244_v55 = vpack.c.bf16 %v6453_v49, %v6452_v48  ;;  %v10325_v56 = vld [vmem:[%s10181_s25 + $0x78] sm:$0xff]  ;;  %v10335_v60 = vld [vmem:[%s10181_s25 + $0x88] sm:$0xff]  ;;  %v10339_v61 = vld [vmem:[%s10181_s25 + $0x90] sm:$0xff] }
 0x12c   : > { %v10346_v63 = vld [vmem:[%s10181_s25 + $0x98] sm:$0xff]  ;;  %v10350_v0 = vld [vmem:[%s10181_s25 + $0xa0] sm:$0xff]  ;;  %v10360_v3 = vld [vmem:[%s10181_s25 + $0xb0] sm:$0xff] }
 0x12d   : > { %8211 = vmatpush3.bf16.msra.mxu1 %v8208_v38  ;;  %v6450_v38 = vld [vmem:[%s9759_s12 + $0xe0] sm:$0xff]  ;;  %v10366_v5 = vld [vmem:[%s10181_s25 + $0xb8] sm:$0xff]  ;;  %v6552_v8 = vld [vmem:[%s9759_s12 + $0x290] sm:$0xff] }
 0x12e   : > { %8275 = vmatpush3.bf16.msra.mxu0 %v10208_v39  ;;  %8213 = vmatprep.subr.bf16.mxu1 %v8212_v44  ;;  %v8240_v46 = vpack.c.bf16 %v6451_v40, %v6450_v38  ;;  %v6553_v10 = vld [vmem:[%s9759_s12 + $0x298] sm:$0xff]  ;;  %v10382_v13 = vld [vmem:[%s10181_s25 + $0xd0] sm:$0xff]  ;;  %v6555_v18 = vld [vmem:[%s9759_s12 + $0x2a8] sm:$0xff] }
 0x12f   : > { %8277 = vmatprep.subr.bf16.mxu0 %v10216_v45  ;;  %v8348_v15 = vpack.c.bf16 %v6553_v10, %v6552_v8  ;;  %v10390_v19 = vld [vmem:[%s10181_s25 + $0xd8] sm:$0xff]  ;;  %v6556_v25 = vld [vmem:[%s9759_s12 + $0x2b0] sm:$0xff]  ;;  %v10402_v29 = vld [vmem:[%s10181_s25 + $0xe8] sm:$0xff] }
 0x130   : > { %v10406_v30 = vld [vmem:[%s10181_s25 + $0xf0] sm:$0xff]  ;;  %v6559_v35 = vld [vmem:[%s9759_s12 + $0x2c8] sm:$0xff]  ;;  %v10418_v38 = vld [vmem:[%s10181_s25 + $0x100] sm:$0xff] }
 0x131   : > { %8215 = vmatpush3.bf16.msra.mxu1 %v8212_v44  ;;  %v6533_v44 = vld [vmem:[%s9759_s12 + $0x1f8] sm:$0xff]  ;;  %v6558_v34 = vld [vmem:[%s9759_s12 + $0x2c0] sm:$0xff] }
 0x132   : > { %8279 = vmatpush3.bf16.msra.mxu0 %v10216_v45  ;;  %8217 = vmatprep.subr.bf16.mxu1 %v8216_v50  ;;  %v8360_v40 = vpack.c.bf16 %v6559_v35, %v6558_v34  ;;  %v6562_v49 = vld [vmem:[%s9759_s12 + $0x2e0] sm:$0xff]  ;;  %v6565_v8 = vld [vmem:[%s9759_s12 + $0x2f8] sm:$0xff] }
 0x133   : > { %8281 = vmatprep.subr.bf16.mxu0 %v8280_v51  ;;  %v10450_v10 = vld [vmem:[%s10181_s25 + $0x128] sm:$0xff]  ;;  %v10478_v35 = vld [vmem:[%s10181_s25 + $0x150] sm:$0xff] }
 0x134   : > { %7281 = vmatmul.mubr.f32.vlgmr.msra.gmra.mrb[0].mxu1 %v10227_v54  ;;  %v10474_v34 = vld [vmem:[%s10181_s25 + $0x148] sm:$0xff] }
 0x135   : > { %7489 = vmatmul.mubr.f32.vlgmr.msra.gmra.mrb[0].mxu0 %v10227_v54  ;;  %8219 = vmatpush3.bf16.msra.mxu1 %v8216_v50  ;;  %v10317_v50 = vld [vmem:[%s10181_s25 + $0x70] sm:$0xff] }
 0x136   : > { %8283 = vmatpush3.bf16.msra.mxu0 %v8280_v51  ;;  %7283 = vmatprep.mubr.f32.mxu1 %v10233_v57  ;;  %v8308_v51 = vpack.c.bf16 %v6533_v44, %v6532_v43  ;;  %v6561_v43 = vld [vmem:[%s9759_s12 + $0x2d8] sm:$0xff] }
 0x137   : > { %7491 = vmatprep.mubr.f32.mxu0 %v10233_v57  ;;  %8285 = vmatprep.subr.bf16.mxu0 %v8284_v58  ;;  %v10426_v44 = vld [vmem:[%s10181_s25 + $0x108] sm:$0xff] }
 0x138   : > { %7284 = vmatmul.mubr.f32.gmra.mrb[2].mxu1 %v10240_v62  ;;  %8221 = vmatprep.subr.bf16.mxu1 %v8220_v59 }
 0x139   : > { %7492 = vmatmul.mubr.f32.gmra.mrb[2].mxu0 %v10240_v62  ;;  %7286 = vmatprep.mubr.f32.mxu1 %v10246_v1 }
 0x13a   : > { %7494 = vmatprep.mubr.f32.mxu0 %v10246_v1  ;;  %8287 = vmatpush3.bf16.msra.mxu0 %v8284_v58  ;;  %v10329_v58 = vld [vmem:[%s10181_s25 + $0x80] sm:$0xff] }
 0x13b   : > { %8289 = vmatprep.subr.bf16.mxu0 %v8288_v2  ;;  %8223 = vmatpush3.bf16.msra.mxu1 %v8220_v59  ;;  %v8344_v59 = vpack.c.bf16 %v6551_v53, %v6550_v52  ;;  %v10438_v52 = vld [vmem:[%s10181_s25 + $0x118] sm:$0xff]  ;;  %v10442_v53 = vld [vmem:[%s10181_s25 + $0x120] sm:$0xff] }
 0x13c   : > { %7287 = vmatmul.mubr.f32.gmra.mrb[4].mxu1 %v10255_v7  ;;  %8225 = vmatprep.subr.bf16.mxu1 %v8224_v6 }
 0x13d   : > { %7495 = vmatmul.mubr.f32.gmra.mrb[4].mxu0 %v10255_v7  ;;  %7289 = vmatprep.mubr.f32.mxu1 %v10261_v11 }
 0x13e   : > { %7497 = vmatprep.mubr.f32.mxu0 %v10261_v11  ;;  %8291 = vmatpush3.bf16.msra.mxu0 %v8288_v2  ;;  %v10356_v2 = vld [vmem:[%s10181_s25 + $0xa8] sm:$0xff] }
 0x13f   : > { %8293 = vmatprep.subr.bf16.mxu0 %v8292_v12  ;;  %8227 = vmatpush3.bf16.msra.mxu1 %v8224_v6  ;;  %v10370_v6 = vld [vmem:[%s10181_s25 + $0xc0] sm:$0xff] }
 0x140   : > { %7290 = vmatmul.mubr.f32.gmra.mrb[6].mxu1 %v10269_v17  ;;  %8229 = vmatprep.subr.bf16.mxu1 %v8228_v16 }
 0x141   : > { %7498 = vmatmul.mubr.f32.gmra.mrb[6].mxu0 %v10269_v17  ;;  %7292 = vmatprep.mubr.f32.mxu1 %v10275_v21 }
 0x142   : > { %7500 = vmatprep.mubr.f32.mxu0 %v10275_v21  ;;  %8295 = vmatpush3.bf16.msra.mxu0 %v8292_v12  ;;  %v10378_v12 = vld [vmem:[%s10181_s25 + $0xc8] sm:$0xff] }
 0x143   : > { %8297 = vmatprep.subr.bf16.mxu0 %v8296_v22  ;;  %8231 = vmatpush3.bf16.msra.mxu1 %v8228_v16  ;;  %v6554_v16 = vld [vmem:[%s9759_s12 + $0x2a0] sm:$0xff] }
 0x144   : > { %7293 = vmatmul.mubr.f32.gmra.mrb[8].mxu1 %v10283_v28  ;;  %8233 = vmatprep.subr.bf16.mxu1 %v8232_v26  ;;  %v8352_v24 = vpack.c.bf16 %v6555_v18, %v6554_v16  ;;  %v6614_v18 = vld [vmem:[%s9759_s12 + $0x300] sm:$0xff] }
 0x145   : > { %7501 = vmatmul.mubr.f32.gmra.mrb[8].mxu0 %v10283_v28  ;;  %7295 = vmatprep.mubr.f32.mxu1 %v10289_v31 }
 0x146   : > { %7503 = vmatprep.mubr.f32.mxu0 %v10289_v31  ;;  %8299 = vmatpush3.bf16.msra.mxu0 %v8296_v22  ;;  %v10394_v22 = vld [vmem:[%s10181_s25 + $0xe0] sm:$0xff] }
 0x147   : > { %8301 = vmatprep.subr.bf16.mxu0 %v8300_v32  ;;  %8235 = vmatpush3.bf16.msra.mxu1 %v8232_v26  ;;  %v6557_v26 = vld [vmem:[%s9759_s12 + $0x2b8] sm:$0xff] }
 0x148   : > { %7296 = vmatmul.mubr.f32.gmra.mrb[10].mxu1 %v10297_v37  ;;  %8237 = vmatprep.subr.bf16.mxu1 %v8236_v36 }
 0x149   : > { %7504 = vmatmul.mubr.f32.gmra.mrb[10].mxu0 %v10297_v37  ;;  %7298 = vmatprep.mubr.f32.mxu1 %v10303_v41 }
 0x14a   : > { %7506 = vmatprep.mubr.f32.mxu0 %v10303_v41  ;;  %8303 = vmatpush3.bf16.msra.mxu0 %v8300_v32  ;;  %v8356_v32 = vpack.c.bf16 %v6557_v26, %v6556_v25  ;;  %v10462_v25 = vld [vmem:[%s10181_s25 + $0x138] sm:$0xff]  ;;  %v10466_v26 = vld [vmem:[%s10181_s25 + $0x140] sm:$0xff] }
 0x14b   : > { %8305 = vmatprep.subr.bf16.mxu0 %v8304_v42  ;;  %8239 = vmatpush3.bf16.msra.mxu1 %v8236_v36  ;;  %v10414_v36 = vld [vmem:[%s10181_s25 + $0xf8] sm:$0xff] }
 0x14c   : > { %7299 = vmatmul.mubr.f32.gmra.mrb[12].mxu1 %v10311_v47  ;;  %8241 = vmatprep.subr.bf16.mxu1 %v8240_v46 }
 0x14d   : > { %7507 = vmatmul.mubr.f32.gmra.mrb[12].mxu0 %v10311_v47  ;;  %7301 = vmatprep.mubr.f32.mxu1 %v10317_v50 }
 0x14e   : > { %7509 = vmatprep.mubr.f32.mxu0 %v10317_v50  ;;  %8307 = vmatpush3.bf16.msra.mxu0 %v8304_v42  ;;  %v6560_v42 = vld [vmem:[%s9759_s12 + $0x2d0] sm:$0xff] }
 0x14f   : > { %8309 = vmatprep.subr.bf16.mxu0 %v8308_v51  ;;  %8243 = vmatpush3.bf16.msra.mxu1 %v8240_v46  ;;  %v10430_v46 = vld [vmem:[%s10181_s25 + $0x110] sm:$0xff]  ;;  %v8364_v48 = vpack.c.bf16 %v6561_v43, %v6560_v42  ;;  %v10489_v42 = vld [vmem:[%s10181_s25 + $0x160] sm:$0xff]  ;;  %v10495_v43 = vld [vmem:[%s10181_s25 + $0x168] sm:$0xff] }
 0x150   : > { %7302 = vmatmul.mubr.f32.gmra.mrb[14].mxu1 %v10325_v56  ;;  %8245 = vmatprep.subr.bf16.mxu1 %v8244_v55 }
 0x151   : > { %7510 = vmatmul.mubr.f32.gmra.mrb[14].mxu0 %v10325_v56  ;;  %7304 = vmatprep.mubr.f32.mxu1 %v10329_v58 }
 0x152   : > { %7512 = vmatprep.mubr.f32.mxu0 %v10329_v58  ;;  %8311 = vmatpush3.bf16.msra.mxu0 %v8308_v51  ;;  %v6563_v51 = vld [vmem:[%s9759_s12 + $0x2e8] sm:$0xff] }
 0x153   : > { %8345 = vmatprep.subr.bf16.mxu0 %v8344_v59  ;;  %8247 = vmatpush3.bf16.msra.mxu1 %v8244_v55  ;;  %v8368_v55 = vpack.c.bf16 %v6563_v51, %v6562_v49  ;;  %v10505_v49 = vld [vmem:[%s10181_s25 + $0x178] sm:$0xff] }
 0x154   : > { %7305 = vmatmul.mubr.f32.gmra.mrb[16].mxu1 %v10335_v60  ;;  %8472 = vmatprep.subr.bf16.mxu1 %v10155_v4 }
 0x155   : > { %7513 = vmatmul.mubr.f32.gmra.mrb[16].mxu0 %v10335_v60  ;;  %7307 = vmatprep.mubr.f32.mxu1 %v10339_v61 }
 0x156   : > { %7515 = vmatprep.mubr.f32.mxu0 %v10339_v61 }
 0x158   : > { %7308 = vmatmul.mubr.f32.gmra.mrb[18].mxu1 %v10346_v63 }
 0x159   : > { %7516 = vmatmul.mubr.f32.gmra.mrb[18].mxu0 %v10346_v63  ;;  %7310 = vmatprep.mubr.f32.mxu1 %v10350_v0 }
 0x15a   : > { %7518 = vmatprep.mubr.f32.mxu0 %v10350_v0 }
 0x15c   : > { %7311 = vmatmul.mubr.f32.gmra.mrb[20].mxu1 %v10356_v2 }
 0x15d   : > { %7519 = vmatmul.mubr.f32.gmra.mrb[20].mxu0 %v10356_v2  ;;  %7313 = vmatprep.mubr.f32.mxu1 %v10360_v3 }
 0x15e   : > { %7521 = vmatprep.mubr.f32.mxu0 %v10360_v3 }
 0x160   : > { %7314 = vmatmul.mubr.f32.gmra.mrb[22].mxu1 %v10366_v5 }
 0x161   : > { %7522 = vmatmul.mubr.f32.gmra.mrb[22].mxu0 %v10366_v5  ;;  %7316 = vmatprep.mubr.f32.mxu1 %v10370_v6 }
 0x162   : > { %7592 = vmatprep.mubr.f32.mxu0 %v10240_v62 }
 0x164   : > { %7317 = vmatmul.mubr.f32.gmra.mrb[24].mxu1 %v10378_v12 }
 0x165   : > { %7593 = vmatmul.mubr.f32.vlgmr.msra.gmra.mrb[24].mxu0 %v10246_v1  ;;  %7319 = vmatprep.mubr.f32.mxu1 %v10382_v13 }
 0x166   : > { %8347 = vmatpush3.bf16.msra.mxu0 %v8344_v59  ;;  %7595 = vmatprep.mubr.f32.mxu0 %v10255_v7  ;;  %v6564_v59 = vld [vmem:[%s9759_s12 + $0x2f0] sm:$0xff] }
 0x167   : > { %8349 = vmatprep.subr.bf16.mxu0 %v8348_v15  ;;  %v8372_v16 = vpack.c.bf16 %v6565_v8, %v6564_v59  ;;  %v6623_v59 = vld [vmem:[%s9759_s12 + $0x348] sm:$0xff]  ;;  %v6625_v8 = vld [vmem:[%s9759_s12 + $0x358] sm:$0xff] }
 0x168   : > { %7320 = vmatmul.mubr.f32.gmra.mrb[26].mxu1 %v10390_v19 }
 0x169   : > { %7596 = vmatmul.mubr.f32.gmra.mrb[26].mxu0 %v10261_v11  ;;  %7322 = vmatprep.mubr.f32.mxu1 %v10394_v22 }
 0x16a   : > { %7598 = vmatprep.mubr.f32.mxu0 %v10269_v17  ;;  %8351 = vmatpush3.bf16.msra.mxu0 %v8348_v15  ;;  %v10454_v15 = vld [vmem:[%s10181_s25 + $0x130] sm:$0xff] }
 0x16b   : > { %8353 = vmatprep.subr.bf16.mxu0 %v8352_v24 }
 0x16c   : > { %7323 = vmatmul.mubr.f32.gmra.mrb[28].mxu1 %v10402_v29 }
 0x16d   : > { %7599 = vmatmul.mubr.f32.gmra.mrb[28].mxu0 %v10275_v21  ;;  %7325 = vmatprep.mubr.f32.mxu1 %v10406_v30 }
 0x16e   : > { %7601 = vmatprep.mubr.f32.mxu0 %v10283_v28  ;;  %8355 = vmatpush3.bf16.msra.mxu0 %v8352_v24  ;;  %v6615_v24 = vld [vmem:[%s9759_s12 + $0x308] sm:$0xff] }
 0x16f   : > { %8357 = vmatprep.subr.bf16.mxu0 %v8356_v32 }
 0x170   : > { %7326 = vmatmul.mubr.f32.gmra.mrb[30].mxu1 %v10414_v36 }
 0x171   : > { %7602 = vmatmul.mubr.f32.gmra.mrb[30].mxu0 %v10289_v31  ;;  %7328 = vmatprep.mubr.f32.mxu1 %v10418_v38 }
 0x172   : > { %7604 = vmatprep.mubr.f32.mxu0 %v10297_v37  ;;  %8359 = vmatpush3.bf16.msra.mxu0 %v8356_v32  ;;  %v10468_v32 = vpack.c.bf16 %v6615_v24, %v6614_v18  ;;  %v6629_v18 = vld [vmem:[%s9759_s12 + $0x378] sm:$0xff]  ;;  %v6646_v24 = vld [vmem:[%s9759_s12 + $0x400] sm:$0xff] }
 0x173   : > { %8361 = vmatprep.subr.bf16.mxu0 %v8360_v40 }
 0x174   : > { %7329 = vmatmul.mubr.f32.gmra.mrb[32].mxu1 %v10426_v44 }
 0x175   : > { %7605 = vmatmul.mubr.f32.gmra.mrb[32].mxu0 %v10303_v41  ;;  %7331 = vmatprep.mubr.f32.mxu1 %v10430_v46 }
 0x176   : > { %7607 = vmatprep.mubr.f32.mxu0 %v10311_v47  ;;  %8363 = vmatpush3.bf16.msra.mxu0 %v8360_v40  ;;  %v10485_v40 = vld [vmem:[%s10181_s25 + $0x158] sm:$0xff] }
 0x177   : > { %8365 = vmatprep.subr.bf16.mxu0 %v8364_v48 }
 0x178   : > { %7332 = vmatmul.mubr.f32.gmra.mrb[34].mxu1 %v10438_v52 }
 0x179   : > { %7608 = vmatmul.mubr.f32.gmra.mrb[34].mxu0 %v10317_v50  ;;  %7334 = vmatprep.mubr.f32.mxu1 %v10442_v53 }
 0x17a   : > { %7610 = vmatprep.mubr.f32.mxu0 %v10325_v56  ;;  %8367 = vmatpush3.bf16.msra.mxu0 %v8364_v48  ;;  %v10499_v48 = vld [vmem:[%s10181_s25 + $0x170] sm:$0xff] }
 0x17b   : > { %8369 = vmatprep.subr.bf16.mxu0 %v8368_v55 }
 0x17c   : > { %7335 = vmatmul.mubr.f32.gmra.mrb[36].mxu1 %v10450_v10 }
 0x17d   : > { %7611 = vmatmul.mubr.f32.gmra.mrb[36].mxu0 %v10329_v58  ;;  %7337 = vmatprep.mubr.f32.mxu1 %v10454_v15 }
 0x17e   : > { %7613 = vmatprep.mubr.f32.mxu0 %v10335_v60  ;;  %8371 = vmatpush3.bf16.msra.mxu0 %v8368_v55  ;;  %v6621_v55 = vld [vmem:[%s9759_s12 + $0x338] sm:$0xff] }
 0x17f   : > { %8373 = vmatprep.subr.bf16.mxu0 %v8372_v16 }
 0x180   : > { %7338 = vmatmul.mubr.f32.gmra.mrb[38].mxu1 %v10462_v25 }
 0x181   : > { %7614 = vmatmul.mubr.f32.gmra.mrb[38].mxu0 %v10339_v61  ;;  %7340 = vmatprep.mubr.f32.mxu1 %v10466_v26 }
 0x182   : > { %7616 = vmatprep.mubr.f32.mxu0 %v10346_v63  ;;  %8375 = vmatpush3.bf16.msra.mxu0 %v8372_v16  ;;  %v6627_v16 = vld [vmem:[%s9759_s12 + $0x368] sm:$0xff] }
 0x183   : > { %8377 = vmatprep.subr.bf16.mxu0 %v10468_v32 }
 0x184   : > { %7341 = vmatmul.mubr.f32.gmra.mrb[40].mxu1 %v10474_v34 }
 0x185   : > { %7617 = vmatmul.mubr.f32.gmra.mrb[40].mxu0 %v10350_v0  ;;  %7343 = vmatprep.mubr.f32.mxu1 %v10478_v35 }
 0x186   : > { %7619 = vmatprep.mubr.f32.mxu0 %v10356_v2 }
 0x188   : > { %7344 = vmatmul.mubr.f32.gmra.mrb[42].mxu1 %v10485_v40 }
 0x189   : > { %7620 = vmatmul.mubr.f32.gmra.mrb[42].mxu0 %v10360_v3  ;;  %7346 = vmatprep.mubr.f32.mxu1 %v10489_v42 }
 0x18a   : > { %7622 = vmatprep.mubr.f32.mxu0 %v10366_v5 }
 0x18c   : > { %7347 = vmatmul.mubr.f32.gmra.mrb[44].mxu1 %v10495_v43 }
 0x18d   : > { %7623 = vmatmul.mubr.f32.gmra.mrb[44].mxu0 %v10370_v6  ;;  %7349 = vmatprep.mubr.f32.mxu1 %v10499_v48 }
 0x18e   : > { %7625 = vmatprep.mubr.f32.mxu0 %v10378_v12 }
 0x190   : > { %7350 = vmatmul.mubr.f32.gmra.mrb[46].mxu1 %v10505_v49 }
 0x191   : > { %7626 = vmatmul.mubr.f32.gmra.mrb[46].mxu0 %v10382_v13  ;;  %7384 = vmatprep.mubr.f32.mxu1 %v10184_v23  ;;  %v10576_v23 = vld [vmem:[%s10181_s25 + $0x188] sm:$0xff] }
 0x192   : > { %7628 = vmatprep.mubr.f32.mxu0 %v10390_v19 }
 0x194   : > { %7385 = vmatmul.mubr.f32.vlgmr.msra.gmra.mrb[48].mxu1 %v10227_v54  ;;  %v6618_v54 = vld [vmem:[%s9759_s12 + $0x320] sm:$0xff] }
 0x195   : > { %7629 = vmatmul.mubr.f32.gmra.mrb[48].mxu0 %v10394_v22  ;;  %8480 = vmatpush3.bf16.msra.mxu1 %v10155_v4  ;;  %v6534_v4 = vld [vmem:[%s9759_s12 + $0x200] sm:$0xff] }
 0x196   : > { %7387 = vmatprep.mubr.f32.mxu1 %v10233_v57  ;;  %7631 = vmatprep.mubr.f32.mxu0 %v10402_v29  ;;  %v6619_v57 = vld [vmem:[%s9759_s12 + $0x328] sm:$0xff] }
 0x197   : > { %8473 = vmatprep.subr.bf16.mxu1 %v10160_v9  ;;  %v8384_v51 = vpack.c.bf16 %v6619_v57, %v6618_v54  ;;  %v1338_v54 = vld [vmem:[#allocation3 + $0x18] sm:$0xff] }
 0x198   : > { %7388 = vmatmul.mubr.f32.gmra.mrb[50].mxu1 %v10240_v62 }
 0x199   : > { %7632 = vmatmul.mubr.f32.gmra.mrb[50].mxu0 %v10406_v30  ;;  %7390 = vmatprep.mubr.f32.mxu1 %v10246_v1 }
 0x19a   : > { %7634 = vmatprep.mubr.f32.mxu0 %v10414_v36  ;;  %8481 = vmatpush3.bf16.msra.mxu1 %v10160_v9  ;;  %v6535_v9 = vld [vmem:[%s9759_s12 + $0x208] sm:$0xff] }
 0x19b   : > { %8474 = vmatprep.subr.bf16.mxu1 %v10169_v14 }
 0x19c   : > { %7391 = vmatmul.mubr.f32.gmra.mrb[52].mxu1 %v10255_v7 }
 0x19d   : > { %7635 = vmatmul.mubr.f32.gmra.mrb[52].mxu0 %v10418_v38  ;;  %7393 = vmatprep.mubr.f32.mxu1 %v10261_v11 }
 0x19e   : > { %7637 = vmatprep.mubr.f32.mxu0 %v10426_v44  ;;  %8482 = vmatpush3.bf16.msra.mxu1 %v10169_v14  ;;  %v10556_v14 = vpack.c.bf16 %v6535_v9, %v6534_v4  ;;  %v1335_v4 = vld [vmem:[#allocation3] sm:$0xff] }
 0x19f   : > { %8475 = vmatprep.subr.bf16.mxu1 %v10177_v20 }
 0x1a0   : > { %7394 = vmatmul.mubr.f32.gmra.mrb[54].mxu1 %v10269_v17 }
 0x1a1   : > { %7638 = vmatmul.mubr.f32.gmra.mrb[54].mxu0 %v10430_v46  ;;  %7396 = vmatprep.mubr.f32.mxu1 %v10275_v21 }
 0x1a2   : > { %7640 = vmatprep.mubr.f32.mxu0 %v10438_v52  ;;  %8483 = vmatpush3.bf16.msra.mxu1 %v10177_v20  ;;  %v10573_v20 = vld [vmem:[%s10181_s25 + $0x180] sm:$0xff] }
 0x1a3   : > { %8476 = vmatprep.subr.bf16.mxu1 %v10192_v27 }
 0x1a4   : > { %7397 = vmatmul.mubr.f32.gmra.mrb[56].mxu1 %v10283_v28 }
 0x1a5   : > { %7641 = vmatmul.mubr.f32.gmra.mrb[56].mxu0 %v10442_v53  ;;  %7399 = vmatprep.mubr.f32.mxu1 %v10289_v31 }
 0x1a6   : > { %7643 = vmatprep.mubr.f32.mxu0 %v10450_v10  ;;  %8484 = vmatpush3.bf16.msra.mxu1 %v10192_v27  ;;  %v10583_v27 = vld [vmem:[%s10181_s25 + $0x190] sm:$0xff] }
 0x1a7   : > { %8477 = vmatprep.subr.bf16.mxu1 %v10200_v33 }
 0x1a8   : > { %7400 = vmatmul.mubr.f32.gmra.mrb[58].mxu1 %v10297_v37 }
 0x1a9   : > { %7644 = vmatmul.mubr.f32.gmra.mrb[58].mxu0 %v10454_v15  ;;  %7402 = vmatprep.mubr.f32.mxu1 %v10303_v41 }
 0x1aa   : > { %7646 = vmatprep.mubr.f32.mxu0 %v10462_v25  ;;  %8485 = vmatpush3.bf16.msra.mxu1 %v10200_v33  ;;  %v6616_v33 = vld [vmem:[%s9759_s12 + $0x310] sm:$0xff] }
 0x1ab   : > { %8478 = vmatprep.subr.bf16.mxu1 %v10208_v39 }
 0x1ac   : > { %7403 = vmatmul.mubr.f32.gmra.mrb[60].mxu1 %v10311_v47 }
 0x1ad   : > { %7647 = vmatmul.mubr.f32.gmra.mrb[60].mxu0 %v10466_v26  ;;  %7405 = vmatprep.mubr.f32.mxu1 %v10317_v50 }
 0x1ae   : > { %7649 = vmatprep.mubr.f32.mxu0 %v10474_v34  ;;  %8486 = vmatpush3.bf16.msra.mxu1 %v10208_v39  ;;  %v6617_v39 = vld [vmem:[%s9759_s12 + $0x318] sm:$0xff] }
 0x1af   : > { %8479 = vmatprep.subr.bf16.mxu1 %v10216_v45 }
 0x1b0   : > { %7406 = vmatmul.mubr.f32.gmra.mrb[62].mxu1 %v10325_v56 }
 0x1b1   : > { %7650 = vmatmul.mubr.f32.gmra.mrb[62].mxu0 %v10478_v35  ;;  %7408 = vmatprep.mubr.f32.mxu1 %v10329_v58 }
 0x1b2   : > { %7652 = vmatprep.mubr.f32.mxu0 %v10485_v40  ;;  %8487 = vmatpush3.bf16.msra.mxu1 %v10216_v45  ;;  %v8380_v45 = vpack.c.bf16 %v6617_v39, %v6616_v33  ;;  %v6549_v39 = vld [vmem:[%s9759_s12 + $0x278] sm:$0xff] }
 0x1b3   : > { %8313 = vmatprep.subr.bf16.mxu1 %v10556_v14 }
 0x1b4   : > { %7409 = vmatmul.mubr.f32.gmra.mrb[64].mxu1 %v10335_v60 }
 0x1b5   : > { %7653 = vmatmul.mubr.f32.gmra.mrb[64].mxu0 %v10489_v42  ;;  %7411 = vmatprep.mubr.f32.mxu1 %v10339_v61 }
 0x1b6   : > { %7655 = vmatprep.mubr.f32.mxu0 %v10495_v43 }
 0x1b8   : > { %7412 = vmatmul.mubr.f32.gmra.mrb[66].mxu1 %v10346_v63 }
 0x1b9   : > { %7656 = vmatmul.mubr.f32.gmra.mrb[66].mxu0 %v10499_v48  ;;  %7414 = vmatprep.mubr.f32.mxu1 %v10350_v0 }
 0x1ba   : > { %7658 = vmatprep.mubr.f32.mxu0 %v10505_v49 }
 0x1bc   : > { %7415 = vmatmul.mubr.f32.gmra.mrb[68].mxu1 %v10356_v2 }
 0x1bd   : > { %7659 = vmatmul.mubr.f32.gmra.mrb[68].mxu0 %v10573_v20  ;;  %7417 = vmatprep.mubr.f32.mxu1 %v10360_v3 }
 0x1be   : > { %7661 = vmatprep.mubr.f32.mxu0 %v10576_v23 }
 0x1c0   : > { %7418 = vmatmul.mubr.f32.gmra.mrb[70].mxu1 %v10366_v5 }
 0x1c1   : > { %7662 = vmatmul.mubr.f32.gmra.mrb[70].mxu0 %v10583_v27  ;;  %7420 = vmatprep.mubr.f32.mxu1 %v10370_v6 }
 0x1c2   : > { %7800 = vmatprep.mubr.f32.mxu0 %v10240_v62  ;;  %v6620_v62 = vld [vmem:[%s9759_s12 + $0x330] sm:$0xff] }
 0x1c4   : > { %7421 = vmatmul.mubr.f32.gmra.mrb[72].mxu1 %v10378_v12 }
 0x1c5   : > { %7801 = vmatmul.mubr.f32.vlgmr.msra.gmra.mrb[0].mxu0 %v10246_v1  ;;  %7423 = vmatprep.mubr.f32.mxu1 %v10382_v13  ;;  %v8388_v1 = vpack.c.bf16 %v6621_v55, %v6620_v62  ;;  %v6630_v55 = vld [vmem:[%s9759_s12 + $0x380] sm:$0xff] }
 0x1c6   : > { %8379 = vmatpush3.bf16.msra.mxu0 %v10468_v32  ;;  %7803 = vmatprep.mubr.f32.mxu0 %v10255_v7  ;;  %v6622_v7 = vld [vmem:[%s9759_s12 + $0x340] sm:$0xff]  ;;  %v6547_v32 = vld [vmem:[%s9759_s12 + $0x268] sm:$0xff] }
 0x1c7   : > { %8381 = vmatprep.subr.bf16.mxu0 %v8380_v45 }
 0x1c8   : > { %7424 = vmatmul.mubr.f32.gmra.mrb[74].mxu1 %v10390_v19 }
 0x1c9   : > { %7804 = vmatmul.mubr.f32.gmra.mrb[2].mxu0 %v10261_v11  ;;  %7426 = vmatprep.mubr.f32.mxu1 %v10394_v22  ;;  %v8392_v11 = vpack.c.bf16 %v6623_v59, %v6622_v7  ;;  %v1340_v59 = vld [vmem:[#allocation3 + $0x28] sm:$0xff] }
 0x1ca   : > { %7806 = vmatprep.mubr.f32.mxu0 %v10269_v17  ;;  %8383 = vmatpush3.bf16.msra.mxu0 %v8380_v45  ;;  %v6624_v17 = vld [vmem:[%s9759_s12 + $0x350] sm:$0xff] }
 0x1cb   : > { %8385 = vmatprep.subr.bf16.mxu0 %v8384_v51 }
 0x1cc   : > { %7427 = vmatmul.mubr.f32.gmra.mrb[76].mxu1 %v10402_v29 }
 0x1cd   : > { %7807 = vmatmul.mubr.f32.gmra.mrb[4].mxu0 %v10275_v21  ;;  %7429 = vmatprep.mubr.f32.mxu1 %v10406_v30  ;;  %v8396_v21 = vpack.c.bf16 %v6625_v8, %v6624_v17 }
 0x1ce   : > { %7809 = vmatprep.mubr.f32.mxu0 %v10283_v28  ;;  %8387 = vmatpush3.bf16.msra.mxu0 %v8384_v51  ;;  %v6626_v28 = vld [vmem:[%s9759_s12 + $0x360] sm:$0xff] }
 0x1cf   : > { %8389 = vmatprep.subr.bf16.mxu0 %v8388_v1 }
 0x1d0   : > { %7430 = vmatmul.mubr.f32.gmra.mrb[78].mxu1 %v10414_v36 }
 0x1d1   : > { %7810 = vmatmul.mubr.f32.gmra.mrb[6].mxu0 %v10289_v31  ;;  %7432 = vmatprep.mubr.f32.mxu1 %v10418_v38  ;;  %v8400_v31 = vpack.c.bf16 %v6627_v16, %v6626_v28  ;;  %v1342_v28 = vld [vmem:[#allocation3 + $0x38] sm:$0xff] }
 0x1d2   : > { %7812 = vmatprep.mubr.f32.mxu0 %v10297_v37  ;;  %8391 = vmatpush3.bf16.msra.mxu0 %v8388_v1  ;;  %v6628_v37 = vld [vmem:[%s9759_s12 + $0x370] sm:$0xff]  ;;  %v6631_v1 = vld [vmem:[%s9759_s12 + $0x388] sm:$0xff] }
 0x1d3   : > { %8393 = vmatprep.subr.bf16.mxu0 %v8392_v11  ;;  %v10702_v17 = vpack.c.bf16 %v6631_v1, %v6630_v55  ;;  %v9270_v55 = vld [vmem:[%s10181_s25 + $0x30] sm:$0xff] }
 0x1d4   : > { %7433 = vmatmul.mubr.f32.gmra.mrb[80].mxu1 %v10426_v44 }
 0x1d5   : > { %7813 = vmatmul.mubr.f32.gmra.mrb[8].mxu0 %v10303_v41  ;;  %7435 = vmatprep.mubr.f32.mxu1 %v10430_v46  ;;  %v8404_v41 = vpack.c.bf16 %v6629_v18, %v6628_v37  ;;  %v1344_v18 = vld [vmem:[#allocation3 + $0x48] sm:$0xff] }
 0x1d6   : > { %7815 = vmatprep.mubr.f32.mxu0 %v10311_v47  ;;  %8395 = vmatpush3.bf16.msra.mxu0 %v8392_v11  ;;  %v6647_v47 = vld [vmem:[%s9759_s12 + $0x408] sm:$0xff] }
 0x1d7   : > { %8397 = vmatprep.subr.bf16.mxu0 %v8396_v21 }
 0x1d8   : > { %7436 = vmatmul.mubr.f32.gmra.mrb[82].mxu1 %v10438_v52 }
 0x1d9   : > { %7816 = vmatmul.mubr.f32.gmra.mrb[10].mxu0 %v10317_v50  ;;  %7438 = vmatprep.mubr.f32.mxu1 %v10442_v53  ;;  %v10634_v50 = vpack.c.bf16 %v6647_v47, %v6646_v24 }
 0x1da   : > { %7818 = vmatprep.mubr.f32.mxu0 %v10325_v56  ;;  %8399 = vmatpush3.bf16.msra.mxu0 %v8396_v21  ;;  %v6536_v56 = vld [vmem:[%s9759_s12 + $0x210] sm:$0xff] }
 0x1db   : > { %8401 = vmatprep.subr.bf16.mxu0 %v8400_v31 }
 0x1dc   : > { %7439 = vmatmul.mubr.f32.gmra.mrb[84].mxu1 %v10450_v10 }
 0x1dd   : > { %7819 = vmatmul.mubr.f32.gmra.mrb[12].mxu0 %v10329_v58  ;;  %7441 = vmatprep.mubr.f32.mxu1 %v10454_v15  ;;  %v6537_v58 = vld [vmem:[%s9759_s12 + $0x218] sm:$0xff] }
 0x1de   : > { %7821 = vmatprep.mubr.f32.mxu0 %v10335_v60  ;;  %8403 = vmatpush3.bf16.msra.mxu0 %v8400_v31  ;;  %v8316_v60 = vpack.c.bf16 %v6537_v58, %v6536_v56 }
 0x1df   : > { %8405 = vmatprep.subr.bf16.mxu0 %v8404_v41 }
 0x1e0   : > { %7442 = vmatmul.mubr.f32.gmra.mrb[86].mxu1 %v10462_v25 }
 0x1e1   : > { %7822 = vmatmul.mubr.f32.gmra.mrb[14].mxu0 %v10339_v61  ;;  %7444 = vmatprep.mubr.f32.mxu1 %v10466_v26  ;;  %v6538_v61 = vld [vmem:[%s9759_s12 + $0x220] sm:$0xff] }
 0x1e2   : > { %7824 = vmatprep.mubr.f32.mxu0 %v10346_v63  ;;  %8407 = vmatpush3.bf16.msra.mxu0 %v8404_v41  ;;  %v6539_v63 = vld [vmem:[%s9759_s12 + $0x228] sm:$0xff] }
 0x1e3   : > { %8441 = vmatprep.subr.bf16.mxu0 %v10634_v50 }
 0x1e4   : > { %7445 = vmatmul.mubr.f32.gmra.mrb[88].mxu1 %v10474_v34 }
 0x1e5   : > { %7825 = vmatmul.mubr.f32.gmra.mrb[16].mxu0 %v10350_v0  ;;  %7447 = vmatprep.mubr.f32.mxu1 %v10478_v35  ;;  %v8320_v0 = vpack.c.bf16 %v6539_v63, %v6538_v61  ;;  %v1348_v63 = vld [vmem:[#allocation3 + $0x68] sm:$0xff] }
 0x1e6   : > { %7827 = vmatprep.mubr.f32.mxu0 %v10356_v2  ;;  %v6540_v2 = vld [vmem:[%s9759_s12 + $0x230] sm:$0xff] }
 0x1e8   : > { %7448 = vmatmul.mubr.f32.gmra.mrb[90].mxu1 %v10485_v40 }
 0x1e9   : > { %7828 = vmatmul.mubr.f32.gmra.mrb[18].mxu0 %v10360_v3  ;;  %7450 = vmatprep.mubr.f32.mxu1 %v10489_v42  ;;  %v6541_v3 = vld [vmem:[%s9759_s12 + $0x238] sm:$0xff] }
 0x1ea   : > { %7830 = vmatprep.mubr.f32.mxu0 %v10366_v5  ;;  %v8324_v5 = vpack.c.bf16 %v6541_v3, %v6540_v2  ;;  %v10722_v2 = vld [vmem:[%s10181_s25 + $0x30] sm:$0xff] }
 0x1ec   : > { %7451 = vmatmul.mubr.f32.gmra.mrb[92].mxu1 %v10495_v43 }
 0x1ed   : > { %7831 = vmatmul.mubr.f32.gmra.mrb[20].mxu0 %v10370_v6  ;;  %7453 = vmatprep.mubr.f32.mxu1 %v10499_v48 }
 0x1ee   : > { %7833 = vmatprep.mubr.f32.mxu0 %v10378_v12 }
 0x1f0   : > { %7454 = vmatmul.mubr.f32.gmra.mrb[94].mxu1 %v10505_v49 }
 0x1f1   : > { %7834 = vmatmul.mubr.f32.gmra.mrb[22].mxu0 %v10382_v13  ;;  %7524 = vmatprep.mubr.f32.mxu1 %v10370_v6  ;;  %v6542_v6 = vld [vmem:[%s9759_s12 + $0x240] sm:$0xff] }
 0x1f2   : > { %7836 = vmatprep.mubr.f32.mxu0 %v10390_v19 }
 0x1f4   : > { %7525 = vmatmul.mubr.f32.vlgmr.msra.gmra.mrb[96].mxu1 %v10378_v12  ;;  %v6543_v12 = vld [vmem:[%s9759_s12 + $0x248] sm:$0xff] }
 0x1f5   : > { %7837 = vmatmul.mubr.f32.gmra.mrb[72].mxu0 %v10394_v22  ;;  %8315 = vmatpush3.bf16.msra.mxu1 %v10556_v14 }
 0x1f6   : > { %7527 = vmatprep.mubr.f32.mxu1 %v10382_v13  ;;  %7839 = vmatprep.mubr.f32.mxu0 %v10402_v29  ;;  %v8328_v13 = vpack.c.bf16 %v6543_v12, %v6542_v6  ;;  %v6648_v12 = vld [vmem:[%s9759_s12 + $0x410] sm:$0xff] }
 0x1f7   : > { %8317 = vmatprep.subr.bf16.mxu1 %v8316_v60 }
 0x1f8   : > { %7528 = vmatmul.mubr.f32.gmra.mrb[98].mxu1 %v10390_v19  ;;  %v6544_v19 = vld [vmem:[%s9759_s12 + $0x250] sm:$0xff] }
 0x1f9   : > { %7840 = vmatmul.mubr.f32.gmra.mrb[74].mxu0 %v10406_v30  ;;  %7530 = vmatprep.mubr.f32.mxu1 %v10394_v22  ;;  %v6545_v22 = vld [vmem:[%s9759_s12 + $0x258] sm:$0xff] }
 0x1fa   : > { %8319 = vmatpush3.bf16.msra.mxu1 %v8316_v60  ;;  %7842 = vmatprep.mubr.f32.mxu0 %v10414_v36 }
 0x1fb   : > { %8321 = vmatprep.subr.bf16.mxu1 %v8320_v0 }
 0x1fc   : > { %7531 = vmatmul.mubr.f32.gmra.mrb[100].mxu1 %v10402_v29  ;;  %v8332_v29 = vpack.c.bf16 %v6545_v22, %v6544_v19  ;;  %v1349_v19 = vld [vmem:[#allocation3 + $0x70] sm:$0xff]  ;;  %v10733_v22 = vld [vmem:[%s10181_s25 + $0x38] sm:$0xff] }
 0x1fd   : > { %7843 = vmatmul.mubr.f32.gmra.mrb[76].mxu0 %v10418_v38  ;;  %7533 = vmatprep.mubr.f32.mxu1 %v10406_v30  ;;  %v6546_v30 = vld [vmem:[%s9759_s12 + $0x260] sm:$0xff] }
 0x1fe   : > { %7845 = vmatprep.mubr.f32.mxu0 %v10426_v44  ;;  %8323 = vmatpush3.bf16.msra.mxu1 %v8320_v0  ;;  %v8336_v9 = vpack.c.bf16 %v6547_v32, %v6546_v30  ;;  %v9268_v32 = vld [vmem:[%s10181_s25 + $0x20] sm:$0xff] }
 0x1ff   : > { %8325 = vmatprep.subr.bf16.mxu1 %v8324_v5 }
 0x200   : > { %7534 = vmatmul.mubr.f32.gmra.mrb[102].mxu1 %v10414_v36  ;;  %v1336_v36 = vld [vmem:[#allocation3 + $0x8] sm:$0xff] }
 0x201   : > { %7846 = vmatmul.mubr.f32.gmra.mrb[78].mxu0 %v10430_v46  ;;  %7536 = vmatprep.mubr.f32.mxu1 %v10418_v38 }
 0x202   : > { %7848 = vmatprep.mubr.f32.mxu0 %v10438_v52  ;;  %8327 = vmatpush3.bf16.msra.mxu1 %v8324_v5  ;;  %v6633_v5 = vld [vmem:[%s9759_s12 + $0x398] sm:$0xff] }
 0x203   : > { %8329 = vmatprep.subr.bf16.mxu1 %v8328_v13 }
 0x204   : > { %7537 = vmatmul.mubr.f32.gmra.mrb[104].mxu1 %v10426_v44  ;;  %v6548_v44 = vld [vmem:[%s9759_s12 + $0x270] sm:$0xff] }
 0x205   : > { %7849 = vmatmul.mubr.f32.gmra.mrb[80].mxu0 %v10442_v53  ;;  %7539 = vmatprep.mubr.f32.mxu1 %v10430_v46  ;;  %v1337_v46 = vld [vmem:[#allocation3 + $0x10] sm:$0xff]  ;;  %v8340_v51 = vpack.c.bf16 %v6549_v39, %v6548_v44  ;;  %v6650_v44 = vld [vmem:[%s9759_s12 + $0x420] sm:$0xff]  ;;  %v6651_v39 = vld [vmem:[%s9759_s12 + $0x428] sm:$0xff] }
 0x206   : > { %7851 = vmatprep.mubr.f32.mxu0 %v10450_v10  ;;  %8331 = vmatpush3.bf16.msra.mxu1 %v8328_v13  ;;  %v6649_v13 = vld [vmem:[%s9759_s12 + $0x418] sm:$0xff]  ;;  %v8448_v1 = vpack.c.bf16 %v6651_v39, %v6650_v44  ;;  %v6643_v44 = vld [vmem:[%s9759_s12 + $0x3e8] sm:$0xff] }
 0x207   : > { %v7282_v38 = vpop.f32.mrb[0].mxu1  ;;  %8333 = vmatprep.subr.bf16.mxu1 %v8332_v29 }
 0x208   : > { %v1705_v14 = vadd.f32 %v7282_v38, %v1336_v36  ;;  %v1465_v33 = vpop.f32.mrb[1].mxu1  ;;  %7540 = vmatmul.mubr.f32.gmra.mrb[106].mxu1 %v10438_v52  ;;  %v10737_v36 = vld [vmem:[%s10181_s25 + $0x40] sm:$0xff] }
 0x209   : > { %v1704_v45 = vadd.f32 %v1465_v33, %v1335_v4  ;;  %7852 = vmatmul.mubr.f32.gmra.mrb[82].mxu0 %v10454_v15  ;;  %7542 = vmatprep.mubr.f32.mxu1 %v10442_v53  ;;  %v1339_v53 = vld [vmem:[#allocation3 + $0x20] sm:$0xff]  ;;  %v8444_v4 = vpack.c.bf16 %v6649_v13, %v6648_v12  ;;  %v1352_v33 = vld [vmem:[#allocation3 + $0x88] sm:$0xff]  ;;  %v6656_v13 = vld [vmem:[%s9759_s12 + $0x450] sm:$0xff] }
 0x20a   : > { %8489 = vst [vmem:[#allocation3 + $0x8] sm:$0xff] %v1705_v14  ;;  %7854 = vmatprep.mubr.f32.mxu0 %v10462_v25  ;;  %8335 = vmatpush3.bf16.msra.mxu1 %v8332_v29  ;;  %v6634_v38 = vld [vmem:[%s9759_s12 + $0x3a0] sm:$0xff]  ;;  %v9275_v12 = vld [vmem:[%s10181_s25 + $0x58] sm:$0xff] }
 0x20b   : > { %8493 = vst [vmem:[#allocation3] sm:$0xff] %v1704_v45  ;;  %v7285_v57 = vpop.f32.mrb[2].mxu1  ;;  %8337 = vmatprep.subr.bf16.mxu1 %v8336_v9  ;;  %v9269_v45 = vld [vmem:[%s10181_s25 + $0x28] sm:$0xff] }
 0x20c   : > { %v1707_v52 = vadd.f32 %v7285_v57, %v1338_v54  ;;  %v1475_v62 = vpop.f32.mrb[3].mxu1  ;;  %7543 = vmatmul.mubr.f32.gmra.mrb[108].mxu1 %v10450_v10  ;;  %v1351_v54 = vld [vmem:[#allocation3 + $0x80] sm:$0xff] }
 0x20d   : > { %v1706_v7 = vadd.f32 %v1475_v62, %v1337_v46  ;;  %7855 = vmatmul.mubr.f32.gmra.mrb[84].mxu0 %v10466_v26  ;;  %7545 = vmatprep.mubr.f32.mxu1 %v10454_v15  ;;  %v1341_v15 = vld [vmem:[#allocation3 + $0x30] sm:$0xff]  ;;  %v10748_v46 = vld [vmem:[%s10181_s25 + $0x48] sm:$0xff] }
 0x20e   : > { %8497 = vst [vmem:[#allocation3 + $0x18] sm:$0xff] %v1707_v52  ;;  %7857 = vmatprep.mubr.f32.mxu0 %v10474_v34  ;;  %8339 = vmatpush3.bf16.msra.mxu1 %v8336_v9  ;;  %v6635_v9 = vld [vmem:[%s9759_s12 + $0x3a8] sm:$0xff] }
 0x20f   : > { %8501 = vst [vmem:[#allocation3 + $0x10] sm:$0xff] %v1706_v7  ;;  %v7288_v11 = vpop.f32.mrb[4].mxu1  ;;  %8341 = vmatprep.subr.bf16.mxu1 %v8340_v51  ;;  %v8416_v52 = vpack.c.bf16 %v6635_v9, %v6634_v38  ;;  %v6636_v7 = vld [vmem:[%s9759_s12 + $0x3b0] sm:$0xff] }
 0x210   : > { %v1709_v8 = vadd.f32 %v7288_v11, %v1340_v59  ;;  %v1485_v10 = vpop.f32.mrb[5].mxu1  ;;  %7546 = vmatmul.mubr.f32.gmra.mrb[110].mxu1 %v10462_v25  ;;  %v6637_v59 = vld [vmem:[%s9759_s12 + $0x3b8] sm:$0xff]  ;;  %v9276_v9 = vld [vmem:[%s10181_s25 + $0x60] sm:$0xff] }
 0x211   : > { %v1708_v21 = vadd.f32 %v1485_v10, %v1339_v53  ;;  %7858 = vmatmul.mubr.f32.gmra.mrb[86].mxu0 %v10478_v35  ;;  %7548 = vmatprep.mubr.f32.mxu1 %v10466_v26  ;;  %v1343_v26 = vld [vmem:[#allocation3 + $0x40] sm:$0xff]  ;;  %v1354_v11 = vld [vmem:[#allocation3 + $0x98] sm:$0xff] }
 0x212   : > { %8505 = vst [vmem:[#allocation3 + $0x28] sm:$0xff] %v1709_v8  ;;  %7860 = vmatprep.mubr.f32.mxu0 %v10485_v40  ;;  %8343 = vmatpush3.bf16.msra.mxu1 %v8340_v51  ;;  %v10752_v51 = vld [vmem:[%s10181_s25 + $0x50] sm:$0xff]  ;;  %v6653_v10 = vld [vmem:[%s9759_s12 + $0x438] sm:$0xff] }
 0x213   : > { %8509 = vst [vmem:[#allocation3 + $0x20] sm:$0xff] %v1708_v21  ;;  %v7291_v16 = vpop.f32.mrb[6].mxu1  ;;  %8409 = vmatprep.subr.bf16.mxu1 %v10702_v17  ;;  %v6652_v8 = vld [vmem:[%s9759_s12 + $0x430] sm:$0xff] }
 0x214   : > { %v1711_v31 = vadd.f32 %v7291_v16, %v1342_v28  ;;  %v1495_v37 = vpop.f32.mrb[7].mxu1  ;;  %7549 = vmatmul.mubr.f32.gmra.mrb[112].mxu1 %v10474_v34  ;;  %v1346_v34 = vld [vmem:[#allocation3 + $0x58] sm:$0xff]  ;;  %v1353_v21 = vld [vmem:[#allocation3 + $0x90] sm:$0xff] }
 0x215   : > { %v1710_v25 = vadd.f32 %v1495_v37, %v1341_v15  ;;  %7861 = vmatmul.mubr.f32.gmra.mrb[88].mxu0 %v10489_v42  ;;  %7551 = vmatprep.mubr.f32.mxu1 %v10478_v35  ;;  %v1345_v35 = vld [vmem:[#allocation3 + $0x50] sm:$0xff]  ;;  %v10763_v28 = vld [vmem:[%s10181_s25 + $0x58] sm:$0xff] }
 0x216   : > { %8513 = vst [vmem:[#allocation3 + $0x38] sm:$0xff] %v1711_v31  ;;  %7863 = vmatprep.mubr.f32.mxu0 %v10495_v43  ;;  %v10766_v16 = vld [vmem:[%s10181_s25 + $0x60] sm:$0xff]  ;;  %v8420_v31 = vpack.c.bf16 %v6637_v59, %v6636_v7 }
 0x217   : > { %8517 = vst [vmem:[#allocation3 + $0x30] sm:$0xff] %v1710_v25  ;;  %v7294_v41 = vpop.f32.mrb[8].mxu1 }
 0x218   : > { %v1713_v24 = vadd.f32 %v7294_v41, %v1344_v18  ;;  %v1505_v47 = vpop.f32.mrb[9].mxu1  ;;  %7552 = vmatmul.mubr.f32.gmra.mrb[114].mxu1 %v10485_v40  ;;  %v9272_v18 = vld [vmem:[%s10181_s25 + $0x40] sm:$0xff] }
 0x219   : > { %v1712_v56 = vadd.f32 %v1505_v47, %v1343_v26  ;;  %7864 = vmatmul.mubr.f32.gmra.mrb[90].mxu0 %v10499_v48  ;;  %7554 = vmatprep.mubr.f32.mxu1 %v10489_v42  ;;  %v1347_v42 = vld [vmem:[#allocation3 + $0x60] sm:$0xff]  ;;  %v8452_v26 = vpack.c.bf16 %v6653_v10, %v6652_v8  ;;  %v6644_v8 = vld [vmem:[%s9759_s12 + $0x3f0] sm:$0xff]  ;;  %v6645_v10 = vld [vmem:[%s9759_s12 + $0x3f8] sm:$0xff] }
 0x21a   : > { %8521 = vst [vmem:[#allocation3 + $0x48] sm:$0xff] %v1713_v24  ;;  %7866 = vmatprep.mubr.f32.mxu0 %v10505_v49  ;;  %v6638_v41 = vld [vmem:[%s9759_s12 + $0x3c0] sm:$0xff]  ;;  %v6639_v24 = vld [vmem:[%s9759_s12 + $0x3c8] sm:$0xff] }
 0x21b   : > { %8525 = vst [vmem:[#allocation3 + $0x40] sm:$0xff] %v1712_v56  ;;  %v7297_v58 = vpop.f32.mrb[10].mxu1  ;;  %v1356_v56 = vld [vmem:[#allocation3 + $0xa8] sm:$0xff] }
 0x21c   : > { %v1715_v60 = vadd.f32 %v7297_v58, %v1346_v34  ;;  %v1515_v61 = vpop.f32.mrb[11].mxu1  ;;  %7555 = vmatmul.mubr.f32.gmra.mrb[116].mxu1 %v10495_v43  ;;  %v9273_v34 = vld [vmem:[%s10181_s25 + $0x48] sm:$0xff] }
 0x21d   : > { %v1714_v40 = vadd.f32 %v1515_v61, %v1345_v35  ;;  %7867 = vmatmul.mubr.f32.gmra.mrb[92].mxu0 %v10573_v20  ;;  %7557 = vmatprep.mubr.f32.mxu1 %v10499_v48  ;;  %v6632_v20 = vld [vmem:[%s9759_s12 + $0x390] sm:$0xff]  ;;  %v1350_v48 = vld [vmem:[#allocation3 + $0x78] sm:$0xff]  ;;  %v6654_v35 = vld [vmem:[%s9759_s12 + $0x440] sm:$0xff] }
 0x21e   : > { %8529 = vst [vmem:[#allocation3 + $0x58] sm:$0xff] %v1715_v60  ;;  %7869 = vmatprep.mubr.f32.mxu0 %v10576_v23  ;;  %v9267_v23 = vld [vmem:[%s10181_s25 + $0x18] sm:$0xff]  ;;  %v8412_v29 = vpack.c.bf16 %v6633_v5, %v6632_v20  ;;  %v1355_v60 = vld [vmem:[#allocation3 + $0xa0] sm:$0xff]  ;;  %v10777_v61 = vld [vmem:[%s10181_s25 + $0x68] sm:$0xff] }
 0x21f   : > { %8533 = vst [vmem:[#allocation3 + $0x50] sm:$0xff] %v1714_v40  ;;  %v7300_v0 = vpop.f32.mrb[12].mxu1  ;;  %v6655_v58 = vld [vmem:[%s9759_s12 + $0x448] sm:$0xff]  ;;  %v6640_v5 = vld [vmem:[%s9759_s12 + $0x3d0] sm:$0xff] }
 0x220   : > { %v1717_v3 = vadd.f32 %v7300_v0, %v1348_v63  ;;  %v1525_v43 = vpop.f32.mrb[13].mxu1  ;;  %7558 = vmatmul.mubr.f32.gmra.mrb[118].mxu1 %v10505_v49  ;;  %v10780_v63 = vld [vmem:[%s10181_s25 + $0x70] sm:$0xff]  ;;  %v8456_v20 = vpack.c.bf16 %v6655_v58, %v6654_v35  ;;  %v9280_v35 = vld [vmem:[%s10181_s25 + $0x80] sm:$0xff] }
 0x221   : > { %v1716_v6 = vadd.f32 %v1525_v43, %v1347_v42  ;;  %7870 = vmatmul.mubr.f32.gmra.mrb[94].mxu0 %v10583_v27  ;;  %7696 = vmatprep.mubr.f32.mxu1 %v9267_v23  ;;  %v8424_v42 = vpack.c.bf16 %v6639_v24, %v6638_v41  ;;  %v9274_v43 = vld [vmem:[%s10181_s25 + $0x50] sm:$0xff]  ;;  %v1358_v23 = vld [vmem:[#allocation3 + $0xb8] sm:$0xff]  ;;  %v10822_v24 = vld [vmem:[%s10181_s25 + $0xa0] sm:$0xff] }
 0x222   : > { %8537 = vst [vmem:[#allocation3 + $0x68] sm:$0xff] %v1717_v3  ;;  %7904 = vmatprep.mubr.f32.mxu0 %v10722_v2 }
 0x223   : > { %8541 = vst [vmem:[#allocation3 + $0x60] sm:$0xff] %v1716_v6  ;;  %v7303_v49 = vpop.f32.mrb[14].mxu1  ;;  %v6641_v6 = vld [vmem:[%s9759_s12 + $0x3d8] sm:$0xff] }
 0x224   : > { %v1719_v27 = vadd.f32 %v7303_v49, %v1350_v48  ;;  %v1535_v30 = vpop.f32.mrb[15].mxu1  ;;  %7697 = vmatmul.mubr.f32.vlgmr.msra.gmra.mrb[48].mxu1 %v9268_v32  ;;  %v1357_v49 = vld [vmem:[#allocation3 + $0xb0] sm:$0xff]  ;;  %v8428_v32 = vpack.c.bf16 %v6641_v6, %v6640_v5 }
 0x225   : > { %v1718_v14 = vadd.f32 %v1535_v30, %v1349_v19  ;;  %7905 = vmatmul.mubr.f32.vlgmr.msra.gmra.mrb[24].mxu0 %v10733_v22  ;;  %8411 = vmatpush3.bf16.msra.mxu1 %v10702_v17  ;;  %v9271_v17 = vld [vmem:[%s10181_s25 + $0x38] sm:$0xff]  ;;  %v10794_v30 = vld [vmem:[%s10181_s25 + $0x80] sm:$0xff] }
 0x226   : > { %8545 = vst [vmem:[#allocation3 + $0x78] sm:$0xff] %v1719_v27  ;;  %8443 = vmatpush3.bf16.msra.mxu0 %v10634_v50  ;;  %7699 = vmatprep.mubr.f32.mxu1 %v9269_v45  ;;  %v6657_v19 = vld [vmem:[%s9759_s12 + $0x458] sm:$0xff]  ;;  %v1360_v45 = vld [vmem:[#allocation3 + $0xc8] sm:$0xff] }
 0x227   : > { %8549 = vst [vmem:[#allocation3 + $0x70] sm:$0xff] %v1718_v14  ;;  %v7306_v57 = vpop.f32.mrb[16].mxu1  ;;  %7907 = vmatprep.mubr.f32.mxu0 %v10737_v36  ;;  %8413 = vmatprep.subr.bf16.mxu1 %v8412_v29  ;;  %v8460_v14 = vpack.c.bf16 %v6657_v19, %v6656_v13  ;;  %v9283_v13 = vld [vmem:[%s10181_s25 + $0x98] sm:$0xff]  ;;  %v1365_v19 = vld [vmem:[#allocation3 + $0xf0] sm:$0xff] }
 0x228   : > { %v1721_v62 = vadd.f32 %v7306_v57, %v1352_v33  ;;  %v1545_v50 = vpop.f32.mrb[17].mxu1  ;;  %7700 = vmatmul.mubr.f32.gmra.mrb[50].mxu1 %v9270_v55  ;;  %8445 = vmatprep.subr.bf16.mxu0 %v8444_v4  ;;  %v6642_v33 = vld [vmem:[%s9759_s12 + $0x3e0] sm:$0xff] }
 0x229   : > { %v1720_v53 = vadd.f32 %v1545_v50, %v1351_v54  ;;  %7908 = vmatmul.mubr.f32.gmra.mrb[26].mxu0 %v10748_v46  ;;  %7702 = vmatprep.mubr.f32.mxu1 %v9271_v17  ;;  %v9277_v54 = vld [vmem:[%s10181_s25 + $0x68] sm:$0xff]  ;;  %v6658_v57 = vld [vmem:[%s9759_s12 + $0x460] sm:$0xff]  ;;  %v8432_v7 = vpack.c.bf16 %v6643_v44, %v6642_v33 }
 0x22a   : > { %8553 = vst [vmem:[#allocation3 + $0x88] sm:$0xff] %v1721_v62  ;;  %7910 = vmatprep.mubr.f32.mxu0 %v10752_v51  ;;  %8415 = vmatpush3.bf16.msra.mxu1 %v8412_v29  ;;  %v10791_v29 = vld [vmem:[%s10181_s25 + $0x78] sm:$0xff]  ;;  %v1359_v62 = vld [vmem:[#allocation3 + $0xc0] sm:$0xff]  ;;  %v10805_v50 = vld [vmem:[%s10181_s25 + $0x88] sm:$0xff] }
 0x22b   : > { %8557 = vst [vmem:[#allocation3 + $0x80] sm:$0xff] %v1720_v53  ;;  %v7309_v15 = vpop.f32.mrb[18].mxu1  ;;  %8447 = vmatpush3.bf16.msra.mxu0 %v8444_v4  ;;  %8417 = vmatprep.subr.bf16.mxu1 %v8416_v52  ;;  %v1368_v33 = vld [vmem:[#allocation3 + $0x108] sm:$0xff] }
 0x22c   : > { %v1723_v37 = vadd.f32 %v7309_v15, %v1354_v11  ;;  %v1555_v25 = vpop.f32.mrb[19].mxu1  ;;  %7703 = vmatmul.mubr.f32.gmra.mrb[52].mxu1 %v9272_v18  ;;  %8449 = vmatprep.subr.bf16.mxu0 %v8448_v1  ;;  %v9278_v11 = vld [vmem:[%s10181_s25 + $0x70] sm:$0xff]  ;;  %v1362_v15 = vld [vmem:[#allocation3 + $0xd8] sm:$0xff] }
 0x22d   : > { %v1722_v47 = vadd.f32 %v1555_v25, %v1353_v21  ;;  %7911 = vmatmul.mubr.f32.gmra.mrb[28].mxu0 %v10763_v28  ;;  %7705 = vmatprep.mubr.f32.mxu1 %v9273_v34  ;;  %v6661_v25 = vld [vmem:[%s9759_s12 + $0x478] sm:$0xff]  ;;  %v1361_v18 = vld [vmem:[#allocation3 + $0xd0] sm:$0xff] }
 0x22e   : > { %8561 = vst [vmem:[#allocation3 + $0x98] sm:$0xff] %v1723_v37  ;;  %7913 = vmatprep.mubr.f32.mxu0 %v10766_v16  ;;  %8419 = vmatpush3.bf16.msra.mxu1 %v8416_v52  ;;  %v6659_v52 = vld [vmem:[%s9759_s12 + $0x468] sm:$0xff]  ;;  %v6660_v37 = vld [vmem:[%s9759_s12 + $0x470] sm:$0xff] }
 0x22f   : > { %8565 = vst [vmem:[#allocation3 + $0x90] sm:$0xff] %v1722_v47  ;;  %v7312_v40 = vpop.f32.mrb[20].mxu1  ;;  %8451 = vmatpush3.bf16.msra.mxu0 %v8448_v1  ;;  %8421 = vmatprep.subr.bf16.mxu1 %v8420_v31  ;;  %v10808_v1 = vld [vmem:[%s10181_s25 + $0x90] sm:$0xff]  ;;  %v8464_v17 = vpack.c.bf16 %v6659_v52, %v6658_v57  ;;  %v8436_v47 = vpack.c.bf16 %v6645_v10, %v6644_v8  ;;  %v9285_v44 = vld [vmem:[%s10181_s25 + $0xa8] sm:$0xff]  ;;  %v9288_v10 = vld [vmem:[%s10181_s25 + $0xc0] sm:$0xff] }
 0x230   : > { %v1725_v0 = vadd.f32 %v7312_v40, %v1356_v56  ;;  %v1565_v3 = vpop.f32.mrb[21].mxu1  ;;  %7706 = vmatmul.mubr.f32.gmra.mrb[54].mxu1 %v9274_v43  ;;  %8453 = vmatprep.subr.bf16.mxu0 %v8452_v26  ;;  %v8468_v58 = vpack.c.bf16 %v6661_v25, %v6660_v37  ;;  %v1364_v40 = vld [vmem:[#allocation3 + $0xe8] sm:$0xff]  ;;  %v10852_v57 = vld [vmem:[%s10181_s25 + $0xd0] sm:$0xff] }
 0x231   : > { %v1724_v48 = vadd.f32 %v1565_v3, %v1355_v60  ;;  %7914 = vmatmul.mubr.f32.gmra.mrb[30].mxu0 %v10777_v61  ;;  %7708 = vmatprep.mubr.f32.mxu1 %v9275_v12  ;;  %v10829_v3 = vld [vmem:[%s10181_s25 + $0xa8] sm:$0xff]  ;;  %v10878_v37 = vld [vmem:[%s10181_s25 + $0xf0] sm:$0xff] }
 0x232   : > { %8569 = vst [vmem:[#allocation3 + $0xa8] sm:$0xff] %v1725_v0  ;;  %7916 = vmatprep.mubr.f32.mxu0 %v10780_v63  ;;  %8423 = vmatpush3.bf16.msra.mxu1 %v8420_v31  ;;  %v9279_v31 = vld [vmem:[%s10181_s25 + $0x78] sm:$0xff]  ;;  %v1363_v0 = vld [vmem:[#allocation3 + $0xe0] sm:$0xff] }
 0x233   : > { %8573 = vst [vmem:[#allocation3 + $0xa0] sm:$0xff] %v1724_v48  ;;  %v7315_v27 = vpop.f32.mrb[22].mxu1  ;;  %8455 = vmatpush3.bf16.msra.mxu0 %v8452_v26  ;;  %8425 = vmatprep.subr.bf16.mxu1 %v8424_v42  ;;  %v10819_v26 = vld [vmem:[%s10181_s25 + $0x98] sm:$0xff]  ;;  %v9282_v48 = vld [vmem:[%s10181_s25 + $0x90] sm:$0xff] }
 0x234   : > { %v1727_v4 = vadd.f32 %v7315_v27, %v1358_v23  ;;  %v1575_v38 = vpop.f32.mrb[23].mxu1  ;;  %7709 = vmatmul.mubr.f32.gmra.mrb[56].mxu1 %v9276_v9  ;;  %8457 = vmatprep.subr.bf16.mxu0 %v8456_v20  ;;  %v1366_v12 = vld [vmem:[#allocation3 + $0xf8] sm:$0xff]  ;;  %v9284_v9 = vld [vmem:[%s10181_s25 + $0xa0] sm:$0xff] }
 0x235   : > { %v1726_v39 = vadd.f32 %v1575_v38, %v1357_v49  ;;  %7917 = vmatmul.mubr.f32.gmra.mrb[32].mxu0 %v10791_v29  ;;  %7711 = vmatprep.mubr.f32.mxu1 %v9277_v54  ;;  %v10839_v49 = vld [vmem:[%s10181_s25 + $0xb8] sm:$0xff] }
 0x236   : > { %8577 = vst [vmem:[#allocation3 + $0xb8] sm:$0xff] %v1727_v4  ;;  %7919 = vmatprep.mubr.f32.mxu0 %v10794_v30  ;;  %8427 = vmatpush3.bf16.msra.mxu1 %v8424_v42  ;;  %v9281_v42 = vld [vmem:[%s10181_s25 + $0x88] sm:$0xff] }
 0x237   : > { %8581 = vst [vmem:[#allocation3 + $0xb0] sm:$0xff] %v1726_v39  ;;  %v7318_v55 = vpop.f32.mrb[24].mxu1  ;;  %8459 = vmatpush3.bf16.msra.mxu0 %v8456_v20  ;;  %8429 = vmatprep.subr.bf16.mxu1 %v8428_v32  ;;  %v10832_v20 = vld [vmem:[%s10181_s25 + $0xb0] sm:$0xff] }
 0x238   : > { %v1729_v59 = vadd.f32 %v7318_v55, %v1360_v45  ;;  %v1585_v53 = vpop.f32.mrb[25].mxu1  ;;  %7712 = vmatmul.mubr.f32.gmra.mrb[58].mxu1 %v9278_v11  ;;  %8461 = vmatprep.subr.bf16.mxu0 %v8460_v14  ;;  %v1367_v39 = vld [vmem:[#allocation3 + $0x100] sm:$0xff]  ;;  %v10849_v45 = vld [vmem:[%s10181_s25 + $0xc8] sm:$0xff] }
 0x239   : > { %v1728_v21 = vadd.f32 %v1585_v53, %v1359_v62  ;;  %7920 = vmatmul.mubr.f32.gmra.mrb[34].mxu0 %v10805_v50  ;;  %7714 = vmatprep.mubr.f32.mxu1 %v9279_v31  ;;  %v9286_v55 = vld [vmem:[%s10181_s25 + $0xb0] sm:$0xff]  ;;  %v10859_v53 = vld [vmem:[%s10181_s25 + $0xd8] sm:$0xff] }
 0x23a   : > { %8585 = vst [vmem:[#allocation3 + $0xc8] sm:$0xff] %v1729_v59  ;;  %7922 = vmatprep.mubr.f32.mxu0 %v10808_v1  ;;  %8431 = vmatpush3.bf16.msra.mxu1 %v8428_v32  ;;  %v10842_v32 = vld [vmem:[%s10181_s25 + $0xc0] sm:$0xff]  ;;  %v9287_v59 = vld [vmem:[%s10181_s25 + $0xb8] sm:$0xff] }
 0x23b   : > { %8589 = vst [vmem:[#allocation3 + $0xc0] sm:$0xff] %v1728_v21  ;;  %v7321_v41 = vpop.f32.mrb[26].mxu1  ;;  %8463 = vmatpush3.bf16.msra.mxu0 %v8460_v14  ;;  %8433 = vmatprep.subr.bf16.mxu1 %v8432_v7  ;;  %v9289_v21 = vld [vmem:[%s10181_s25 + $0xc8] sm:$0xff] }
 0x23c   : > { %v1731_v56 = vadd.f32 %v7321_v41, %v1362_v15  ;;  %v1595_v34 = vpop.f32.mrb[27].mxu1  ;;  %7715 = vmatmul.mubr.f32.gmra.mrb[60].mxu1 %v9280_v35  ;;  %8465 = vmatprep.subr.bf16.mxu0 %v8464_v17  ;;  %v10873_v15 = vld [vmem:[%s10181_s25 + $0xe8] sm:$0xff]  ;;  %v9291_v41 = vld [vmem:[%s10181_s25 + $0xd8] sm:$0xff] }
 0x23d   : > { %v1730_v60 = vadd.f32 %v1595_v34, %v1361_v18  ;;  %7923 = vmatmul.mubr.f32.gmra.mrb[36].mxu0 %v10819_v26  ;;  %7717 = vmatprep.mubr.f32.mxu1 %v9281_v42  ;;  %v9290_v18 = vld [vmem:[%s10181_s25 + $0xd0] sm:$0xff]  ;;  %v10892_v34 = vld [vmem:[%s10181_s25 + $0x100] sm:$0xff] }
 0x23e   : > { %8593 = vst [vmem:[#allocation3 + $0xd8] sm:$0xff] %v1731_v56  ;;  %7925 = vmatprep.mubr.f32.mxu0 %v10822_v24  ;;  %8435 = vmatpush3.bf16.msra.mxu1 %v8432_v7 }
 0x23f   : > { %8597 = vst [vmem:[#allocation3 + $0xd0] sm:$0xff] %v1730_v60  ;;  %v7324_v43 = vpop.f32.mrb[28].mxu1  ;;  %8467 = vmatpush3.bf16.msra.mxu0 %v8464_v17  ;;  %8437 = vmatprep.subr.bf16.mxu1 %v8436_v47  ;;  %v10864_v17 = vld [vmem:[%s10181_s25 + $0xe0] sm:$0xff]  ;;  %v9293_v60 = vld [vmem:[%s10181_s25 + $0xe8] sm:$0xff] }
 0x240   : > { %v1733_v5 = vadd.f32 %v7324_v43, %v1364_v40  ;;  %v1605_v6 = vpop.f32.mrb[29].mxu1  ;;  %7718 = vmatmul.mubr.f32.gmra.mrb[62].mxu1 %v9282_v48  ;;  %8469 = vmatprep.subr.bf16.mxu0 %v8468_v58  ;;  %v10901_v40 = vld [vmem:[%s10181_s25 + $0x108] sm:$0xff]  ;;  %v10915_v48 = vld [vmem:[%s10181_s25 + $0x118] sm:$0xff] }
 0x241   : > { %v1732_v23 = vadd.f32 %v1605_v6, %v1363_v0  ;;  %7926 = vmatmul.mubr.f32.gmra.mrb[38].mxu0 %v10829_v3  ;;  %7720 = vmatprep.mubr.f32.mxu1 %v9283_v13  ;;  %v10906_v0 = vld [vmem:[%s10181_s25 + $0x110] sm:$0xff]  ;;  %v9295_v6 = vld [vmem:[%s10181_s25 + $0xf8] sm:$0xff] }
 0x242   : > { %8601 = vst [vmem:[#allocation3 + $0xe8] sm:$0xff] %v1733_v5  ;;  %7928 = vmatprep.mubr.f32.mxu0 %v10832_v20  ;;  %8439 = vmatpush3.bf16.msra.mxu1 %v8436_v47  ;;  %v10887_v47 = vld [vmem:[%s10181_s25 + $0xf8] sm:$0xff]  ;;  %v9294_v5 = vld [vmem:[%s10181_s25 + $0xf0] sm:$0xff] }
 0x243   : > { %8605 = vst [vmem:[#allocation3 + $0xe0] sm:$0xff] %v1732_v23  ;;  %v7327_v27 = vpop.f32.mrb[30].mxu1  ;;  %8471 = vmatpush3.bf16.msra.mxu0 %v8468_v58  ;;  %v9292_v58 = vld [vmem:[%s10181_s25 + $0xe0] sm:$0xff] }
 0x244   : > { %v1735_v4 = vadd.f32 %v7327_v27, %v1366_v12  ;;  %v1615_v38 = vpop.f32.mrb[31].mxu1  ;;  %7721 = vmatmul.mubr.f32.gmra.mrb[64].mxu1 %v9284_v9  ;;  %v10920_v12 = vld [vmem:[%s10181_s25 + $0x120] sm:$0xff]  ;;  %v9297_v27 = vld [vmem:[%s10181_s25 + $0x108] sm:$0xff]  ;;  %v10934_v9 = vld [vmem:[%s10181_s25 + $0x130] sm:$0xff] }
 0x245   : > { %v1734_v14 = vadd.f32 %v1615_v38, %v1365_v19  ;;  %7929 = vmatmul.mubr.f32.gmra.mrb[40].mxu0 %v10839_v49  ;;  %7723 = vmatprep.mubr.f32.mxu1 %v9285_v44  ;;  %v9296_v19 = vld [vmem:[%s10181_s25 + $0x100] sm:$0xff]  ;;  %v9299_v44 = vld [vmem:[%s10181_s25 + $0x118] sm:$0xff] }
 0x246   : > { %8609 = vst [vmem:[#allocation3 + $0xf8] sm:$0xff] %v1735_v4  ;;  %7931 = vmatprep.mubr.f32.mxu0 %v10842_v32  ;;  %v10929_v4 = vld [vmem:[%s10181_s25 + $0x128] sm:$0xff] }
 0x247   : > { %8613 = vst [vmem:[#allocation3 + $0xf0] sm:$0xff] %v1734_v14  ;;  %v7330_v54 = vpop.f32.mrb[32].mxu1 }
 0x248   : > { %v1737_v52 = vadd.f32 %v7330_v54, %v1368_v33  ;;  %v1625_v62 = vpop.f32.mrb[33].mxu1  ;;  %7724 = vmatmul.mubr.f32.gmra.mrb[66].mxu1 %v9286_v55  ;;  %v9298_v33 = vld [vmem:[%s10181_s25 + $0x110] sm:$0xff]  ;;  %v9300_v55 = vld [vmem:[%s10181_s25 + $0x120] sm:$0xff] }
 0x249   : > { %v1736_v7 = vadd.f32 %v1625_v62, %v1367_v39  ;;  %7932 = vmatmul.mubr.f32.gmra.mrb[42].mxu0 %v10849_v45  ;;  %7726 = vmatprep.mubr.f32.mxu1 %v9287_v59  ;;  %v10943_v39 = vld [vmem:[%s10181_s25 + $0x138] sm:$0xff]  ;;  %v10957_v59 = vld [vmem:[%s10181_s25 + $0x148] sm:$0xff] }
 0x24a   : > { %8617 = vst [vmem:[#allocation3 + $0x108] sm:$0xff] %v1737_v52  ;;  %7934 = vmatprep.mubr.f32.mxu0 %v10852_v57  ;;  %v10948_v52 = vld [vmem:[%s10181_s25 + $0x140] sm:$0xff] }
 0x24b   : > { %8621 = vst [vmem:[#allocation3 + $0x100] sm:$0xff] %v1736_v7  ;;  %v10861_v11 = vpop.f32.mrb[34].mxu1  ;;  %v9301_v7 = vld [vmem:[%s10181_s25 + $0x128] sm:$0xff] }
 0x24c   : > { %v10866_v8 = vpop.f32.mrb[35].mxu1  ;;  %7727 = vmatmul.mubr.f32.gmra.mrb[68].mxu1 %v9288_v10  ;;  %v10960_v10 = vld [vmem:[%s10181_s25 + $0x150] sm:$0xff] }
 0x24d   : > { %7935 = vmatmul.mubr.f32.gmra.mrb[44].mxu0 %v10859_v53  ;;  %7729 = vmatprep.mubr.f32.mxu1 %v9289_v21  ;;  %v9302_v21 = vld [vmem:[%s10181_s25 + $0x130] sm:$0xff] }
 0x24e   : > { %7937 = vmatprep.mubr.f32.mxu0 %v10864_v17 }
 0x24f   : > { %v10875_v31 = vpop.f32.mrb[36].mxu1 }
 0x250   : > { %v10880_v25 = vpop.f32.mrb[37].mxu1  ;;  %7730 = vmatmul.mubr.f32.gmra.mrb[70].mxu1 %v9290_v18  ;;  %v9303_v18 = vld [vmem:[%s10181_s25 + $0x138] sm:$0xff] }
 0x251   : > { %7938 = vmatmul.mubr.f32.gmra.mrb[46].mxu0 %v10873_v15  ;;  %7732 = vmatprep.mubr.f32.mxu1 %v9291_v41  ;;  %v10967_v41 = vld [vmem:[%s10181_s25 + $0x158] sm:$0xff] }
 0x252   : > { %7940 = vmatprep.mubr.f32.mxu0 %v10878_v37 }
 0x253   : > { %v10889_v56 = vpop.f32.mrb[38].mxu1 }
 0x254   : > { %v10894_v35 = vpop.f32.mrb[39].mxu1  ;;  %7733 = vmatmul.mubr.f32.gmra.mrb[72].mxu1 %v9292_v58  ;;  %v10970_v58 = vld [vmem:[%s10181_s25 + $0x160] sm:$0xff] }
 0x255   : > { %7941 = vmatmul.mubr.f32.gmra.mrb[48].mxu0 %v10887_v47  ;;  %7735 = vmatprep.mubr.f32.mxu1 %v9293_v60  ;;  %v9304_v60 = vld [vmem:[%s10181_s25 + $0x140] sm:$0xff] }
 0x256   : > { %7943 = vmatprep.mubr.f32.mxu0 %v10892_v34 }
 0x257   : > { %v10903_v42 = vpop.f32.mrb[40].mxu1 }
 0x258   : > { %v10908_v43 = vpop.f32.mrb[41].mxu1  ;;  %7736 = vmatmul.mubr.f32.gmra.mrb[74].mxu1 %v9294_v5  ;;  %v9305_v5 = vld [vmem:[%s10181_s25 + $0x148] sm:$0xff] }
 0x259   : > { %7944 = vmatmul.mubr.f32.gmra.mrb[50].mxu0 %v10901_v40  ;;  %7738 = vmatprep.mubr.f32.mxu1 %v9295_v6  ;;  %v10977_v6 = vld [vmem:[%s10181_s25 + $0x168] sm:$0xff] }
 0x25a   : > { %7946 = vmatprep.mubr.f32.mxu0 %v10906_v0 }
 0x25b   : > { %v10917_v23 = vpop.f32.mrb[42].mxu1 }
 0x25c   : > { %v10922_v13 = vpop.f32.mrb[43].mxu1  ;;  %7739 = vmatmul.mubr.f32.gmra.mrb[76].mxu1 %v9296_v19  ;;  %v10980_v19 = vld [vmem:[%s10181_s25 + $0x170] sm:$0xff] }
 0x25d   : > { %7947 = vmatmul.mubr.f32.gmra.mrb[52].mxu0 %v10915_v48  ;;  %7741 = vmatprep.mubr.f32.mxu1 %v9297_v27  ;;  %v9306_v27 = vld [vmem:[%s10181_s25 + $0x150] sm:$0xff] }
 0x25e   : > { %7949 = vmatprep.mubr.f32.mxu0 %v10920_v12 }
 0x25f   : > { %v10931_v38 = vpop.f32.mrb[44].mxu1 }
 0x260   : > { %v10936_v14 = vpop.f32.mrb[45].mxu1  ;;  %7742 = vmatmul.mubr.f32.gmra.mrb[78].mxu1 %v9298_v33  ;;  %v9307_v33 = vld [vmem:[%s10181_s25 + $0x158] sm:$0xff] }
 0x261   : > { %7950 = vmatmul.mubr.f32.gmra.mrb[54].mxu0 %v10929_v4  ;;  %7744 = vmatprep.mubr.f32.mxu1 %v9299_v44  ;;  %v10987_v44 = vld [vmem:[%s10181_s25 + $0x178] sm:$0xff] }
 0x262   : > { %7952 = vmatprep.mubr.f32.mxu0 %v10934_v9 }
 0x263   : > { %v10945_v54 = vpop.f32.mrb[46].mxu1 }
 0x264   : > { %11290 = vst [vmem:[#allocation9_spill] sm:$0xff] %v10945_v54  ;;  %v10950_v62 = vpop.f32.mrb[47].mxu1  ;;  %7745 = vmatmul.mubr.f32.gmra.mrb[80].mxu1 %v9300_v55  ;;  %v10990_v55 = vld [vmem:[%s10181_s25 + $0x180] sm:$0xff]  ;;  %v11017_v54 = vld [vmem:[%s10181_s25 + $0x1a8] sm:$0xff] }
 0x265   : > { %11291 = vst [vmem:[#allocation10_spill] sm:$0xff] %v10950_v62  ;;  %7953 = vmatmul.mubr.f32.gmra.mrb[56].mxu0 %v10943_v39  ;;  %7747 = vmatprep.mubr.f32.mxu1 %v9301_v7  ;;  %v9308_v7 = vld [vmem:[%s10181_s25 + $0x160] sm:$0xff]  ;;  %v9313_v62 = vld [vmem:[%s10181_s25 + $0x188] sm:$0xff] }
 0x266   : > { %7955 = vmatprep.mubr.f32.mxu0 %v10948_v52 }
 0x268   : > { %7748 = vmatmul.mubr.f32.gmra.mrb[82].mxu1 %v9302_v21  ;;  %v9309_v21 = vld [vmem:[%s10181_s25 + $0x168] sm:$0xff] }
 0x269   : > { %7956 = vmatmul.mubr.f32.gmra.mrb[58].mxu0 %v10957_v59  ;;  %7750 = vmatprep.mubr.f32.mxu1 %v9303_v18  ;;  %v10997_v18 = vld [vmem:[%s10181_s25 + $0x188] sm:$0xff] }
 0x26a   : > { %7958 = vmatprep.mubr.f32.mxu0 %v10960_v10 }
 0x26c   : > { %7751 = vmatmul.mubr.f32.gmra.mrb[84].mxu1 %v9304_v60  ;;  %v11000_v60 = vld [vmem:[%s10181_s25 + $0x190] sm:$0xff] }
 0x26d   : > { %7959 = vmatmul.mubr.f32.gmra.mrb[60].mxu0 %v10967_v41  ;;  %7753 = vmatprep.mubr.f32.mxu1 %v9305_v5  ;;  %v9310_v5 = vld [vmem:[%s10181_s25 + $0x170] sm:$0xff] }
 0x26e   : > { %7961 = vmatprep.mubr.f32.mxu0 %v10970_v58 }
 0x270   : > { %7754 = vmatmul.mubr.f32.gmra.mrb[86].mxu1 %v9306_v27  ;;  %v9311_v27 = vld [vmem:[%s10181_s25 + $0x178] sm:$0xff] }
 0x271   : > { %7962 = vmatmul.mubr.f32.gmra.mrb[62].mxu0 %v10977_v6  ;;  %7756 = vmatprep.mubr.f32.mxu1 %v9307_v33  ;;  %v11007_v33 = vld [vmem:[%s10181_s25 + $0x198] sm:$0xff] }
 0x272   : > { %7964 = vmatprep.mubr.f32.mxu0 %v10980_v19 }
 0x274   : > { %7757 = vmatmul.mubr.f32.gmra.mrb[88].mxu1 %v9308_v7  ;;  %v11010_v7 = vld [vmem:[%s10181_s25 + $0x1a0] sm:$0xff] }
 0x275   : > { %7965 = vmatmul.mubr.f32.gmra.mrb[64].mxu0 %v10987_v44  ;;  %7759 = vmatprep.mubr.f32.mxu1 %v9309_v21  ;;  %v9312_v21 = vld [vmem:[%s10181_s25 + $0x180] sm:$0xff] }
 0x276   : > { %7967 = vmatprep.mubr.f32.mxu0 %v10990_v55 }
 0x278   : > { %7760 = vmatmul.mubr.f32.gmra.mrb[90].mxu1 %v9310_v5  ;;  %v9314_v5 = vld [vmem:[%s10181_s25 + $0x190] sm:$0xff] }
 0x279   : > { %7968 = vmatmul.mubr.f32.gmra.mrb[66].mxu0 %v10997_v18  ;;  %7762 = vmatprep.mubr.f32.mxu1 %v9311_v27 }
 0x27a   : > { %7970 = vmatprep.mubr.f32.mxu0 %v11000_v60 }
 0x27c   : > { %7763 = vmatmul.mubr.f32.gmra.mrb[92].mxu1 %v9312_v21  ;;  %v2309_v21 = vld [vmem:[#allocation3 + $0x448] sm:$0xff] }
 0x27d   : > { %7971 = vmatmul.mubr.f32.gmra.mrb[68].mxu0 %v11007_v33  ;;  %7765 = vmatprep.mubr.f32.mxu1 %v9313_v62 }
 0x27e   : > { %7973 = vmatprep.mubr.f32.mxu0 %v11010_v7 }
 0x280   : > { %7766 = vmatmul.mubr.f32.gmra.mrb[94].mxu1 %v9314_v5 }
 0x281   : > { %7974 = vmatmul.mubr.f32.gmra.mrb[70].mxu0 %v11017_v54  ;;  %8008 = vmatprep.mubr.f32.mxu1 %v10722_v2 }
 0x282   : > { %8112 = vmatprep.mubr.f32.mxu0 %v10722_v2  ;;  %v2293_v2 = vld [vmem:[#allocation3 + $0x3c8] sm:$0xff] }
 0x284   : > { %8009 = vmatmul.mubr.f32.vlgmr.msra.gmra.mrb[48].mxu1 %v10733_v22 }
 0x285   : > { %8113 = vmatmul.mubr.f32.vlgmr.msra.gmra.mrb[0].mxu0 %v10733_v22  ;;  %8011 = vmatprep.mubr.f32.mxu1 %v10737_v36  ;;  %v2292_v22 = vld [vmem:[#allocation3 + $0x3c0] sm:$0xff] }
 0x286   : > { %8115 = vmatprep.mubr.f32.mxu0 %v10737_v36 }
 0x288   : > { %8012 = vmatmul.mubr.f32.gmra.mrb[50].mxu1 %v10748_v46 }
 0x289   : > { %8116 = vmatmul.mubr.f32.gmra.mrb[2].mxu0 %v10748_v46  ;;  %8014 = vmatprep.mubr.f32.mxu1 %v10752_v51 }
 0x28a   : > { %8118 = vmatprep.mubr.f32.mxu0 %v10752_v51 }
 0x28c   : > { %8015 = vmatmul.mubr.f32.gmra.mrb[52].mxu1 %v10763_v28 }
 0x28d   : > { %8119 = vmatmul.mubr.f32.gmra.mrb[4].mxu0 %v10763_v28  ;;  %8017 = vmatprep.mubr.f32.mxu1 %v10766_v16 }
 0x28e   : > { %8121 = vmatprep.mubr.f32.mxu0 %v10766_v16  ;;  %v2295_v16 = vld [vmem:[#allocation3 + $0x3d8] sm:$0xff] }
 0x290   : > { %8018 = vmatmul.mubr.f32.gmra.mrb[54].mxu1 %v10777_v61 }
 0x291   : > { %8122 = vmatmul.mubr.f32.gmra.mrb[6].mxu0 %v10777_v61  ;;  %8020 = vmatprep.mubr.f32.mxu1 %v10780_v63  ;;  %v2294_v61 = vld [vmem:[#allocation3 + $0x3d0] sm:$0xff] }
 0x292   : > { %8124 = vmatprep.mubr.f32.mxu0 %v10780_v63 }
 0x294   : > { %8021 = vmatmul.mubr.f32.gmra.mrb[56].mxu1 %v10791_v29 }
 0x295   : > { %8125 = vmatmul.mubr.f32.gmra.mrb[8].mxu0 %v10791_v29  ;;  %8023 = vmatprep.mubr.f32.mxu1 %v10794_v30 }
 0x296   : > { %8127 = vmatprep.mubr.f32.mxu0 %v10794_v30 }
 0x298   : > { %8024 = vmatmul.mubr.f32.gmra.mrb[58].mxu1 %v10805_v50 }
 0x299   : > { %8128 = vmatmul.mubr.f32.gmra.mrb[10].mxu0 %v10805_v50  ;;  %8026 = vmatprep.mubr.f32.mxu1 %v10808_v1 }
 0x29a   : > { %8130 = vmatprep.mubr.f32.mxu0 %v10808_v1  ;;  %v2297_v1 = vld [vmem:[#allocation3 + $0x3e8] sm:$0xff] }
 0x29c   : > { %8027 = vmatmul.mubr.f32.gmra.mrb[60].mxu1 %v10819_v26 }
 0x29d   : > { %8131 = vmatmul.mubr.f32.gmra.mrb[12].mxu0 %v10819_v26  ;;  %8029 = vmatprep.mubr.f32.mxu1 %v10822_v24  ;;  %v2296_v26 = vld [vmem:[#allocation3 + $0x3e0] sm:$0xff] }
 0x29e   : > { %8133 = vmatprep.mubr.f32.mxu0 %v10822_v24 }
 0x2a0   : > { %8030 = vmatmul.mubr.f32.gmra.mrb[62].mxu1 %v10829_v3 }
 0x2a1   : > { %8134 = vmatmul.mubr.f32.gmra.mrb[14].mxu0 %v10829_v3  ;;  %8032 = vmatprep.mubr.f32.mxu1 %v10832_v20 }
 0x2a2   : > { %8136 = vmatprep.mubr.f32.mxu0 %v10832_v20 }
 0x2a4   : > { %8033 = vmatmul.mubr.f32.gmra.mrb[64].mxu1 %v10839_v49 }
 0x2a5   : > { %8137 = vmatmul.mubr.f32.gmra.mrb[16].mxu0 %v10839_v49  ;;  %8035 = vmatprep.mubr.f32.mxu1 %v10842_v32 }
 0x2a6   : > { %8139 = vmatprep.mubr.f32.mxu0 %v10842_v32  ;;  %v2299_v32 = vld [vmem:[#allocation3 + $0x3f8] sm:$0xff] }
 0x2a8   : > { %8036 = vmatmul.mubr.f32.gmra.mrb[66].mxu1 %v10849_v45 }
 0x2a9   : > { %8140 = vmatmul.mubr.f32.gmra.mrb[18].mxu0 %v10849_v45  ;;  %8038 = vmatprep.mubr.f32.mxu1 %v10852_v57  ;;  %v2298_v45 = vld [vmem:[#allocation3 + $0x3f0] sm:$0xff] }
 0x2aa   : > { %8142 = vmatprep.mubr.f32.mxu0 %v10852_v57 }
 0x2ac   : > { %8039 = vmatmul.mubr.f32.gmra.mrb[68].mxu1 %v10859_v53 }
 0x2ad   : > { %8143 = vmatmul.mubr.f32.gmra.mrb[20].mxu0 %v10859_v53  ;;  %8041 = vmatprep.mubr.f32.mxu1 %v10864_v17 }
 0x2ae   : > { %8145 = vmatprep.mubr.f32.mxu0 %v10864_v17 }
 0x2b0   : > { %8042 = vmatmul.mubr.f32.gmra.mrb[70].mxu1 %v10873_v15 }
 0x2b1   : > { %8146 = vmatmul.mubr.f32.gmra.mrb[22].mxu0 %v10873_v15  ;;  %8044 = vmatprep.mubr.f32.mxu1 %v10878_v37 }
 0x2b2   : > { %8148 = vmatprep.mubr.f32.mxu0 %v10878_v37  ;;  %v2301_v37 = vld [vmem:[#allocation3 + $0x408] sm:$0xff] }
 0x2b4   : > { %8045 = vmatmul.mubr.f32.gmra.mrb[72].mxu1 %v10887_v47 }
 0x2b5   : > { %8149 = vmatmul.mubr.f32.gmra.mrb[72].mxu0 %v10887_v47  ;;  %8047 = vmatprep.mubr.f32.mxu1 %v10892_v34  ;;  %v2300_v47 = vld [vmem:[#allocation3 + $0x400] sm:$0xff] }
 0x2b6   : > { %8151 = vmatprep.mubr.f32.mxu0 %v10892_v34 }
 0x2b8   : > { %8048 = vmatmul.mubr.f32.gmra.mrb[74].mxu1 %v10901_v40 }
 0x2b9   : > { %8152 = vmatmul.mubr.f32.gmra.mrb[74].mxu0 %v10901_v40  ;;  %8050 = vmatprep.mubr.f32.mxu1 %v10906_v0 }
 0x2ba   : > { %8154 = vmatprep.mubr.f32.mxu0 %v10906_v0 }
 0x2bc   : > { %8051 = vmatmul.mubr.f32.gmra.mrb[76].mxu1 %v10915_v48 }
 0x2bd   : > { %8155 = vmatmul.mubr.f32.gmra.mrb[76].mxu0 %v10915_v48  ;;  %8053 = vmatprep.mubr.f32.mxu1 %v10920_v12 }
 0x2be   : > { %8157 = vmatprep.mubr.f32.mxu0 %v10920_v12  ;;  %v2303_v12 = vld [vmem:[#allocation3 + $0x418] sm:$0xff] }
 0x2c0   : > { %8054 = vmatmul.mubr.f32.gmra.mrb[78].mxu1 %v10929_v4 }
 0x2c1   : > { %8158 = vmatmul.mubr.f32.gmra.mrb[78].mxu0 %v10929_v4  ;;  %8056 = vmatprep.mubr.f32.mxu1 %v10934_v9  ;;  %v2302_v4 = vld [vmem:[#allocation3 + $0x410] sm:$0xff] }
 0x2c2   : > { %8160 = vmatprep.mubr.f32.mxu0 %v10934_v9 }
 0x2c4   : > { %8057 = vmatmul.mubr.f32.gmra.mrb[80].mxu1 %v10943_v39 }
 0x2c5   : > { %8161 = vmatmul.mubr.f32.gmra.mrb[80].mxu0 %v10943_v39  ;;  %8059 = vmatprep.mubr.f32.mxu1 %v10948_v52 }
 0x2c6   : > { %8163 = vmatprep.mubr.f32.mxu0 %v10948_v52 }
 0x2c7   : > { %v7526_v36 = vpop.f32.mrb[96].mxu1 }
 0x2c8   : > { %v2663_v46 = vadd.f32 %v7526_v36, %v2293_v2  ;;  %v2519_v51 = vpop.f32.mrb[97].mxu1  ;;  %8060 = vmatmul.mubr.f32.gmra.mrb[82].mxu1 %v10957_v59 }
 0x2c9   : > { %v2662_v28 = vadd.f32 %v2519_v51, %v2292_v22  ;;  %8164 = vmatmul.mubr.f32.gmra.mrb[82].mxu0 %v10957_v59  ;;  %8062 = vmatprep.mubr.f32.mxu1 %v10960_v10  ;;  %v2305_v59 = vld [vmem:[#allocation3 + $0x428] sm:$0xff]  ;;  %v2310_v51 = vld [vmem:[#allocation3 + $0x450] sm:$0xff] }
 0x2ca   : > { %8897 = vst [vmem:[#allocation3 + $0x3c8] sm:$0xff] %v2663_v46  ;;  %8166 = vmatprep.mubr.f32.mxu0 %v10960_v10  ;;  %v2304_v10 = vld [vmem:[#allocation3 + $0x420] sm:$0xff]  ;;  %v2311_v46 = vld [vmem:[#allocation3 + $0x458] sm:$0xff] }
 0x2cb   : > { %8901 = vst [vmem:[#allocation3 + $0x3c0] sm:$0xff] %v2662_v28  ;;  %v7529_v63 = vpop.f32.mrb[98].mxu1 }
 0x2cc   : > { %v2665_v29 = vadd.f32 %v7529_v63, %v2295_v16  ;;  %v2529_v30 = vpop.f32.mrb[99].mxu1  ;;  %8063 = vmatmul.mubr.f32.gmra.mrb[84].mxu1 %v10967_v41  ;;  %v2313_v63 = vld [vmem:[#allocation3 + $0x468] sm:$0xff] }
 0x2cd   : > { %v2664_v50 = vadd.f32 %v2529_v30, %v2294_v61  ;;  %8167 = vmatmul.mubr.f32.gmra.mrb[84].mxu0 %v10967_v41  ;;  %8065 = vmatprep.mubr.f32.mxu1 %v10970_v58 }
 0x2ce   : > { %8905 = vst [vmem:[#allocation3 + $0x3d8] sm:$0xff] %v2665_v29  ;;  %8169 = vmatprep.mubr.f32.mxu0 %v10970_v58  ;;  %v2312_v29 = vld [vmem:[#allocation3 + $0x460] sm:$0xff] }
 0x2cf   : > { %8909 = vst [vmem:[#allocation3 + $0x3d0] sm:$0xff] %v2664_v50  ;;  %v7532_v24 = vpop.f32.mrb[100].mxu1 }
 0x2d0   : > { %v2667_v3 = vadd.f32 %v7532_v24, %v2297_v1  ;;  %v2539_v20 = vpop.f32.mrb[101].mxu1  ;;  %8066 = vmatmul.mubr.f32.gmra.mrb[86].mxu1 %v10977_v6  ;;  %v2315_v24 = vld [vmem:[#allocation3 + $0x478] sm:$0xff] }
 0x2d1   : > { %v2666_v49 = vadd.f32 %v2539_v20, %v2296_v26  ;;  %8170 = vmatmul.mubr.f32.gmra.mrb[86].mxu0 %v10977_v6  ;;  %8068 = vmatprep.mubr.f32.mxu1 %v10980_v19 }
 0x2d2   : > { %8913 = vst [vmem:[#allocation3 + $0x3e8] sm:$0xff] %v2667_v3  ;;  %8172 = vmatprep.mubr.f32.mxu0 %v10980_v19  ;;  %v2314_v3 = vld [vmem:[#allocation3 + $0x470] sm:$0xff] }
 0x2d3   : > { %8917 = vst [vmem:[#allocation3 + $0x3e0] sm:$0xff] %v2666_v49  ;;  %v7535_v57 = vpop.f32.mrb[102].mxu1 }
 0x2d4   : > { %v2669_v53 = vadd.f32 %v7535_v57, %v2299_v32  ;;  %v2549_v17 = vpop.f32.mrb[103].mxu1  ;;  %8069 = vmatmul.mubr.f32.gmra.mrb[88].mxu1 %v10987_v44 }
 0x2d5   : > { %v2668_v15 = vadd.f32 %v2549_v17, %v2298_v45  ;;  %8173 = vmatmul.mubr.f32.gmra.mrb[88].mxu0 %v10987_v44  ;;  %8071 = vmatprep.mubr.f32.mxu1 %v10990_v55  ;;  %v2307_v44 = vld [vmem:[#allocation3 + $0x438] sm:$0xff] }
 0x2d6   : > { %8921 = vst [vmem:[#allocation3 + $0x3f8] sm:$0xff] %v2669_v53  ;;  %8175 = vmatprep.mubr.f32.mxu0 %v10990_v55  ;;  %v2306_v55 = vld [vmem:[#allocation3 + $0x430] sm:$0xff]  ;;  %v8490_v53 = vld [vmem:[#allocation3 + $0x8] sm:$0xff] }
 0x2d7   : > { %8925 = vst [vmem:[#allocation3 + $0x3f0] sm:$0xff] %v2668_v15  ;;  %v7538_v34 = vpop.f32.mrb[104].mxu1 }
 0x2d8   : > { %v2671_v40 = vadd.f32 %v7538_v34, %v2301_v37  ;;  %v2559_v0 = vpop.f32.mrb[105].mxu1  ;;  %8072 = vmatmul.mubr.f32.gmra.mrb[90].mxu1 %v10997_v18  ;;  %v8494_v37 = vld [vmem:[#allocation3] sm:$0xff] }
 0x2d9   : > { %v2670_v48 = vadd.f32 %v2559_v0, %v2300_v47  ;;  %8176 = vmatmul.mubr.f32.gmra.mrb[90].mxu0 %v10997_v18  ;;  %8074 = vmatprep.mubr.f32.mxu1 %v11000_v60 }
 0x2da   : > { %8929 = vst [vmem:[#allocation3 + $0x408] sm:$0xff] %v2671_v40  ;;  %8178 = vmatprep.mubr.f32.mxu0 %v11000_v60  ;;  %v8498_v40 = vld [vmem:[#allocation3 + $0x18] sm:$0xff] }
 0x2db   : > { %8933 = vst [vmem:[#allocation3 + $0x400] sm:$0xff] %v2670_v48  ;;  %v7541_v9 = vpop.f32.mrb[106].mxu1 }
 0x2dc   : > { %v2673_v39 = vadd.f32 %v7541_v9, %v2303_v12  ;;  %v2569_v52 = vpop.f32.mrb[107].mxu1  ;;  %8075 = vmatmul.mubr.f32.gmra.mrb[92].mxu1 %v11007_v33  ;;  %v8502_v12 = vld [vmem:[#allocation3 + $0x10] sm:$0xff] }
 0x2dd   : > { %v2672_v62 = vadd.f32 %v2569_v52, %v2302_v4  ;;  %8179 = vmatmul.mubr.f32.gmra.mrb[92].mxu0 %v11007_v33  ;;  %8077 = vmatprep.mubr.f32.mxu1 %v11010_v7 }
 0x2de   : > { %8937 = vst [vmem:[#allocation3 + $0x418] sm:$0xff] %v2673_v39  ;;  %8181 = vmatprep.mubr.f32.mxu0 %v11010_v7  ;;  %v2308_v7 = vld [vmem:[#allocation3 + $0x440] sm:$0xff]  ;;  %v8506_v39 = vld [vmem:[#allocation3 + $0x28] sm:$0xff] }
 0x2df   : > { %8941 = vst [vmem:[#allocation3 + $0x410] sm:$0xff] %v2672_v62  ;;  %v7544_v41 = vpop.f32.mrb[108].mxu1 }
 0x2e0   : > { %v2675_v58 = vadd.f32 %v7544_v41, %v2305_v59  ;;  %v2579_v6 = vpop.f32.mrb[109].mxu1  ;;  %8078 = vmatmul.mubr.f32.gmra.mrb[94].mxu1 %v11017_v54  ;;  %v8510_v59 = vld [vmem:[#allocation3 + $0x20] sm:$0xff] }
 0x2e1   : > { %v2674_v19 = vadd.f32 %v2579_v6, %v2304_v10  ;;  %8182 = vmatmul.mubr.f32.gmra.mrb[94].mxu0 %v11017_v54 }
 0x2e2   : > { %8945 = vst [vmem:[#allocation3 + $0x428] sm:$0xff] %v2675_v58  ;;  %v8514_v58 = vld [vmem:[#allocation3 + $0x38] sm:$0xff] }
 0x2e3   : > { %8949 = vst [vmem:[#allocation3 + $0x420] sm:$0xff] %v2674_v19  ;;  %v7547_v18 = vpop.f32.mrb[110].mxu1 }
 0x2e4   : > { %v2677_v60 = vadd.f32 %v7547_v18, %v2307_v44  ;;  %v2589_v27 = vpop.f32.mrb[111].mxu1  ;;  %v8518_v44 = vld [vmem:[#allocation3 + $0x30] sm:$0xff] }
 0x2e5   : > { %v2676_v33 = vadd.f32 %v2589_v27, %v2306_v55 }
 0x2e6   : > { %8953 = vst [vmem:[#allocation3 + $0x438] sm:$0xff] %v2677_v60  ;;  %v8522_v60 = vld [vmem:[#allocation3 + $0x48] sm:$0xff] }
 0x2e7   : > { %8957 = vst [vmem:[#allocation3 + $0x430] sm:$0xff] %v2676_v33  ;;  %v7550_v5 = vpop.f32.mrb[112].mxu1 }
 0x2e8   : > { %v2679_v2 = vadd.f32 %v7550_v5, %v2309_v21  ;;  %v2599_v22 = vpop.f32.mrb[113].mxu1  ;;  %v8526_v21 = vld [vmem:[#allocation3 + $0x40] sm:$0xff] }
 0x2e9   : > { %v2678_v36 = vadd.f32 %v2599_v22, %v2308_v7 }
 0x2ea   : > { %8961 = vst [vmem:[#allocation3 + $0x448] sm:$0xff] %v2679_v2  ;;  %v8530_v2 = vld [vmem:[#allocation3 + $0x58] sm:$0xff] }
 0x2eb   : > { %8965 = vst [vmem:[#allocation3 + $0x440] sm:$0xff] %v2678_v36  ;;  %v7553_v54 = vpop.f32.mrb[114].mxu1 }
 0x2ec   : > { %v2681_v28 = vadd.f32 %v7553_v54, %v2311_v46  ;;  %v2609_v16 = vpop.f32.mrb[115].mxu1  ;;  %v8534_v46 = vld [vmem:[#allocation3 + $0x50] sm:$0xff] }
 0x2ed   : > { %v2680_v61 = vadd.f32 %v2609_v16, %v2310_v51 }
 0x2ee   : > { %8969 = vst [vmem:[#allocation3 + $0x458] sm:$0xff] %v2681_v28  ;;  %v8538_v28 = vld [vmem:[#allocation3 + $0x68] sm:$0xff] }
 0x2ef   : > { %8973 = vst [vmem:[#allocation3 + $0x450] sm:$0xff] %v2680_v61  ;;  %v7556_v30 = vpop.f32.mrb[116].mxu1 }
 0x2f0   : > { %v2683_v50 = vadd.f32 %v7556_v30, %v2313_v63  ;;  %v2619_v1 = vpop.f32.mrb[117].mxu1  ;;  %v8542_v63 = vld [vmem:[#allocation3 + $0x60] sm:$0xff] }
 0x2f1   : > { %v2682_v26 = vadd.f32 %v2619_v1, %v2312_v29 }
 0x2f2   : > { %8977 = vst [vmem:[#allocation3 + $0x468] sm:$0xff] %v2683_v50  ;;  %v8546_v50 = vld [vmem:[#allocation3 + $0x78] sm:$0xff] }
 0x2f3   : > { %8981 = vst [vmem:[#allocation3 + $0x460] sm:$0xff] %v2682_v26  ;;  %v7559_v20 = vpop.f32.mrb[118].mxu1 }
 0x2f4   : > { %v2685_v49 = vadd.f32 %v7559_v20, %v2315_v24  ;;  %v2629_v32 = vpop.f32.mrb[119].mxu1  ;;  %v8550_v24 = vld [vmem:[#allocation3 + $0x70] sm:$0xff] }
 0x2f5   : > { %v2684_v45 = vadd.f32 %v2629_v32, %v2314_v3 }
 0x2f6   : > { %8985 = vst [vmem:[#allocation3 + $0x478] sm:$0xff] %v2685_v49  ;;  %v8554_v49 = vld [vmem:[#allocation3 + $0x88] sm:$0xff] }
 0x2f7   : > { %8989 = vst [vmem:[#allocation3 + $0x470] sm:$0xff] %v2684_v45 }
 0x2f8   : > { %v7906_v57 = vpop.f32.mrb[24].mxu0 }
 0x2f9   : > { %v8491_v17 = vadd.f32 %v8490_v53, %v7906_v57  ;;  %v4363_v15 = vpop.f32.mrb[25].mxu0  ;;  %v8558_v57 = vld [vmem:[#allocation3 + $0x80] sm:$0xff] }
 0x2fa   : > { %v8495_v47 = vadd.f32 %v8494_v37, %v4363_v15  ;;  %v8562_v15 = vld [vmem:[#allocation3 + $0x98] sm:$0xff] }
 0x2fb   : > { %4651 = vst [vmem:[#allocation3 + $0x8] sm:$0xff] %v8491_v17 }
 0x2fc   : > { %4650 = vst [vmem:[#allocation3] sm:$0xff] %v8495_v47  ;;  %v7909_v34 = vpop.f32.mrb[26].mxu0 }
 0x2fd   : > { %v8499_v0 = vadd.f32 %v8498_v40, %v7909_v34  ;;  %v4373_v48 = vpop.f32.mrb[27].mxu0  ;;  %v8566_v34 = vld [vmem:[#allocation3 + $0x90] sm:$0xff] }
 0x2fe   : > { %v8503_v4 = vadd.f32 %v8502_v12, %v4373_v48  ;;  %v8570_v48 = vld [vmem:[#allocation3 + $0xa8] sm:$0xff] }
 0x2ff   : > { %4653 = vst [vmem:[#allocation3 + $0x18] sm:$0xff] %v8499_v0 }
 0x300   : > { %4652 = vst [vmem:[#allocation3 + $0x10] sm:$0xff] %v8503_v4  ;;  %v7912_v9 = vpop.f32.mrb[28].mxu0 }
 0x301   : > { %v8507_v52 = vadd.f32 %v8506_v39, %v7912_v9  ;;  %v4383_v62 = vpop.f32.mrb[29].mxu0  ;;  %v8574_v9 = vld [vmem:[#allocation3 + $0xa0] sm:$0xff] }
 0x302   : > { %v8511_v10 = vadd.f32 %v8510_v59, %v4383_v62  ;;  %v8578_v62 = vld [vmem:[#allocation3 + $0xb8] sm:$0xff] }
 0x303   : > { %4655 = vst [vmem:[#allocation3 + $0x28] sm:$0xff] %v8507_v52 }
 0x304   : > { %4654 = vst [vmem:[#allocation3 + $0x20] sm:$0xff] %v8511_v10  ;;  %v7915_v41 = vpop.f32.mrb[30].mxu0 }
 0x305   : > { %v8515_v6 = vadd.f32 %v8514_v58, %v7915_v41  ;;  %v4393_v19 = vpop.f32.mrb[31].mxu0  ;;  %v8582_v41 = vld [vmem:[#allocation3 + $0xb0] sm:$0xff] }
 0x306   : > { %v8519_v55 = vadd.f32 %v8518_v44, %v4393_v19  ;;  %v8586_v19 = vld [vmem:[#allocation3 + $0xc8] sm:$0xff] }
 0x307   : > { %4657 = vst [vmem:[#allocation3 + $0x38] sm:$0xff] %v8515_v6 }
 0x308   : > { %4656 = vst [vmem:[#allocation3 + $0x30] sm:$0xff] %v8519_v55  ;;  %v7918_v18 = vpop.f32.mrb[32].mxu0 }
 0x309   : > { %v8523_v27 = vadd.f32 %v8522_v60, %v7918_v18  ;;  %v4403_v33 = vpop.f32.mrb[33].mxu0  ;;  %v8590_v18 = vld [vmem:[#allocation3 + $0xc0] sm:$0xff] }
 0x30a   : > { %v8527_v7 = vadd.f32 %v8526_v21, %v4403_v33  ;;  %v8594_v33 = vld [vmem:[#allocation3 + $0xd8] sm:$0xff] }
 0x30b   : > { %4659 = vst [vmem:[#allocation3 + $0x48] sm:$0xff] %v8523_v27 }
 0x30c   : > { %4658 = vst [vmem:[#allocation3 + $0x40] sm:$0xff] %v8527_v7  ;;  %v7921_v5 = vpop.f32.mrb[34].mxu0 }
 0x30d   : > { %v8531_v22 = vadd.f32 %v8530_v2, %v7921_v5  ;;  %v4413_v36 = vpop.f32.mrb[35].mxu0  ;;  %v8598_v5 = vld [vmem:[#allocation3 + $0xd0] sm:$0xff] }
 0x30e   : > { %v8535_v51 = vadd.f32 %v8534_v46, %v4413_v36  ;;  %v8602_v36 = vld [vmem:[#allocation3 + $0xe8] sm:$0xff] }
 0x30f   : > { %4661 = vst [vmem:[#allocation3 + $0x58] sm:$0xff] %v8531_v22 }
 0x310   : > { %4660 = vst [vmem:[#allocation3 + $0x50] sm:$0xff] %v8535_v51  ;;  %v7924_v54 = vpop.f32.mrb[36].mxu0 }
 0x311   : > { %v8539_v16 = vadd.f32 %v8538_v28, %v7924_v54  ;;  %v4423_v61 = vpop.f32.mrb[37].mxu0  ;;  %v8606_v54 = vld [vmem:[#allocation3 + $0xe0] sm:$0xff] }
 0x312   : > { %v8543_v29 = vadd.f32 %v8542_v63, %v4423_v61  ;;  %v8610_v61 = vld [vmem:[#allocation3 + $0xf8] sm:$0xff] }
 0x313   : > { %4663 = vst [vmem:[#allocation3 + $0x68] sm:$0xff] %v8539_v16 }
 0x314   : > { %4662 = vst [vmem:[#allocation3 + $0x60] sm:$0xff] %v8543_v29  ;;  %v7927_v30 = vpop.f32.mrb[38].mxu0 }
 0x315   : > { %v8547_v1 = vadd.f32 %v8546_v50, %v7927_v30  ;;  %v4433_v26 = vpop.f32.mrb[39].mxu0  ;;  %v8614_v30 = vld [vmem:[#allocation3 + $0xf0] sm:$0xff] }
 0x316   : > { %v8551_v3 = vadd.f32 %v8550_v24, %v4433_v26  ;;  %v8618_v24 = vld [vmem:[#allocation3 + $0x108] sm:$0xff] }
 0x317   : > { %4665 = vst [vmem:[#allocation3 + $0x78] sm:$0xff] %v8547_v1  ;;  %v1370_v1 = vld [vmem:[#allocation3 + $0x118] sm:$0xff] }
 0x318   : > { %4664 = vst [vmem:[#allocation3 + $0x70] sm:$0xff] %v8551_v3  ;;  %v7930_v20 = vpop.f32.mrb[40].mxu0  ;;  %v1369_v3 = vld [vmem:[#allocation3 + $0x110] sm:$0xff] }
 0x319   : > { %v8555_v32 = vadd.f32 %v8554_v49, %v7930_v20  ;;  %v4443_v45 = vpop.f32.mrb[41].mxu0 }
 0x31a   : > { %v8559_v53 = vadd.f32 %v8558_v57, %v4443_v45  ;;  %v1739_v57 = vadd.f32 %v10861_v11, %v1370_v1 }
 0x31b   : > { %4667 = vst [vmem:[#allocation3 + $0x88] sm:$0xff] %v8555_v32  ;;  %v8622_v32 = vld [vmem:[#allocation3 + $0x100] sm:$0xff] }
 0x31c   : > { %4666 = vst [vmem:[#allocation3 + $0x80] sm:$0xff] %v8559_v53  ;;  %v7933_v17 = vpop.f32.mrb[42].mxu0  ;;  %v1738_v53 = vadd.f32 %v10866_v8, %v1369_v3 }
 0x31d   : > { %v8563_v37 = vadd.f32 %v8562_v15, %v7933_v17  ;;  %v4453_v47 = vpop.f32.mrb[43].mxu0  ;;  %v1372_v17 = vld [vmem:[#allocation3 + $0x128] sm:$0xff] }
 0x31e   : > { %v8567_v40 = vadd.f32 %v8566_v34, %v4453_v47 }
 0x31f   : > { %4669 = vst [vmem:[#allocation3 + $0x98] sm:$0xff] %v8563_v37  ;;  %v1371_v37 = vld [vmem:[#allocation3 + $0x120] sm:$0xff] }
 0x320   : > { %4668 = vst [vmem:[#allocation3 + $0x90] sm:$0xff] %v8567_v40  ;;  %v7936_v0 = vpop.f32.mrb[44].mxu0 }
 0x321   : > { %v8571_v12 = vadd.f32 %v8570_v48, %v7936_v0  ;;  %v4463_v4 = vpop.f32.mrb[45].mxu0  ;;  %v1741_v0 = vadd.f32 %v10875_v31, %v1372_v17  ;;  %v1740_v48 = vadd.f32 %v10880_v25, %v1371_v37 }
 0x322   : > { %v8575_v39 = vadd.f32 %v8574_v9, %v4463_v4  ;;  %v1373_v9 = vld [vmem:[#allocation3 + $0x130] sm:$0xff] }
 0x323   : > { %4671 = vst [vmem:[#allocation3 + $0xa8] sm:$0xff] %v8571_v12  ;;  %v1374_v12 = vld [vmem:[#allocation3 + $0x138] sm:$0xff] }
 0x324   : > { %4670 = vst [vmem:[#allocation3 + $0xa0] sm:$0xff] %v8575_v39  ;;  %v7939_v52 = vpop.f32.mrb[46].mxu0  ;;  %v1743_v8 = vadd.f32 %v10889_v56, %v1374_v12 }
 0x325   : > { %v8579_v59 = vadd.f32 %v8578_v62, %v7939_v52  ;;  %v4473_v10 = vpop.f32.mrb[47].mxu0  ;;  %v1742_v62 = vadd.f32 %v10894_v35, %v1373_v9 }
 0x326   : > { %v8583_v58 = vadd.f32 %v8582_v41, %v4473_v10  ;;  %v1375_v41 = vld [vmem:[#allocation3 + $0x140] sm:$0xff] }
 0x327   : > { %4673 = vst [vmem:[#allocation3 + $0xb8] sm:$0xff] %v8579_v59  ;;  %v1376_v59 = vld [vmem:[#allocation3 + $0x148] sm:$0xff] }
 0x328   : > { %4672 = vst [vmem:[#allocation3 + $0xb0] sm:$0xff] %v8583_v58  ;;  %v7942_v6 = vpop.f32.mrb[48].mxu0  ;;  %v1745_v25 = vadd.f32 %v10903_v42, %v1376_v59  ;;  %v1805_v59 = vld [vmem:[#allocation3 + $0x1a0] sm:$0xff] }
 0x329   : > { %v8587_v44 = vadd.f32 %v8586_v19, %v7942_v6  ;;  %v4483_v55 = vpop.f32.mrb[49].mxu0  ;;  %v1744_v19 = vadd.f32 %v10908_v43, %v1375_v41  ;;  %v2272_v41 = vld [vmem:[#allocation3 + $0x320] sm:$0xff] }
 0x32a   : > { %v8591_v60 = vadd.f32 %v8590_v18, %v4483_v55  ;;  %v1377_v18 = vld [vmem:[#allocation3 + $0x150] sm:$0xff] }
 0x32b   : > { %4675 = vst [vmem:[#allocation3 + $0xc8] sm:$0xff] %v8587_v44  ;;  %v1378_v44 = vld [vmem:[#allocation3 + $0x158] sm:$0xff] }
 0x32c   : > { %4674 = vst [vmem:[#allocation3 + $0xc0] sm:$0xff] %v8591_v60  ;;  %v7945_v27 = vpop.f32.mrb[50].mxu0  ;;  %v1747_v35 = vadd.f32 %v10917_v23, %v1378_v44 }
 0x32d   : > { %v8595_v21 = vadd.f32 %v8594_v33, %v7945_v27  ;;  %v4493_v7 = vpop.f32.mrb[51].mxu0  ;;  %v1746_v33 = vadd.f32 %v10922_v13, %v1377_v18  ;;  %v11292_v13 = vld [vmem:[#allocation9_spill] sm:$0xff] }
 0x32e   : > { %v8599_v2 = vadd.f32 %v8598_v5, %v4493_v7  ;;  %v1379_v5 = vld [vmem:[#allocation3 + $0x160] sm:$0xff] }
 0x32f   : > { %4677 = vst [vmem:[#allocation3 + $0xd8] sm:$0xff] %v8595_v21  ;;  %v1380_v21 = vld [vmem:[#allocation3 + $0x168] sm:$0xff] }
 0x330   : > { %4676 = vst [vmem:[#allocation3 + $0xd0] sm:$0xff] %v8599_v2  ;;  %v7948_v22 = vpop.f32.mrb[52].mxu0  ;;  %v1749_v43 = vadd.f32 %v10931_v38, %v1380_v21  ;;  %v1802_v38 = vld [vmem:[#allocation3 + $0x188] sm:$0xff] }
 0x331   : > { %v8603_v46 = vadd.f32 %v8602_v36, %v7948_v22  ;;  %v4503_v51 = vpop.f32.mrb[53].mxu0  ;;  %v1748_v36 = vadd.f32 %v10936_v14, %v1379_v5  ;;  %v1801_v14 = vld [vmem:[#allocation3 + $0x180] sm:$0xff] }
 0x332   : > { %v8607_v28 = vadd.f32 %v8606_v54, %v4503_v51  ;;  %v1381_v54 = vld [vmem:[#allocation3 + $0x170] sm:$0xff] }
 0x333   : > { %4679 = vst [vmem:[#allocation3 + $0xe8] sm:$0xff] %v8603_v46  ;;  %v1382_v46 = vld [vmem:[#allocation3 + $0x178] sm:$0xff] }
 0x334   : > { %4678 = vst [vmem:[#allocation3 + $0xe0] sm:$0xff] %v8607_v28  ;;  %v7951_v16 = vpop.f32.mrb[54].mxu0 }
 0x335   : > { %v8611_v63 = vadd.f32 %v8610_v61, %v7951_v16  ;;  %v4513_v29 = vpop.f32.mrb[55].mxu0  ;;  %v1751_v61 = vadd.f32 %v11292_v13, %v1382_v46  ;;  %v1809_v46 = vld [vmem:[#allocation3 + $0x1c0] sm:$0xff] }
 0x336   : > { %v8615_v50 = vadd.f32 %v8614_v30, %v4513_v29 }
 0x337   : > { %4681 = vst [vmem:[#allocation3 + $0xf8] sm:$0xff] %v8611_v63  ;;  %v11293_v63 = vld [vmem:[#allocation10_spill] sm:$0xff] }
 0x338   : > { %4680 = vst [vmem:[#allocation3 + $0xf0] sm:$0xff] %v8615_v50  ;;  %v7954_v26 = vpop.f32.mrb[56].mxu0  ;;  %v1750_v29 = vadd.f32 %v11293_v63, %v1381_v54  ;;  %v2276_v54 = vld [vmem:[#allocation3 + $0x340] sm:$0xff] }
 0x339   : > { %v8619_v20 = vadd.f32 %v8618_v24, %v7954_v26  ;;  %v4523_v49 = vpop.f32.mrb[57].mxu0  ;;  %v2269_v24 = vld [vmem:[#allocation3 + $0x308] sm:$0xff] }
 0x33a   : > { %v8623_v45 = vadd.f32 %v8622_v32, %v4523_v49 }
 0x33b   : > { %4683 = vst [vmem:[#allocation3 + $0x108] sm:$0xff] %v8619_v20  ;;  %v2268_v20 = vld [vmem:[#allocation3 + $0x300] sm:$0xff] }
 0x33c   : > { %4682 = vst [vmem:[#allocation3 + $0x100] sm:$0xff] %v8623_v45  ;;  %v7957_v15 = vpop.f32.mrb[58].mxu0 }
 0x33d   : > { %v8627_v47 = vadd.f32 %v7957_v15, %v1739_v57  ;;  %v4533_v34 = vpop.f32.mrb[59].mxu0  ;;  %v1804_v15 = vld [vmem:[#allocation3 + $0x198] sm:$0xff] }
 0x33e   : > { %v8631_v40 = vadd.f32 %v4533_v34, %v1738_v53  ;;  %v1803_v34 = vld [vmem:[#allocation3 + $0x190] sm:$0xff] }
 0x33f   : > { %4685 = vst [vmem:[#allocation3 + $0x118] sm:$0xff] %v8627_v47  ;;  %v2271_v47 = vld [vmem:[#allocation3 + $0x318] sm:$0xff] }
 0x340   : > { %4684 = vst [vmem:[#allocation3 + $0x110] sm:$0xff] %v8631_v40  ;;  %v7960_v4 = vpop.f32.mrb[60].mxu0 }
 0x341   : > { %v8635_v11 = vadd.f32 %v7960_v4, %v1741_v0  ;;  %v4543_v39 = vpop.f32.mrb[61].mxu0  ;;  %v2270_v0 = vld [vmem:[#allocation3 + $0x310] sm:$0xff] }
 0x342   : > { %v8639_v52 = vadd.f32 %v4543_v39, %v1740_v48 }
 0x343   : > { %4687 = vst [vmem:[#allocation3 + $0x128] sm:$0xff] %v8635_v11 }
 0x344   : > { %4686 = vst [vmem:[#allocation3 + $0x120] sm:$0xff] %v8639_v52  ;;  %v7963_v10 = vpop.f32.mrb[62].mxu0  ;;  %v1806_v52 = vld [vmem:[#allocation3 + $0x1a8] sm:$0xff] }
 0x345   : > { %v8643_v31 = vadd.f32 %v7963_v10, %v1743_v8  ;;  %v4553_v58 = vpop.f32.mrb[63].mxu0 }
 0x346   : > { %v8647_v6 = vadd.f32 %v4553_v58, %v1742_v62  ;;  %v2273_v62 = vld [vmem:[#allocation3 + $0x328] sm:$0xff] }
 0x347   : > { %4689 = vst [vmem:[#allocation3 + $0x138] sm:$0xff] %v8643_v31 }
 0x348   : > { %4688 = vst [vmem:[#allocation3 + $0x130] sm:$0xff] %v8647_v6  ;;  %v7966_v55 = vpop.f32.mrb[64].mxu0 }
 0x349   : > { %v8651_v56 = vadd.f32 %v7966_v55, %v1745_v25  ;;  %v4563_v60 = vpop.f32.mrb[65].mxu0  ;;  %v1808_v55 = vld [vmem:[#allocation3 + $0x1b8] sm:$0xff] }
 0x34a   : > { %v8655_v27 = vadd.f32 %v4563_v60, %v1744_v19  ;;  %v1807_v60 = vld [vmem:[#allocation3 + $0x1b0] sm:$0xff] }
 0x34b   : > { %4691 = vst [vmem:[#allocation3 + $0x148] sm:$0xff] %v8651_v56  ;;  %v2275_v56 = vld [vmem:[#allocation3 + $0x338] sm:$0xff] }
 0x34c   : > { %4690 = vst [vmem:[#allocation3 + $0x140] sm:$0xff] %v8655_v27  ;;  %v7969_v7 = vpop.f32.mrb[66].mxu0 }
 0x34d   : > { %v8659_v42 = vadd.f32 %v7969_v7, %v1747_v35  ;;  %v4573_v2 = vpop.f32.mrb[67].mxu0  ;;  %v2274_v35 = vld [vmem:[#allocation3 + $0x330] sm:$0xff] }
 0x34e   : > { %v8663_v22 = vadd.f32 %v4573_v2, %v1746_v33 }
 0x34f   : > { %4693 = vst [vmem:[#allocation3 + $0x158] sm:$0xff] %v8659_v42 }
 0x350   : > { %4692 = vst [vmem:[#allocation3 + $0x150] sm:$0xff] %v8663_v22  ;;  %v7972_v51 = vpop.f32.mrb[68].mxu0  ;;  %v1810_v22 = vld [vmem:[#allocation3 + $0x1c8] sm:$0xff] }
 0x351   : > { %v8667_v23 = vadd.f32 %v7972_v51, %v1749_v43  ;;  %v4583_v28 = vpop.f32.mrb[69].mxu0 }
 0x352   : > { %v8671_v16 = vadd.f32 %v4583_v28, %v1748_v36  ;;  %v2277_v36 = vld [vmem:[#allocation3 + $0x348] sm:$0xff] }
 0x353   : > { %4695 = vst [vmem:[#allocation3 + $0x168] sm:$0xff] %v8667_v23 }
 0x354   : > { %4694 = vst [vmem:[#allocation3 + $0x160] sm:$0xff] %v8671_v16  ;;  %v7975_v30 = vpop.f32.mrb[70].mxu0 }
 0x355   : > { %v8675_v50 = vadd.f32 %v7975_v30, %v1751_v61  ;;  %v4593_v1 = vpop.f32.mrb[71].mxu0 }
 0x356   : > { %v8679_v26 = vadd.f32 %v4593_v1, %v1750_v29  ;;  %v1812_v29 = vld [vmem:[#allocation3 + $0x1d8] sm:$0xff]  ;;  %v1811_v1 = vld [vmem:[#allocation3 + $0x1d0] sm:$0xff] }
 0x357   : > { %4697 = vst [vmem:[#allocation3 + $0x178] sm:$0xff] %v8675_v50  ;;  %v8010_v3 = vpop.f32.mrb[48].mxu1  ;;  %v2279_v50 = vld [vmem:[#allocation3 + $0x358] sm:$0xff] }
 0x358   : > { %4696 = vst [vmem:[#allocation3 + $0x170] sm:$0xff] %v8679_v26  ;;  %v8682_v49 = vadd.f32 %v8010_v3, %v1802_v38  ;;  %v8114_v32 = vpop.f32.mrb[0].mxu0  ;;  %v4829_v45 = vpop.f32.mrb[49].mxu1  ;;  %v2278_v26 = vld [vmem:[#allocation3 + $0x350] sm:$0xff] }
 0x359   : > { %v8826_v57 = vadd.f32 %v8114_v32, %v2269_v24  ;;  %v8685_v53 = vadd.f32 %v4829_v45, %v1801_v14  ;;  %v5295_v17 = vpop.f32.mrb[1].mxu0  ;;  %v1814_v45 = vld [vmem:[#allocation3 + $0x1e8] sm:$0xff] }
 0x35a   : > { %5117 = vst [vmem:[#allocation3 + $0x188] sm:$0xff] %v8682_v49  ;;  %v8829_v37 = vadd.f32 %v5295_v17, %v2268_v20  ;;  %v1813_v17 = vld [vmem:[#allocation3 + $0x1e0] sm:$0xff] }
 0x35b   : > { %5583 = vst [vmem:[#allocation3 + $0x308] sm:$0xff] %v8826_v57  ;;  %5116 = vst [vmem:[#allocation3 + $0x180] sm:$0xff] %v8685_v53  ;;  %v8013_v40 = vpop.f32.mrb[50].mxu1  ;;  %v2281_v53 = vld [vmem:[#allocation3 + $0x368] sm:$0xff] }
 0x35c   : > { %5582 = vst [vmem:[#allocation3 + $0x300] sm:$0xff] %v8829_v37  ;;  %v8688_v48 = vadd.f32 %v8013_v40, %v1804_v15  ;;  %v8117_v12 = vpop.f32.mrb[2].mxu0  ;;  %v4839_v4 = vpop.f32.mrb[51].mxu1  ;;  %v2280_v37 = vld [vmem:[#allocation3 + $0x360] sm:$0xff] }
 0x35d   : > { %v8832_v9 = vadd.f32 %v8117_v12, %v2271_v47  ;;  %v8691_v11 = vadd.f32 %v4839_v4, %v1803_v34  ;;  %v5305_v39 = vpop.f32.mrb[3].mxu0  ;;  %v1816_v4 = vld [vmem:[#allocation3 + $0x1f8] sm:$0xff] }
 0x35e   : > { %5119 = vst [vmem:[#allocation3 + $0x198] sm:$0xff] %v8688_v48  ;;  %v8835_v8 = vadd.f32 %v5305_v39, %v2270_v0  ;;  %v1815_v39 = vld [vmem:[#allocation3 + $0x1f0] sm:$0xff] }
 0x35f   : > { %5585 = vst [vmem:[#allocation3 + $0x318] sm:$0xff] %v8832_v9  ;;  %5118 = vst [vmem:[#allocation3 + $0x190] sm:$0xff] %v8691_v11  ;;  %v8016_v10 = vpop.f32.mrb[52].mxu1  ;;  %v2283_v11 = vld [vmem:[#allocation3 + $0x378] sm:$0xff] }
 0x360   : > { %5584 = vst [vmem:[#allocation3 + $0x310] sm:$0xff] %v8835_v8  ;;  %v8694_v31 = vadd.f32 %v8016_v10, %v1806_v52  ;;  %v8120_v58 = vpop.f32.mrb[4].mxu0  ;;  %v4849_v6 = vpop.f32.mrb[53].mxu1  ;;  %v2282_v8 = vld [vmem:[#allocation3 + $0x370] sm:$0xff] }
 0x361   : > { %v8838_v25 = vadd.f32 %v8120_v58, %v2273_v62  ;;  %v8697_v19 = vadd.f32 %v4849_v6, %v1805_v59  ;;  %v5315_v44 = vpop.f32.mrb[5].mxu0  ;;  %v1818_v6 = vld [vmem:[#allocation3 + $0x208] sm:$0xff] }
 0x362   : > { %5121 = vst [vmem:[#allocation3 + $0x1a8] sm:$0xff] %v8694_v31  ;;  %v8841_v18 = vadd.f32 %v5315_v44, %v2272_v41  ;;  %v1817_v44 = vld [vmem:[#allocation3 + $0x200] sm:$0xff] }
 0x363   : > { %5587 = vst [vmem:[#allocation3 + $0x328] sm:$0xff] %v8838_v25  ;;  %5120 = vst [vmem:[#allocation3 + $0x1a0] sm:$0xff] %v8697_v19  ;;  %v8019_v27 = vpop.f32.mrb[54].mxu1  ;;  %v2285_v19 = vld [vmem:[#allocation3 + $0x388] sm:$0xff] }
 0x364   : > { %5586 = vst [vmem:[#allocation3 + $0x320] sm:$0xff] %v8841_v18  ;;  %v8700_v33 = vadd.f32 %v8019_v27, %v1808_v55  ;;  %v8123_v21 = vpop.f32.mrb[6].mxu0  ;;  %v4859_v7 = vpop.f32.mrb[55].mxu1  ;;  %v2284_v18 = vld [vmem:[#allocation3 + $0x380] sm:$0xff] }
 0x365   : > { %v8844_v5 = vadd.f32 %v8123_v21, %v2275_v56  ;;  %v8703_v42 = vadd.f32 %v4859_v7, %v1807_v60  ;;  %v5325_v2 = vpop.f32.mrb[7].mxu0  ;;  %v1820_v7 = vld [vmem:[#allocation3 + $0x218] sm:$0xff] }
 0x366   : > { %5123 = vst [vmem:[#allocation3 + $0x1b8] sm:$0xff] %v8700_v33  ;;  %v8847_v43 = vadd.f32 %v5325_v2, %v2274_v35  ;;  %v1819_v2 = vld [vmem:[#allocation3 + $0x210] sm:$0xff] }
 0x367   : > { %5589 = vst [vmem:[#allocation3 + $0x338] sm:$0xff] %v8844_v5  ;;  %5122 = vst [vmem:[#allocation3 + $0x1b0] sm:$0xff] %v8703_v42  ;;  %v8022_v51 = vpop.f32.mrb[56].mxu1  ;;  %v2287_v42 = vld [vmem:[#allocation3 + $0x398] sm:$0xff] }
 0x368   : > { %5588 = vst [vmem:[#allocation3 + $0x330] sm:$0xff] %v8847_v43  ;;  %v8706_v23 = vadd.f32 %v8022_v51, %v1810_v22  ;;  %v8126_v28 = vpop.f32.mrb[8].mxu0  ;;  %v4869_v16 = vpop.f32.mrb[57].mxu1  ;;  %v2286_v43 = vld [vmem:[#allocation3 + $0x390] sm:$0xff] }
 0x369   : > { %v8850_v13 = vadd.f32 %v8126_v28, %v2277_v36  ;;  %v8709_v61 = vadd.f32 %v4869_v16, %v1809_v46  ;;  %v5335_v63 = vpop.f32.mrb[9].mxu0  ;;  %v1822_v16 = vld [vmem:[#allocation3 + $0x228] sm:$0xff] }
 0x36a   : > { %5125 = vst [vmem:[#allocation3 + $0x1c8] sm:$0xff] %v8706_v23  ;;  %v8853_v30 = vadd.f32 %v5335_v63, %v2276_v54  ;;  %v1821_v63 = vld [vmem:[#allocation3 + $0x220] sm:$0xff] }
 0x36b   : > { %5591 = vst [vmem:[#allocation3 + $0x348] sm:$0xff] %v8850_v13  ;;  %5124 = vst [vmem:[#allocation3 + $0x1c0] sm:$0xff] %v8709_v61  ;;  %v8025_v38 = vpop.f32.mrb[58].mxu1  ;;  %v2289_v61 = vld [vmem:[#allocation3 + $0x3a8] sm:$0xff] }
 0x36c   : > { %5590 = vst [vmem:[#allocation3 + $0x340] sm:$0xff] %v8853_v30  ;;  %v8712_v24 = vadd.f32 %v8025_v38, %v1812_v29  ;;  %v8129_v14 = vpop.f32.mrb[10].mxu0  ;;  %v4879_v3 = vpop.f32.mrb[59].mxu1  ;;  %v2288_v30 = vld [vmem:[#allocation3 + $0x3a0] sm:$0xff] }
 0x36d   : > { %v8856_v20 = vadd.f32 %v8129_v14, %v2279_v50  ;;  %v8715_v49 = vadd.f32 %v4879_v3, %v1811_v1  ;;  %v5345_v32 = vpop.f32.mrb[11].mxu0  ;;  %v1824_v3 = vld [vmem:[#allocation3 + $0x238] sm:$0xff] }
 0x36e   : > { %5127 = vst [vmem:[#allocation3 + $0x1d8] sm:$0xff] %v8712_v24  ;;  %v8859_v57 = vadd.f32 %v5345_v32, %v2278_v26  ;;  %v1823_v32 = vld [vmem:[#allocation3 + $0x230] sm:$0xff] }
 0x36f   : > { %5593 = vst [vmem:[#allocation3 + $0x358] sm:$0xff] %v8856_v20  ;;  %5126 = vst [vmem:[#allocation3 + $0x1d0] sm:$0xff] %v8715_v49  ;;  %v8028_v15 = vpop.f32.mrb[60].mxu1  ;;  %v2291_v49 = vld [vmem:[#allocation3 + $0x3b8] sm:$0xff] }
 0x370   : > { %5592 = vst [vmem:[#allocation3 + $0x350] sm:$0xff] %v8859_v57  ;;  %v8718_v47 = vadd.f32 %v8028_v15, %v1814_v45  ;;  %v8132_v34 = vpop.f32.mrb[12].mxu0  ;;  %v4889_v40 = vpop.f32.mrb[61].mxu1  ;;  %v2290_v57 = vld [vmem:[#allocation3 + $0x3b0] sm:$0xff] }
 0x371   : > { %v8862_v0 = vadd.f32 %v8132_v34, %v2281_v53  ;;  %v8721_v48 = vadd.f32 %v4889_v40, %v1813_v17  ;;  %v5355_v12 = vpop.f32.mrb[13].mxu0  ;;  %v1826_v40 = vld [vmem:[#allocation3 + $0x248] sm:$0xff] }
 0x372   : > { %5129 = vst [vmem:[#allocation3 + $0x1e8] sm:$0xff] %v8718_v47  ;;  %v8865_v9 = vadd.f32 %v5355_v12, %v2280_v37 }
 0x373   : > { %5595 = vst [vmem:[#allocation3 + $0x368] sm:$0xff] %v8862_v0  ;;  %5128 = vst [vmem:[#allocation3 + $0x1e0] sm:$0xff] %v8721_v48  ;;  %v8031_v52 = vpop.f32.mrb[62].mxu1  ;;  %v1825_v48 = vld [vmem:[#allocation3 + $0x240] sm:$0xff] }
 0x374   : > { %5594 = vst [vmem:[#allocation3 + $0x360] sm:$0xff] %v8865_v9  ;;  %v8724_v62 = vadd.f32 %v8031_v52, %v1816_v4  ;;  %v8135_v59 = vpop.f32.mrb[14].mxu0  ;;  %v4899_v10 = vpop.f32.mrb[63].mxu1 }
 0x375   : > { %v8868_v41 = vadd.f32 %v8135_v59, %v2283_v11  ;;  %v8727_v31 = vadd.f32 %v4899_v10, %v1815_v39  ;;  %v5365_v58 = vpop.f32.mrb[15].mxu0  ;;  %v8898_v11 = vld [vmem:[#allocation3 + $0x3c8] sm:$0xff]  ;;  %v8902_v59 = vld [vmem:[#allocation3 + $0x3c0] sm:$0xff]  ;;  %v1828_v10 = vld [vmem:[#allocation3 + $0x258] sm:$0xff] }
 0x376   : > { %5131 = vst [vmem:[#allocation3 + $0x1f8] sm:$0xff] %v8724_v62  ;;  %v8871_v25 = vadd.f32 %v5365_v58, %v2282_v8 }
 0x377   : > { %5597 = vst [vmem:[#allocation3 + $0x378] sm:$0xff] %v8868_v41  ;;  %5130 = vst [vmem:[#allocation3 + $0x1f0] sm:$0xff] %v8727_v31  ;;  %v8034_v55 = vpop.f32.mrb[64].mxu1  ;;  %v1827_v31 = vld [vmem:[#allocation3 + $0x250] sm:$0xff] }
 0x378   : > { %5596 = vst [vmem:[#allocation3 + $0x370] sm:$0xff] %v8871_v25  ;;  %v8730_v56 = vadd.f32 %v8034_v55, %v1818_v6  ;;  %v8138_v60 = vpop.f32.mrb[16].mxu0  ;;  %v4909_v27 = vpop.f32.mrb[65].mxu1 }
 0x379   : > { %v8874_v35 = vadd.f32 %v8138_v60, %v2285_v19  ;;  %v8733_v33 = vadd.f32 %v4909_v27, %v1817_v44  ;;  %v5375_v21 = vpop.f32.mrb[17].mxu0  ;;  %v8906_v19 = vld [vmem:[#allocation3 + $0x3d8] sm:$0xff]  ;;  %v8910_v60 = vld [vmem:[#allocation3 + $0x3d0] sm:$0xff]  ;;  %v1830_v27 = vld [vmem:[#allocation3 + $0x268] sm:$0xff] }
 0x37a   : > { %5133 = vst [vmem:[#allocation3 + $0x208] sm:$0xff] %v8730_v56  ;;  %v8877_v5 = vadd.f32 %v5375_v21, %v2284_v18 }
 0x37b   : > { %5599 = vst [vmem:[#allocation3 + $0x388] sm:$0xff] %v8874_v35  ;;  %5132 = vst [vmem:[#allocation3 + $0x200] sm:$0xff] %v8733_v33  ;;  %v8037_v22 = vpop.f32.mrb[66].mxu1  ;;  %v1829_v33 = vld [vmem:[#allocation3 + $0x260] sm:$0xff] }
 0x37c   : > { %5598 = vst [vmem:[#allocation3 + $0x380] sm:$0xff] %v8877_v5  ;;  %v8736_v36 = vadd.f32 %v8037_v22, %v1820_v7  ;;  %v8141_v46 = vpop.f32.mrb[18].mxu0  ;;  %v4919_v51 = vpop.f32.mrb[67].mxu1 }
 0x37d   : > { %v8880_v54 = vadd.f32 %v8141_v46, %v2287_v42  ;;  %v8739_v23 = vadd.f32 %v4919_v51, %v1819_v2  ;;  %v5385_v28 = vpop.f32.mrb[19].mxu0  ;;  %v8914_v42 = vld [vmem:[#allocation3 + $0x3e8] sm:$0xff]  ;;  %v8918_v46 = vld [vmem:[#allocation3 + $0x3e0] sm:$0xff]  ;;  %v1832_v51 = vld [vmem:[#allocation3 + $0x278] sm:$0xff] }
 0x37e   : > { %5135 = vst [vmem:[#allocation3 + $0x218] sm:$0xff] %v8736_v36  ;;  %v8883_v13 = vadd.f32 %v5385_v28, %v2286_v43 }
 0x37f   : > { %5601 = vst [vmem:[#allocation3 + $0x398] sm:$0xff] %v8880_v54  ;;  %5134 = vst [vmem:[#allocation3 + $0x210] sm:$0xff] %v8739_v23  ;;  %v8040_v29 = vpop.f32.mrb[68].mxu1  ;;  %v1831_v23 = vld [vmem:[#allocation3 + $0x270] sm:$0xff] }
 0x380   : > { %5600 = vst [vmem:[#allocation3 + $0x390] sm:$0xff] %v8883_v13  ;;  %v8742_v50 = vadd.f32 %v8040_v29, %v1822_v16  ;;  %v8144_v1 = vpop.f32.mrb[20].mxu0  ;;  %v4929_v38 = vpop.f32.mrb[69].mxu1 }
 0x381   : > { %v8886_v26 = vadd.f32 %v8144_v1, %v2289_v61  ;;  %v8745_v24 = vadd.f32 %v4929_v38, %v1821_v63  ;;  %v5395_v14 = vpop.f32.mrb[21].mxu0  ;;  %v8922_v61 = vld [vmem:[#allocation3 + $0x3f8] sm:$0xff]  ;;  %v8926_v1 = vld [vmem:[#allocation3 + $0x3f0] sm:$0xff]  ;;  %v1834_v38 = vld [vmem:[#allocation3 + $0x288] sm:$0xff] }
 0x382   : > { %5137 = vst [vmem:[#allocation3 + $0x228] sm:$0xff] %v8742_v50  ;;  %v8889_v20 = vadd.f32 %v5395_v14, %v2288_v30 }
 0x383   : > { %5603 = vst [vmem:[#allocation3 + $0x3a8] sm:$0xff] %v8886_v26  ;;  %5136 = vst [vmem:[#allocation3 + $0x220] sm:$0xff] %v8745_v24  ;;  %v8043_v45 = vpop.f32.mrb[70].mxu1  ;;  %v1833_v24 = vld [vmem:[#allocation3 + $0x280] sm:$0xff] }
 0x384   : > { %5602 = vst [vmem:[#allocation3 + $0x3a0] sm:$0xff] %v8889_v20  ;;  %v8748_v53 = vadd.f32 %v8043_v45, %v1824_v3  ;;  %v8147_v17 = vpop.f32.mrb[22].mxu0  ;;  %v4939_v15 = vpop.f32.mrb[71].mxu1 }
 0x385   : > { %v8892_v37 = vadd.f32 %v8147_v17, %v2291_v49  ;;  %v8751_v47 = vadd.f32 %v4939_v15, %v1823_v32  ;;  %v5405_v34 = vpop.f32.mrb[23].mxu0  ;;  %v8930_v49 = vld [vmem:[#allocation3 + $0x408] sm:$0xff]  ;;  %v8934_v17 = vld [vmem:[#allocation3 + $0x400] sm:$0xff]  ;;  %v1836_v15 = vld [vmem:[#allocation3 + $0x298] sm:$0xff] }
 0x386   : > { %5139 = vst [vmem:[#allocation3 + $0x238] sm:$0xff] %v8748_v53  ;;  %v8895_v0 = vadd.f32 %v5405_v34, %v2290_v57 }
 0x387   : > { %5605 = vst [vmem:[#allocation3 + $0x3b8] sm:$0xff] %v8892_v37  ;;  %5138 = vst [vmem:[#allocation3 + $0x230] sm:$0xff] %v8751_v47  ;;  %v8046_v12 = vpop.f32.mrb[72].mxu1  ;;  %v1835_v47 = vld [vmem:[#allocation3 + $0x290] sm:$0xff] }
 0x388   : > { %5604 = vst [vmem:[#allocation3 + $0x3b0] sm:$0xff] %v8895_v0  ;;  %v8754_v4 = vadd.f32 %v8046_v12, %v1826_v40  ;;  %v8150_v9 = vpop.f32.mrb[72].mxu0  ;;  %v4949_v39 = vpop.f32.mrb[73].mxu1 }
 0x389   : > { %v8899_v52 = vadd.f32 %v8898_v11, %v8150_v9  ;;  %v8757_v8 = vadd.f32 %v4949_v39, %v1825_v48  ;;  %v5415_v62 = vpop.f32.mrb[73].mxu0  ;;  %v8938_v48 = vld [vmem:[#allocation3 + $0x418] sm:$0xff]  ;;  %v8942_v39 = vld [vmem:[#allocation3 + $0x410] sm:$0xff] }
 0x38a   : > { %5141 = vst [vmem:[#allocation3 + $0x248] sm:$0xff] %v8754_v4  ;;  %v8903_v41 = vadd.f32 %v8902_v59, %v5415_v62  ;;  %v1837_v62 = vld [vmem:[#allocation3 + $0x2a0] sm:$0xff] }
 0x38b   : > { %5607 = vst [vmem:[#allocation3 + $0x3c8] sm:$0xff] %v8899_v52  ;;  %5140 = vst [vmem:[#allocation3 + $0x240] sm:$0xff] %v8757_v8  ;;  %v8049_v58 = vpop.f32.mrb[74].mxu1  ;;  %v1838_v52 = vld [vmem:[#allocation3 + $0x2a8] sm:$0xff] }
 0x38c   : > { %5606 = vst [vmem:[#allocation3 + $0x3c0] sm:$0xff] %v8903_v41  ;;  %v8760_v6 = vadd.f32 %v8049_v58, %v1828_v10  ;;  %v8153_v25 = vpop.f32.mrb[74].mxu0  ;;  %v4959_v44 = vpop.f32.mrb[75].mxu1 }
 0x38d   : > { %v8907_v55 = vadd.f32 %v8906_v19, %v8153_v25  ;;  %v8763_v18 = vadd.f32 %v4959_v44, %v1827_v31  ;;  %v5425_v56 = vpop.f32.mrb[75].mxu0  ;;  %v8946_v31 = vld [vmem:[#allocation3 + $0x428] sm:$0xff]  ;;  %v8950_v44 = vld [vmem:[#allocation3 + $0x420] sm:$0xff] }
 0x38e   : > { %5143 = vst [vmem:[#allocation3 + $0x258] sm:$0xff] %v8760_v6  ;;  %v8911_v35 = vadd.f32 %v8910_v60, %v5425_v56  ;;  %v1839_v56 = vld [vmem:[#allocation3 + $0x2b0] sm:$0xff] }
 0x38f   : > { %5609 = vst [vmem:[#allocation3 + $0x3d8] sm:$0xff] %v8907_v55  ;;  %5142 = vst [vmem:[#allocation3 + $0x250] sm:$0xff] %v8763_v18  ;;  %v8052_v21 = vpop.f32.mrb[76].mxu1  ;;  %v1840_v55 = vld [vmem:[#allocation3 + $0x2b8] sm:$0xff] }
 0x390   : > { %5608 = vst [vmem:[#allocation3 + $0x3d0] sm:$0xff] %v8911_v35  ;;  %v8766_v7 = vadd.f32 %v8052_v21, %v1830_v27  ;;  %v8156_v5 = vpop.f32.mrb[76].mxu0  ;;  %v4969_v2 = vpop.f32.mrb[77].mxu1 }
 0x391   : > { %v8915_v22 = vadd.f32 %v8914_v42, %v8156_v5  ;;  %v8769_v43 = vadd.f32 %v4969_v2, %v1829_v33  ;;  %v5435_v36 = vpop.f32.mrb[77].mxu0  ;;  %v8954_v33 = vld [vmem:[#allocation3 + $0x438] sm:$0xff]  ;;  %v8958_v2 = vld [vmem:[#allocation3 + $0x430] sm:$0xff] }
 0x392   : > { %5145 = vst [vmem:[#allocation3 + $0x268] sm:$0xff] %v8766_v7  ;;  %v8919_v54 = vadd.f32 %v8918_v46, %v5435_v36  ;;  %v1841_v36 = vld [vmem:[#allocation3 + $0x2c0] sm:$0xff] }
 0x393   : > { %5611 = vst [vmem:[#allocation3 + $0x3e8] sm:$0xff] %v8915_v22  ;;  %5144 = vst [vmem:[#allocation3 + $0x260] sm:$0xff] %v8769_v43  ;;  %v8055_v28 = vpop.f32.mrb[78].mxu1  ;;  %v1842_v22 = vld [vmem:[#allocation3 + $0x2c8] sm:$0xff] }
 0x394   : > { %5610 = vst [vmem:[#allocation3 + $0x3e0] sm:$0xff] %v8919_v54  ;;  %v8772_v16 = vadd.f32 %v8055_v28, %v1832_v51  ;;  %v8159_v13 = vpop.f32.mrb[78].mxu0  ;;  %v4979_v63 = vpop.f32.mrb[79].mxu1 }
 0x395   : > { %v8923_v29 = vadd.f32 %v8922_v61, %v8159_v13  ;;  %v8775_v30 = vadd.f32 %v4979_v63, %v1831_v23  ;;  %v5445_v50 = vpop.f32.mrb[79].mxu0  ;;  %v8962_v23 = vld [vmem:[#allocation3 + $0x448] sm:$0xff]  ;;  %v8966_v63 = vld [vmem:[#allocation3 + $0x440] sm:$0xff] }
 0x396   : > { %5147 = vst [vmem:[#allocation3 + $0x278] sm:$0xff] %v8772_v16  ;;  %v8927_v26 = vadd.f32 %v8926_v1, %v5445_v50  ;;  %v1843_v50 = vld [vmem:[#allocation3 + $0x2d0] sm:$0xff] }
 0x397   : > { %5613 = vst [vmem:[#allocation3 + $0x3f8] sm:$0xff] %v8923_v29  ;;  %5146 = vst [vmem:[#allocation3 + $0x270] sm:$0xff] %v8775_v30  ;;  %v8058_v14 = vpop.f32.mrb[80].mxu1  ;;  %v1844_v29 = vld [vmem:[#allocation3 + $0x2d8] sm:$0xff] }
 0x398   : > { %5612 = vst [vmem:[#allocation3 + $0x3f0] sm:$0xff] %v8927_v26  ;;  %v8778_v3 = vadd.f32 %v8058_v14, %v1834_v38  ;;  %v8162_v20 = vpop.f32.mrb[80].mxu0  ;;  %v4989_v32 = vpop.f32.mrb[81].mxu1 }
 0x399   : > { %v8931_v45 = vadd.f32 %v8930_v49, %v8162_v20  ;;  %v8781_v57 = vadd.f32 %v4989_v32, %v1833_v24  ;;  %v5455_v53 = vpop.f32.mrb[81].mxu0  ;;  %v8970_v24 = vld [vmem:[#allocation3 + $0x458] sm:$0xff]  ;;  %v8974_v32 = vld [vmem:[#allocation3 + $0x450] sm:$0xff] }
 0x39a   : > { %5149 = vst [vmem:[#allocation3 + $0x288] sm:$0xff] %v8778_v3  ;;  %v8935_v37 = vadd.f32 %v8934_v17, %v5455_v53  ;;  %v1845_v53 = vld [vmem:[#allocation3 + $0x2e0] sm:$0xff] }
 0x39b   : > { %5615 = vst [vmem:[#allocation3 + $0x408] sm:$0xff] %v8931_v45  ;;  %5148 = vst [vmem:[#allocation3 + $0x280] sm:$0xff] %v8781_v57  ;;  %v8061_v34 = vpop.f32.mrb[82].mxu1  ;;  %v1846_v45 = vld [vmem:[#allocation3 + $0x2e8] sm:$0xff] }
 0x39c   : > { %5614 = vst [vmem:[#allocation3 + $0x400] sm:$0xff] %v8935_v37  ;;  %v8784_v40 = vadd.f32 %v8061_v34, %v1836_v15  ;;  %v8165_v0 = vpop.f32.mrb[82].mxu0  ;;  %v4999_v12 = vpop.f32.mrb[83].mxu1 }
 0x39d   : > { %v8939_v4 = vadd.f32 %v8938_v48, %v8165_v0  ;;  %v8787_v9 = vadd.f32 %v4999_v12, %v1835_v47  ;;  %v5465_v11 = vpop.f32.mrb[83].mxu0  ;;  %v8978_v47 = vld [vmem:[#allocation3 + $0x468] sm:$0xff]  ;;  %v8982_v12 = vld [vmem:[#allocation3 + $0x460] sm:$0xff] }
 0x39e   : > { %5151 = vst [vmem:[#allocation3 + $0x298] sm:$0xff] %v8784_v40  ;;  %v8943_v8 = vadd.f32 %v8942_v39, %v5465_v11  ;;  %v1847_v11 = vld [vmem:[#allocation3 + $0x2f0] sm:$0xff] }
 0x39f   : > { %5617 = vst [vmem:[#allocation3 + $0x418] sm:$0xff] %v8939_v4  ;;  %5150 = vst [vmem:[#allocation3 + $0x290] sm:$0xff] %v8787_v9  ;;  %v8064_v59 = vpop.f32.mrb[84].mxu1  ;;  %v1848_v4 = vld [vmem:[#allocation3 + $0x2f8] sm:$0xff] }
 0x3a0   : > { %5616 = vst [vmem:[#allocation3 + $0x410] sm:$0xff] %v8943_v8  ;;  %v8790_v10 = vadd.f32 %v8064_v59, %v1838_v52  ;;  %v8168_v41 = vpop.f32.mrb[84].mxu0  ;;  %v5009_v58 = vpop.f32.mrb[85].mxu1 }
 0x3a1   : > { %v8947_v6 = vadd.f32 %v8946_v31, %v8168_v41  ;;  %v8793_v25 = vadd.f32 %v5009_v58, %v1837_v62  ;;  %v5475_v19 = vpop.f32.mrb[85].mxu0  ;;  %v8986_v62 = vld [vmem:[#allocation3 + $0x478] sm:$0xff]  ;;  %v8990_v58 = vld [vmem:[#allocation3 + $0x470] sm:$0xff] }
 0x3a2   : > { %5153 = vst [vmem:[#allocation3 + $0x2a8] sm:$0xff] %v8790_v10  ;;  %v8951_v18 = vadd.f32 %v8950_v44, %v5475_v19  ;;  %v5635_v19 = vld [vmem:[#allocation3 + $0x10] sm:$0xff] (!%p6662_p2)  ;;  %v5681_v44 = vld [vmem:[#allocation3 + $0x180] sm:$0xff] (!%p6662_p2) }
 0x3a3   : > { %5619 = vst [vmem:[#allocation3 + $0x428] sm:$0xff] %v8947_v6  ;;  %5152 = vst [vmem:[#allocation3 + $0x2a0] sm:$0xff] %v8793_v25  ;;  %v8067_v60 = vpop.f32.mrb[86].mxu1  ;;  %v5633_v25 = vld [vmem:[#allocation3] sm:$0xff] (!%p6662_p2) }
 0x3a4   : > { %5618 = vst [vmem:[#allocation3 + $0x420] sm:$0xff] %v8951_v18  ;;  %v8796_v27 = vadd.f32 %v8067_v60, %v1840_v55  ;;  %v8171_v35 = vpop.f32.mrb[86].mxu0  ;;  %v5019_v21 = vpop.f32.mrb[87].mxu1  ;;  %v5713_v55 = vld [vmem:[#allocation3 + $0x300] sm:$0xff] (!%p6662_p2)  ;;  %v5714_v18 = vld [vmem:[#allocation3 + $0x308] sm:$0xff] (!%p6662_p2)  ;;  %v5842_v60 = vrot.slane (!%p6662_p2), %v5633_v25, 7 }
 0x3a5   : > { %v8955_v7 = vadd.f32 %v8954_v33, %v8171_v35  ;;  %v8799_v5 = vadd.f32 %v5019_v21, %v1839_v56  ;;  %v5485_v42 = vpop.f32.mrb[87].mxu0  ;;  %v5777_v56 = vrot.slane (!%p6662_p2), %v5635_v19, 7  ;;  %v6020_v35 = vrot.slane (!%p6662_p2), %v5714_v18, 1  ;;  %v5634_v33 = vld [vmem:[#allocation3 + $0x8] sm:$0xff] (!%p6662_p2) }
 0x3a6   : > { %5155 = vst [vmem:[#allocation3 + $0x2b8] sm:$0xff] %v8796_v27  ;;  %v8959_v43 = vadd.f32 %v8958_v2, %v5485_v42  ;;  %v6019_v27 = vrot.slane (!%p6662_p2), %v5713_v55, 1  ;;  %v5682_v21 = vld [vmem:[#allocation3 + $0x188] sm:$0xff] (!%p6662_p2)  ;;  %v5843_v42 = vrot.slane (!%p6662_p2), %v5634_v33, 7 }
 0x3a7   : > { %5621 = vst [vmem:[#allocation3 + $0x438] sm:$0xff] %v8955_v7  ;;  %5154 = vst [vmem:[#allocation3 + $0x2b0] sm:$0xff] %v8799_v5  ;;  %v8070_v46 = vpop.f32.mrb[88].mxu1  ;;  %v5715_v7 = vld [vmem:[#allocation3 + $0x310] sm:$0xff] (!%p6662_p2)  ;;  %v5922_v5 = vsel (!%p6662_p2), %vm5841_vm0, %v5777_v56, %v5842_v60  ;;  %v5642_v19 = vld [vmem:[#allocation3 + $0x48] sm:$0xff] (!%p6662_p2) }
 0x3a8   : > { %5620 = vst [vmem:[#allocation3 + $0x430] sm:$0xff] %v8959_v43  ;;  %v8802_v51 = vadd.f32 %v8070_v46, %v1842_v22  ;;  %v8174_v54 = vpop.f32.mrb[88].mxu0  ;;  %v5029_v28 = vpop.f32.mrb[89].mxu1  ;;  %v6022_v2 = vrot.slane (!%p6662_p2), %v5715_v7, 1  ;;  %v5636_v22 = vld [vmem:[#allocation3 + $0x18] sm:$0xff] (!%p6662_p2)  ;;  %v5638_v43 = vld [vmem:[#allocation3 + $0x28] sm:$0xff] (!%p6662_p2)  ;;  %v5938_v46 = vadd.f32 (!%p6662_p2), %v5922_v5, %v5681_v44 }
 0x3a9   : > { %v8963_v16 = vadd.f32 %v8962_v23, %v8174_v54  ;;  %v8805_v13 = vadd.f32 %v5029_v28, %v1841_v36  ;;  %v5495_v61 = vpop.f32.mrb[89].mxu0  ;;  %v5683_v36 = vld [vmem:[#allocation3 + $0x198] sm:$0xff] (!%p6662_p2)  ;;  %v5717_v23 = vld [vmem:[#allocation3 + $0x320] sm:$0xff] (!%p6662_p2)  ;;  %v5778_v28 = vrot.slane (!%p6662_p2), %v5638_v43, 7  ;;  %v5722_v44 = vld [vmem:[#allocation3 + $0x348] sm:$0xff] (!%p6662_p2) }
 0x3aa   : > { %5157 = vst [vmem:[#allocation3 + $0x2c8] sm:$0xff] %v8802_v51  ;;  %v8967_v30 = vadd.f32 %v8966_v63, %v5495_v61  ;;  %v6021_v51 = vsel (!%p6662_p2), %vm6018_vm1, %v6019_v27, %v6020_v35  ;;  %v5716_v54 = vld [vmem:[#allocation3 + $0x318] sm:$0xff] (!%p6662_p2)  ;;  %v11137_v61 = vld [vmem:[%s11288_s2] ss:$0 sm:$0xff] (!%p6662_p2)  ;;  %v5844_v63 = vsel (!%p6662_p2), %vm5841_vm0, %v5842_v60, %v5843_v42  ;;  %v5723_v60 = vld [vmem:[#allocation3 + $0x350] sm:$0xff] (!%p6662_p2) }
 0x3ab   : > { %5623 = vst [vmem:[#allocation3 + $0x448] sm:$0xff] %v8963_v16  ;;  %5156 = vst [vmem:[#allocation3 + $0x2c0] sm:$0xff] %v8805_v13  ;;  %v8073_v1 = vpop.f32.mrb[90].mxu1  ;;  %v5845_v16 = vrot.slane (!%p6662_p2), %v5636_v22, 7  ;;  %v5637_v13 = vld [vmem:[#allocation3 + $0x20] sm:$0xff] (!%p6662_p2)  ;;  %v5724_v42 = vld [vmem:[#allocation3 + $0x358] sm:$0xff] (!%p6662_p2) }
 0x3ac   : > { %5622 = vst [vmem:[#allocation3 + $0x440] sm:$0xff] %v8967_v30  ;;  %v8808_v38 = vadd.f32 %v8073_v1, %v1844_v29  ;;  %v8177_v26 = vpop.f32.mrb[90].mxu0  ;;  %v5039_v14 = vpop.f32.mrb[91].mxu1  ;;  %v6023_v29 = vsel (!%p6662_p2), %vm6018_vm1, %v6020_v35, %v6022_v2  ;;  %v6024_v30 = vrot.slane (!%p6662_p2), %v5716_v54, 1  ;;  %v5718_v1 = vld [vmem:[#allocation3 + $0x328] sm:$0xff] (!%p6662_p2)  ;;  %v5643_v35 = vld [vmem:[#allocation3 + $0x50] sm:$0xff] (!%p6662_p2) }
 0x3ad   : > { %v8971_v3 = vadd.f32 %v8970_v24, %v8177_v26  ;;  %v8811_v20 = vadd.f32 %v5039_v14, %v1843_v50  ;;  %v5505_v49 = vpop.f32.mrb[91].mxu0  ;;  %v6025_v50 = vrot.slane (!%p6662_p2), %v5717_v23, 1  ;;  %v6131_v26 = vadd.f32 (!%p6662_p2), %v6021_v51, %v5938_v46  ;;  %v5647_v2 = vld [vmem:[#allocation3 + $0x70] sm:$0xff] (!%p6662_p2) }
 0x3ae   : > { %5159 = vst [vmem:[#allocation3 + $0x2d8] sm:$0xff] %v8808_v38  ;;  %v8975_v57 = vadd.f32 %v8974_v32, %v5505_v49  ;;  %v5639_v38 = vld [vmem:[#allocation3 + $0x30] sm:$0xff] (!%p6662_p2)  ;;  %v5939_v24 = vadd.f32 (!%p6662_p2), %v5844_v63, %v5682_v21  ;;  %v5923_v14 = vsel (!%p6662_p2), %vm5841_vm0, %v5778_v28, %v5845_v16  ;;  %v5641_v49 = vld [vmem:[#allocation3 + $0x40] sm:$0xff] (!%p6662_p2)  ;;  %v5851_v46 = vrot.slane (!%p6662_p2), %v5642_v19, 7 }
 0x3af   : > { %5625 = vst [vmem:[#allocation3 + $0x458] sm:$0xff] %v8971_v3  ;;  %5158 = vst [vmem:[#allocation3 + $0x2d0] sm:$0xff] %v8811_v20  ;;  %v8076_v17 = vpop.f32.mrb[92].mxu1  ;;  %v5684_v3 = vld [vmem:[#allocation3 + $0x1a0] sm:$0xff] (!%p6662_p2)  ;;  %v5846_v20 = vrot.slane (!%p6662_p2), %v5637_v13, 7  ;;  %v5719_v32 = vld [vmem:[#allocation3 + $0x330] sm:$0xff] (!%p6662_p2) }
 0x3b0   : > { %5624 = vst [vmem:[#allocation3 + $0x450] sm:$0xff] %v8975_v57  ;;  %v8814_v15 = vadd.f32 %v8076_v17, %v1846_v45  ;;  %v8180_v37 = vpop.f32.mrb[92].mxu0  ;;  %v5049_v34 = vpop.f32.mrb[93].mxu1  ;;  %v5940_v45 = vadd.f32 (!%p6662_p2), %v5923_v14, %v5683_v36  ;;  %v6026_v57 = vsel (!%p6662_p2), %vm6018_vm1, %v6024_v30, %v6025_v50  ;;  %v5720_v17 = vld [vmem:[#allocation3 + $0x338] sm:$0xff] (!%p6662_p2)  ;;  %v5687_v36 = vld [vmem:[#allocation3 + $0x1c8] sm:$0xff] (!%p6662_p2)  ;;  %v6034_v51 = vrot.slane (!%p6662_p2), %v5722_v44, 1 }
 0x3b1   : > { %v8979_v40 = vadd.f32 %v8978_v47, %v8180_v37  ;;  %v8817_v0 = vadd.f32 %v5049_v34, %v1845_v53  ;;  %v5515_v48 = vpop.f32.mrb[93].mxu0  ;;  %v6027_v53 = vrot.slane (!%p6662_p2), %v5718_v1, 1  ;;  %v6170_v37 = vadd.f32 (!%p6662_p2), %v11137_v61, %v6131_v26  ;;  %v5645_v63 = vld [vmem:[#allocation3 + $0x60] sm:$0xff] (!%p6662_p2)  ;;  %v5730_v44 = vld [vmem:[#allocation3 + $0x388] sm:$0xff] (!%p6662_p2) }
 0x3b2   : > { %5161 = vst [vmem:[#allocation3 + $0x2e8] sm:$0xff] %v8814_v15  ;;  %v8983_v9 = vadd.f32 %v8982_v12, %v5515_v48  ;;  %5632 = sbr.rel (%p6662_p2) target bundleno = 1020 (0x3fc), region = 150  ;;  %v5779_v15 = vrot.slane (!%p6662_p2), %v5641_v49, 7  ;;  %v6132_v47 = vadd.f32 (!%p6662_p2), %v6023_v29, %v5939_v24  ;;  %v5847_v34 = vsel (!%p6662_p2), %vm5841_vm0, %v5845_v16, %v5846_v20  ;;  %v5640_v48 = vld [vmem:[#allocation3 + $0x38] sm:$0xff] (!%p6662_p2)  ;;  %v5688_v16 = vld [vmem:[#allocation3 + $0x1d0] sm:$0xff] (!%p6662_p2)  ;;  %v5725_v1 = vld [vmem:[#allocation3 + $0x360] sm:$0xff] (!%p6662_p2) }
 0x3b3   : > { %5627 = vst [vmem:[#allocation3 + $0x468] sm:$0xff] %v8979_v40  ;;  %5160 = vst [vmem:[#allocation3 + $0x2e0] sm:$0xff] %v8817_v0  ;;  %v8079_v39 = vpop.f32.mrb[94].mxu1  ;;  %v5685_v40 = vld [vmem:[#allocation3 + $0x1b0] sm:$0xff] (!%p6662_p2)  ;;  %v5848_v0 = vrot.slane (!%p6662_p2), %v5639_v38, 7  ;;  %v6133_v12 = vadd.f32 (!%p6662_p2), %v6026_v57, %v5940_v45  ;;  %v5849_v25 = vrot.slane (!%p6662_p2), %v5640_v48, 7 }
 0x3b4   : > { %5626 = vst [vmem:[#allocation3 + $0x460] sm:$0xff] %v8983_v9  ;;  %v8820_v52 = vadd.f32 %v8079_v39, %v1848_v4  ;;  %v8183_v8 = vpop.f32.mrb[94].mxu0  ;;  %v5059_v59 = vpop.f32.mrb[95].mxu1  ;;  %v5941_v4 = vadd.f32 (!%p6662_p2), %v5847_v34, %v5684_v3  ;;  %v6028_v9 = vsel (!%p6662_p2), %vm6018_vm1, %v6025_v50, %v6027_v53  ;;  %v5721_v39 = vld [vmem:[#allocation3 + $0x340] sm:$0xff] (!%p6662_p2)  ;;  %v6035_v28 = vrot.slane (!%p6662_p2), %v5723_v60, 1  ;;  %v5726_v38 = vld [vmem:[#allocation3 + $0x368] sm:$0xff] (!%p6662_p2) }
 0x3b5   : > { %v8987_v10 = vadd.f32 %v8986_v62, %v8183_v8  ;;  %v8823_v41 = vadd.f32 %v5059_v59, %v1847_v11  ;;  %v5525_v31 = vpop.f32.mrb[95].mxu0  ;;  %v6029_v11 = vrot.slane (!%p6662_p2), %v5719_v32, 1  ;;  %v6202_v8 = vmax.f32 (!%p6662_p2), %v6170_v37, 0.0  ;;  %v5646_v24 = vld [vmem:[#allocation3 + $0x68] sm:$0xff] (!%p6662_p2)  ;;  %v5727_v32 = vld [vmem:[#allocation3 + $0x370] sm:$0xff] (!%p6662_p2)  ;;  %v5691_v60 = vld [vmem:[#allocation3 + $0x1f8] sm:$0xff] (!%p6662_p2) }
 0x3b6   : > { %5163 = vst [vmem:[#allocation3 + $0x2f8] sm:$0xff] %v8820_v52  ;;  %v8991_v6 = vadd.f32 %v8990_v58, %v5525_v31  ;;  %v5644_v52 = vld [vmem:[#allocation3 + $0x58] sm:$0xff] (!%p6662_p2)  ;;  %v6171_v62 = vadd.f32 (!%p6662_p2), %v11137_v61, %v6132_v47  ;;  %v5924_v59 = vsel (!%p6662_p2), %vm5841_vm0, %v5779_v15, %v5848_v0  ;;  %v6134_v31 = vadd.f32 (!%p6662_p2), %v6028_v9, %v5941_v4  ;;  %v5650_v48 = vld [vmem:[#allocation3 + $0x88] sm:$0xff] (!%p6662_p2) }
 0x3b7   : > { %5629 = vst [vmem:[#allocation3 + $0x478] sm:$0xff] %v8987_v10  ;;  %5162 = vst [vmem:[#allocation3 + $0x2f0] sm:$0xff] %v8823_v41  ;;  %v6030_v10 = vrot.slane (!%p6662_p2), %v5720_v17, 1  ;;  %v6172_v41 = vadd.f32 (!%p6662_p2), %v11137_v61, %v6133_v12  ;;  %v5942_v58 = vadd.f32 (!%p6662_p2), %v5924_v59, %v5685_v40  ;;  %v6032_v56 = vrot.slane (!%p6662_p2), %v5721_v39, 1  ;;  %v5689_v17 = vld [vmem:[#allocation3 + $0x1e0] sm:$0xff] (!%p6662_p2)  ;;  %v5690_v40 = vld [vmem:[#allocation3 + $0x1e8] sm:$0xff] (!%p6662_p2) }
 0x3b8   : > { %5628 = vst [vmem:[#allocation3 + $0x470] sm:$0xff] %v8991_v6  ;;  %v5686_v6 = vld [vmem:[#allocation3 + $0x1b8] sm:$0xff] (!%p6662_p2)  ;;  %6234 = vst [vmem:[%s9754_s21] sm:$0xff] (!%p6662_p2), %v6202_v8  ;;  %v6203_v55 = vmax.f32 (!%p6662_p2), %v6171_v62, 0.0  ;;  %v5780_v27 = vrot.slane (!%p6662_p2), %v5644_v52, 7  ;;  %v6173_v21 = vadd.f32 (!%p6662_p2), %v11137_v61, %v6134_v31  ;;  %v5850_v5 = vsel (!%p6662_p2), %vm5841_vm0, %v5848_v0, %v5849_v25  ;;  %v5649_v31 = vld [vmem:[#allocation3 + $0x80] sm:$0xff] (!%p6662_p2) }
 0x3b9   : > { %v6031_v18 = vsel %vm6018_vm1, %v6029_v11, %v6030_v10  ;;  %v6204_v33 = vmax.f32 %v6172_v41, 0.0  ;;  %v5943_v22 = vadd.f32 %v5850_v5, %v5686_v6  ;;  %v6033_v43 = vsel %vm6018_vm1, %v6030_v10, %v6032_v56  ;;  %v5648_v39 = vld [vmem:[#allocation3 + $0x78] sm:$0xff]  ;;  %v5729_v41 = vld [vmem:[#allocation3 + $0x380] sm:$0xff] }
 0x3ba   : > { %v6135_v7 = vadd.f32 %v6031_v18, %v5942_v58  ;;  %6235 = vst [vmem:[%s9754_s21 + $0x8] sm:$0xff] %v6203_v55  ;;  %v6205_v54 = vmax.f32 %v6173_v21, 0.0  ;;  %v5852_v13 = vrot.slane %v5643_v35, 7  ;;  %v5925_v30 = vsel %vm5841_vm0, %v5780_v27, %v5851_v46  ;;  %v5728_v52 = vld [vmem:[#allocation3 + $0x378] sm:$0xff]  ;;  %v5653_v55 = vld [vmem:[#allocation3 + $0xa0] sm:$0xff] }
 0x3bb   : > { %6236 = vst [vmem:[%s9754_s21 + $0x10] sm:$0xff] %v6204_v33  ;;  %v6136_v29 = vadd.f32 %v6033_v43, %v5943_v22  ;;  %v6037_v50 = vrot.slane %v5724_v42, 1  ;;  %v5781_v26 = vrot.slane %v5647_v2, 7  ;;  %v5944_v3 = vadd.f32 %v5925_v30, %v5687_v36  ;;  %v5692_v5 = vld [vmem:[#allocation3 + $0x200] sm:$0xff]  ;;  %v5651_v2 = vld [vmem:[#allocation3 + $0x90] sm:$0xff] }
 0x3bc   : > { %v6174_v23 = vadd.f32 %v11137_v61, %v6135_v7  ;;  %6237 = vst [vmem:[%s9754_s21 + $0x18] sm:$0xff] %v6205_v54  ;;  %v6036_v20 = vsel %vm6018_vm1, %v6034_v51, %v6035_v28  ;;  %v5853_v49 = vsel %vm5841_vm0, %v5851_v46, %v5852_v13  ;;  %v5854_v15 = vrot.slane %v5645_v63, 7  ;;  %v5731_v46 = vld [vmem:[#allocation3 + $0x390] sm:$0xff]  ;;  %v5732_v51 = vld [vmem:[#allocation3 + $0x398] sm:$0xff] }
 0x3bd   : > { %v6175_v45 = vadd.f32 %v11137_v61, %v6136_v29  ;;  %v5945_v57 = vadd.f32 %v5853_v49, %v5688_v16  ;;  %v6038_v53 = vsel %vm6018_vm1, %v6035_v28, %v6037_v50  ;;  %v6137_v37 = vadd.f32 %v6036_v20, %v5944_v3  ;;  %v5652_v63 = vld [vmem:[#allocation3 + $0x98] sm:$0xff]  ;;  %v5733_v29 = vld [vmem:[#allocation3 + $0x3a0] sm:$0xff] }
 0x3be   : > { %v6206_v14 = vmax.f32 %v6174_v23, 0.0  ;;  %v6039_v47 = vrot.slane %v5725_v1, 1  ;;  %v6040_v34 = vrot.slane %v5726_v38, 1  ;;  %v5855_v0 = vrot.slane %v5646_v24, 7  ;;  %v5693_v38 = vld [vmem:[#allocation3 + $0x210] sm:$0xff]  ;;  %v5656_v24 = vld [vmem:[#allocation3 + $0xb8] sm:$0xff] }
 0x3bf   : > { %v6207_v12 = vmax.f32 %v6175_v45, 0.0  ;;  %v6138_v4 = vadd.f32 %v6038_v53, %v5945_v57  ;;  %v5926_v9 = vsel %vm5841_vm0, %v5781_v26, %v5854_v15  ;;  %v6042_v11 = vrot.slane %v5727_v32, 1  ;;  %v5654_v32 = vld [vmem:[#allocation3 + $0xa8] sm:$0xff]  ;;  %v5694_v53 = vld [vmem:[#allocation3 + $0x218] sm:$0xff] }
 0x3c0   : > { %6238 = vst [vmem:[%s9754_s21 + $0x20] sm:$0xff] %v6206_v14  ;;  %v6176_v8 = vadd.f32 %v11137_v61, %v6137_v37  ;;  %v5946_v62 = vadd.f32 %v5926_v9, %v5689_v17  ;;  %v6041_v59 = vsel %vm6018_vm1, %v6039_v47, %v6040_v34  ;;  %v5856_v10 = vsel %vm5841_vm0, %v5854_v15, %v5855_v0  ;;  %v5734_v37 = vld [vmem:[#allocation3 + $0x3a8] sm:$0xff]  ;;  %v5735_v0 = vld [vmem:[#allocation3 + $0x3b0] sm:$0xff] }
 0x3c1   : > { %6239 = vst [vmem:[%s9754_s21 + $0x28] sm:$0xff] %v6207_v12  ;;  %v6177_v58 = vadd.f32 %v11137_v61, %v6138_v4  ;;  %v5947_v6 = vadd.f32 %v5856_v10, %v5690_v40  ;;  %v6043_v25 = vsel %vm6018_vm1, %v6040_v34, %v6042_v11  ;;  %v5782_v19 = vrot.slane %v5650_v48, 7  ;;  %v5655_v12 = vld [vmem:[#allocation3 + $0xb0] sm:$0xff] }
 0x3c2   : > { %v6208_v18 = vmax.f32 %v6176_v8, 0.0  ;;  %v6139_v56 = vadd.f32 %v6041_v59, %v5946_v62  ;;  %v5857_v27 = vrot.slane %v5648_v39, 7  ;;  %v6044_v35 = vrot.slane %v5728_v52, 1  ;;  %v5695_v39 = vld [vmem:[#allocation3 + $0x228] sm:$0xff]  ;;  %v5736_v8 = vld [vmem:[#allocation3 + $0x3b8] sm:$0xff] }
 0x3c3   : > { %v6209_v33 = vmax.f32 %v6177_v58, 0.0  ;;  %v6140_v21 = vadd.f32 %v6043_v25, %v5947_v6  ;;  %v6045_v7 = vrot.slane %v5729_v41, 1  ;;  %v5858_v42 = vrot.slane %v5649_v31, 7  ;;  %v5657_v31 = vld [vmem:[#allocation3 + $0xc0] sm:$0xff]  ;;  %v5659_v58 = vld [vmem:[#allocation3 + $0xd0] sm:$0xff] }
 0x3c4   : > { %6240 = vst [vmem:[%s9754_s21 + $0x30] sm:$0xff] %v6208_v18  ;;  %v6178_v22 = vadd.f32 %v11137_v61, %v6139_v56  ;;  %v5927_v43 = vsel %vm5841_vm0, %v5782_v19, %v5857_v27  ;;  %v6047_v36 = vrot.slane %v5730_v44, 1  ;;  %v5783_v54 = vrot.slane %v5653_v55, 7  ;;  %v5696_v44 = vld [vmem:[#allocation3 + $0x230] sm:$0xff] }
 0x3c5   : > { %6241 = vst [vmem:[%s9754_s21 + $0x38] sm:$0xff] %v6209_v33  ;;  %v6179_v23 = vadd.f32 %v11137_v61, %v6140_v21  ;;  %v5948_v28 = vadd.f32 %v5927_v43, %v5691_v60  ;;  %v6046_v16 = vsel %vm6018_vm1, %v6044_v35, %v6045_v7  ;;  %v5859_v13 = vsel %vm5841_vm0, %v5857_v27, %v5858_v42  ;;  %v5737_v35 = vld [vmem:[#allocation3 + $0x3c0] sm:$0xff]  ;;  %v5738_v33 = vld [vmem:[#allocation3 + $0x3c8] sm:$0xff] }
 0x3c6   : > { %v6210_v30 = vmax.f32 %v6178_v22, 0.0  ;;  %v5949_v50 = vadd.f32 %v5859_v13, %v5692_v5  ;;  %v6048_v1 = vsel %vm6018_vm1, %v6045_v7, %v6047_v36  ;;  %v5860_v26 = vrot.slane %v5651_v2, 7  ;;  %v5697_v5 = vld [vmem:[#allocation3 + $0x240] sm:$0xff] }
 0x3c7   : > { %v6211_v14 = vmax.f32 %v6179_v23, 0.0  ;;  %v6141_v3 = vadd.f32 %v6046_v16, %v5948_v28  ;;  %v6049_v20 = vrot.slane %v5731_v46, 1  ;;  %v6050_v49 = vrot.slane %v5732_v51, 1  ;;  %v5658_v51 = vld [vmem:[#allocation3 + $0xc8] sm:$0xff] }
 0x3c8   : > { %6242 = vst [vmem:[%s9754_s21 + $0x40] sm:$0xff] %v6210_v30  ;;  %v6142_v45 = vadd.f32 %v6048_v1, %v5949_v50  ;;  %v5928_v57 = vsel %vm5841_vm0, %v5783_v54, %v5860_v26  ;;  %v5861_v17 = vrot.slane %v5652_v63, 7  ;;  %v6052_v15 = vrot.slane %v5733_v29, 1  ;;  %v5739_v54 = vld [vmem:[#allocation3 + $0x3d0] sm:$0xff]  ;;  %v5662_v23 = vld [vmem:[#allocation3 + $0xe8] sm:$0xff]  ;;  %v5660_v29 = vld [vmem:[#allocation3 + $0xd8] sm:$0xff] }
 0x3c9   : > { %6243 = vst [vmem:[%s9754_s21 + $0x48] sm:$0xff] %v6211_v14  ;;  %v6180_v47 = vadd.f32 %v11137_v61, %v6141_v3  ;;  %v5950_v34 = vadd.f32 %v5928_v57, %v5693_v38  ;;  %v6051_v40 = vsel %vm6018_vm1, %v6049_v20, %v6050_v49  ;;  %v5784_v48 = vrot.slane %v5656_v24, 7  ;;  %v5741_v24 = vld [vmem:[#allocation3 + $0x3e0] sm:$0xff]  ;;  %v5698_v3 = vld [vmem:[#allocation3 + $0x248] sm:$0xff] }
 0x3ca   : > { %v6181_v4 = vadd.f32 %v11137_v61, %v6142_v45  ;;  %v5862_v9 = vsel %vm5841_vm0, %v5860_v26, %v5861_v17  ;;  %v6053_v11 = vsel %vm6018_vm1, %v6050_v49, %v6052_v15  ;;  %v5863_v52 = vrot.slane %v5654_v32, 7  ;;  %v5740_v26 = vld [vmem:[#allocation3 + $0x3d8] sm:$0xff] }
 0x3cb   : > { %v6212_v62 = vmax.f32 %v6180_v47, 0.0  ;;  %v6143_v59 = vadd.f32 %v6051_v40, %v5950_v34  ;;  %v5951_v10 = vadd.f32 %v5862_v9, %v5694_v53  ;;  %v6054_v41 = vrot.slane %v5734_v37, 1  ;;  %v5699_v17 = vld [vmem:[#allocation3 + $0x258] sm:$0xff]  ;;  %v5661_v37 = vld [vmem:[#allocation3 + $0xe0] sm:$0xff]  ;;  %v5742_v47 = vld [vmem:[#allocation3 + $0x3e8] sm:$0xff] }
 0x3cc   : > { %v6213_v6 = vmax.f32 %v6181_v4, 0.0  ;;  %v5929_v25 = vsel %vm5841_vm0, %v5784_v48, %v5863_v52  ;;  %v6055_v19 = vrot.slane %v5735_v0, 1  ;;  %v5864_v55 = vrot.slane %v5655_v12, 7  ;;  %v5663_v12 = vld [vmem:[#allocation3 + $0xf0] sm:$0xff]  ;;  %v5665_v4 = vld [vmem:[#allocation3 + $0x100] sm:$0xff] }
 0x3cd   : > { %6244 = vst [vmem:[%s9754_s21 + $0x50] sm:$0xff] %v6212_v62  ;;  %v6182_v18 = vadd.f32 %v11137_v61, %v6143_v59  ;;  %v6144_v56 = vadd.f32 %v6053_v11, %v5951_v10  ;;  %v5952_v60 = vadd.f32 %v5929_v25, %v5695_v39  ;;  %v6057_v27 = vrot.slane %v5736_v8, 1  ;;  %v5743_v8 = vld [vmem:[#allocation3 + $0x3f0] sm:$0xff]  ;;  %v5700_v10 = vld [vmem:[#allocation3 + $0x260] sm:$0xff] }
 0x3ce   : > { %6245 = vst [vmem:[%s9754_s21 + $0x58] sm:$0xff] %v6213_v6  ;;  %v6056_v21 = vsel %vm6018_vm1, %v6054_v41, %v6055_v19  ;;  %v5865_v7 = vsel %vm5841_vm0, %v5863_v52, %v5864_v55  ;;  %v5785_v42 = vrot.slane %v5659_v58, 7  ;;  %v5866_v2 = vrot.slane %v5657_v31, 7  ;;  %v5744_v58 = vld [vmem:[#allocation3 + $0x3f8] sm:$0xff] }
 0x3cf   : > { %v6214_v22 = vmax.f32 %v6182_v18, 0.0  ;;  %v6183_v43 = vadd.f32 %v11137_v61, %v6144_v56  ;;  %v6145_v36 = vadd.f32 %v6056_v21, %v5952_v60  ;;  %v5953_v46 = vadd.f32 %v5865_v7, %v5696_v44  ;;  %v5664_v18 = vld [vmem:[#allocation3 + $0xf8] sm:$0xff]  ;;  %v5745_v56 = vld [vmem:[#allocation3 + $0x400] sm:$0xff] }
 0x3d0   : > { %v6058_v28 = vsel %vm6018_vm1, %v6055_v19, %v6057_v27  ;;  %v5930_v16 = vsel %vm5841_vm0, %v5785_v42, %v5866_v2  ;;  %v6059_v13 = vrot.slane %v5737_v35, 1  ;;  %v6060_v63 = vrot.slane %v5738_v33, 1  ;;  %v5701_v19 = vld [vmem:[#allocation3 + $0x270] sm:$0xff]  ;;  %v5668_v21 = vld [vmem:[#allocation3 + $0x118] sm:$0xff] }
 0x3d1   : > { %6246 = vst [vmem:[%s9754_s21 + $0x60] sm:$0xff] %v6214_v22  ;;  %v6215_v30 = vmax.f32 %v6183_v43, 0.0  ;;  %v6184_v50 = vadd.f32 %v11137_v61, %v6145_v36  ;;  %v6146_v1 = vadd.f32 %v6058_v28, %v5953_v46  ;;  %v5954_v38 = vadd.f32 %v5930_v16, %v5697_v5  ;;  %v5702_v36 = vld [vmem:[#allocation3 + $0x278] sm:$0xff] }
 0x3d2   : > { %v6061_v14 = vsel %vm6018_vm1, %v6059_v13, %v6060_v63  ;;  %v5867_v20 = vrot.slane %v5658_v51, 7  ;;  %v6062_v49 = vrot.slane %v5739_v54, 1  ;;  %v5786_v32 = vrot.slane %v5662_v23, 7  ;;  %v5666_v54 = vld [vmem:[#allocation3 + $0x108] sm:$0xff] }
 0x3d3   : > { %6247 = vst [vmem:[%s9754_s21 + $0x68] sm:$0xff] %v6215_v30  ;;  %v6216_v45 = vmax.f32 %v6184_v50, 0.0  ;;  %v6185_v57 = vadd.f32 %v11137_v61, %v6146_v1  ;;  %v6147_v53 = vadd.f32 %v6061_v14, %v5954_v38  ;;  %v5869_v15 = vrot.slane %v5660_v29, 7  ;;  %v5746_v23 = vld [vmem:[#allocation3 + $0x408] sm:$0xff]  ;;  %v5667_v30 = vld [vmem:[#allocation3 + $0x110] sm:$0xff]  ;;  %v5748_v50 = vld [vmem:[#allocation3 + $0x418] sm:$0xff] }
 0x3d4   : > { %v5868_v34 = vsel %vm5841_vm0, %v5866_v2, %v5867_v20  ;;  %v6063_v40 = vsel %vm6018_vm1, %v6060_v63, %v6062_v49  ;;  %v6064_v0 = vrot.slane %v5740_v26, 1  ;;  %v6065_v48 = vrot.slane %v5741_v24, 1  ;;  %v5747_v63 = vld [vmem:[#allocation3 + $0x410] sm:$0xff]  ;;  %v5703_v49 = vld [vmem:[#allocation3 + $0x288] sm:$0xff] }
 0x3d5   : > { %6248 = vst [vmem:[%s9754_s21 + $0x70] sm:$0xff] %v6216_v45  ;;  %v6217_v9 = vmax.f32 %v6185_v57, 0.0  ;;  %v6186_v11 = vadd.f32 %v11137_v61, %v6147_v53  ;;  %v5955_v39 = vadd.f32 %v5868_v34, %v5698_v3  ;;  %v5931_v52 = vsel %vm5841_vm0, %v5786_v32, %v5869_v15  ;;  %v5671_v14 = vld [vmem:[#allocation3 + $0x130] sm:$0xff] }
 0x3d6   : > { %v5956_v62 = vadd.f32 %v5931_v52, %v5699_v17  ;;  %v6066_v59 = vsel %vm6018_vm1, %v6064_v0, %v6065_v48  ;;  %v5870_v41 = vrot.slane %v5661_v37, 7  ;;  %v6067_v31 = vrot.slane %v5742_v47, 1  ;;  %v5704_v17 = vld [vmem:[#allocation3 + $0x290] sm:$0xff]  ;;  %v5669_v47 = vld [vmem:[#allocation3 + $0x120] sm:$0xff] }
 0x3d7   : > { %6249 = vst [vmem:[%s9754_s21 + $0x78] sm:$0xff] %v6217_v9  ;;  %v6218_v6 = vmax.f32 %v6186_v11, 0.0  ;;  %v6148_v25 = vadd.f32 %v6063_v40, %v5955_v39  ;;  %v5787_v44 = vrot.slane %v5665_v4, 7  ;;  %v5872_v55 = vrot.slane %v5663_v12, 7  ;;  %v5750_v12 = vld [vmem:[#allocation3 + $0x428] sm:$0xff] }
 0x3d8   : > { %v6149_v60 = vadd.f32 %v6066_v59, %v5956_v62  ;;  %v5871_v27 = vsel %vm5841_vm0, %v5869_v15, %v5870_v41  ;;  %v6068_v35 = vsel %vm6018_vm1, %v6065_v48, %v6067_v31  ;;  %v6069_v33 = vrot.slane %v5743_v8, 1  ;;  %v5749_v48 = vld [vmem:[#allocation3 + $0x420] sm:$0xff]  ;;  %v5670_v9 = vld [vmem:[#allocation3 + $0x128] sm:$0xff]  ;;  %v5751_v62 = vld [vmem:[#allocation3 + $0x430] sm:$0xff] }
 0x3d9   : > { %6250 = vst [vmem:[%s9754_s21 + $0x80] sm:$0xff] %v6218_v6  ;;  %v6187_v7 = vadd.f32 %v11137_v61, %v6148_v25  ;;  %v5957_v5 = vadd.f32 %v5871_v27, %v5700_v10  ;;  %v5932_v42 = vsel %vm5841_vm0, %v5787_v44, %v5872_v55  ;;  %v6070_v2 = vrot.slane %v5744_v58, 1  ;;  %v5705_v31 = vld [vmem:[#allocation3 + $0x2a0] sm:$0xff]  ;;  %v5706_v44 = vld [vmem:[#allocation3 + $0x2a8] sm:$0xff] }
 0x3da   : > { %v6188_v22 = vadd.f32 %v11137_v61, %v6149_v60  ;;  %v5958_v43 = vadd.f32 %v5932_v42, %v5701_v19  ;;  %v5873_v46 = vrot.slane %v5664_v18, 7  ;;  %v6072_v51 = vrot.slane %v5745_v56, 1  ;;  %v5674_v18 = vld [vmem:[#allocation3 + $0x148] sm:$0xff] }
 0x3db   : > { %v6219_v28 = vmax.f32 %v6187_v7, 0.0  ;;  %v6150_v16 = vadd.f32 %v6068_v35, %v5957_v5  ;;  %v6071_v13 = vsel %vm6018_vm1, %v6069_v33, %v6070_v2  ;;  %v5788_v29 = vrot.slane %v5668_v21, 7  ;;  %v5672_v33 = vld [vmem:[#allocation3 + $0x138] sm:$0xff] }
 0x3dc   : > { %v6220_v1 = vmax.f32 %v6188_v22, 0.0  ;;  %v6151_v38 = vadd.f32 %v6071_v13, %v5958_v43  ;;  %v5874_v26 = vsel %vm5841_vm0, %v5872_v55, %v5873_v46  ;;  %v6073_v24 = vsel %vm6018_vm1, %v6070_v2, %v6072_v51  ;;  %v5752_v21 = vld [vmem:[#allocation3 + $0x438] sm:$0xff]  ;;  %v5753_v22 = vld [vmem:[#allocation3 + $0x440] sm:$0xff] }
 0x3dd   : > { %6251 = vst [vmem:[%s9754_s21 + $0x88] sm:$0xff] %v6219_v28  ;;  %v6189_v3 = vadd.f32 %v11137_v61, %v6150_v16  ;;  %v5959_v20 = vadd.f32 %v5874_v26, %v5702_v36  ;;  %v5875_v32 = vrot.slane %v5666_v54, 7  ;;  %v6074_v45 = vrot.slane %v5746_v23, 1  ;;  %v5673_v43 = vld [vmem:[#allocation3 + $0x140] sm:$0xff]  ;;  %v5754_v23 = vld [vmem:[#allocation3 + $0x448] sm:$0xff] }
 0x3de   : > { %6252 = vst [vmem:[%s9754_s21 + $0x90] sm:$0xff] %v6220_v1  ;;  %v6190_v57 = vadd.f32 %v11137_v61, %v6151_v38  ;;  %v6075_v53 = vrot.slane %v5747_v63, 1  ;;  %v5876_v15 = vrot.slane %v5667_v30, 7  ;;  %v6077_v37 = vrot.slane %v5748_v50, 1  ;;  %v5677_v28 = vld [vmem:[#allocation3 + $0x160] sm:$0xff]  ;;  %v5707_v63 = vld [vmem:[#allocation3 + $0x2b8] sm:$0xff] }
 0x3df   : > { %v6221_v34 = vmax.f32 %v6189_v3, 0.0  ;;  %v6152_v40 = vadd.f32 %v6073_v24, %v5959_v20  ;;  %v5933_v0 = vsel %vm5841_vm0, %v5788_v29, %v5875_v32  ;;  %v5789_v4 = vrot.slane %v5671_v14, 7  ;;  %v5708_v26 = vld [vmem:[#allocation3 + $0x2c0] sm:$0xff]  ;;  %v5675_v14 = vld [vmem:[#allocation3 + $0x150] sm:$0xff] }
 0x3e0   : > { %v6222_v11 = vmax.f32 %v6190_v57, 0.0  ;;  %v5960_v39 = vadd.f32 %v5933_v0, %v5703_v49  ;;  %v6076_v52 = vsel %vm6018_vm1, %v6074_v45, %v6075_v53  ;;  %v5877_v8 = vsel %vm5841_vm0, %v5875_v32, %v5876_v15  ;;  %v5755_v32 = vld [vmem:[#allocation3 + $0x450] sm:$0xff]  ;;  %v5756_v45 = vld [vmem:[#allocation3 + $0x458] sm:$0xff] }
 0x3e1   : > { %6253 = vst [vmem:[%s9754_s21 + $0x98] sm:$0xff] %v6221_v34  ;;  %v6191_v59 = vadd.f32 %v11137_v61, %v6152_v40  ;;  %v5961_v10 = vadd.f32 %v5877_v8, %v5704_v17  ;;  %v6078_v41 = vsel %vm6018_vm1, %v6075_v53, %v6077_v37  ;;  %v5878_v58 = vrot.slane %v5669_v47, 7  ;;  %v5676_v47 = vld [vmem:[#allocation3 + $0x158] sm:$0xff]  ;;  %v5757_v34 = vld [vmem:[#allocation3 + $0x460] sm:$0xff] }
 0x3e2   : > { %6254 = vst [vmem:[%s9754_s21 + $0xa0] sm:$0xff] %v6222_v11  ;;  %v6153_v6 = vadd.f32 %v6076_v52, %v5960_v39  ;;  %v6079_v25 = vrot.slane %v5749_v48, 1  ;;  %v6080_v19 = vrot.slane %v5750_v12, 1  ;;  %v5879_v55 = vrot.slane %v5670_v9, 7  ;;  %v5709_v12 = vld [vmem:[#allocation3 + $0x2d0] sm:$0xff]  ;;  %v5680_v9 = vld [vmem:[#allocation3 + $0x178] sm:$0xff] }
 0x3e3   : > { %v6223_v56 = vmax.f32 %v6191_v59, 0.0  ;;  %v6154_v60 = vadd.f32 %v6078_v41, %v5961_v10  ;;  %v5934_v27 = vsel %vm5841_vm0, %v5789_v4, %v5878_v58  ;;  %v6082_v35 = vrot.slane %v5751_v62, 1  ;;  %v5678_v62 = vld [vmem:[#allocation3 + $0x168] sm:$0xff]  ;;  %v5710_v41 = vld [vmem:[#allocation3 + $0x2d8] sm:$0xff] }
 0x3e4   : > { %v6192_v7 = vadd.f32 %v11137_v61, %v6153_v6  ;;  %v5962_v5 = vadd.f32 %v5934_v27, %v5705_v31  ;;  %v6081_v42 = vsel %vm6018_vm1, %v6079_v25, %v6080_v19  ;;  %v5880_v2 = vsel %vm5841_vm0, %v5878_v58, %v5879_v55  ;;  %v5758_v6 = vld [vmem:[#allocation3 + $0x468] sm:$0xff]  ;;  %v5759_v55 = vld [vmem:[#allocation3 + $0x470] sm:$0xff] }
 0x3e5   : > { %6255 = vst [vmem:[%s9754_s21 + $0xa8] sm:$0xff] %v6223_v56  ;;  %v6193_v36 = vadd.f32 %v11137_v61, %v6154_v60  ;;  %v5963_v46 = vadd.f32 %v5880_v2, %v5706_v44  ;;  %v6083_v51 = vsel %vm6018_vm1, %v6080_v19, %v6082_v35  ;;  %v5790_v54 = vrot.slane %v5674_v18, 7  ;;  %v5679_v56 = vld [vmem:[#allocation3 + $0x170] sm:$0xff] }
 0x3e6   : > { %v6224_v16 = vmax.f32 %v6192_v7, 0.0  ;;  %v6155_v13 = vadd.f32 %v6081_v42, %v5962_v5  ;;  %v5881_v29 = vrot.slane %v5672_v33, 7  ;;  %v6084_v30 = vrot.slane %v5752_v21, 1  ;;  %v5711_v33 = vld [vmem:[#allocation3 + $0x2e8] sm:$0xff]  ;;  %v5760_v7 = vld [vmem:[#allocation3 + $0x478] sm:$0xff] }
 0x3e7   : > { %v6225_v50 = vmax.f32 %v6193_v36, 0.0  ;;  %v6156_v1 = vadd.f32 %v6083_v51, %v5963_v46  ;;  %v6085_v38 = vrot.slane %v5753_v22, 1  ;;  %v5882_v24 = vrot.slane %v5673_v43, 7  ;;  %v5712_v51 = vld [vmem:[#allocation3 + $0x2f0] sm:$0xff] }
 0x3e8   : > { %6256 = vst [vmem:[%s9754_s21 + $0xb0] sm:$0xff] %v6224_v16  ;;  %v6194_v3 = vadd.f32 %v11137_v61, %v6155_v13  ;;  %v5935_v20 = vsel %vm5841_vm0, %v5790_v54, %v5881_v29  ;;  %v6087_v49 = vrot.slane %v5754_v23, 1  ;;  %v5791_v57 = vrot.slane %v5677_v28, 7 }
 0x3e9   : > { %6257 = vst [vmem:[%s9754_s21 + $0xb8] sm:$0xff] %v6225_v50  ;;  %v6195_v53 = vadd.f32 %v11137_v61, %v6156_v1  ;;  %v5964_v17 = vadd.f32 %v5935_v20, %v5707_v63  ;;  %v6086_v15 = vsel %vm6018_vm1, %v6084_v30, %v6085_v38  ;;  %v5883_v37 = vsel %vm5841_vm0, %v5881_v29, %v5882_v24 }
 0x3ea   : > { %v6226_v40 = vmax.f32 %v6194_v3, 0.0  ;;  %v5965_v0 = vadd.f32 %v5883_v37, %v5708_v26  ;;  %v6088_v48 = vsel %vm6018_vm1, %v6085_v38, %v6087_v49  ;;  %v5884_v4 = vrot.slane %v5675_v14, 7 }
 0x3eb   : > { %v6227_v11 = vmax.f32 %v6195_v53, 0.0  ;;  %v6157_v39 = vadd.f32 %v6086_v15, %v5964_v17  ;;  %v6089_v52 = vrot.slane %v5755_v32, 1  ;;  %v6090_v8 = vrot.slane %v5756_v45, 1 }
 0x3ec   : > { %6258 = vst [vmem:[%s9754_s21 + $0xc0] sm:$0xff] %v6226_v40  ;;  %v6158_v59 = vadd.f32 %v6088_v48, %v5965_v0  ;;  %v5936_v10 = vsel %vm5841_vm0, %v5791_v57, %v5884_v4  ;;  %v5885_v31 = vrot.slane %v5676_v47, 7  ;;  %v6092_v58 = vrot.slane %v5757_v34, 1 }
 0x3ed   : > { %6259 = vst [vmem:[%s9754_s21 + $0xc8] sm:$0xff] %v6227_v11  ;;  %v6196_v25 = vadd.f32 %v11137_v61, %v6157_v39  ;;  %v5966_v19 = vadd.f32 %v5936_v10, %v5709_v12  ;;  %v6091_v44 = vsel %vm6018_vm1, %v6089_v52, %v6090_v8  ;;  %v5792_v18 = vrot.slane %v5680_v9, 7 }
 0x3ee   : > { %v6197_v60 = vadd.f32 %v11137_v61, %v6158_v59  ;;  %v5886_v27 = vsel %vm5841_vm0, %v5884_v4, %v5885_v31  ;;  %v6093_v35 = vsel %vm6018_vm1, %v6090_v8, %v6092_v58  ;;  %v5887_v21 = vrot.slane %v5678_v62, 7 }
 0x3ef   : > { %v6228_v5 = vmax.f32 %v6196_v25, 0.0  ;;  %v6159_v42 = vadd.f32 %v6091_v44, %v5966_v19  ;;  %v5967_v2 = vadd.f32 %v5886_v27, %v5710_v41  ;;  %v6094_v22 = vrot.slane %v5758_v6, 1 }
 0x3f0   : > { %v6229_v43 = vmax.f32 %v6197_v60, 0.0  ;;  %v5937_v36 = vsel %vm5841_vm0, %v5792_v18, %v5887_v21  ;;  %v6095_v46 = vrot.slane %v5759_v55, 1  ;;  %v5888_v54 = vrot.slane %v5679_v56, 7 }
 0x3f1   : > { %6260 = vst [vmem:[%s9754_s21 + $0xd0] sm:$0xff] %v6228_v5  ;;  %v6198_v23 = vadd.f32 %v11137_v61, %v6159_v42  ;;  %v6160_v28 = vadd.f32 %v6093_v35, %v5967_v2  ;;  %v5968_v16 = vadd.f32 %v5937_v36, %v5711_v33  ;;  %v6097_v13 = vrot.slane %v5760_v7, 1 }
 0x3f2   : > { %6261 = vst [vmem:[%s9754_s21 + $0xd8] sm:$0xff] %v6229_v43  ;;  %v6096_v63 = vsel %vm6018_vm1, %v6094_v22, %v6095_v46  ;;  %v5889_v29 = vsel %vm5841_vm0, %v5887_v21, %v5888_v54 }
 0x3f3   : > { %v6230_v30 = vmax.f32 %v6198_v23, 0.0  ;;  %v6199_v50 = vadd.f32 %v11137_v61, %v6160_v28  ;;  %v6161_v1 = vadd.f32 %v6096_v63, %v5968_v16  ;;  %v5969_v38 = vadd.f32 %v5889_v29, %v5712_v51 }
 0x3f4   : > { %v6098_v26 = vsel %vm6018_vm1, %v6095_v46, %v6097_v13 }
 0x3f5   : > { %6262 = vst [vmem:[%s9754_s21 + $0xe0] sm:$0xff] %v6230_v30  ;;  %v6231_v24 = vmax.f32 %v6199_v50, 0.0  ;;  %v6200_v14 = vadd.f32 %v11137_v61, %v6161_v1  ;;  %v6162_v3 = vadd.f32 %v6098_v26, %v5969_v38 }
 0x3f7   : > { %6263 = vst [vmem:[%s9754_s21 + $0xe8] sm:$0xff] %v6231_v24  ;;  %v6232_v20 = vmax.f32 %v6200_v14, 0.0  ;;  %v6201_v49 = vadd.f32 %v11137_v61, %v6162_v3 }
 0x3f9   : > { %6264 = vst [vmem:[%s9754_s21 + $0xf0] sm:$0xff] %v6232_v20  ;;  %v6233_v32 = vmax.f32 %v6201_v49, 0.0 }
 0x3fb   : > { %6265 = vst [vmem:[%s9754_s21 + $0xf8] sm:$0xff] %v6233_v32 }
 0x3fc PF: > { %s13_s18 = sadd.s32 1, %s9371_s18   ;;  %s11294_s12 = smov %s9351_s13 }
 0x3fd   : > { %p10_p3 = scmp.ge.s32.totalorder %s13_s18, 6   ;;  %s11295_s13 = smov %s9443_s23 }
 0x3fe   : > { %s11296_s14 = smov %s9363_s16  ;;  %s11297_s15 = smov %s9367_s17 }
 0x3ff   : > { %s11298_s16 = smov %s11301_s19  ;;  %s11299_s17 = smov %s11305_s20 }
 0x400   :  { %12 = sbr.rel (!%p10_p3) target bundleno = 4 (0x4), region = 222 }
 0x407   :  { %6298 = vsyncmov [#allocation4] }
 0x40a   :  { %s6299_s21 = vpop.sfrf %6298 }
 0x40b   :  { %p6666_p4 = scmp.ne.s32.totalorder %s6299_s21, 0 }
 0x40d   :  { %6303 = shalt.err (%p6666_p4)  }
 0x40e   :  { %6305 = vsyncmov [#allocation4 + $0x1] }
 0x411   :  { %s6306_s8 = vpop.sfrf %6305 }
 0x412   :  { %p6667_p5 = scmp.ne.s32.totalorder %s6306_s8, 0 }
 0x414   :  { %6310 = shalt.err (%p6667_p5)  }

</bundles_post_ra>
